<compile_context>
chip_gen: v7x
topology: tpu7x:2x2x1
jax: 0.10.0
libtpu: 0.0.40
codegen_flags: <defaults>
</compile_context>

<pallas_src>
import functools

import jax
import jax.numpy as jnp
from jax.experimental import pallas as pl
from jax.experimental.pallas import tpu as pltpu


def feature_embedding_kernel(x_ref, w_ref, b_ref, o_ref, out_s, pad_s,
                             *, r, d, H, W, C):
    # Zero only the 1-pixel border of the padded activation buffer; the
    # interior is fully rewritten before every conv.  (Deliberately NOT gated
    # on program_id == 0: under "parallel" batch semantics the second
    # TensorCore never sees step 0, so its private scratch is initialised
    # here, every grid step.)
    zrow = jnp.zeros((1, W + 2, C), jnp.bfloat16)
    zcol = jnp.zeros((H + 2, 1, C), jnp.bfloat16)
    pad_s[0:1, :, :] = zrow
    pad_s[H + 1:H + 2, :, :] = zrow
    pad_s[:, 0:1, :] = zcol
    pad_s[:, W + 1:W + 2, :] = zcol

    # output = x.clone()  (f32, VMEM-resident across the recursion loop)
    out_s[...] = x_ref[0].astype(jnp.float32)

    def leaky_to_pad(a):
        # LeakyReLU(0.2) in f32, cast only the conv LHS to bf16, write it
        # straight into the interior of the zero-padded buffer.
        pad_s[1:H + 1, 1:W + 1, :] = jnp.where(a > 0, a, 0.2 * a).astype(jnp.bfloat16)

    @pl.loop(0, r)                         # recursions share the block weights
    def _recursion(_):
        leaky_to_pad(out_s[...])           # first layer reads `output` directly

        for layer in range(d):             # unrolled: d is a compile-time const
            # kx-im2col over ALL H+2 padded rows -> ((H+2)*W, 3C) bf16.
            lhs = jnp.concatenate(
                [pad_s[:, kx:kx + W, :] for kx in range(3)], axis=-1
            ).reshape((H + 2) * W, 3 * C)

            # Single wide MXU matmul per conv: (.., 3C) x (3C, 3C), f32 acc.
            y = jnp.dot(lhs, w_ref[layer],
                        preferred_element_type=jnp.float32
                        ).reshape(H + 2, W, 3 * C)

            # Sum the three ky taps: row-shifted, channel-group slices of Y.
            conv = (y[0:H, :, 0 * C:1 * C]
                    + y[1:H + 1, :, 1 * C:2 * C]
                    + y[2:H + 2, :, 2 * C:3 * C]
                    + b_ref[layer])                      # (1, 1, C) bias

            if layer + 1 < d:
                leaky_to_pad(conv)                       # feeds the next conv
            else:
                # output = block(output) + x  (residual with the original input)
                out_s[...] = conv + x_ref[0].astype(jnp.float32)

    o_ref[0] = out_s[...].astype(o_ref.dtype)


def feature_embedding(x, w, b, *, r, d):
    """x: (N, H, W, C) NHWC; w: (d, 3, 3, Cin, Cout) HWIO per layer; b: (d, 1, Cout)."""
    N, H, W, C = x.shape
    assert w.shape == (d, 3, 3, C, C) and b.shape[0] == d

    # (d, ky, kx, cin, cout) -> (d, kx, cin, ky, cout) -> (d, 3C, 3C):
    #   row index = kx*C + cin  (matches the kernel's kx-major im2col concat)
    #   col index = ky*C + cout (the three ky taps stacked on the MXU's output
    #                            axis -> 192 of 256 MXU columns on v6e/v7x)
    # bf16 = native MXU input dtype; accumulation stays f32 in the kernel.
    w_k = jnp.transpose(w, (0, 2, 3, 1, 4)).reshape(d, 3 * C, 3 * C)
    w_k = w_k.astype(jnp.bfloat16)
    b_k = b.reshape(d, 1, 1, C).astype(jnp.float32)

    kernel = functools.partial(feature_embedding_kernel, r=r, d=d, H=H, W=W, C=C)

    # Advisory cost hint so XLA schedules neighbouring ops correctly.
    flops = 2 * N * r * d * 9 * H * W * C * C
    bytes_accessed = (2 * N * H * W * C * x.dtype.itemsize
                      + int(w_k.size) * 2 + int(b_k.size) * 4)

    return pl.pallas_call(
        kernel,
        out_shape=jax.ShapeDtypeStruct((N, H, W, C), x.dtype),
        grid_spec=pltpu.PrefetchScalarGridSpec(
            num_scalar_prefetch=0,
            grid=(N,),                                   # one batch element per step
            in_specs=[
                pl.BlockSpec((1, H, W, C), lambda n: (n, 0, 0, 0)),
                # Weights / bias are grid-invariant (constant index map), so
                # Pallas only fetches them once.
                pl.BlockSpec((d, 3 * C, 3 * C), lambda n: (0, 0, 0)),
                pl.BlockSpec((d, 1, 1, C), lambda n: (0, 0, 0, 0)),
            ],
            out_specs=pl.BlockSpec((1, H, W, C), lambda n: (n, 0, 0, 0)),
            scratch_shapes=[
                pltpu.VMEM((H, W, C), jnp.float32),            # running `output`
                pltpu.VMEM((H + 2, W + 2, C), jnp.bfloat16),   # zero-padded activation
            ],
        ),
        compiler_params=pltpu.CompilerParams(
            # Batch elements are independent -> megacore sharding on v7x.
            dimension_semantics=("parallel",),
            # TODO(synk): at real SR resolutions (H, W >~ 128) add an H-tile
            # grid axis with a 1-row halo (and/or a batch block), and set
            # vmem_limit_bytes explicitly (v7x: 64 MiB VMEM, v5e scoped
            # default: 16 MiB).  Not needed at these toy shapes.
        ),
        cost_estimate=pl.CostEstimate(flops=flops, transcendentals=0,
                                      bytes_accessed=bytes_accessed),
    )(x, w_k, b_k)


def feature_embedding_reference(x, w, b, *, r, d):
    """Pure-JAX f32 reference (NHWC)."""
    C = x.shape[-1]
    out = x
    for _ in range(r):
        cur = out
        for layer in range(d):
            cur = jnp.where(cur > 0, cur, 0.2 * cur)
            cur = jax.lax.conv_general_dilated(
                cur, w[layer], window_strides=(1, 1), padding="SAME",
                dimension_numbers=("NHWC", "HWIO", "NHWC"),
            ) + b[layer].reshape(1, 1, 1, C)
        out = cur + x
    return out


if __name__ == "__main__":
    # Module hyperparameters (small): r recursions, d conv layers per block.
    r, d = 2, 3
    N, H, W, C = 2, 16, 16, 64     # channels fixed at 64 by the module

    key = jax.random.PRNGKey(0)
    k_x, k_w, k_b = jax.random.split(key, 3)

    x = jax.random.normal(k_x, (N, H, W, C), dtype=jnp.float32)

    # Deterministic Kaiming-uniform-style init (matches PyTorch Conv2d default scale).
    fan_in = C * 3 * 3
    bound = 1.0 / jnp.sqrt(jnp.float32(fan_in))
    w = jax.random.uniform(k_w, (d, 3, 3, C, C), jnp.float32, -bound, bound)
    b = jax.random.uniform(k_b, (d, 1, C), jnp.float32, -bound, bound)

    out = feature_embedding(x, w, b, r=r, d=d)
    out = jax.block_until_ready(out)

    ref = feature_embedding_reference(x, w, b, r=r, d=d)
    assert out.shape == (N, H, W, C)
    # Only the conv LHS is bf16 (f32 accumulation / f32 residual path):
    # tolerance loosened vs an all-f32 path.
    assert jnp.max(jnp.abs(out - ref)) < 5e-2
    print("KERNEL_OK")
</pallas_src>

<mosaic_0001>
module attributes {stable_mosaic.version = 11 : i64} {
  func.func @feature_embedding_kernel(%arg0: i32, %arg1: memref<1x16x16x64xf32, #tpu.memory_space<vmem>>, %arg2: memref<3x192x192xbf16, #tpu.memory_space<vmem>>, %arg3: memref<3x1x1x64xf32, #tpu.memory_space<vmem>>, %arg4: memref<1x16x16x64xf32, #tpu.memory_space<vmem>>, %arg5: memref<16x16x64xf32, #tpu.memory_space<vmem>>, %arg6: memref<18x18x64xbf16, #tpu.memory_space<vmem>>) attributes {dimension_semantics = [#tpu.dimension_semantics<parallel>], iteration_bounds = array<i64: 2>, scalar_prefetch = 0 : i64, scratch_operands = 2 : i64, tpu.core_type = #tpu.core_type<tc>, window_params = [{transform_indices = @transform_0, window_bounds = array<i64: 1, 16, 16, 64>}, {pipeline_mode = #tpu.pipeline_mode<synchronous>, transform_indices = @transform_1, window_bounds = array<i64: 3, 192, 192>}, {pipeline_mode = #tpu.pipeline_mode<synchronous>, transform_indices = @transform_2, window_bounds = array<i64: 3, 1, 1, 64>}, {transform_indices = @transform_3, window_bounds = array<i64: 1, 16, 16, 64>}]} {
    %cst = arith.constant 0.000000e+00 : bf16
    %0 = vector.broadcast %cst : bf16 to vector<1x18x64xbf16>
    %cst_0 = arith.constant 0.000000e+00 : bf16
    %1 = vector.broadcast %cst_0 : bf16 to vector<18x1x64xbf16>
    %c0 = arith.constant 0 : index
    %c0_1 = arith.constant 0 : index
    %c0_2 = arith.constant 0 : index
    %2 = vector.load %arg6[%c0, %c0_1, %c0_2] : memref<18x18x64xbf16, #tpu.memory_space<vmem>>, vector<1x18x64xbf16>
    tpu.vector_store %arg6[%c0, %c0_1, %c0_2], %0 {strides = array<i32>} : memref<18x18x64xbf16, #tpu.memory_space<vmem>>, vector<1x18x64xbf16>,
    %c17 = arith.constant 17 : index
    %c0_3 = arith.constant 0 : index
    %c0_4 = arith.constant 0 : index
    %3 = vector.load %arg6[%c17, %c0_3, %c0_4] : memref<18x18x64xbf16, #tpu.memory_space<vmem>>, vector<1x18x64xbf16>
    tpu.vector_store %arg6[%c17, %c0_3, %c0_4], %0 {strides = array<i32>} : memref<18x18x64xbf16, #tpu.memory_space<vmem>>, vector<1x18x64xbf16>,
    %c0_5 = arith.constant 0 : index
    %c0_6 = arith.constant 0 : index
    %c0_7 = arith.constant 0 : index
    %4 = vector.load %arg6[%c0_5, %c0_6, %c0_7] : memref<18x18x64xbf16, #tpu.memory_space<vmem>>, vector<18x1x64xbf16>
    tpu.vector_store %arg6[%c0_5, %c0_6, %c0_7], %1 {strides = array<i32>} : memref<18x18x64xbf16, #tpu.memory_space<vmem>>, vector<18x1x64xbf16>,
    %c0_8 = arith.constant 0 : index
    %c17_9 = arith.constant 17 : index
    %c0_10 = arith.constant 0 : index
    %5 = vector.load %arg6[%c0_8, %c17_9, %c0_10] : memref<18x18x64xbf16, #tpu.memory_space<vmem>>, vector<18x1x64xbf16>
    tpu.vector_store %arg6[%c0_8, %c17_9, %c0_10], %1 {strides = array<i32>} : memref<18x18x64xbf16, #tpu.memory_space<vmem>>, vector<18x1x64xbf16>,
    %c0_11 = arith.constant 0 : index
    %c0_12 = arith.constant 0 : index
    %c0_13 = arith.constant 0 : index
    %c0_14 = arith.constant 0 : index
    %6 = vector.load %arg1[%c0_11, %c0_12, %c0_13, %c0_14] : memref<1x16x16x64xf32, #tpu.memory_space<vmem>>, vector<1x16x16x64xf32>
    %7 = vector.shape_cast %6 : vector<1x16x16x64xf32> to vector<16x16x64xf32>
    %c0_15 = arith.constant 0 : index
    %c0_16 = arith.constant 0 : index
    %c0_17 = arith.constant 0 : index
    %8 = vector.load %arg5[%c0_15, %c0_16, %c0_17] : memref<16x16x64xf32, #tpu.memory_space<vmem>>, vector<16x16x64xf32>
    tpu.vector_store %arg5[%c0_15, %c0_16, %c0_17], %7 {strides = array<i32>} : memref<16x16x64xf32, #tpu.memory_space<vmem>>, vector<16x16x64xf32>,
    %c0_i32 = arith.constant 0 : i32
    %c2_i32 = arith.constant 2 : i32
    %9 = arith.addi %c0_i32, %c2_i32 : i32
    %c1_i32 = arith.constant 1 : i32
    scf.for %arg7 = %c0_i32 to %9 step %c1_i32  : i32 {
      %c0_25 = arith.constant 0 : index
      %c0_26 = arith.constant 0 : index
      %c0_27 = arith.constant 0 : index
      %14 = vector.load %arg5[%c0_25, %c0_26, %c0_27] : memref<16x16x64xf32, #tpu.memory_space<vmem>>, vector<16x16x64xf32>
      %cst_28 = arith.constant 0.000000e+00 : f32
      %15 = vector.broadcast %cst_28 : f32 to vector<16x16x64xf32>
      %16 = arith.cmpf ogt, %14, %15 : vector<16x16x64xf32>
      %cst_29 = arith.constant 2.000000e-01 : f32
      %17 = vector.broadcast %cst_29 : f32 to vector<16x16x64xf32>
      %18 = arith.mulf %17, %14 : vector<16x16x64xf32>
      %19 = arith.select %16, %14, %18 : vector<16x16x64xi1>, vector<16x16x64xf32>
      %20 = arith.truncf %19 : vector<16x16x64xf32> to vector<16x16x64xbf16>
      %c1 = arith.constant 1 : index
      %c1_30 = arith.constant 1 : index
      %c0_31 = arith.constant 0 : index
      %21 = vector.load %arg6[%c1, %c1_30, %c0_31] : memref<18x18x64xbf16, #tpu.memory_space<vmem>>, vector<16x16x64xbf16>
      tpu.vector_store %arg6[%c1, %c1_30, %c0_31], %20 {strides = array<i32>} : memref<18x18x64xbf16, #tpu.memory_space<vmem>>, vector<16x16x64xbf16>,
      %c0_32 = arith.constant 0 : index
      %c0_33 = arith.constant 0 : index
      %c0_34 = arith.constant 0 : index
      %22 = vector.load %arg6[%c0_32, %c0_33, %c0_34] : memref<18x18x64xbf16, #tpu.memory_space<vmem>>, vector<18x16x64xbf16>
      %c0_35 = arith.constant 0 : index
      %c1_36 = arith.constant 1 : index
      %c0_37 = arith.constant 0 : index
      %23 = vector.load %arg6[%c0_35, %c1_36, %c0_37] : memref<18x18x64xbf16, #tpu.memory_space<vmem>>, vector<18x16x64xbf16>
      %c0_38 = arith.constant 0 : index
      %c2 = arith.constant 2 : index
      %c0_39 = arith.constant 0 : index
      %24 = vector.load %arg6[%c0_38, %c2, %c0_39] : memref<18x18x64xbf16, #tpu.memory_space<vmem>>, vector<18x16x64xbf16>
      %25 = tpu.concatenate %22, %23, %24 in 2 : vector<18x16x64xbf16>, vector<18x16x64xbf16>, vector<18x16x64xbf16> -> vector<18x16x192xbf16>
      %26 = vector.shape_cast %25 : vector<18x16x192xbf16> to vector<288x192xbf16>
      %c0_40 = arith.constant 0 : index
      %c0_41 = arith.constant 0 : index
      %c0_42 = arith.constant 0 : index
      %27 = vector.load %arg2[%c0_40, %c0_41, %c0_42] : memref<3x192x192xbf16, #tpu.memory_space<vmem>>, vector<1x192x192xbf16>
      %28 = vector.shape_cast %27 : vector<1x192x192xbf16> to vector<192x192xbf16>
      %cst_43 = arith.constant dense<0.000000e+00> : vector<288x192xf32>
      %29 = tpu.matmul %26, %28, %cst_43 {dimension_numbers = #tpu.dot_dimension_numbers<[1], [0], [0], [1], [0, 0, 1, 1], [], []>} : vector<288x192xbf16>, vector<192x192xbf16>, vector<288x192xf32> -> vector<288x192xf32>
      %30 = vector.shape_cast %29 : vector<288x192xf32> to vector<18x16x192xf32>
      %31 = vector.extract_strided_slice %30 {offsets = [0, 0, 0], sizes = [16, 16, 64], strides = [1, 1, 1]} : vector<18x16x192xf32> to vector<16x16x64xf32>
      %32 = vector.extract_strided_slice %30 {offsets = [1, 0, 64], sizes = [16, 16, 64], strides = [1, 1, 1]} : vector<18x16x192xf32> to vector<16x16x64xf32>
      %33 = arith.addf %31, %32 : vector<16x16x64xf32>
      %34 = vector.extract_strided_slice %30 {offsets = [2, 0, 128], sizes = [16, 16, 64], strides = [1, 1, 1]} : vector<18x16x192xf32> to vector<16x16x64xf32>
      %35 = arith.addf %33, %34 : vector<16x16x64xf32>
      %c0_44 = arith.constant 0 : index
      %c0_45 = arith.constant 0 : index
      %c0_46 = arith.constant 0 : index
      %c0_47 = arith.constant 0 : index
      %36 = vector.load %arg3[%c0_44, %c0_45, %c0_46, %c0_47] : memref<3x1x1x64xf32, #tpu.memory_space<vmem>>, vector<1x1x1x64xf32>
      %37 = vector.shape_cast %36 : vector<1x1x1x64xf32> to vector<1x1x64xf32>
      %38 = vector.broadcast %37 : vector<1x1x64xf32> to vector<16x16x64xf32>
      %39 = arith.addf %35, %38 : vector<16x16x64xf32>
      %cst_48 = arith.constant 0.000000e+00 : f32
      %40 = vector.broadcast %cst_48 : f32 to vector<16x16x64xf32>
      %41 = arith.cmpf ogt, %39, %40 : vector<16x16x64xf32>
      %cst_49 = arith.constant 2.000000e-01 : f32
      %42 = vector.broadcast %cst_49 : f32 to vector<16x16x64xf32>
      %43 = arith.mulf %42, %39 : vector<16x16x64xf32>
      %44 = arith.select %41, %39, %43 : vector<16x16x64xi1>, vector<16x16x64xf32>
      %45 = arith.truncf %44 : vector<16x16x64xf32> to vector<16x16x64xbf16>
      %c1_50 = arith.constant 1 : index
      %c1_51 = arith.constant 1 : index
      %c0_52 = arith.constant 0 : index
      %46 = vector.load %arg6[%c1_50, %c1_51, %c0_52] : memref<18x18x64xbf16, #tpu.memory_space<vmem>>, vector<16x16x64xbf16>
      tpu.vector_store %arg6[%c1_50, %c1_51, %c0_52], %45 {strides = array<i32>} : memref<18x18x64xbf16, #tpu.memory_space<vmem>>, vector<16x16x64xbf16>,
      %c0_53 = arith.constant 0 : index
      %c0_54 = arith.constant 0 : index
      %c0_55 = arith.constant 0 : index
      %47 = vector.load %arg6[%c0_53, %c0_54, %c0_55] : memref<18x18x64xbf16, #tpu.memory_space<vmem>>, vector<18x16x64xbf16>
      %c0_56 = arith.constant 0 : index
      %c1_57 = arith.constant 1 : index
      %c0_58 = arith.constant 0 : index
      %48 = vector.load %arg6[%c0_56, %c1_57, %c0_58] : memref<18x18x64xbf16, #tpu.memory_space<vmem>>, vector<18x16x64xbf16>
      %c0_59 = arith.constant 0 : index
      %c2_60 = arith.constant 2 : index
      %c0_61 = arith.constant 0 : index
      %49 = vector.load %arg6[%c0_59, %c2_60, %c0_61] : memref<18x18x64xbf16, #tpu.memory_space<vmem>>, vector<18x16x64xbf16>
      %50 = tpu.concatenate %47, %48, %49 in 2 : vector<18x16x64xbf16>, vector<18x16x64xbf16>, vector<18x16x64xbf16> -> vector<18x16x192xbf16>
      %51 = vector.shape_cast %50 : vector<18x16x192xbf16> to vector<288x192xbf16>
      %c1_62 = arith.constant 1 : index
      %c0_63 = arith.constant 0 : index
      %c0_64 = arith.constant 0 : index
      %52 = vector.load %arg2[%c1_62, %c0_63, %c0_64] : memref<3x192x192xbf16, #tpu.memory_space<vmem>>, vector<1x192x192xbf16>
      %53 = vector.shape_cast %52 : vector<1x192x192xbf16> to vector<192x192xbf16>
      %cst_65 = arith.constant dense<0.000000e+00> : vector<288x192xf32>
      %54 = tpu.matmul %51, %53, %cst_65 {dimension_numbers = #tpu.dot_dimension_numbers<[1], [0], [0], [1], [0, 0, 1, 1], [], []>} : vector<288x192xbf16>, vector<192x192xbf16>, vector<288x192xf32> -> vector<288x192xf32>
      %55 = vector.shape_cast %54 : vector<288x192xf32> to vector<18x16x192xf32>
      %56 = vector.extract_strided_slice %55 {offsets = [0, 0, 0], sizes = [16, 16, 64], strides = [1, 1, 1]} : vector<18x16x192xf32> to vector<16x16x64xf32>
      %57 = vector.extract_strided_slice %55 {offsets = [1, 0, 64], sizes = [16, 16, 64], strides = [1, 1, 1]} : vector<18x16x192xf32> to vector<16x16x64xf32>
      %58 = arith.addf %56, %57 : vector<16x16x64xf32>
      %59 = vector.extract_strided_slice %55 {offsets = [2, 0, 128], sizes = [16, 16, 64], strides = [1, 1, 1]} : vector<18x16x192xf32> to vector<16x16x64xf32>
      %60 = arith.addf %58, %59 : vector<16x16x64xf32>
      %c1_66 = arith.constant 1 : index
      %c0_67 = arith.constant 0 : index
      %c0_68 = arith.constant 0 : index
      %c0_69 = arith.constant 0 : index
      %61 = vector.load %arg3[%c1_66, %c0_67, %c0_68, %c0_69] : memref<3x1x1x64xf32, #tpu.memory_space<vmem>>, vector<1x1x1x64xf32>
      %62 = vector.shape_cast %61 : vector<1x1x1x64xf32> to vector<1x1x64xf32>
      %63 = vector.broadcast %62 : vector<1x1x64xf32> to vector<16x16x64xf32>
      %64 = arith.addf %60, %63 : vector<16x16x64xf32>
      %cst_70 = arith.constant 0.000000e+00 : f32
      %65 = vector.broadcast %cst_70 : f32 to vector<16x16x64xf32>
      %66 = arith.cmpf ogt, %64, %65 : vector<16x16x64xf32>
      %cst_71 = arith.constant 2.000000e-01 : f32
      %67 = vector.broadcast %cst_71 : f32 to vector<16x16x64xf32>
      %68 = arith.mulf %67, %64 : vector<16x16x64xf32>
      %69 = arith.select %66, %64, %68 : vector<16x16x64xi1>, vector<16x16x64xf32>
      %70 = arith.truncf %69 : vector<16x16x64xf32> to vector<16x16x64xbf16>
      %c1_72 = arith.constant 1 : index
      %c1_73 = arith.constant 1 : index
      %c0_74 = arith.constant 0 : index
      %71 = vector.load %arg6[%c1_72, %c1_73, %c0_74] : memref<18x18x64xbf16, #tpu.memory_space<vmem>>, vector<16x16x64xbf16>
      tpu.vector_store %arg6[%c1_72, %c1_73, %c0_74], %70 {strides = array<i32>} : memref<18x18x64xbf16, #tpu.memory_space<vmem>>, vector<16x16x64xbf16>,
      %c0_75 = arith.constant 0 : index
      %c0_76 = arith.constant 0 : index
      %c0_77 = arith.constant 0 : index
      %72 = vector.load %arg6[%c0_75, %c0_76, %c0_77] : memref<18x18x64xbf16, #tpu.memory_space<vmem>>, vector<18x16x64xbf16>
      %c0_78 = arith.constant 0 : index
      %c1_79 = arith.constant 1 : index
      %c0_80 = arith.constant 0 : index
      %73 = vector.load %arg6[%c0_78, %c1_79, %c0_80] : memref<18x18x64xbf16, #tpu.memory_space<vmem>>, vector<18x16x64xbf16>
      %c0_81 = arith.constant 0 : index
      %c2_82 = arith.constant 2 : index
      %c0_83 = arith.constant 0 : index
      %74 = vector.load %arg6[%c0_81, %c2_82, %c0_83] : memref<18x18x64xbf16, #tpu.memory_space<vmem>>, vector<18x16x64xbf16>
      %75 = tpu.concatenate %72, %73, %74 in 2 : vector<18x16x64xbf16>, vector<18x16x64xbf16>, vector<18x16x64xbf16> -> vector<18x16x192xbf16>
      %76 = vector.shape_cast %75 : vector<18x16x192xbf16> to vector<288x192xbf16>
      %c2_84 = arith.constant 2 : index
      %c0_85 = arith.constant 0 : index
      %c0_86 = arith.constant 0 : index
      %77 = vector.load %arg2[%c2_84, %c0_85, %c0_86] : memref<3x192x192xbf16, #tpu.memory_space<vmem>>, vector<1x192x192xbf16>
      %78 = vector.shape_cast %77 : vector<1x192x192xbf16> to vector<192x192xbf16>
      %cst_87 = arith.constant dense<0.000000e+00> : vector<288x192xf32>
      %79 = tpu.matmul %76, %78, %cst_87 {dimension_numbers = #tpu.dot_dimension_numbers<[1], [0], [0], [1], [0, 0, 1, 1], [], []>} : vector<288x192xbf16>, vector<192x192xbf16>, vector<288x192xf32> -> vector<288x192xf32>
      %80 = vector.shape_cast %79 : vector<288x192xf32> to vector<18x16x192xf32>
      %81 = vector.extract_strided_slice %80 {offsets = [0, 0, 0], sizes = [16, 16, 64], strides = [1, 1, 1]} : vector<18x16x192xf32> to vector<16x16x64xf32>
      %82 = vector.extract_strided_slice %80 {offsets = [1, 0, 64], sizes = [16, 16, 64], strides = [1, 1, 1]} : vector<18x16x192xf32> to vector<16x16x64xf32>
      %83 = arith.addf %81, %82 : vector<16x16x64xf32>
      %84 = vector.extract_strided_slice %80 {offsets = [2, 0, 128], sizes = [16, 16, 64], strides = [1, 1, 1]} : vector<18x16x192xf32> to vector<16x16x64xf32>
      %85 = arith.addf %83, %84 : vector<16x16x64xf32>
      %c2_88 = arith.constant 2 : index
      %c0_89 = arith.constant 0 : index
      %c0_90 = arith.constant 0 : index
      %c0_91 = arith.constant 0 : index
      %86 = vector.load %arg3[%c2_88, %c0_89, %c0_90, %c0_91] : memref<3x1x1x64xf32, #tpu.memory_space<vmem>>, vector<1x1x1x64xf32>
      %87 = vector.shape_cast %86 : vector<1x1x1x64xf32> to vector<1x1x64xf32>
      %88 = vector.broadcast %87 : vector<1x1x64xf32> to vector<16x16x64xf32>
      %89 = arith.addf %85, %88 : vector<16x16x64xf32>
      %c0_92 = arith.constant 0 : index
      %c0_93 = arith.constant 0 : index
      %c0_94 = arith.constant 0 : index
      %c0_95 = arith.constant 0 : index
      %90 = vector.load %arg1[%c0_92, %c0_93, %c0_94, %c0_95] : memref<1x16x16x64xf32, #tpu.memory_space<vmem>>, vector<1x16x16x64xf32>
      %91 = vector.shape_cast %90 : vector<1x16x16x64xf32> to vector<16x16x64xf32>
      %92 = arith.addf %89, %91 : vector<16x16x64xf32>
      %c0_96 = arith.constant 0 : index
      %c0_97 = arith.constant 0 : index
      %c0_98 = arith.constant 0 : index
      %93 = vector.load %arg5[%c0_96, %c0_97, %c0_98] : memref<16x16x64xf32, #tpu.memory_space<vmem>>, vector<16x16x64xf32>
      tpu.vector_store %arg5[%c0_96, %c0_97, %c0_98], %92 {strides = array<i32>} : memref<16x16x64xf32, #tpu.memory_space<vmem>>, vector<16x16x64xf32>,
    }
    %c0_18 = arith.constant 0 : index
    %c0_19 = arith.constant 0 : index
    %c0_20 = arith.constant 0 : index
    %10 = vector.load %arg5[%c0_18, %c0_19, %c0_20] : memref<16x16x64xf32, #tpu.memory_space<vmem>>, vector<16x16x64xf32>
    %c0_21 = arith.constant 0 : index
    %c0_22 = arith.constant 0 : index
    %c0_23 = arith.constant 0 : index
    %c0_24 = arith.constant 0 : index
    %11 = vector.load %arg4[%c0_21, %c0_22, %c0_23, %c0_24] : memref<1x16x16x64xf32, #tpu.memory_space<vmem>>, vector<1x16x16x64xf32>
    %12 = vector.shape_cast %11 : vector<1x16x16x64xf32> to vector<16x16x64xf32>
    %13 = vector.shape_cast %10 : vector<16x16x64xf32> to vector<1x16x16x64xf32>
    tpu.vector_store %arg4[%c0_21, %c0_22, %c0_23, %c0_24], %13 {strides = array<i32>} : memref<1x16x16x64xf32, #tpu.memory_space<vmem>>, vector<1x16x16x64xf32>,
    return
  }
  func.func @transform_0(%arg0: i32) -> (i32, i32, i32, i32) {
    %c0_i32 = arith.constant 0 : i32
    %c0_i32_0 = arith.constant 0 : i32
    %c0_i32_1 = arith.constant 0 : i32
    %c0_i32_2 = arith.constant 0 : i32
    return %arg0, %c0_i32, %c0_i32_0, %c0_i32_1 : i32, i32, i32, i32
  }
  func.func @transform_1(%arg0: i32) -> (i32, i32, i32) {
    %c0_i32 = arith.constant 0 : i32
    %c0_i32_0 = arith.constant 0 : i32
    %c0_i32_1 = arith.constant 0 : i32
    %c0_i32_2 = arith.constant 0 : i32
    return %c0_i32, %c0_i32_0, %c0_i32_1 : i32, i32, i32
  }
  func.func @transform_2(%arg0: i32) -> (i32, i32, i32, i32) {
    %c0_i32 = arith.constant 0 : i32
    %c0_i32_0 = arith.constant 0 : i32
    %c0_i32_1 = arith.constant 0 : i32
    %c0_i32_2 = arith.constant 0 : i32
    %c0_i32_3 = arith.constant 0 : i32
    return %c0_i32, %c0_i32_0, %c0_i32_1, %c0_i32_2 : i32, i32, i32, i32
  }
  func.func @transform_3(%arg0: i32) -> (i32, i32, i32, i32) {
    %c0_i32 = arith.constant 0 : i32
    %c0_i32_0 = arith.constant 0 : i32
    %c0_i32_1 = arith.constant 0 : i32
    %c0_i32_2 = arith.constant 0 : i32
    return %arg0, %c0_i32, %c0_i32_0, %c0_i32_1 : i32, i32, i32, i32
  }
}

</mosaic_0001>

<bundles_post_ra>
// kernel: tpu_custom_call.1
= control target key start
LH: loop header
LB: loop body
LE: loop exit
PB: predicated region body
PF: predicated region fallthrough
CT: control target
= control target key end

     0   :  { %8 = vsyncpa [#allocation5], 0  ;;  %s10071_s0 = inlined_call_operand.hbm [shape: f32[2,16,16,64], index: 0, kind: input, shape index: {}]   ;;  %s10072_s1 = inlined_call_operand.hbm [shape: bf16[3,192,192], index: 1, kind: input, shape index: {}]   ;;  %s10073_s2 = inlined_call_operand.vmem [shape: f32[3,1,1,64], index: 2, kind: input, shape index: {}]   ;;  %s10074_s3 = inlined_call_operand.hbm [shape: f32[2,16,16,64], index: 3, kind: output, shape index: {}]  }
   0x1   :  { %10 = vsyncpa [#allocation5 + $0x1], 0 }
   0x2   :  { %11 = vsyncpa [#allocation8], 0 }
   0x3   :  { %12 = vsyncpa [#allocation6], 0 }
   0x4   :  { %14 = vsyncpa [#allocation6 + $0x1], 0  ;;  %s7382_s12 = smov 0   ;;  %s7384_s13 = smov 0  }
   0x5   :  { %s7386_s14 = smov 0   ;;  %s7388_s15 = smov 0  }
   0x6 LB: > { %s7403_s16 = sadd.s32 4294967295, %s7347_s15   ;;  %s6373_s17 = sadd.s32 4294967294, %s7347_s15   ;;  %s7347_s15 = sphi %s7388_s15, %s10182_s15   ;;  %s7343_s14 = sphi %s7386_s14, %s10181_s14   ;;  %s7339_s13 = sphi %s7384_s13, %s10180_s13   ;;  %s7335_s12 = sphi %s7382_s12, %s10179_s12  }
   0x7   : > { %p40_p0 = scmp.ne.s32.totalorder %s7339_s13, %s7335_s12  ;;  %p10075_p1 = scmp.eq.s32.totalorder %s7403_s16, 0 }
   0x8   : > { %p112_p3 = scmp.eq.s32.totalorder %s6373_s17, 1  ;;  %p6374_p5 = scmp.ge.s32.totalorder %s7347_s15, 1 }
   0x9   : > { %p7412_p4 = por %p10075_p1, %p40_p0  ;;  %p119_p7 = scmp.lt.s32.totalorder %s7347_s15, 3 }
   0xa   : > { %p7417_p6 = por %p112_p3, %p40_p0  ;;  %s7353_s21 = smov [#allocation7]  }
   0xb   : > { %s10096_s18 = scalar_select %p7412_p4, 1, 0 }
   0xc   : > { %s10097_s19 = scalar_select %p7417_p6, 1, 0 }
   0xd   : > { %p7422_p8 = pnand %p6374_p5, %p119_p7  ;;  %s131_s22 = sshll.u32 %s7353_s21, 4  ;;  %s7426_s22 = int_to_ptr.vmem [resolvable:$true] %s131_s22 }
   0xe   : > { %s7438_s24 = sadd.s32 1, %s7347_s15   ;;  %s27_s25 = sadd.s32 1, %s7343_s14 }
   0xf   : > { %s10098_s20 = scalar_select %p7422_p8, 1, 0 }
  0x10   : > { %p6908_p9 = pneg %p7422_p8  ;;  %s24_s26 = ssub.s32 %s7347_s15, %s7438_s24 }
  0x11   : > { %s7215_s29 = scalar_lea.hbm %s10072_s1, 9216 }
  0x12   : > { %p7433_p11 = pnand %p6908_p9, %p10075_p1  ;;  %p7216_p12 = scmp.ne.s32.totalorder %s10072_s1, %s7215_s29 }
  0x13   : > { %p7222_p5 = scmp.lt.u32.totalorder %s7215_s29, %s10072_s1 }
  0x14   : > { %p7217_p13 = pneg %p7433_p11 }
  0x16   : > { %p7218_p0 = pnand %p7217_p13, %p7216_p12 }
  0x18   : > { %p7219_p3 = pneg %p7218_p0 }
  0x1a   : > { %p7224_p7 = pnand %p7222_p5, %p7219_p3 }
  0x1c   : > { %7227 = shalt.err (!%p7224_p7)
}
  0x1d   : > { %s7228_s7 = scalar_lea.vmem %s7426_s22, 9216  ;;  %p7236_p2 = scmp.lt.s32.totalorder %s7426_s22, %s7426_s22 }
  0x1e   : > { %p7229_p9 = scmp.ne.s32.totalorder %s7426_s22, %s7228_s7  ;;  %p7237_p6 = scmp.lt.s32.totalorder %s7228_s7, %s7228_s7 }
  0x20   : > { %p7231_p10 = pnand %p7229_p9, %p7217_p13  ;;  %p7238_p4 = por %p7237_p6, %p7236_p2 }
  0x22   : > { %p7232_p1 = pneg %p7231_p10 }
  0x24   : > { %p7239_p8 = pnand %p7238_p4, %p7232_p1 }
  0x26   : > { %7242 = shalt.err (!%p7239_p8)
}
  0x27   : > { %s7354_s8 = smov 128   ;;  %s7355_s9 = smov 8  }
  0x28   : > { %6911 = dma.hbm_to_vmem [thread:$0]  (!%p7433_p11), %s10072_s1, 9216, %s7426_s22, [#allocation8], %s7354_s8, %s7354_s8, %s7355_s9  }
  0x29   : > { %p25_p1 = scmp.eq.s32.totalorder %s24_s26, 0  ;;  %p34_p2 = scmp.ne.s32.totalorder %s7343_s14, %s7339_s13 }
  0x2a   : > { %p35_p4 = scmp.eq.s32.totalorder %s7347_s15, 0  ;;  %p6921_p6 = scmp.lt.s32.totalorder %s7347_s15, 2 }
  0x2b   : > { %s7472_s17 = scalar_select %p25_p1, %s7343_s14, %s27_s25  }
  0x2c   : > { %p36_p8 = por %p35_p4, %p34_p2  ;;  %p10100_p10 = scmp.eq.s32.totalorder %s7403_s16, 1 }
  0x2d   : > { %s148_s23 = sand.u32 1, %s7343_s14   ;;  %s6778_s27 = sshll.u32 %s7347_s15, 12 }
  0x2e   : > { %p7476_p12 = por %p10100_p10, %p34_p2  ;;  %s6377_s28 = sshll.u32 %s148_s23, 8 }
  0x2f   : > { %s7485_s4 = scalar_lea.hbm %s10071_s0, %s6778_s27  ;;  %s152_s22 = scalar_lea.vmem [#allocation4], %s6377_s28 }
  0x30   : > { %s159_s25 = sshll.u32 %s152_s22, 4  ;;  %p7487_p11 = pnand %p6921_p6, %p36_p8  ;;  %s7491_s25 = int_to_ptr.vmem [resolvable:$true] %s159_s25 }
  0x31   : > { %s7493_s5 = scalar_lea.sflag [#allocation5], %s148_s23  ;;  %s7243_s6 = scalar_lea.hbm %s7485_s4, 4096 }
  0x32   : > { %p7244_p13 = scmp.ne.s32.totalorder %s7485_s4, %s7243_s6  ;;  %p7245_p0 = pneg %p7487_p11 }
  0x33   : > { %s7248_s11 = scalar_lea.hbm %s10071_s0, 8192  ;;  %p7249_p7 = scmp.lt.u32.totalorder %s7485_s4, %s10071_s0 }
  0x34   : > { %p7246_p3 = pnand %p7245_p0, %p7244_p13  ;;  %p7250_p9 = scmp.lt.u32.totalorder %s7248_s11, %s7243_s6 }
  0x35   : > { %p7252_p2 = scmp.lt.u32.totalorder %s7243_s6, %s7485_s4 }
  0x36   : > { %p7247_p5 = pneg %p7246_p3  ;;  %p7251_p1 = por %p7250_p9, %p7249_p7 }
  0x38   : > { %p7253_p4 = por %p7252_p2, %p7251_p1 }
  0x3a   : > { %p7254_p6 = pnand %p7253_p4, %p7247_p5 }
  0x3c   : > { %7257 = shalt.err (!%p7254_p6)
}
  0x3d   : > { %s7258_s23 = scalar_lea.vmem %s7491_s25, 4096  ;;  %s7356_s29 = smov [#allocation4]  }
  0x3e   : > { %p7259_p8 = scmp.ne.s32.totalorder %s7491_s25, %s7258_s23  ;;  %s7263_s30 = sshll.u32 %s7356_s29, 4  ;;  %s7264_s30 = int_to_ptr.vmem [resolvable:$false] %s7263_s30 }
  0x3f   : > { %s7265_s22 = scalar_lea.vmem %s7264_s30, 8192  ;;  %p7266_p3 = scmp.lt.s32.totalorder %s7491_s25, %s7264_s30 }
  0x40   : > { %p7261_p10 = pnand %p7259_p8, %p7245_p0  ;;  %p7267_p7 = scmp.lt.s32.totalorder %s7265_s22, %s7258_s23 }
  0x42   : > { %p7262_p13 = pneg %p7261_p10  ;;  %p7268_p9 = por %p7267_p7, %p7266_p3 }
  0x44   : > { %p7269_p1 = pnand %p7268_p9, %p7262_p13 }
  0x46   : > { %7272 = shalt.err (!%p7269_p1)
}
  0x47   : > { %6915 = dma.hbm_to_vmem [thread:$0]  (!%p7487_p11), %s7485_s4, 4096, %s7491_s25, %s7493_s5, %s7354_s8, %s7354_s8, %s7355_s9  }
  0x48   : > { %p10103_p0 = scmp.ne.s32.totalorder %s10098_s20, 0 }
  0x49   : > { %s7527_s6 = sand.u32 (!%p10103_p0), 1, %s7339_s13   ;;  %p10104_p5 = scmp.ne.s32.totalorder (!%p10103_p0), %s10096_s18, 0 }
  0x4a   : > { %171 = sbr.rel (%p10103_p0) target bundleno = 1798 (0x706), region = 32  ;;  %s6381_s7 = sshll.u32 (!%p10103_p0), %s7527_s6, 8 }
  0x4b   : > { %s174_s10 = scalar_lea.sflag (!%p10103_p0), [#allocation5], %s7527_s6  ;;  %s7533_s26 = scalar_lea.vmem (!%p10103_p0), [#allocation4], %s6381_s7 }
  0x51   : > { %7322 = dma.done.wait (%p10104_p5), %s174_s10, 4096  }
  0x52   : > { %7324 = vsyncadd (%p10104_p5), %s174_s10, 4294963200  ;;  %p10105_p11 = scmp.eq.s32.totalorder %s7403_s16, 0 }
  0x54   : > { %7326 = dma.done.wait (%p10105_p11), [#allocation8], 9216   ;;  %p10106_p2 = pmov %p10105_p11 }
  0x55   : > { %vm205_vm0 = vcmask 519168   ;;  %vm208_vm1 = vcmask 516096   ;;  %v7357_v0 = vmov 0   ;;  %vm215_vm2 = vsmask.f32 256  ;;  %v327_v9 = vld [vmem:[%s7533_s26] sm:$0xff] }
  0x56   : > { %7328 = vsyncadd (%p10106_p2), [#allocation8], 4294958080  ;;  %206 = vst.msk [vmem:[#allocation3] sm:$0xf] %vm205_vm0, %v7357_v0  ;;  %vm271_vm4 = vsmask.f32 7938 }
  0x57   : > { %207 = vst.msk [vmem:[#allocation3 + $0x4] sm:$0xf] %vm205_vm0, %v7357_v0  ;;  %211 = vst.msk [vmem:[#allocation3 + $0xcc] sm:$0xf] %vm205_vm0, %v7357_v0  ;;  %vm359_vm5 = vcmask 523264   ;;  %v328_v13 = vld [vmem:[%s7533_s26 + $0x8] sm:$0xff] }
  0x58   : > { %212 = vst.msk [vmem:[#allocation3 + $0xd0] sm:$0xf] %vm205_vm0, %v7357_v0  ;;  %vm7551_vm3 = vmand %vm208_vm1, %vm215_vm2  ;;  %v220_v2 = vld [vmem:[#allocation3 + $0xc] sm:$0x1]  ;;  %v223_v3 = vld [vmem:[#allocation3 + $0x18] sm:$0x1] }
  0x59   : > { %209 = vst.msk [vmem:[#allocation3 + $0x8] sm:$0x1] %vm208_vm1, %v7357_v0  ;;  %213 = vst.msk [vmem:[#allocation3 + $0xd4] sm:$0x1] %vm208_vm1, %v7357_v0  ;;  %v226_v4 = vld [vmem:[#allocation3 + $0x24] sm:$0x1] }
  0x5a   : > { %v221_v6 = vsel %vm7551_vm3, 0, %v220_v2  ;;  %v224_v7 = vsel %vm7551_vm3, 0, %v223_v3  ;;  %v227_v8 = vsel %vm7551_vm3, 0, %v226_v4  ;;  %v229_v11 = vld [vmem:[#allocation3 + $0x30] sm:$0x1]  ;;  %360 = vst.msk [vmem:[#allocation2] sm:$0xff] %vm359_vm5, %v327_v9  ;;  %vm7585_vm6 = vmand %vm208_vm1, %vm271_vm4 }
  0x5b   : > { %222 = vst [vmem:[#allocation3 + $0xc] sm:$0x1] %v221_v6  ;;  %225 = vst [vmem:[#allocation3 + $0x18] sm:$0x1] %v224_v7  ;;  %v232_v12 = vld [vmem:[#allocation3 + $0x3c] sm:$0x1] }
  0x5c   : > { %228 = vst [vmem:[#allocation3 + $0x24] sm:$0x1] %v227_v8  ;;  %v230_v14 = vsel %vm7551_vm3, 0, %v229_v11  ;;  %v233_v15 = vsel %vm7551_vm3, 0, %v232_v12  ;;  %v235_v16 = vld [vmem:[#allocation3 + $0x48] sm:$0x1] }
  0x5d   : > { %v217_v5 = vld [vmem:[#allocation3] sm:$0x1]  ;;  %v238_v17 = vld [vmem:[#allocation3 + $0x54] sm:$0x1]  ;;  %361 = vst.msk [vmem:[#allocation2 + $0x8] sm:$0xff] %vm359_vm5, %v328_v13  ;;  %v236_v18 = vsel %vm7551_vm3, 0, %v235_v16 }
  0x5e   : > { %v218_v10 = vsel %vm7551_vm3, 0, %v217_v5  ;;  %231 = vst [vmem:[#allocation3 + $0x30] sm:$0x1] %v230_v14  ;;  %234 = vst [vmem:[#allocation3 + $0x3c] sm:$0x1] %v233_v15  ;;  %v239_v19 = vsel %vm7551_vm3, 0, %v238_v17 }
  0x5f   : > { %219 = vst [vmem:[#allocation3] sm:$0x1] %v218_v10  ;;  %v241_v20 = vld [vmem:[#allocation3 + $0x60] sm:$0x1]  ;;  %v244_v21 = vld [vmem:[#allocation3 + $0x6c] sm:$0x1] }
  0x60   : > { %237 = vst [vmem:[#allocation3 + $0x48] sm:$0x1] %v236_v18  ;;  %240 = vst [vmem:[#allocation3 + $0x54] sm:$0x1] %v239_v19  ;;  %v242_v22 = vsel %vm7551_vm3, 0, %v241_v20  ;;  %v245_v23 = vsel %vm7551_vm3, 0, %v244_v21 }
  0x61   : > { %v247_v24 = vld [vmem:[#allocation3 + $0x78] sm:$0x1]  ;;  %v250_v25 = vld [vmem:[#allocation3 + $0x84] sm:$0x1]  ;;  %243 = vst [vmem:[#allocation3 + $0x60] sm:$0x1] %v242_v22 }
  0x62   : > { %246 = vst [vmem:[#allocation3 + $0x6c] sm:$0x1] %v245_v23  ;;  %v248_v26 = vsel %vm7551_vm3, 0, %v247_v24  ;;  %v251_v27 = vsel %vm7551_vm3, 0, %v250_v25  ;;  %v253_v28 = vld [vmem:[#allocation3 + $0x90] sm:$0x1] }
  0x63   : > { %v256_v29 = vld [vmem:[#allocation3 + $0x9c] sm:$0x1]  ;;  %249 = vst [vmem:[#allocation3 + $0x78] sm:$0x1] %v248_v26  ;;  %252 = vst [vmem:[#allocation3 + $0x84] sm:$0x1] %v251_v27 }
  0x64   : > { %v254_v31 = vsel %vm7551_vm3, 0, %v253_v28  ;;  %v257_v32 = vsel %vm7551_vm3, 0, %v256_v29  ;;  %v259_v33 = vld [vmem:[#allocation3 + $0xa8] sm:$0x1]  ;;  %v262_v34 = vld [vmem:[#allocation3 + $0xb4] sm:$0x1] }
  0x65   : > { %255 = vst [vmem:[#allocation3 + $0x90] sm:$0x1] %v254_v31  ;;  %258 = vst [vmem:[#allocation3 + $0x9c] sm:$0x1] %v257_v32  ;;  %v260_v35 = vsel %vm7551_vm3, 0, %v259_v33  ;;  %v263_v36 = vsel %vm7551_vm3, 0, %v262_v34 }
  0x66   : > { %v265_v37 = vld [vmem:[#allocation3 + $0xc0] sm:$0x1]  ;;  %v268_v38 = vld [vmem:[#allocation3 + $0xcc] sm:$0x1]  ;;  %261 = vst [vmem:[#allocation3 + $0xa8] sm:$0x1] %v260_v35 }
  0x67   : > { %264 = vst [vmem:[#allocation3 + $0xb4] sm:$0x1] %v263_v36  ;;  %v266_v39 = vsel %vm7551_vm3, 0, %v265_v37  ;;  %v269_v40 = vsel %vm7551_vm3, 0, %v268_v38  ;;  %v273_v41 = vld [vmem:[#allocation3 + $0x8] sm:$0x1] }
  0x68   : > { %v276_v42 = vld [vmem:[#allocation3 + $0x14] sm:$0x1]  ;;  %267 = vst [vmem:[#allocation3 + $0xc0] sm:$0x1] %v266_v39  ;;  %270 = vst [vmem:[#allocation3 + $0xcc] sm:$0x1] %v269_v40 }
  0x69   : > { %v274_v43 = vsel %vm7585_vm6, 0, %v273_v41  ;;  %v277_v44 = vsel %vm7585_vm6, 0, %v276_v42  ;;  %v279_v45 = vld [vmem:[#allocation3 + $0x20] sm:$0x1]  ;;  %v282_v46 = vld [vmem:[#allocation3 + $0x2c] sm:$0x1] }
  0x6a   : > { %275 = vst [vmem:[#allocation3 + $0x8] sm:$0x1] %v274_v43  ;;  %278 = vst [vmem:[#allocation3 + $0x14] sm:$0x1] %v277_v44  ;;  %v280_v47 = vsel %vm7585_vm6, 0, %v279_v45  ;;  %v283_v48 = vsel %vm7585_vm6, 0, %v282_v46 }
  0x6b   : > { %v285_v49 = vld [vmem:[#allocation3 + $0x38] sm:$0x1]  ;;  %v288_v50 = vld [vmem:[#allocation3 + $0x44] sm:$0x1]  ;;  %281 = vst [vmem:[#allocation3 + $0x20] sm:$0x1] %v280_v47 }
  0x6c   : > { %284 = vst [vmem:[#allocation3 + $0x2c] sm:$0x1] %v283_v48  ;;  %v286_v51 = vsel %vm7585_vm6, 0, %v285_v49  ;;  %v289_v52 = vsel %vm7585_vm6, 0, %v288_v50  ;;  %v291_v53 = vld [vmem:[#allocation3 + $0x50] sm:$0x1] }
  0x6d   : > { %v294_v54 = vld [vmem:[#allocation3 + $0x5c] sm:$0x1]  ;;  %287 = vst [vmem:[#allocation3 + $0x38] sm:$0x1] %v286_v51  ;;  %290 = vst [vmem:[#allocation3 + $0x44] sm:$0x1] %v289_v52 }
  0x6e   : > { %v292_v55 = vsel %vm7585_vm6, 0, %v291_v53  ;;  %v295_v56 = vsel %vm7585_vm6, 0, %v294_v54  ;;  %v297_v57 = vld [vmem:[#allocation3 + $0x68] sm:$0x1]  ;;  %v300_v58 = vld [vmem:[#allocation3 + $0x74] sm:$0x1] }
  0x6f   : > { %293 = vst [vmem:[#allocation3 + $0x50] sm:$0x1] %v292_v55  ;;  %296 = vst [vmem:[#allocation3 + $0x5c] sm:$0x1] %v295_v56  ;;  %v298_v59 = vsel %vm7585_vm6, 0, %v297_v57  ;;  %v301_v60 = vsel %vm7585_vm6, 0, %v300_v58 }
  0x70   : > { %v303_v61 = vld [vmem:[#allocation3 + $0x80] sm:$0x1]  ;;  %v306_v62 = vld [vmem:[#allocation3 + $0x8c] sm:$0x1]  ;;  %299 = vst [vmem:[#allocation3 + $0x68] sm:$0x1] %v298_v59 }
  0x71   : > { %302 = vst [vmem:[#allocation3 + $0x74] sm:$0x1] %v301_v60  ;;  %v304_v63 = vsel %vm7585_vm6, 0, %v303_v61  ;;  %v307_v0 = vsel %vm7585_vm6, 0, %v306_v62  ;;  %v309_v2 = vld [vmem:[#allocation3 + $0x98] sm:$0x1] }
  0x72   : > { %v312_v3 = vld [vmem:[#allocation3 + $0xa4] sm:$0x1]  ;;  %305 = vst [vmem:[#allocation3 + $0x80] sm:$0x1] %v304_v63  ;;  %308 = vst [vmem:[#allocation3 + $0x8c] sm:$0x1] %v307_v0 }
  0x73   : > { %v310_v4 = vsel %vm7585_vm6, 0, %v309_v2  ;;  %v313_v5 = vsel %vm7585_vm6, 0, %v312_v3  ;;  %v315_v6 = vld [vmem:[#allocation3 + $0xb0] sm:$0x1]  ;;  %v318_v7 = vld [vmem:[#allocation3 + $0xbc] sm:$0x1] }
  0x74   : > { %311 = vst [vmem:[#allocation3 + $0x98] sm:$0x1] %v310_v4  ;;  %314 = vst [vmem:[#allocation3 + $0xa4] sm:$0x1] %v313_v5  ;;  %v316_v8 = vsel %vm7585_vm6, 0, %v315_v6  ;;  %v319_v9 = vsel %vm7585_vm6, 0, %v318_v7 }
  0x75   : > { %v321_v10 = vld [vmem:[#allocation3 + $0xc8] sm:$0x1]  ;;  %v324_v11 = vld [vmem:[#allocation3 + $0xd4] sm:$0x1]  ;;  %317 = vst [vmem:[#allocation3 + $0xb0] sm:$0x1] %v316_v8 }
  0x76   : > { %320 = vst [vmem:[#allocation3 + $0xbc] sm:$0x1] %v319_v9  ;;  %v322_v12 = vsel %vm7585_vm6, 0, %v321_v10  ;;  %v325_v13 = vsel %vm7585_vm6, 0, %v324_v11  ;;  %v329_v14 = vld [vmem:[%s7533_s26 + $0x10] sm:$0xff]  ;;  %v330_v15 = vld [vmem:[%s7533_s26 + $0x18] sm:$0xff] }
  0x77   : > { %v331_v16 = vld [vmem:[%s7533_s26 + $0x20] sm:$0xff]  ;;  %323 = vst [vmem:[#allocation3 + $0xc8] sm:$0x1] %v322_v12  ;;  %326 = vst [vmem:[#allocation3 + $0xd4] sm:$0x1] %v325_v13  ;;  %v332_v17 = vld [vmem:[%s7533_s26 + $0x28] sm:$0xff] }
  0x78   : > { %362 = vst.msk [vmem:[#allocation2 + $0x10] sm:$0xff] %vm359_vm5, %v329_v14  ;;  %363 = vst.msk [vmem:[#allocation2 + $0x18] sm:$0xff] %vm359_vm5, %v330_v15  ;;  %v333_v18 = vld [vmem:[%s7533_s26 + $0x30] sm:$0xff]  ;;  %v334_v19 = vld [vmem:[%s7533_s26 + $0x38] sm:$0xff]  ;;  %s7699_s18 = scalar_lea.vmem [#allocation9], %s6381_s7  ;;  %s7701_s20 = smov 0  }
  0x79   : > { %364 = vst.msk [vmem:[#allocation2 + $0x20] sm:$0xff] %vm359_vm5, %v331_v16  ;;  %365 = vst.msk [vmem:[#allocation2 + $0x28] sm:$0xff] %vm359_vm5, %v332_v17  ;;  %v335_v20 = vld [vmem:[%s7533_s26 + $0x40] sm:$0xff]  ;;  %v336_v21 = vld [vmem:[%s7533_s26 + $0x48] sm:$0xff] }
  0x7a   : > { %366 = vst.msk [vmem:[#allocation2 + $0x30] sm:$0xff] %vm359_vm5, %v333_v18  ;;  %367 = vst.msk [vmem:[#allocation2 + $0x38] sm:$0xff] %vm359_vm5, %v334_v19  ;;  %v337_v22 = vld [vmem:[%s7533_s26 + $0x50] sm:$0xff]  ;;  %v338_v23 = vld [vmem:[%s7533_s26 + $0x58] sm:$0xff] }
  0x7b   : > { %368 = vst.msk [vmem:[#allocation2 + $0x40] sm:$0xff] %vm359_vm5, %v335_v20  ;;  %369 = vst.msk [vmem:[#allocation2 + $0x48] sm:$0xff] %vm359_vm5, %v336_v21  ;;  %v339_v24 = vld [vmem:[%s7533_s26 + $0x60] sm:$0xff]  ;;  %v340_v25 = vld [vmem:[%s7533_s26 + $0x68] sm:$0xff] }
  0x7c   : > { %370 = vst.msk [vmem:[#allocation2 + $0x50] sm:$0xff] %vm359_vm5, %v337_v22  ;;  %371 = vst.msk [vmem:[#allocation2 + $0x58] sm:$0xff] %vm359_vm5, %v338_v23  ;;  %v341_v26 = vld [vmem:[%s7533_s26 + $0x70] sm:$0xff]  ;;  %v342_v27 = vld [vmem:[%s7533_s26 + $0x78] sm:$0xff] }
  0x7d   : > { %372 = vst.msk [vmem:[#allocation2 + $0x60] sm:$0xff] %vm359_vm5, %v339_v24  ;;  %373 = vst.msk [vmem:[#allocation2 + $0x68] sm:$0xff] %vm359_vm5, %v340_v25  ;;  %v343_v28 = vld [vmem:[%s7533_s26 + $0x80] sm:$0xff]  ;;  %v344_v29 = vld [vmem:[%s7533_s26 + $0x88] sm:$0xff] }
  0x7e   : > { %374 = vst.msk [vmem:[#allocation2 + $0x70] sm:$0xff] %vm359_vm5, %v341_v26  ;;  %375 = vst.msk [vmem:[#allocation2 + $0x78] sm:$0xff] %vm359_vm5, %v342_v27  ;;  %v345_v30 = vld [vmem:[%s7533_s26 + $0x90] sm:$0xff]  ;;  %v346_v31 = vld [vmem:[%s7533_s26 + $0x98] sm:$0xff] }
  0x7f   : > { %376 = vst.msk [vmem:[#allocation2 + $0x80] sm:$0xff] %vm359_vm5, %v343_v28  ;;  %377 = vst.msk [vmem:[#allocation2 + $0x88] sm:$0xff] %vm359_vm5, %v344_v29  ;;  %v347_v32 = vld [vmem:[%s7533_s26 + $0xa0] sm:$0xff]  ;;  %v348_v33 = vld [vmem:[%s7533_s26 + $0xa8] sm:$0xff] }
  0x80   : > { %378 = vst.msk [vmem:[#allocation2 + $0x90] sm:$0xff] %vm359_vm5, %v345_v30  ;;  %379 = vst.msk [vmem:[#allocation2 + $0x98] sm:$0xff] %vm359_vm5, %v346_v31  ;;  %v349_v34 = vld [vmem:[%s7533_s26 + $0xb0] sm:$0xff]  ;;  %v350_v35 = vld [vmem:[%s7533_s26 + $0xb8] sm:$0xff] }
  0x81   : > { %380 = vst.msk [vmem:[#allocation2 + $0xa0] sm:$0xff] %vm359_vm5, %v347_v32  ;;  %381 = vst.msk [vmem:[#allocation2 + $0xa8] sm:$0xff] %vm359_vm5, %v348_v33  ;;  %v351_v36 = vld [vmem:[%s7533_s26 + $0xc0] sm:$0xff]  ;;  %v352_v37 = vld [vmem:[%s7533_s26 + $0xc8] sm:$0xff] }
  0x82   : > { %382 = vst.msk [vmem:[#allocation2 + $0xb0] sm:$0xff] %vm359_vm5, %v349_v34  ;;  %383 = vst.msk [vmem:[#allocation2 + $0xb8] sm:$0xff] %vm359_vm5, %v350_v35  ;;  %v353_v38 = vld [vmem:[%s7533_s26 + $0xd0] sm:$0xff]  ;;  %v354_v39 = vld [vmem:[%s7533_s26 + $0xd8] sm:$0xff] }
  0x83   : > { %384 = vst.msk [vmem:[#allocation2 + $0xc0] sm:$0xff] %vm359_vm5, %v351_v36  ;;  %385 = vst.msk [vmem:[#allocation2 + $0xc8] sm:$0xff] %vm359_vm5, %v352_v37  ;;  %v355_v40 = vld [vmem:[%s7533_s26 + $0xe0] sm:$0xff]  ;;  %v356_v41 = vld [vmem:[%s7533_s26 + $0xe8] sm:$0xff] }
  0x84   : > { %386 = vst.msk [vmem:[#allocation2 + $0xd0] sm:$0xff] %vm359_vm5, %v353_v38  ;;  %387 = vst.msk [vmem:[#allocation2 + $0xd8] sm:$0xff] %vm359_vm5, %v354_v39  ;;  %v357_v42 = vld [vmem:[%s7533_s26 + $0xf0] sm:$0xff]  ;;  %v358_v43 = vld [vmem:[%s7533_s26 + $0xf8] sm:$0xff] }
  0x85   : > { %388 = vst.msk [vmem:[#allocation2 + $0xe0] sm:$0xff] %vm359_vm5, %v355_v40  ;;  %389 = vst.msk [vmem:[#allocation2 + $0xe8] sm:$0xff] %vm359_vm5, %v356_v41 }
  0x86   : > { %390 = vst.msk [vmem:[#allocation2 + $0xf0] sm:$0xff] %vm359_vm5, %v357_v42  ;;  %391 = vst.msk [vmem:[#allocation2 + $0xf8] sm:$0xff] %vm359_vm5, %v358_v43 }
  0x87 LB: >> { %v1059_v44 = vld [vmem:[#allocation3] sm:$0xf]  ;;  %v1060_v45 = vld [vmem:[#allocation3 + $0x4] sm:$0xf]  ;;  %vm1275_vm7 = vsmask.f32 7424  ;;  %vm7714_vm15 = vmand %vm205_vm0, %vm271_vm4  ;;  %s7351_s20 = sphi %s7701_s20, %s397_s20  }
  0x88   : >> { %v7706_v46 = vcombine.low %v1059_v44, %v1060_v45  ;;  %v6972_v47 = vld [vmem:[#allocation3 + $0x8] ss:$0 sps:$4 sm:$0x11]   ;;  %v398_v48 = vld [vmem:[#allocation2] sm:$0xff]  ;;  %vm622_vm8 = vsmask.f32 4368 }
  0x89   : >> { %v399_v49 = vld [vmem:[#allocation2 + $0x8] sm:$0xff]  ;;  %v1284_v52 = vshll.u32 %v6972_v47, 16  ;;  %vm430_vm9 = vcmp.gt.f32.partialorder %v398_v48, 0.0  ;;  %v462_v53 = vmul.f32 0.2, %v398_v48  ;;  %v400_v55 = vld [vmem:[#allocation2 + $0x10] sm:$0xff]  ;;  %vm7720_vm1 = vmor %vm215_vm2, %vm622_vm8 }
  0x8a   : >> { %v1277_v50 = vshrl.u32 %v7706_v46, 16  ;;  %v1279_v51 = vshll.u32 %v7706_v46, 16  ;;  %vm431_vm10 = vcmp.gt.f32.partialorder %v399_v49, 0.0  ;;  %v463_v54 = vmul.f32 0.2, %v399_v49  ;;  %v401_v58 = vld [vmem:[#allocation2 + $0x18] sm:$0xff] }
  0x8b   : >> { %v1286_v57 = vrot.slane %v1284_v52, 1  ;;  %vm432_vm11 = vcmp.gt.f32.partialorder %v400_v55, 0.0  ;;  %v464_v59 = vmul.f32 0.2, %v400_v55  ;;  %v494_v60 = vsel %vm430_vm9, %v398_v48, %v462_v53  ;;  %v402_v63 = vld [vmem:[#allocation2 + $0x20] sm:$0xff]  ;;  %v403_v5 = vld [vmem:[#allocation2 + $0x28] sm:$0xff] }
  0x8c   : >> { %v1281_v56 = vrot.slane %v1279_v51, 1  ;;  %v495_v61 = vsel %vm431_vm10, %v399_v49, %v463_v54  ;;  %vm433_vm12 = vcmp.gt.f32.partialorder %v401_v58, 0.0  ;;  %v465_v62 = vmul.f32 0.2, %v401_v58  ;;  %v404_v12 = vld [vmem:[#allocation2 + $0x30] sm:$0xff]  ;;  %s7358_s8 = smov 64  }
  0x8d   : >> { %v6779_v2 = vpack.c.bf16 %v494_v60, %v494_v60  ;;  %v6780_v3 = vpack.c.bf16 %v495_v61, %v495_v61  ;;  %v496_v4 = vsel %vm432_vm11, %v400_v55, %v464_v59  ;;  %vm434_vm13 = vcmp.gt.f32.partialorder %v402_v63, 0.0  ;;  %v947_v14 = vld [vmem:[#allocation3 + $0xc] sm:$0xf]  ;;  %v951_v24 = vld [vmem:[#allocation3 + $0x14] sm:$0x1]  ;;  %v405_v37 = vld [vmem:[#allocation2 + $0x38] sm:$0xff] }
  0x8e   : >> { %v1282_v0 = vor.u32 %v1281_v56, %v1277_v50  ;;  %v497_v6 = vsel %vm433_vm12, %v401_v58, %v465_v62  ;;  %v6781_v7 = vpack.c.bf16 %v496_v4, %v496_v4  ;;  %vm435_vm14 = vcmp.gt.f32.partialorder %v403_v5, 0.0  ;;  %v954_v32 = vld [vmem:[#allocation3 + $0x18] sm:$0xf]  ;;  %v958_v41 = vld [vmem:[#allocation3 + $0x20] sm:$0x1]  ;;  %v407_v56 = vld [vmem:[#allocation2 + $0x48] sm:$0xff] }
  0x8f   : >> { %v625_v9 = vshrl.u32 %v6779_v2, 16  ;;  %v628_v10 = vshll.u32 %v6779_v2, 16  ;;  %v633_v11 = vshrl.u32 %v6780_v3, 16  ;;  %v636_v13 = vshll.u32 %v6780_v3, 16  ;;  %v406_v51 = vld [vmem:[#allocation2 + $0x40] sm:$0xff]  ;;  %s397_s20 = sadd.s32 1, %s7351_s20  }
  0x90   : >> { %v1287_v8 = vsel %vm1275_vm7, %v1282_v0, %v1286_v57  ;;  %v6782_v15 = vpack.c.bf16 %v497_v6, %v497_v6  ;;  %v642_v16 = vshrl.u32 %v6781_v7, 16  ;;  %v645_v17 = vshll.u32 %v6781_v7, 16  ;;  %v961_v62 = vld [vmem:[#allocation3 + $0x24] sm:$0xf]  ;;  %v965_v7 = vld [vmem:[#allocation3 + $0x2c] sm:$0x1] }
  0x91   : >> { %1492 = vrot.lane.b32.xlu0 %v1287_v8, %s7358_s8  ;;  %v627_v18 = vrot.slane %v625_v9, 7  ;;  %v635_v19 = vrot.slane %v633_v11, 7  ;;  %v466_v21 = vmul.f32 0.2, %v402_v63  ;;  %v467_v22 = vmul.f32 0.2, %v403_v5 }
  0x92   : >> { %v644_v25 = vrot.slane %v642_v16, 7  ;;  %v650_v26 = vshrl.u32 %v6782_v15, 16  ;;  %v653_v27 = vshll.u32 %v6782_v15, 16  ;;  %vm436_vm6 = vcmp.gt.f32.partialorder %v404_v12, 0.0  ;;  %p394_p4 = scmp.ge.s32.totalorder %s397_s20, 2  }
  0x93   : >> { %v630_v28 = vor.u32 %v628_v10, %v627_v18  ;;  %v631_v29 = vrot.slane %v627_v18, 4  ;;  %v638_v30 = vor.u32 %v636_v13, %v635_v19  ;;  %v640_v31 = vrot.slane %v635_v19, 4  ;;  %s6875_s22 = sshll.u32 (%p394_p4), %s7403_s16, 12  ;;  %s6285_s7 = sshll.u32 (%p394_p4), %s7699_s18, 4  ;;  %s10011_s7 = int_to_ptr.vmem [resolvable:$true] %s6285_s7 }
  0x94   : >> { %v647_v33 = vor.u32 %v645_v17, %v644_v25  ;;  %v648_v34 = vrot.slane %v644_v25, 4  ;;  %v652_v35 = vrot.slane %v650_v26, 7  ;;  %v498_v36 = vsel %vm434_vm13, %v402_v63, %v466_v21  ;;  %s6272_s20 = scalar_lea.sflag (%p394_p4), [#allocation6], %s7527_s6  ;;  %s7359_s9 = smov (%p394_p4), [#allocation9]  }
  0x95   : >> { %v639_v38 = vsel %vm7720_vm1, %v631_v29, %v638_v30  ;;  %v948_v39 = vsel %vm7714_vm15, %v630_v28, %v947_v14  ;;  %v952_v40 = vsel %vm7551_vm3, %v640_v31, %v951_v24  ;;  %v499_v42 = vsel %vm435_vm14, %v403_v5, %v467_v22  ;;  %s7277_s4 = sshll.u32 (%p394_p4), %s7359_s9, 4  ;;  %s7278_s4 = int_to_ptr.vmem [resolvable:$false] %s7277_s4 }
  0x96   : >> { %949 = vst [vmem:[#allocation3 + $0xc] sm:$0xf] %v948_v39  ;;  %950 = vst.msk [vmem:[#allocation3 + $0x10] sm:$0xf] %vm205_vm0, %v639_v38  ;;  %v655_v43 = vor.u32 %v653_v27, %v652_v35  ;;  %v657_v44 = vrot.slane %v652_v35, 4  ;;  %v955_v45 = vsel %vm7714_vm15, %v647_v33, %v954_v32  ;;  %v6783_v47 = vpack.c.bf16 %v498_v36, %v498_v36  ;;  %s7279_s25 = scalar_lea.vmem (%p394_p4), %s7278_s4, 8192  ;;  %p7280_p13 = scmp.lt.s32.totalorder (%p394_p4), %s10011_s7, %s7278_s4 }
  0x97   : >> { %953 = vst [vmem:[#allocation3 + $0x14] sm:$0x1] %v952_v40  ;;  %956 = vst [vmem:[#allocation3 + $0x18] sm:$0xf] %v955_v45  ;;  %v6784_v48 = vpack.c.bf16 %v499_v42, %v499_v42  ;;  %vm437_vm8 = vcmp.gt.f32.partialorder %v405_v37, 0.0  ;;  %vm438_vm9 = vcmp.gt.f32.partialorder %v406_v51, 0.0 }
  0x98   : >> { %v468_v49 = vmul.f32 0.2, %v404_v12  ;;  %v469_v50 = vmul.f32 0.2, %v405_v37  ;;  %v656_v52 = vsel %vm7720_vm1, %v648_v34, %v655_v43  ;;  %v959_v53 = vsel %vm7551_vm3, %v657_v44, %v958_v41  ;;  %v968_v27 = vld [vmem:[#allocation3 + $0x30] sm:$0xf] }
  0x99   : >> { %v659_v54 = vshrl.u32 %v6783_v47, 16  ;;  %v662_v55 = vshll.u32 %v6783_v47, 16  ;;  %957 = vst.msk [vmem:[#allocation3 + $0x1c] sm:$0xf] %vm205_vm0, %v656_v52  ;;  %960 = vst [vmem:[#allocation3 + $0x20] sm:$0x1] %v959_v53 }
  0x9a   : >> { %v667_v57 = vshrl.u32 %v6784_v48, 16  ;;  %v670_v58 = vshll.u32 %v6784_v48, 16  ;;  %v500_v59 = vsel %vm436_vm6, %v404_v12, %v468_v49  ;;  %v501_v60 = vsel %vm437_vm8, %v405_v37, %v469_v50  ;;  %v972_v37 = vld [vmem:[#allocation3 + $0x38] sm:$0x1]  ;;  %v6993_v43 = vld [vmem:[#allocation7 + $0x4] ss:$8 sps:$4 sm:$0xff]  }
  0x9b   : >> { %v661_v61 = vrot.slane %v659_v54, 7  ;;  %v6785_v63 = vpack.c.bf16 %v500_v59, %v500_v59  ;;  %v6786_v0 = vpack.c.bf16 %v501_v60, %v501_v60  ;;  %vm439_vm10 = vcmp.gt.f32.partialorder %v407_v56, 0.0  ;;  %v6995_v49 = vld [vmem:[#allocation7] ss:$8 sps:$4 sm:$0xff]   ;;  %v975_v54 = vld [vmem:[#allocation3 + $0x3c] sm:$0xf]  ;;  %1889 = vmatprep.subr.bf16.mxu0 %v6993_v43  ;;  %6876 = vmatprep.subr.bf16.mxu1 %v6993_v43 }
  0x9c   : >> { %v669_v2 = vrot.slane %v667_v57, 7  ;;  %v470_v3 = vmul.f32 0.2, %v406_v51  ;;  %v471_v4 = vmul.f32 0.2, %v407_v56  ;;  %1890 = vmatpush1.bf16.msra.mxu0 %v6995_v49  ;;  %6888 = vmatpush1.bf16.msra.mxu1 %v6995_v49 }
  0x9d   : >> { %v664_v5 = vor.u32 %v662_v55, %v661_v61  ;;  %v665_v6 = vrot.slane %v661_v61, 4  ;;  %v676_v8 = vshrl.u32 %v6785_v63, 16  ;;  %v679_v9 = vshll.u32 %v6785_v63, 16  ;;  %v1061_v10 = vld [vmem:[#allocation3 + $0xc] sm:$0xf]  ;;  %v408_v61 = vld [vmem:[#allocation2 + $0x50] sm:$0xff] }
  0x9e   : >> { %v1062_v11 = vld [vmem:[#allocation3 + $0x10] sm:$0xf]  ;;  %v672_v13 = vor.u32 %v670_v58, %v669_v2  ;;  %v502_v14 = vsel %vm438_vm9, %v406_v51, %v470_v3  ;;  %v503_v12 = vsel %vm439_vm10, %v407_v56, %v471_v4  ;;  %v6974_v16 = vld [vmem:[#allocation3 + $0x14] ss:$0 sps:$4 sm:$0x11]   ;;  %v674_v18 = vrot.slane %v669_v2, 4 }
  0x9f   : >> { %v7741_v15 = vcombine.low %v1061_v10, %v1062_v11  ;;  %v1063_v17 = vld [vmem:[#allocation3 + $0x18] sm:$0xf]  ;;  %v962_v19 = vsel %vm7714_vm15, %v664_v5, %v961_v62  ;;  %v6787_v21 = vpack.c.bf16 %v502_v14, %v502_v14  ;;  %v678_v24 = vrot.slane %v676_v8, 7  ;;  %v6996_v55 = vld [vmem:[#allocation7 + $0x14] ss:$8 sps:$4 sm:$0xff]   ;;  %v410_v11 = vld [vmem:[#allocation2 + $0x60] sm:$0xff] }
  0xa0   : >> { %v673_v22 = vsel %vm7720_vm1, %v665_v6, %v672_v13  ;;  %963 = vst [vmem:[#allocation3 + $0x24] sm:$0xf] %v962_v19  ;;  %v684_v25 = vshrl.u32 %v6786_v0, 16  ;;  %v687_v26 = vshll.u32 %v6786_v0, 16  ;;  %v1296_v30 = vshll.u32 %v6974_v16, 16  ;;  %v409_v5 = vld [vmem:[#allocation2 + $0x58] sm:$0xff]  ;;  %1891 = vmatprep.subr.bf16.mxu0 %v6996_v55  ;;  %6877 = vmatprep.subr.bf16.mxu1 %v6996_v55 }
  0xa1   : >> { %v1289_v28 = vshrl.u32 %v7741_v15, 16  ;;  %v1291_v29 = vshll.u32 %v7741_v15, 16  ;;  %v1064_v31 = vld [vmem:[#allocation3 + $0x1c] sm:$0xf]  ;;  %964 = vst.msk [vmem:[#allocation3 + $0x28] sm:$0xf] %vm205_vm0, %v673_v22  ;;  %v966_v32 = vsel %vm7551_vm3, %v674_v18, %v965_v7  ;;  %v681_v35 = vor.u32 %v679_v9, %v678_v24 }
  0xa2   : >> { %v7752_v33 = vcombine.low %v1063_v17, %v1064_v31  ;;  %v6976_v34 = vld [vmem:[#allocation3 + $0x20] ss:$0 sps:$4 sm:$0x11]   ;;  %967 = vst [vmem:[#allocation3 + $0x2c] sm:$0x1] %v966_v32  ;;  %v682_v36 = vrot.slane %v678_v24, 4  ;;  %v6788_v38 = vpack.c.bf16 %v503_v12, %v503_v12 }
  0xa3   : >> { %v1293_v39 = vrot.slane %v1291_v29, 1  ;;  %v1298_v40 = vrot.slane %v1296_v30, 1  ;;  %v686_v41 = vrot.slane %v684_v25, 7  ;;  %v693_v42 = vshrl.u32 %v6787_v21, 16  ;;  %v6998_v56 = vld [vmem:[#allocation7 + $0x10] ss:$8 sps:$4 sm:$0xff]  }
  0xa4   : >> { %v1301_v44 = vshrl.u32 %v7752_v33, 16  ;;  %v1303_v45 = vshll.u32 %v7752_v33, 16  ;;  %v1308_v47 = vshll.u32 %v6976_v34, 16  ;;  %v969_v48 = vsel %vm7714_vm15, %v681_v35, %v968_v27  ;;  %v979_v4 = vld [vmem:[#allocation3 + $0x44] sm:$0x1]  ;;  %v411_v13 = vld [vmem:[#allocation2 + $0x68] sm:$0xff]  ;;  %1892 = vmatpush1.bf16.msra.mxu0 %v6998_v56  ;;  %6889 = vmatpush1.bf16.msra.mxu1 %v6998_v56 }
  0xa5   : >> { %v1294_v50 = vor.u32 %v1293_v39, %v1289_v28  ;;  %v689_v51 = vor.u32 %v687_v26, %v686_v41  ;;  %v691_v52 = vrot.slane %v686_v41, 4  ;;  %970 = vst [vmem:[#allocation3 + $0x30] sm:$0xf] %v969_v48  ;;  %v695_v53 = vrot.slane %v693_v42, 7  ;;  %v7003_v22 = vld [vmem:[#allocation7 + $0x20] ss:$8 sps:$4 sm:$0xff]  }
  0xa6   : >> { %v1305_v57 = vrot.slane %v1303_v45, 1  ;;  %v1310_v58 = vrot.slane %v1308_v47, 1  ;;  %v696_v59 = vshll.u32 %v6787_v21, 16  ;;  %v701_v60 = vshrl.u32 %v6788_v38, 16  ;;  %v7001_v21 = vld [vmem:[#allocation7 + $0x24] ss:$8 sps:$4 sm:$0xff]  }
  0xa7   : >> { %v1299_v62 = vsel %vm1275_vm7, %v1294_v50, %v1298_v40  ;;  %v1065_v63 = vld [vmem:[#allocation3 + $0x24] sm:$0xf]  ;;  %v690_v0 = vsel %vm7720_vm1, %v682_v36, %v689_v51  ;;  %v973_v2 = vsel %vm7551_vm3, %v691_v52, %v972_v37  ;;  %v699_v3 = vrot.slane %v695_v53, 4  ;;  %v7779_v34 = vld [vmem:[#allocation2 + $0x88] sm:$0xff]  ;;  %1893 = vmatprep.subr.bf16.mxu0 %v7001_v21  ;;  %6878 = vmatprep.subr.bf16.mxu1 %v7001_v21 }
  0xa8   : >> { %1494 = vrot.lane.b32.xlu0 %v1299_v62, %s7358_s8  ;;  %v1306_v6 = vor.u32 %v1305_v57, %v1301_v44  ;;  %v1066_v7 = vld [vmem:[#allocation3 + $0x28] sm:$0xf]  ;;  %971 = vst.msk [vmem:[#allocation3 + $0x34] sm:$0xf] %vm205_vm0, %v690_v0  ;;  %974 = vst [vmem:[#allocation3 + $0x38] sm:$0x1] %v973_v2  ;;  %v698_v8 = vor.u32 %v696_v59, %v695_v53  ;;  %1894 = vmatpush1.bf16.msra.mxu0 %v7003_v22 }
  0xa9   : >> { %v703_v9 = vrot.slane %v701_v60, 7  ;;  %v704_v10 = vshll.u32 %v6788_v38, 16  ;;  %v7765_v14 = vcombine.low %v1065_v63, %v1066_v7  ;;  %v6978_v12 = vld [vmem:[#allocation3 + $0x2c] ss:$0 sps:$4 sm:$0x11]   ;;  %vm440_vm11 = vcmp.gt.f32.partialorder %v408_v61, 0.0  ;;  %6890 = vmatpush1.bf16.msra.mxu1 %v7003_v22 }
  0xaa   : >> { %v1311_v16 = vsel %vm1275_vm7, %v1306_v6, %v1310_v58  ;;  %v976_v19 = vsel %vm7714_vm15, %v698_v8, %v975_v54  ;;  %v1320_v26 = vshll.u32 %v6978_v12, 16  ;;  %vm441_vm12 = vcmp.gt.f32.partialorder %v409_v5, 0.0  ;;  %v7777_v32 = vld [vmem:[#allocation2 + $0x80] sm:$0xff]  ;;  %v7004_v37 = vld [vmem:[#allocation7 + $0x34] ss:$8 sps:$4 sm:$0xff]  }
  0xab   : >> { %v706_v17 = vor.u32 %v704_v10, %v703_v9  ;;  %v708_v18 = vrot.slane %v703_v9, 4  ;;  %1496 = vrot.lane.b32.xlu1 %v1311_v16, %s7358_s8  ;;  %v1313_v24 = vshrl.u32 %v7765_v14, 16  ;;  %v1315_v25 = vshll.u32 %v7765_v14, 16  ;;  %977 = vst [vmem:[#allocation3 + $0x3c] sm:$0xf] %v976_v19  ;;  %1895 = vmatprep.subr.bf16.mxu0 %v7004_v37 }
  0xac   : >> { %v1067_v27 = vld [vmem:[#allocation3 + $0x30] sm:$0xf]  ;;  %v472_v30 = vmul.f32 0.2, %v408_v61  ;;  %v473_v31 = vmul.f32 0.2, %v409_v5  ;;  %6879 = vmatprep.subr.bf16.mxu1 %v7004_v37 }
  0xad   : >> { %v707_v28 = vsel %vm7720_vm1, %v699_v3, %v706_v17  ;;  %v980_v29 = vsel %vm7551_vm3, %v708_v18, %v979_v4  ;;  %v1317_v35 = vrot.slane %v1315_v25, 1  ;;  %v1322_v36 = vrot.slane %v1320_v26, 1  ;;  %v7006_v42 = vld [vmem:[#allocation7 + $0x30] ss:$8 sps:$4 sm:$0xff]   ;;  %v7009_v3 = vld [vmem:[#allocation7 + $0x44] ss:$8 sps:$4 sm:$0xff]  }
  0xae   : >> { %978 = vst.msk [vmem:[#allocation3 + $0x40] sm:$0xf] %vm205_vm0, %v707_v28  ;;  %981 = vst [vmem:[#allocation3 + $0x44] sm:$0x1] %v980_v29  ;;  %vm442_vm13 = vcmp.gt.f32.partialorder %v410_v11, 0.0  ;;  %vm443_vm14 = vcmp.gt.f32.partialorder %v411_v13, 0.0  ;;  %v504_v38 = vsel %vm440_vm11, %v408_v61, %v472_v30  ;;  %v505_v39 = vsel %vm441_vm12, %v409_v5, %v473_v31  ;;  %1896 = vmatpush1.bf16.msra.mxu0 %v7006_v42 }
  0xaf   : >> { %v474_v40 = vmul.f32 0.2, %v410_v11  ;;  %v475_v41 = vmul.f32 0.2, %v411_v13  ;;  %v1318_v43 = vor.u32 %v1317_v35, %v1313_v24  ;;  %v1068_v44 = vld [vmem:[#allocation3 + $0x34] sm:$0xf]  ;;  %v6789_v45 = vpack.c.bf16 %v504_v38, %v504_v38  ;;  %6891 = vmatpush1.bf16.msra.mxu1 %v7006_v42  ;;  %1897 = vmatprep.subr.bf16.mxu0 %v7009_v3 }
  0xb0   : >> { %v6790_v47 = vpack.c.bf16 %v505_v39, %v505_v39  ;;  %v7784_v48 = vcombine.low %v1067_v27, %v1068_v44  ;;  %v6980_v49 = vld [vmem:[#allocation3 + $0x38] ss:$0 sps:$4 sm:$0x11]   ;;  %vm446_vm6 = vcmp.gt.f32.partialorder %v7777_v32, 0.0  ;;  %vm447_vm8 = vcmp.gt.f32.partialorder %v7779_v34, 0.0  ;;  %6880 = vmatprep.subr.bf16.mxu1 %v7009_v3  ;;  %v7807_v42 = vld [vmem:[#allocation2 + $0x90] sm:$0xff] }
  0xb1   : >> { %v506_v50 = vsel %vm442_vm13, %v410_v11, %v474_v40  ;;  %v507_v51 = vsel %vm443_vm14, %v411_v13, %v475_v41  ;;  %v1323_v52 = vsel %vm1275_vm7, %v1318_v43, %v1322_v36  ;;  %v710_v53 = vshrl.u32 %v6789_v45, 16  ;;  %v982_v63 = vld [vmem:[#allocation3 + $0x48] sm:$0xf]  ;;  %v986_v0 = vld [vmem:[#allocation3 + $0x50] sm:$0x1]  ;;  %v413_v37 = vld [vmem:[#allocation2 + $0x78] sm:$0xff] }
  0xb2   : >> { %v713_v54 = vshll.u32 %v6789_v45, 16  ;;  %v718_v55 = vshrl.u32 %v6790_v47, 16  ;;  %1498 = vrot.lane.b32.xlu1 %v1323_v52, %s7358_s8  ;;  %v1325_v56 = vshrl.u32 %v7784_v48, 16  ;;  %v1327_v57 = vshll.u32 %v7784_v48, 16  ;;  %v1069_v59 = vld [vmem:[#allocation3 + $0x3c] sm:$0xf] }
  0xb3   : >> { %v1332_v58 = vshll.u32 %v6980_v49, 16  ;;  %v721_v60 = vshll.u32 %v6790_v47, 16  ;;  %v712_v61 = vrot.slane %v710_v53, 7  ;;  %v6791_v2 = vpack.c.bf16 %v506_v50, %v506_v50  ;;  %v7011_v12 = vld [vmem:[#allocation7 + $0x40] ss:$8 sps:$4 sm:$0xff]   ;;  %v412_v36 = vld [vmem:[#allocation2 + $0x70] sm:$0xff] }
  0xb4   : >> { %v720_v62 = vrot.slane %v718_v55, 7  ;;  %v1329_v4 = vrot.slane %v1327_v57, 1  ;;  %v6792_v7 = vpack.c.bf16 %v507_v51, %v507_v51  ;;  %v7012_v21 = vld [vmem:[#allocation7 + $0x54] ss:$8 sps:$4 sm:$0xff]   ;;  %1898 = vmatpush1.bf16.msra.mxu0 %v7011_v12  ;;  %v7014_v27 = vld [vmem:[#allocation7 + $0x50] ss:$8 sps:$4 sm:$0xff]   ;;  %6892 = vmatpush1.bf16.msra.mxu1 %v7011_v12 }
  0xb5   : >> { %v1334_v5 = vrot.slane %v1332_v58, 1  ;;  %v1070_v6 = vld [vmem:[#allocation3 + $0x40] sm:$0xf]  ;;  %v6982_v9 = vld [vmem:[#allocation3 + $0x44] ss:$0 sps:$4 sm:$0x11]   ;;  %v715_v10 = vor.u32 %v713_v54, %v712_v61  ;;  %1899 = vmatprep.subr.bf16.mxu0 %v7012_v21  ;;  %6881 = vmatprep.subr.bf16.mxu1 %v7012_v21 }
  0xb6   : >> { %v7794_v8 = vcombine.low %v1069_v59, %v1070_v6  ;;  %v716_v11 = vrot.slane %v712_v61, 4  ;;  %v723_v13 = vor.u32 %v721_v60, %v720_v62  ;;  %v1330_v16 = vor.u32 %v1329_v4, %v1325_v56  ;;  %v989_v35 = vld [vmem:[#allocation3 + $0x54] sm:$0xf]  ;;  %v993_v45 = vld [vmem:[#allocation3 + $0x5c] sm:$0x1] }
  0xb7   : >> { %v725_v17 = vrot.slane %v720_v62, 4  ;;  %v727_v18 = vshrl.u32 %v6791_v2, 16  ;;  %v730_v19 = vshll.u32 %v6791_v2, 16  ;;  %v1344_v25 = vshll.u32 %v6982_v9, 16  ;;  %v7017_v52 = vld [vmem:[#allocation7 + $0x64] ss:$8 sps:$4 sm:$0xff]  }
  0xb8   : >> { %v1337_v22 = vshrl.u32 %v7794_v8, 16  ;;  %v1339_v24 = vshll.u32 %v7794_v8, 16  ;;  %v724_v26 = vsel %vm7720_vm1, %v716_v11, %v723_v13  ;;  %v1335_v28 = vsel %vm1275_vm7, %v1330_v16, %v1334_v5  ;;  %1900 = vmatpush1.bf16.msra.mxu0 %v7014_v27  ;;  %6893 = vmatpush1.bf16.msra.mxu1 %v7014_v27  ;;  %v7019_v57 = vld [vmem:[#allocation7 + $0x60] ss:$8 sps:$4 sm:$0xff]   ;;  %v7020_v58 = vld [vmem:[#allocation7 + $0x74] ss:$8 sps:$4 sm:$0xff]  }
  0xb9   : >> { %v983_v29 = vsel %vm7714_vm15, %v715_v10, %v982_v63  ;;  %985 = vst.msk [vmem:[#allocation3 + $0x4c] sm:$0xf] %vm205_vm0, %v724_v26  ;;  %v987_v30 = vsel %vm7551_vm3, %v725_v17, %v986_v0  ;;  %v729_v31 = vrot.slane %v727_v18, 7  ;;  %1500 = vrot.lane.b32.xlu0 %v1335_v28, %s7358_s8  ;;  %v1346_v39 = vrot.slane %v1344_v25, 1  ;;  %v7820_v63 = vld [vmem:[#allocation2 + $0x98] sm:$0xff]  ;;  %1901 = vmatprep.subr.bf16.mxu0 %v7017_v52 }
  0xba   : >> { %v1341_v38 = vrot.slane %v1339_v24, 1  ;;  %984 = vst [vmem:[#allocation3 + $0x48] sm:$0xf] %v983_v29  ;;  %988 = vst [vmem:[#allocation3 + $0x50] sm:$0x1] %v987_v30  ;;  %v735_v40 = vshrl.u32 %v6792_v7, 16  ;;  %6882 = vmatprep.subr.bf16.mxu1 %v7017_v52 }
  0xbb   : >> { %v738_v41 = vshll.u32 %v6792_v7, 16  ;;  %v732_v43 = vor.u32 %v730_v19, %v729_v31  ;;  %v733_v44 = vrot.slane %v729_v31, 4  ;;  %v478_v47 = vmul.f32 0.2, %v7777_v32  ;;  %v7023_v9 = vld [vmem:[#allocation7 + $0x84] ss:$8 sps:$4 sm:$0xff]  }
  0xbc   : >> { %v479_v49 = vmul.f32 0.2, %v7779_v34  ;;  %v1342_v50 = vor.u32 %v1341_v38, %v1337_v22  ;;  %v737_v51 = vrot.slane %v735_v40, 7  ;;  %vm444_vm9 = vcmp.gt.f32.partialorder %v412_v36, 0.0  ;;  %1902 = vmatpush1.bf16.msra.mxu0 %v7019_v57  ;;  %6894 = vmatpush1.bf16.msra.mxu1 %v7019_v57  ;;  %v1003_v12 = vld [vmem:[#allocation3 + $0x6c] sm:$0xf] }
  0xbd   : >> { %vm445_vm10 = vcmp.gt.f32.partialorder %v413_v37, 0.0  ;;  %v990_v53 = vsel %vm7714_vm15, %v732_v43, %v989_v35  ;;  %v510_v54 = vsel %vm446_vm6, %v7777_v32, %v478_v47  ;;  %v476_v56 = vmul.f32 0.2, %v412_v36  ;;  %1903 = vmatprep.subr.bf16.mxu0 %v7020_v58  ;;  %6883 = vmatprep.subr.bf16.mxu1 %v7020_v58  ;;  %v1007_v22 = vld [vmem:[#allocation3 + $0x74] sm:$0x1] }
  0xbe   : >> { %v511_v55 = vsel %vm447_vm8, %v7779_v34, %v479_v49  ;;  %v1347_v59 = vsel %vm1275_vm7, %v1342_v50, %v1346_v39  ;;  %v740_v60 = vor.u32 %v738_v41, %v737_v51  ;;  %v742_v61 = vrot.slane %v737_v51, 4  ;;  %991 = vst [vmem:[#allocation3 + $0x54] sm:$0xf] %v990_v53  ;;  %v7022_v34 = vld [vmem:[#allocation7 + $0x70] ss:$8 sps:$4 sm:$0xff]  }
  0xbf   : >> { %v6795_v62 = vpack.c.bf16 %v510_v54, %v510_v54  ;;  %1502 = vrot.lane.b32.xlu1 %v1347_v59, %s7358_s8  ;;  %v6796_v32 = vpack.c.bf16 %v511_v55, %v511_v55  ;;  %v477_v0 = vmul.f32 0.2, %v413_v37  ;;  %v508_v2 = vsel %vm444_vm9, %v412_v36, %v476_v56  ;;  %v996_v36 = vld [vmem:[#allocation3 + $0x60] sm:$0xf]  ;;  %v7026_v43 = vld [vmem:[#allocation7 + $0x94] ss:$8 sps:$4 sm:$0xff]  }
  0xc0   : >> { %vm448_vm11 = vcmp.gt.f32.partialorder %v7807_v42, 0.0  ;;  %v1072_v3 = vld [vmem:[#allocation3 + $0x4c] sm:$0xf]  ;;  %v741_v4 = vsel %vm7720_vm1, %v733_v44, %v740_v60  ;;  %v994_v5 = vsel %vm7551_vm3, %v742_v61, %v993_v45  ;;  %v6793_v17 = vpack.c.bf16 %v508_v2, %v508_v2  ;;  %1904 = vmatpush1.bf16.msra.mxu0 %v7022_v34  ;;  %6895 = vmatpush1.bf16.msra.mxu1 %v7022_v34  ;;  %v1000_v55 = vld [vmem:[#allocation3 + $0x68] sm:$0x1]  ;;  %v7843_v56 = vld [vmem:[#allocation2 + $0xa0] sm:$0xff] }
  0xc1   : >> { %v761_v6 = vshrl.u32 %v6795_v62, 16  ;;  %v764_v7 = vshll.u32 %v6795_v62, 16  ;;  %v1071_v10 = vld [vmem:[#allocation3 + $0x48] sm:$0xf]  ;;  %992 = vst.msk [vmem:[#allocation3 + $0x58] sm:$0xf] %vm205_vm0, %v741_v4  ;;  %v509_v16 = vsel %vm445_vm10, %v413_v37, %v477_v0  ;;  %1905 = vmatprep.subr.bf16.mxu0 %v7023_v9  ;;  %6884 = vmatprep.subr.bf16.mxu1 %v7023_v9 }
  0xc2   : >> { %995 = vst [vmem:[#allocation3 + $0x5c] sm:$0x1] %v994_v5  ;;  %v769_v11 = vshrl.u32 %v6796_v32, 16  ;;  %v772_v13 = vshll.u32 %v6796_v32, 16  ;;  %v7831_v18 = vcombine.low %v1071_v10, %v1072_v3  ;;  %v6794_v24 = vpack.c.bf16 %v509_v16, %v509_v16  ;;  %v7025_v37 = vld [vmem:[#allocation7 + $0x80] ss:$8 sps:$4 sm:$0xff]  }
  0xc3   : >> { %v6984_v19 = vld [vmem:[#allocation3 + $0x50] ss:$0 sps:$4 sm:$0x11]   ;;  %v763_v21 = vrot.slane %v761_v6, 7  ;;  %vm449_vm12 = vcmp.gt.f32.partialorder %v7820_v63, 0.0  ;;  %v744_v26 = vshrl.u32 %v6793_v17, 16 }
  0xc4   : >> { %v771_v25 = vrot.slane %v769_v11, 7  ;;  %v747_v27 = vshll.u32 %v6793_v17, 16  ;;  %v480_v28 = vmul.f32 0.2, %v7807_v42  ;;  %v1349_v29 = vshrl.u32 %v7831_v18, 16  ;;  %1906 = vmatpush1.bf16.msra.mxu0 %v7025_v37  ;;  %6896 = vmatpush1.bf16.msra.mxu1 %v7025_v37 }
  0xc5   : >> { %v1351_v30 = vshll.u32 %v7831_v18, 16  ;;  %v1356_v31 = vshll.u32 %v6984_v19, 16  ;;  %v766_v35 = vor.u32 %v764_v7, %v763_v21  ;;  %v767_v38 = vrot.slane %v763_v21, 4  ;;  %v1073_v47 = vld [vmem:[#allocation3 + $0x54] sm:$0xf]  ;;  %1907 = vmatprep.subr.bf16.mxu0 %v7026_v43  ;;  %6885 = vmatprep.subr.bf16.mxu1 %v7026_v43 }
  0xc6   : >> { %v774_v39 = vor.u32 %v772_v13, %v771_v25  ;;  %v776_v40 = vrot.slane %v771_v25, 4  ;;  %v746_v41 = vrot.slane %v744_v26, 7  ;;  %v752_v50 = vshrl.u32 %v6794_v24, 16  ;;  %v7028_v57 = vld [vmem:[#allocation7 + $0x90] ss:$8 sps:$4 sm:$0xff]  }
  0xc7   : >> { %v1353_v44 = vrot.slane %v1351_v30, 1  ;;  %v1358_v45 = vrot.slane %v1356_v31, 1  ;;  %v1004_v49 = vsel %vm7714_vm15, %v766_v35, %v1003_v12  ;;  %v7029_v58 = vld [vmem:[#allocation7 + $0xa4] ss:$8 sps:$4 sm:$0xff]   ;;  %v755_v62 = vshll.u32 %v6794_v24, 16  ;;  %v7868_v12 = vld [vmem:[#allocation2 + $0xb0] sm:$0xff] }
  0xc8   : >> { %v775_v51 = vsel %vm7720_vm1, %v767_v38, %v774_v39  ;;  %1005 = vst [vmem:[#allocation3 + $0x6c] sm:$0xf] %v1004_v49  ;;  %v1008_v52 = vsel %vm7551_vm3, %v776_v40, %v1007_v22  ;;  %v749_v53 = vor.u32 %v747_v27, %v746_v41  ;;  %v750_v54 = vrot.slane %v746_v41, 4  ;;  %v7845_v60 = vld [vmem:[#allocation3 + $0x58] sm:$0xf]  ;;  %1908 = vmatpush1.bf16.msra.mxu0 %v7028_v57 }
  0xc9   : >> { %v1354_v59 = vor.u32 %v1353_v44, %v1349_v29  ;;  %1006 = vst.msk [vmem:[#allocation3 + $0x70] sm:$0xf] %vm205_vm0, %v775_v51  ;;  %1009 = vst [vmem:[#allocation3 + $0x74] sm:$0x1] %v1008_v52  ;;  %v754_v61 = vrot.slane %v752_v50, 7  ;;  %v512_v32 = vsel %vm448_vm11, %v7807_v42, %v480_v28  ;;  %v7852_v0 = vcombine.low %v1073_v47, %v7845_v60  ;;  %v419_v42 = vld [vmem:[#allocation2 + $0xa8] sm:$0xff] }
  0xca   : >> { %v7854_v2 = vld [vmem:[#allocation3 + $0x5c] ss:$0 sps:$4 sm:$0x11]   ;;  %v997_v34 = vsel %vm7714_vm15, %v749_v53, %v996_v36  ;;  %v481_v3 = vmul.f32 0.2, %v7820_v63  ;;  %v6797_v4 = vpack.c.bf16 %v512_v32, %v512_v32  ;;  %vm450_vm13 = vcmp.gt.f32.partialorder %v7843_v56, 0.0  ;;  %6897 = vmatpush1.bf16.msra.mxu1 %v7028_v57  ;;  %1909 = vmatprep.subr.bf16.mxu0 %v7029_v58 }
  0xcb   : >> { %v1359_v5 = vsel %vm1275_vm7, %v1354_v59, %v1358_v45  ;;  %v757_v6 = vor.u32 %v755_v62, %v754_v61  ;;  %v759_v7 = vrot.slane %v754_v61, 4  ;;  %998 = vst [vmem:[#allocation3 + $0x60] sm:$0xf] %v997_v34  ;;  %v1361_v9 = vshrl.u32 %v7852_v0, 16  ;;  %v7874_v22 = vld [vmem:[#allocation2 + $0xb8] sm:$0xff]  ;;  %6886 = vmatprep.subr.bf16.mxu1 %v7029_v58 }
  0xcc   : >> { %1504 = vrot.lane.b32.xlu0 %v1359_v5, %s7358_s8  ;;  %v1363_v10 = vshll.u32 %v7852_v0, 16  ;;  %v1368_v11 = vshll.u32 %v7854_v2, 16  ;;  %v513_v13 = vsel %vm449_vm12, %v7820_v63, %v481_v3  ;;  %v778_v21 = vshrl.u32 %v6797_v4, 16  ;;  %v7031_v24 = vld [vmem:[#allocation7 + $0xa0] ss:$8 sps:$4 sm:$0xff]  }
  0xcd   : >> { %v758_v16 = vsel %vm7720_vm1, %v750_v54, %v757_v6  ;;  %v1001_v17 = vsel %vm7551_vm3, %v759_v7, %v1000_v55  ;;  %v6798_v19 = vpack.c.bf16 %v513_v13, %v513_v13  ;;  %v781_v63 = vshll.u32 %v6797_v4, 16  ;;  %v7032_v27 = vld [vmem:[#allocation7 + $0xb4] ss:$8 sps:$4 sm:$0xff]   ;;  %v1010_v35 = vld [vmem:[#allocation3 + $0x78] sm:$0xf]  ;;  %1910 = vmatpush1.bf16.msra.mxu0 %v7031_v24 }
  0xce   : >> { %v1365_v25 = vrot.slane %v1363_v10, 1  ;;  %v1370_v26 = vrot.slane %v1368_v11, 1  ;;  %999 = vst.msk [vmem:[#allocation3 + $0x64] sm:$0xf] %vm205_vm0, %v758_v16  ;;  %1002 = vst [vmem:[#allocation3 + $0x68] sm:$0x1] %v1001_v17  ;;  %6898 = vmatpush1.bf16.msra.mxu1 %v7031_v24  ;;  %1911 = vmatprep.subr.bf16.mxu0 %v7032_v27 }
  0xcf   : >> { %vm451_vm14 = vcmp.gt.f32.partialorder %v419_v42, 0.0  ;;  %v1077_v28 = vld [vmem:[#allocation3 + $0x6c] sm:$0xf]  ;;  %v780_v29 = vrot.slane %v778_v21, 7  ;;  %v786_v30 = vshrl.u32 %v6798_v19, 16  ;;  %v789_v31 = vshll.u32 %v6798_v19, 16  ;;  %6887 = vmatprep.subr.bf16.mxu1 %v7032_v27 }
  0xd0   : >> { %vm452_vm6 = vcmp.gt.f32.partialorder %v7868_v12, 0.0  ;;  %v7034_v36 = vld [vmem:[#allocation7 + $0xb0] ss:$8 sps:$4 sm:$0xff]   ;;  %v1366_v37 = vor.u32 %v1365_v25, %v1361_v9  ;;  %v482_v39 = vmul.f32 0.2, %v7843_v56  ;;  %vm453_vm8 = vcmp.gt.f32.partialorder %v7874_v22, 0.0 }
  0xd1   : >> { %v7878_v38 = vld [vmem:[#allocation3 + $0x70] sm:$0xf]  ;;  %v7884_v41 = vld [vmem:[#allocation3 + $0x74] ss:$0 sps:$4 sm:$0x11]   ;;  %v783_v43 = vor.u32 %v781_v63, %v780_v29  ;;  %v784_v44 = vrot.slane %v780_v29, 4  ;;  %1912 = vmatpush1.bf16.msra.mxu0 %v7034_v36 }
  0xd2   : >> { %v7882_v40 = vcombine.low %v1077_v28, %v7878_v38  ;;  %v788_v45 = vrot.slane %v786_v30, 7  ;;  %v1371_v47 = vsel %vm1275_vm7, %v1366_v37, %v1370_v26  ;;  %v1014_v49 = vld [vmem:[#allocation3 + $0x80] sm:$0x1]  ;;  %v483_v50 = vmul.f32 0.2, %v419_v42  ;;  %6899 = vmatpush1.bf16.msra.mxu1 %v7034_v36 }
  0xd3   : >> { %v514_v51 = vsel %vm450_vm13, %v7843_v56, %v482_v39  ;;  %1506 = vrot.lane.b32.xlu1 %v1371_v47, %s7358_s8  ;;  %v1392_v54 = vshll.u32 %v7884_v41, 16  ;;  %v1075_v55 = vld [vmem:[#allocation3 + $0x60] sm:$0xf]  ;;  %v1011_v59 = vsel %vm7714_vm15, %v783_v43, %v1010_v35  ;;  %v484_v16 = vmul.f32 0.2, %v7868_v12 }
  0xd4   : >> { %v1385_v52 = vshrl.u32 %v7882_v40, 16  ;;  %v1387_v53 = vshll.u32 %v7882_v40, 16  ;;  %v791_v57 = vor.u32 %v789_v31, %v788_v45  ;;  %v793_v58 = vrot.slane %v788_v45, 4  ;;  %1012 = vst [vmem:[#allocation3 + $0x78] sm:$0xf] %v1011_v59  ;;  %v422_v29 = vld [vmem:[#allocation2 + $0xc0] sm:$0xff] }
  0xd5   : >> { %v515_v56 = vsel %vm451_vm14, %v419_v42, %v483_v50  ;;  %v6799_v61 = vpack.c.bf16 %v514_v51, %v514_v51  ;;  %v1394_v32 = vrot.slane %v1392_v54, 1  ;;  %v7898_v34 = vld [vmem:[#allocation3 + $0x64] sm:$0xf]  ;;  %v7905_v6 = vld [vmem:[#allocation3 + $0x68] ss:$0 sps:$4 sm:$0x11]   ;;  %v516_v28 = vsel %vm452_vm6, %v7868_v12, %v484_v16 }
  0xd6   : >> { %v1389_v62 = vrot.slane %v1387_v53, 1  ;;  %v792_v3 = vsel %vm7720_vm1, %v784_v44, %v791_v57  ;;  %v6800_v4 = vpack.c.bf16 %v515_v56, %v515_v56  ;;  %v7903_v5 = vcombine.low %v1075_v55, %v7898_v34  ;;  %v1017_v25 = vld [vmem:[#allocation3 + $0x84] sm:$0xf]  ;;  %v1021_v37 = vld [vmem:[#allocation3 + $0x8c] sm:$0x1] }
  0xd7   : >> { %1013 = vst.msk [vmem:[#allocation3 + $0x7c] sm:$0xf] %vm205_vm0, %v792_v3  ;;  %v1015_v7 = vsel %vm7551_vm3, %v793_v58, %v1014_v49  ;;  %v795_v42 = vshrl.u32 %v6799_v61, 16  ;;  %v798_v9 = vshll.u32 %v6799_v61, 16  ;;  %v1380_v21 = vshll.u32 %v7905_v6, 16 }
  0xd8   : >> { %v1390_v10 = vor.u32 %v1389_v62, %v1385_v52  ;;  %1016 = vst [vmem:[#allocation3 + $0x80] sm:$0x1] %v1015_v7  ;;  %v803_v11 = vshrl.u32 %v6800_v4, 16  ;;  %v806_v13 = vshll.u32 %v6800_v4, 16  ;;  %v1373_v17 = vshrl.u32 %v7903_v5, 16  ;;  %v423_v52 = vld [vmem:[#allocation2 + $0xc8] sm:$0xff] }
  0xd9   : >> { %v1375_v19 = vshll.u32 %v7903_v5, 16  ;;  %v797_v24 = vrot.slane %v795_v42, 7  ;;  %v485_v27 = vmul.f32 0.2, %v7874_v22  ;;  %v1382_v31 = vrot.slane %v1380_v21, 1 }
  0xda   : >> { %v1395_v26 = vsel %vm1275_vm7, %v1390_v10, %v1394_v32  ;;  %v805_v63 = vrot.slane %v803_v11, 7  ;;  %v6801_v45 = vpack.c.bf16 %v516_v28, %v516_v28  ;;  %v7923_v47 = vld [vmem:[#allocation3] sm:$0xe]  ;;  %vm454_vm9 = vcmp.gt.f32.partialorder %v422_v29, 0.0  ;;  %v7199_v62 = vld [vmem:[#allocation3 + $0x4] sm:$0xf] }
  0xdb   : >> { %1510 = vrot.lane.b32.xlu1 %v1395_v26, %s7358_s8  ;;  %v1377_v30 = vrot.slane %v1375_v19, 1  ;;  %v800_v35 = vor.u32 %v798_v9, %v797_v24  ;;  %v801_v36 = vrot.slane %v797_v24, 4  ;;  %v517_v44 = vsel %vm453_vm8, %v7874_v22, %v485_v27  ;;  %v1079_v50 = vld [vmem:[#allocation3 + $0x78] sm:$0xf] }
  0xdc   : >> { %v808_v39 = vor.u32 %v806_v13, %v805_v63  ;;  %v810_v43 = vrot.slane %v805_v63, 4  ;;  %v6802_v51 = vpack.c.bf16 %v517_v44, %v517_v44  ;;  %v812_v55 = vshrl.u32 %v6801_v45, 16  ;;  %v1024_v13 = vld [vmem:[#allocation3 + $0x90] sm:$0xf]  ;;  %v1028_v19 = vld [vmem:[#allocation3 + $0x98] sm:$0x1] }
  0xdd   : >> { %v1378_v49 = vor.u32 %v1377_v30, %v1373_v17  ;;  %v1018_v12 = vsel %vm7714_vm15, %v800_v35, %v1017_v25  ;;  %v815_v57 = vshll.u32 %v6801_v45, 16  ;;  %v6452_v32 = vcombine.low %v7923_v47, %v7199_v62 }
  0xde   : >> { %v7927_v53 = vld [vmem:[#allocation3 + $0x7c] sm:$0xf]  ;;  %v809_v54 = vsel %vm7720_vm1, %v801_v36, %v808_v39  ;;  %1019 = vst [vmem:[#allocation3 + $0x84] sm:$0xf] %v1018_v12  ;;  %v1022_v22 = vsel %vm7551_vm3, %v810_v43, %v1021_v37  ;;  %v820_v61 = vshrl.u32 %v6802_v51, 16  ;;  %v814_v3 = vrot.slane %v812_v55, 7 }
  0xdf   : >> { %v1383_v58 = vsel %vm1275_vm7, %v1378_v49, %v1382_v31  ;;  %v7935_v59 = vcombine.low %v1079_v50, %v7927_v53  ;;  %v7937_v56 = vld [vmem:[#allocation3 + $0x80] ss:$0 sps:$4 sm:$0x11]   ;;  %1020 = vst.msk [vmem:[#allocation3 + $0x88] sm:$0xf] %vm205_vm0, %v809_v54  ;;  %v823_v4 = vshll.u32 %v6802_v51, 16 }
  0xe0   : >> { %1023 = vst [vmem:[#allocation3 + $0x8c] sm:$0x1] %v1022_v22  ;;  %1508 = vrot.lane.b32.xlu0 %v1383_v58, %s7358_s8  ;;  %vm455_vm10 = vcmp.gt.f32.partialorder %v423_v52, 0.0  ;;  %v486_v7 = vmul.f32 0.2, %v422_v29  ;;  %v1404_v10 = vshll.u32 %v7937_v56, 16  ;;  %v817_v16 = vor.u32 %v815_v57, %v814_v3 }
  0xe1   : >> { %v1397_v42 = vshrl.u32 %v7935_v59, 16  ;;  %v1399_v9 = vshll.u32 %v7935_v59, 16  ;;  %v822_v11 = vrot.slane %v820_v61, 7  ;;  %v818_v17 = vrot.slane %v814_v3, 4  ;;  %v1035_v22 = vld [vmem:[#allocation3 + $0xa4] sm:$0x1] }
  0xe2   : >> { %v487_v21 = vmul.f32 0.2, %v423_v52  ;;  %v518_v24 = vsel %vm454_vm9, %v422_v29, %v486_v7  ;;  %v1406_v26 = vrot.slane %v1404_v10, 1  ;;  %v1025_v28 = vsel %vm7714_vm15, %v817_v16, %v1024_v13  ;;  %v7200_v57 = vld [vmem:[#allocation3 + $0x8] ss:$0 sps:$4 sm:$0x11]  }
  0xe3   : >> { %v1401_v25 = vrot.slane %v1399_v9, 1  ;;  %v825_v63 = vor.u32 %v823_v4, %v822_v11  ;;  %v827_v27 = vrot.slane %v822_v11, 4  ;;  %v6803_v31 = vpack.c.bf16 %v518_v24, %v518_v24  ;;  %1026 = vst [vmem:[#allocation3 + $0x90] sm:$0xf] %v1025_v28  ;;  %v425_v28 = vld [vmem:[#allocation2 + $0xd8] sm:$0xff] }
  0xe4   : >> { %v519_v30 = vsel %vm455_vm10, %v423_v52, %v487_v21  ;;  %vm1582_vm11 = vcmask 1046528   ;;  %v1031_v52 = vld [vmem:[#allocation3 + $0x9c] sm:$0xf]  ;;  %v1583_v55 = vrot.slane %v6452_v32, 1  ;;  %v1584_v58 = vrot.slane %v7200_v57, 1 }
  0xe5   : >> { %v1402_v35 = vor.u32 %v1401_v25, %v1397_v42  ;;  %v1081_v36 = vld [vmem:[#allocation3 + $0x84] sm:$0xf]  ;;  %v826_v37 = vsel %vm7720_vm1, %v818_v17, %v825_v63  ;;  %v1029_v29 = vsel %vm7551_vm3, %v827_v27, %v1028_v19  ;;  %v6804_v39 = vpack.c.bf16 %v519_v30, %v519_v30 }
  0xe6   : >> { %v7953_v43 = vld [vmem:[#allocation3 + $0x88] sm:$0xf]  ;;  %1027 = vst.msk [vmem:[#allocation3 + $0x94] sm:$0xf] %vm205_vm0, %v826_v37  ;;  %1030 = vst [vmem:[#allocation3 + $0x98] sm:$0x1] %v1029_v29  ;;  %v1585_v9 = vsel %vm1582_vm11, %v1583_v55, %v1584_v58 }
  0xe7   : >> { %v829_v44 = vshrl.u32 %v6803_v31, 16  ;;  %v832_v45 = vshll.u32 %v6803_v31, 16  ;;  %v1407_v47 = vsel %vm1275_vm7, %v1402_v35, %v1406_v26  ;;  %v7958_v49 = vcombine.low %v1081_v36, %v7953_v43  ;;  %v7960_v50 = vld [vmem:[#allocation3 + $0x8c] ss:$0 sps:$4 sm:$0x11]   ;;  %6494 = vmatprep.mubr.msk.bf16.mxu0 %vm359_vm5, %v1585_v9  ;;  %v424_v26 = vld [vmem:[#allocation2 + $0xd0] sm:$0xff] }
  0xe8   : >> { %v837_v12 = vshrl.u32 %v6804_v39, 16  ;;  %v840_v51 = vshll.u32 %v6804_v39, 16  ;;  %1512 = vrot.lane.b32.xlu0 %v1407_v47, %s7358_s8  ;;  %v1416_v3 = vshll.u32 %v7960_v50, 16  ;;  %v1122_v31 = vld [vmem:[#allocation3 + $0x6c] sm:$0xe]  ;;  %vm456_vm12 = vcmp.gt.f32.partialorder %v424_v26, 0.0 }
  0xe9   : >> { %v831_v54 = vrot.slane %v829_v44, 7  ;;  %v1409_v61 = vshrl.u32 %v7958_v49, 16  ;;  %v1411_v62 = vshll.u32 %v7958_v49, 16  ;;  %vm457_vm13 = vcmp.gt.f32.partialorder %v425_v28, 0.0  ;;  %v426_v47 = vld [vmem:[#allocation2 + $0xe0] sm:$0xff] }
  0xea   : >> { %v839_v4 = vrot.slane %v837_v12, 7  ;;  %v1418_v11 = vrot.slane %v1416_v3, 1  ;;  %v1083_v32 = vld [vmem:[#allocation3 + $0x90] sm:$0xf]  ;;  %v488_v44 = vmul.f32 0.2, %v424_v26 }
  0xeb   : >> { %v834_v7 = vor.u32 %v832_v45, %v831_v54  ;;  %v835_v42 = vrot.slane %v831_v54, 4  ;;  %v1413_v10 = vrot.slane %v1411_v62, 1  ;;  %v489_v45 = vmul.f32 0.2, %v425_v28  ;;  %v427_v54 = vld [vmem:[#allocation2 + $0xe8] sm:$0xff] }
  0xec   : >> { %v842_v13 = vor.u32 %v840_v51, %v839_v4  ;;  %v844_v16 = vrot.slane %v839_v4, 4  ;;  %v520_v55 = vsel %vm456_vm12, %v424_v26, %v488_v44  ;;  %v1611_v58 = vrot.slane %v7884_v41, 1  ;;  %v1042_v44 = vld [vmem:[#allocation3 + $0xb0] sm:$0x1] }
  0xed   : >> { %v1032_v17 = vsel %vm7714_vm15, %v834_v7, %v1031_v52  ;;  %v1414_v19 = vor.u32 %v1413_v10, %v1409_v61  ;;  %v7970_v21 = vld [vmem:[#allocation3 + $0x94] sm:$0xf]  ;;  %v7979_v27 = vld [vmem:[#allocation3 + $0x98] ss:$0 sps:$4 sm:$0x11]   ;;  %v6461_v52 = vcombine.low %v1122_v31, %v7878_v38  ;;  %v521_v57 = vsel %vm457_vm13, %v425_v28, %v489_v45 }
  0xee   : >> { %v843_v24 = vsel %vm7720_vm1, %v835_v42, %v842_v13  ;;  %1033 = vst [vmem:[#allocation3 + $0x9c] sm:$0xf] %v1032_v17  ;;  %v1036_v25 = vsel %vm7551_vm3, %v844_v16, %v1035_v22  ;;  %v7977_v63 = vcombine.low %v1083_v32, %v7970_v21  ;;  %v1428_v37 = vshll.u32 %v7979_v27, 16  ;;  %v1114_v42 = vld [vmem:[#allocation3 + $0xc] sm:$0xe] }
  0xef   : >> { %1034 = vst.msk [vmem:[#allocation3 + $0xa0] sm:$0xf] %vm205_vm0, %v843_v24  ;;  %1037 = vst [vmem:[#allocation3 + $0xa4] sm:$0x1] %v1036_v25  ;;  %v1419_v30 = vsel %vm1275_vm7, %v1414_v19, %v1418_v11  ;;  %v6805_v4 = vpack.c.bf16 %v520_v55, %v520_v55  ;;  %v6806_v7 = vpack.c.bf16 %v521_v57, %v521_v57  ;;  %v1610_v38 = vrot.slane %v6461_v52, 1 }
  0xf0   : >> { %1514 = vrot.lane.b32.xlu1 %v1419_v30, %s7358_s8  ;;  %v1421_v35 = vshrl.u32 %v7977_v63, 16  ;;  %v1423_v36 = vshll.u32 %v7977_v63, 16  ;;  %v1430_v39 = vrot.slane %v1428_v37, 1  ;;  %vm458_vm14 = vcmp.gt.f32.partialorder %v426_v47, 0.0  ;;  %v1038_v17 = vld [vmem:[#allocation3 + $0xa8] sm:$0xf] }
  0xf1   : >> { %vm459_vm6 = vcmp.gt.f32.partialorder %v427_v54, 0.0  ;;  %v846_v11 = vshrl.u32 %v6805_v4, 16  ;;  %v849_v13 = vshll.u32 %v6805_v4, 16  ;;  %v854_v16 = vshrl.u32 %v6806_v7, 16  ;;  %v428_v4 = vld [vmem:[#allocation2 + $0xf0] sm:$0xff] }
  0xf2   : >> { %v1425_v29 = vrot.slane %v1423_v36, 1  ;;  %v857_v32 = vshll.u32 %v6806_v7, 16  ;;  %v1612_v26 = vsel %vm1582_vm11, %v1610_v38, %v1611_v58  ;;  %v490_v30 = vmul.f32 0.2, %v426_v47  ;;  %v7201_v36 = vld [vmem:[#allocation3 + $0x10] sm:$0xf] }
  0xf3   : >> { %v848_v25 = vrot.slane %v846_v11, 7  ;;  %v856_v28 = vrot.slane %v854_v16, 7  ;;  %6503 = vmatprep.mubr.msk.bf16.mxu1 %vm359_vm5, %v1612_v26  ;;  %v491_v31 = vmul.f32 0.2, %v427_v54  ;;  %v6453_v37 = vcombine.low %v1114_v42, %v7201_v36 }
  0xf4   : >> { %v1426_v12 = vor.u32 %v1425_v29, %v1421_v35  ;;  %v7202_v11 = vld [vmem:[#allocation3 + $0x14] ss:$0 sps:$4 sm:$0x11]   ;;  %vm460_vm8 = vcmp.gt.f32.partialorder %v428_v4, 0.0 }
  0xf5   : >> { %v1085_v51 = vld [vmem:[#allocation3 + $0x9c] sm:$0xf]  ;;  %v851_v29 = vor.u32 %v849_v13, %v848_v25  ;;  %v859_v45 = vor.u32 %v857_v32, %v856_v28  ;;  %v523_v52 = vsel %vm459_vm6, %v427_v54, %v491_v31  ;;  %v1587_v13 = vrot.slane %v7202_v11, 1 }
  0xf6   : >> { %v7988_v22 = vld [vmem:[#allocation3 + $0xa0] sm:$0xf]  ;;  %v1431_v61 = vsel %vm1275_vm7, %v1426_v12, %v1430_v39  ;;  %v7995_v3 = vld [vmem:[#allocation3 + $0xa4] ss:$0 sps:$4 sm:$0x11]   ;;  %v852_v39 = vrot.slane %v848_v25, 4 }
  0xf7   : >> { %v7993_v62 = vcombine.low %v1085_v51, %v7988_v22  ;;  %1516 = vrot.lane.b32.xlu0 %v1431_v61, %s7358_s8  ;;  %v1440_v41 = vshll.u32 %v7995_v3, 16  ;;  %v861_v12 = vrot.slane %v856_v28, 4  ;;  %v522_v51 = vsel %vm458_vm14, %v426_v47, %v490_v30  ;;  %v429_v47 = vld [vmem:[#allocation2 + $0xf8] sm:$0xff] }
  0xf8   : >> { %v1039_v57 = vsel %vm7714_vm15, %v851_v29, %v1038_v17  ;;  %v6807_v58 = vpack.c.bf16 %v522_v51, %v522_v51  ;;  %v6808_v61 = vpack.c.bf16 %v523_v52, %v523_v52  ;;  %v860_v7 = vsel %vm7720_vm1, %v852_v39, %v859_v45 }
  0xf9   : >> { %v1433_v9 = vshrl.u32 %v7993_v62, 16  ;;  %v1435_v10 = vshll.u32 %v7993_v62, 16  ;;  %v1442_v24 = vrot.slane %v1440_v41, 1  ;;  %1040 = vst [vmem:[#allocation3 + $0xa8] sm:$0xf] %v1039_v57  ;;  %v1043_v42 = vsel %vm7551_vm3, %v861_v12, %v1042_v44 }
  0xfa   : >> { %1041 = vst.msk [vmem:[#allocation3 + $0xac] sm:$0xf] %vm205_vm0, %v860_v7  ;;  %1044 = vst [vmem:[#allocation3 + $0xb0] sm:$0x1] %v1043_v42  ;;  %v863_v54 = vshrl.u32 %v6807_v58, 16  ;;  %v866_v38 = vshll.u32 %v6807_v58, 16 }
  0xfb   : >> { %v1437_v19 = vrot.slane %v1435_v10, 1  ;;  %v874_v10 = vshll.u32 %v6808_v61, 16  ;;  %v1586_v41 = vrot.slane %v6453_v37, 1  ;;  %vm461_vm9 = vcmp.gt.f32.partialorder %v429_v47, 0.0 }
  0xfc   : >> { %v865_v16 = vrot.slane %v863_v54, 7  ;;  %v492_v17 = vmul.f32 0.2, %v428_v4  ;;  %v493_v25 = vmul.f32 0.2, %v429_v47 }
  0xfd   : >> { %v1438_v35 = vor.u32 %v1437_v19, %v1433_v9  ;;  %v871_v9 = vshrl.u32 %v6808_v61, 16  ;;  %v1045_v19 = vld [vmem:[#allocation3 + $0xb4] sm:$0xf] }
  0xfe   : >> { %v868_v26 = vor.u32 %v866_v38, %v865_v16  ;;  %v869_v28 = vrot.slane %v865_v16, 4  ;;  %v524_v36 = vsel %vm460_vm8, %v428_v4, %v492_v17  ;;  %v525_v29 = vsel %vm461_vm9, %v429_v47, %v493_v25  ;;  %v1056_v17 = vld [vmem:[#allocation3 + $0xc8] sm:$0x1] }
  0xff   : >> { %v1443_v55 = vsel %vm1275_vm7, %v1438_v35, %v1442_v24  ;;  %v873_v32 = vrot.slane %v871_v9, 7  ;;  %v1049_v24 = vld [vmem:[#allocation3 + $0xbc] sm:$0x1]  ;;  %v1588_v35 = vsel %vm1582_vm11, %v1586_v41, %v1587_v13  ;;  %v6809_v51 = vpack.c.bf16 %v524_v36, %v524_v36  ;;  %v1052_v41 = vld [vmem:[#allocation3 + $0xc0] sm:$0xf] }
 0x100   : >> { %1518 = vrot.lane.b32.xlu1 %v1443_v55, %s7358_s8  ;;  %v1087_v37 = vld [vmem:[#allocation3 + $0xa8] sm:$0xf]  ;;  %v1046_v45 = vsel %vm7714_vm15, %v868_v26, %v1045_v19  ;;  %v6810_v57 = vpack.c.bf16 %v525_v29, %v525_v29 }
 0x101   : >> { %v876_v30 = vor.u32 %v874_v10, %v873_v32  ;;  %v878_v31 = vrot.slane %v873_v32, 4  ;;  %v8023_v55 = vld [vmem:[#allocation3 + $0xac] sm:$0xf]  ;;  %1047 = vst [vmem:[#allocation3 + $0xb4] sm:$0xf] %v1046_v45  ;;  %v880_v4 = vshrl.u32 %v6809_v51, 16 }
 0x102   : >> { %v8027_v58 = vcombine.low %v1087_v37, %v8023_v55  ;;  %v8029_v61 = vld [vmem:[#allocation3 + $0xb0] ss:$0 sps:$4 sm:$0x11]   ;;  %v883_v7 = vshll.u32 %v6809_v51, 16  ;;  %v888_v42 = vshrl.u32 %v6810_v57, 16  ;;  %v891_v47 = vshll.u32 %v6810_v57, 16 }
 0x103   : >> { %v1493_v39 = vpop.permute.xlu0 %1492  ;;  %v877_v44 = vsel %vm7720_vm1, %v869_v28, %v876_v30  ;;  %v1050_v12 = vsel %vm7551_vm3, %v878_v31, %v1049_v24  ;;  %v1452_v38 = vshll.u32 %v8029_v61, 16  ;;  %v882_v9 = vrot.slane %v880_v4, 7  ;;  %v1093_v57 = vld [vmem:[#allocation3 + $0xcc] sm:$0xf]  ;;  %v8054_v4 = vld [vmem:[#allocation3 + $0xd0] sm:$0xf] }
 0x104   : >> { %v1638_v52 = vsel %vm359_vm5, %v7706_v46, %v1493_v39  ;;  %1048 = vst.msk [vmem:[#allocation3 + $0xb8] sm:$0xf] %vm205_vm0, %v877_v44  ;;  %1051 = vst [vmem:[#allocation3 + $0xbc] sm:$0x1] %v1050_v12  ;;  %v1445_v46 = vshrl.u32 %v8027_v58, 16  ;;  %v1447_v54 = vshll.u32 %v8027_v58, 16 }
 0x105   : >> { %1922 = vmatmul.mubr.bf16.vlgmr.msra.gmra.mrb[0].mxu0 %v1638_v52  ;;  %v890_v10 = vrot.slane %v888_v42, 7  ;;  %v1454_v13 = vrot.slane %v1452_v38, 1  ;;  %v885_v16 = vor.u32 %v883_v7, %v882_v9  ;;  %v886_v32 = vrot.slane %v882_v9, 4  ;;  %v1115_v12 = vld [vmem:[#allocation3 + $0x18] sm:$0xe] }
 0x106   : >> { %6495 = vmatprep.mubr.msk.bf16.mxu0 %vm359_vm5, %v1588_v35  ;;  %v1449_v11 = vrot.slane %v1447_v54, 1  ;;  %v8057_v7 = vcombine.low %v1093_v57, %v8054_v4  ;;  %v8059_v42 = vld [vmem:[#allocation3 + $0xd4] ss:$0 sps:$4 sm:$0x11]  }
 0x107   : >> { %v893_v19 = vor.u32 %v891_v47, %v890_v10  ;;  %v895_v24 = vrot.slane %v890_v10, 4  ;;  %v1053_v30 = vsel %vm7714_vm15, %v885_v16, %v1052_v41  ;;  %v7203_v47 = vld [vmem:[#allocation3 + $0x1c] sm:$0xf] }
 0x108   : >> { %v1450_v25 = vor.u32 %v1449_v11, %v1445_v46  ;;  %v1089_v26 = vld [vmem:[#allocation3 + $0xb4] sm:$0xf]  ;;  %1054 = vst [vmem:[#allocation3 + $0xc0] sm:$0xf] %v1053_v30  ;;  %v6454_v46 = vcombine.low %v1115_v12, %v7203_v47  ;;  %v1483_v9 = vshll.u32 %v8057_v7, 16  ;;  %v1481_v11 = vshrl.u32 %v8057_v7, 16 }
 0x109   : >> { %v894_v36 = vsel %vm7720_vm1, %v886_v32, %v893_v19  ;;  %v1057_v29 = vsel %vm7551_vm3, %v895_v24, %v1056_v17  ;;  %v7204_v24 = vld [vmem:[#allocation3 + $0x20] ss:$0 sps:$4 sm:$0x11]   ;;  %v1116_v30 = vld [vmem:[#allocation3 + $0x24] sm:$0xe] }
 0x10a   : >> { %v1455_v39 = vsel %vm1275_vm7, %v1450_v25, %v1454_v13  ;;  %1055 = vst.msk [vmem:[#allocation3 + $0xc4] sm:$0xf] %vm205_vm0, %v894_v36  ;;  %1058 = vst [vmem:[#allocation3 + $0xc8] sm:$0x1] %v1057_v29  ;;  %v1488_v13 = vshll.u32 %v8059_v42, 16  ;;  %v1485_v17 = vrot.slane %v1483_v9, 1 }
 0x10b   : >> { %v8035_v28 = vld [vmem:[#allocation3 + $0xb8] sm:$0xf]  ;;  %v8042_v35 = vld [vmem:[#allocation3 + $0xbc] ss:$0 sps:$4 sm:$0x11]   ;;  %1520 = vrot.lane.b32.xlu0 %v1455_v39, %s7358_s8  ;;  %v1589_v19 = vrot.slane %v6454_v46, 1 }
 0x10c   : >> { %v8040_v31 = vcombine.low %v1089_v26, %v8035_v28  ;;  %v1464_v45 = vshll.u32 %v8042_v35, 16  ;;  %v1590_v25 = vrot.slane %v7204_v24, 1  ;;  %v1490_v26 = vrot.slane %v1488_v13, 1  ;;  %v7207_v24 = vld [vmem:[#allocation3 + $0x34] sm:$0xf] }
 0x10e   : >> { %v1457_v37 = vshrl.u32 %v8040_v31, 16  ;;  %v1459_v44 = vshll.u32 %v8040_v31, 16  ;;  %v1466_v52 = vrot.slane %v1464_v45, 1 }
 0x10f   : >> { %v1091_v38 = vld [vmem:[#allocation3 + $0xc0] sm:$0xf] }
 0x110   : >> { %v1461_v51 = vrot.slane %v1459_v44, 1 }
 0x111   : >> { %v8063_v41 = vld [vmem:[#allocation3 + $0xc4] sm:$0xf]  ;;  %v8071_v32 = vld [vmem:[#allocation3 + $0xc8] ss:$0 sps:$4 sm:$0x11]  }
 0x112   : >> { %v1462_v54 = vor.u32 %v1461_v51, %v1457_v37  ;;  %v8069_v16 = vcombine.low %v1091_v38, %v8063_v41  ;;  %v1476_v39 = vshll.u32 %v8071_v32, 16  ;;  %v1486_v37 = vor.u32 %v1485_v17, %v1481_v11  ;;  %v7206_v11 = vld [vmem:[#allocation3 + $0x2c] ss:$0 sps:$4 sm:$0x11]   ;;  %v1117_v17 = vld [vmem:[#allocation3 + $0x30] sm:$0xe] }
 0x113   : >> { %v1591_v51 = vsel %vm1582_vm11, %v1589_v19, %v1590_v25  ;;  %v1593_v13 = vrot.slane %v7206_v11, 1  ;;  %v6456_v25 = vcombine.low %v1117_v17, %v7207_v24  ;;  %v7212_v11 = vld [vmem:[#allocation3 + $0x50] ss:$0 sps:$4 sm:$0x11]   ;;  %v1120_v17 = vld [vmem:[#allocation3 + $0x54] sm:$0xe] }
 0x114   : >> { %v1467_v10 = vsel %vm1275_vm7, %v1462_v54, %v1466_v52  ;;  %v1469_v36 = vshrl.u32 %v8069_v16, 16  ;;  %v1471_v29 = vshll.u32 %v8069_v16, 16  ;;  %v1478_v45 = vrot.slane %v1476_v39, 1  ;;  %v7205_v52 = vld [vmem:[#allocation3 + $0x28] sm:$0xf] }
 0x115   : >> { %1522 = vrot.lane.b32.xlu1 %v1467_v10, %s7358_s8  ;;  %v6455_v57 = vcombine.low %v1116_v30, %v7205_v52  ;;  %v1491_v47 = vsel %vm1275_vm7, %v1486_v37, %v1490_v26  ;;  %v1595_v30 = vrot.slane %v6456_v25, 1  ;;  %v1118_v39 = vld [vmem:[#allocation3 + $0x3c] sm:$0xe]  ;;  %v7210_v52 = vld [vmem:[#allocation3 + $0x44] ss:$0 sps:$4 sm:$0x11]   ;;  %v6459_v24 = vcombine.low %v1120_v17, %v7845_v60 }
 0x116   : >> { %v1473_v44 = vrot.slane %v1471_v29, 1  ;;  %v1127_v17 = vld [vmem:[#allocation3 + $0xa8] sm:$0xe] }
 0x117   : >> { %v1592_v10 = vrot.slane %v6455_v57, 1  ;;  %v1599_v57 = vrot.slane %v7210_v52, 1  ;;  %v1604_v25 = vrot.slane %v6459_v24, 1  ;;  %v1124_v52 = vld [vmem:[#allocation3 + $0x84] sm:$0xe]  ;;  %v6466_v24 = vcombine.low %v1127_v17, %v8023_v55 }
 0x118   : >> { %v1474_v54 = vor.u32 %v1473_v44, %v1469_v36  ;;  %v7208_v36 = vld [vmem:[#allocation3 + $0x38] ss:$0 sps:$4 sm:$0x11]   ;;  %v1629_v55 = vrot.slane %v8042_v35, 1 }
 0x119   : >> { %1526 = vrot.lane.b32.xlu1 %v1491_v47, %s7358_s8  ;;  %v1596_v29 = vrot.slane %v7208_v36, 1  ;;  %v1119_v47 = vld [vmem:[#allocation3 + $0x48] sm:$0xe]  ;;  %v1123_v36 = vld [vmem:[#allocation3 + $0x78] sm:$0xe] }
 0x11a   : >> { %v1495_v12 = vpop.permute.xlu0 %1494  ;;  %v1479_v38 = vsel %vm1275_vm7, %v1474_v54, %v1478_v45  ;;  %v7209_v45 = vld [vmem:[#allocation3 + $0x40] sm:$0xf] }
 0x11b   : >> { %v1641_v46 = vsel %vm359_vm5, %v7741_v15, %v1495_v12  ;;  %1524 = vrot.lane.b32.xlu0 %v1479_v38, %s7358_s8  ;;  %v1594_v15 = vsel %vm1582_vm11, %v1592_v10, %v1593_v13  ;;  %v1597_v44 = vsel %vm1582_vm11, %v1595_v30, %v1596_v29  ;;  %v6457_v12 = vcombine.low %v1118_v39, %v7209_v45  ;;  %v7211_v38 = vld [vmem:[#allocation3 + $0x4c] sm:$0xf]  ;;  %v1121_v30 = vld [vmem:[#allocation3 + $0x60] sm:$0xe] }
 0x11c   : >> { %1930 = vmatmul.mubr.bf16.gmra.mrb[4].mxu0 %v1641_v46  ;;  %v1602_v13 = vrot.slane %v7212_v11, 1  ;;  %v1608_v45 = vrot.slane %v7905_v6, 1  ;;  %v6463_v6 = vcombine.low %v1124_v52, %v7953_v43 }
 0x11d   : >> { %6496 = vmatprep.mubr.msk.bf16.mxu0 %vm359_vm5, %v1591_v51  ;;  %v1497_v9 = vpop.permute.xlu1 %1496  ;;  %v1598_v51 = vrot.slane %v6457_v12, 1 }
 0x11e   : >> { %v1644_v19 = vsel %vm359_vm5, %v7752_v33, %v1497_v9  ;;  %v6458_v9 = vcombine.low %v1119_v47, %v7211_v38  ;;  %v1617_v47 = vrot.slane %v7960_v50, 1 }
 0x11f   : >> { %v1600_v54 = vsel %vm1582_vm11, %v1598_v51, %v1599_v57  ;;  %v1616_v57 = vrot.slane %v6463_v6, 1 }
 0x120   : >> { %v1601_v10 = vrot.slane %v6458_v9, 1 }
 0x124   : >> { %1938 = vmatmul.mubr.bf16.gmra.mrb[8].mxu0 %v1644_v19  ;;  %v1499_v26 = vpop.permute.xlu1 %1498 }
 0x125   : >> { %6497 = vmatprep.mubr.msk.bf16.mxu0 %vm359_vm5, %v1594_v15  ;;  %v1647_v37 = vsel %vm359_vm5, %v7765_v14, %v1499_v26  ;;  %v1603_v15 = vsel %vm1582_vm11, %v1601_v10, %v1602_v13  ;;  %v1605_v26 = vrot.slane %v7854_v2, 1  ;;  %v1614_v2 = vrot.slane %v7937_v56, 1 }
 0x127   : >> { %v1606_v39 = vsel %vm1582_vm11, %v1604_v25, %v1605_v26 }
 0x12b   : >> { %v1501_v33 = vpop.permute.xlu0 %1500 }
 0x12c   : >> { %1948 = vmatmul.mubr.bf16.gmra.mrb[12].mxu0 %v1647_v37  ;;  %v1650_v46 = vsel %vm359_vm5, %v7784_v48, %v1501_v33  ;;  %v6462_v37 = vcombine.low %v1123_v36, %v7927_v53  ;;  %v1129_v36 = vld [vmem:[#allocation3 + $0xc0] sm:$0xe] }
 0x12d   : >> { %6498 = vmatprep.mubr.msk.bf16.mxu0 %vm359_vm5, %v1597_v44 }
 0x12e   : >> { %v1613_v12 = vrot.slane %v6462_v37, 1  ;;  %v1632_v37 = vrot.slane %v8071_v32, 1 }
 0x131   : >> { %v1503_v14 = vpop.permute.xlu1 %1502 }
 0x132   : >> { %v1653_v19 = vsel %vm359_vm5, %v7794_v8, %v1503_v14  ;;  %v6460_v8 = vcombine.low %v1121_v30, %v7898_v34  ;;  %v1615_v34 = vsel %vm1582_vm11, %v1613_v12, %v1614_v2  ;;  %v1620_v14 = vrot.slane %v7979_v27, 1 }
 0x133   : >> { %v1635_v12 = vrot.slane %v8059_v42, 1 }
 0x134   : >> { %1958 = vmatmul.mubr.bf16.gmra.mrb[16].mxu0 %v1650_v46  ;;  %v1607_v44 = vrot.slane %v6460_v8, 1  ;;  %v1125_v46 = vld [vmem:[#allocation3 + $0x90] sm:$0xe] }
 0x135   : >> { %6499 = vmatprep.mubr.msk.bf16.mxu0 %vm359_vm5, %v1600_v54  ;;  %v6464_v38 = vcombine.low %v1125_v46, %v7970_v21 }
 0x136   : >> { %v1609_v51 = vsel %vm1582_vm11, %v1607_v44, %v1608_v45 }
 0x137   : >> { %v1619_v43 = vrot.slane %v6464_v38, 1 }
 0x139   : >> { %v1621_v50 = vsel %vm1582_vm11, %v1619_v43, %v1620_v14  ;;  %v7050_v43 = vld [vmem:[#allocation7 + $0xd0] ss:$8 sps:$4 sm:$0xff]  }
 0x13c   : >> { %1968 = vmatmul.mubr.bf16.gmra.mrb[20].mxu0 %v1653_v19 }
 0x13d   : >> { %6500 = vmatprep.mubr.msk.bf16.mxu0 %vm359_vm5, %v1603_v15 }
 0x13e   : >> { %v1505_v48 = vpop.permute.xlu0 %1504 }
 0x13f   : >> { %v1656_v29 = vsel %vm359_vm5, %v7831_v18, %v1505_v48 }
 0x144   : >> { %1978 = vmatmul.mubr.bf16.gmra.mrb[24].mxu0 %v1656_v29 }
 0x145   : >> { %v1507_v60 = vpop.permute.xlu1 %1506  ;;  %6501 = vmatprep.mubr.msk.bf16.mxu0 %vm359_vm5, %v1606_v39 }
 0x146   : >> { %v1659_v33 = vsel %vm359_vm5, %v7852_v0, %v1507_v60 }
 0x14c   : >> { %1988 = vmatmul.mubr.bf16.gmra.mrb[28].mxu0 %v1659_v33 }
 0x14d   : >> { %v1511_v18 = vpop.permute.xlu1 %1510  ;;  %6502 = vmatprep.mubr.msk.bf16.mxu0 %vm359_vm5, %v1609_v51 }
 0x14e   : >> { %v1665_v53 = vsel %vm359_vm5, %v7882_v40, %v1511_v18  ;;  %v1618_v40 = vsel %vm1582_vm11, %v1616_v57, %v1617_v47  ;;  %v7049_v47 = vld [vmem:[#allocation7 + $0xc4] ss:$8 sps:$4 sm:$0xff]  }
 0x14f   : >> { %2008 = vmatmul.mubr.bf16.vlgmr.msra.gmra.mrb[0].mxu1 %v1665_v53  ;;  %3780 = vmatprep.subr.bf16.mxu1 %v7049_v47 }
 0x150   : >> { %6504 = vmatprep.mubr.msk.bf16.mxu1 %vm359_vm5, %v1615_v34 }
 0x152   : >> { %v1509_v56 = vpop.permute.xlu0 %1508 }
 0x153   : >> { %v1662_v0 = vsel %vm359_vm5, %v7903_v5, %v1509_v56  ;;  %v1126_v5 = vld [vmem:[#allocation3 + $0x9c] sm:$0xe] }
 0x154   : >> { %1998 = vmatmul.mubr.bf16.gmra.mrb[32].mxu0 %v1662_v0  ;;  %v6465_v11 = vcombine.low %v1126_v5, %v7988_v22  ;;  %v1625_v22 = vrot.slane %v6466_v24, 1  ;;  %v7055_v5 = vld [vmem:[#allocation7 + $0xe4] ss:$8 sps:$4 sm:$0xff]  }
 0x155   : >> { %v7063_v24 = vld [vmem:[#allocation7 + $0x104] ss:$8 sps:$4 sm:$0xff]  }
 0x156   : >> { %v1622_v21 = vrot.slane %v6465_v11, 1 }
 0x15a   : >> { %v1513_v54 = vpop.permute.xlu0 %1512 }
 0x15b   : >> { %v1668_v9 = vsel %vm359_vm5, %v7935_v59, %v1513_v54  ;;  %v1623_v59 = vrot.slane %v7995_v3, 1  ;;  %v7047_v54 = vld [vmem:[#allocation7 + $0xc0] ss:$8 sps:$4 sm:$0xff]  }
 0x15c   : >> { %2018 = vmatmul.mubr.bf16.gmra.mrb[4].mxu1 %v1668_v9  ;;  %v7052_v9 = vld [vmem:[#allocation7 + $0xd4] ss:$8 sps:$4 sm:$0xff]  }
 0x15d   : >> { %6505 = vmatprep.mubr.msk.bf16.mxu1 %vm359_vm5, %v1618_v40  ;;  %v1624_v15 = vsel %vm1582_vm11, %v1622_v21, %v1623_v59  ;;  %3781 = vmatpush1.bf16.msra.mxu1 %v7047_v54  ;;  %v7058_v21 = vld [vmem:[#allocation7 + $0xf4] ss:$8 sps:$4 sm:$0xff]   ;;  %v7056_v59 = vld [vmem:[#allocation7 + $0xf0] ss:$8 sps:$4 sm:$0xff]  }
 0x15e   : >> { %3782 = vmatprep.subr.bf16.mxu1 %v7052_v9 }
 0x161   : >> { %3783 = vmatpush1.bf16.msra.mxu1 %v7050_v43 }
 0x162   : >> { %v1515_v10 = vpop.permute.xlu1 %1514  ;;  %3784 = vmatprep.subr.bf16.mxu1 %v7055_v5 }
 0x163   : >> { %v1671_v13 = vsel %vm359_vm5, %v7958_v49, %v1515_v10  ;;  %v1626_v49 = vrot.slane %v8029_v61, 1  ;;  %v6468_v61 = vcombine.low %v1129_v36, %v8063_v41 }
 0x164   : >> { %2028 = vmatmul.mubr.bf16.gmra.mrb[8].mxu1 %v1671_v13 }
 0x165   : >> { %6506 = vmatprep.mubr.msk.bf16.mxu1 %vm359_vm5, %v1621_v50  ;;  %v1627_v3 = vsel %vm1582_vm11, %v1625_v22, %v1626_v49  ;;  %v1631_v8 = vrot.slane %v6468_v61, 1  ;;  %v7053_v50 = vld [vmem:[#allocation7 + $0xe0] ss:$8 sps:$4 sm:$0xff]   ;;  %v7066_v49 = vld [vmem:[#allocation7 + $0x114] ss:$8 sps:$4 sm:$0xff]  }
 0x166   : >> { %3785 = vmatpush1.bf16.msra.mxu1 %v7053_v50  ;;  %v7061_v22 = vld [vmem:[#allocation7 + $0x100] ss:$8 sps:$4 sm:$0xff]  }
 0x167   : >> { %v1633_v35 = vsel %vm1582_vm11, %v1631_v8, %v1632_v37  ;;  %3786 = vmatprep.subr.bf16.mxu1 %v7058_v21  ;;  %v7074_v37 = vld [vmem:[#allocation7 + $0x134] ss:$8 sps:$4 sm:$0xff]  }
 0x169   : >> { %v1517_v19 = vpop.permute.xlu0 %1516 }
 0x16a   : >> { %v1674_v27 = vsel %vm359_vm5, %v7977_v63, %v1517_v19  ;;  %v1128_v63 = vld [vmem:[#allocation3 + $0xb4] sm:$0xe]  ;;  %3787 = vmatpush1.bf16.msra.mxu1 %v7056_v59 }
 0x16b   : >> { %v6467_v26 = vcombine.low %v1128_v63, %v8035_v28  ;;  %3788 = vmatprep.subr.bf16.mxu1 %v7063_v24 }
 0x16c   : >> { %2038 = vmatmul.mubr.bf16.gmra.mrb[12].mxu1 %v1674_v27 }
 0x16d   : >> { %6507 = vmatprep.mubr.msk.bf16.mxu1 %vm359_vm5, %v1624_v15  ;;  %v1628_v30 = vrot.slane %v6467_v26, 1 }
 0x16e   : >> { %3789 = vmatpush1.bf16.msra.mxu1 %v7061_v22 }
 0x16f   : >> { %v1630_v39 = vsel %vm1582_vm11, %v1628_v30, %v1629_v55  ;;  %3790 = vmatprep.subr.bf16.mxu1 %v7066_v49  ;;  %v7071_v30 = vld [vmem:[#allocation7 + $0x124] ss:$8 sps:$4 sm:$0xff]   ;;  %v7069_v55 = vld [vmem:[#allocation7 + $0x120] ss:$8 sps:$4 sm:$0xff]  }
 0x172   : >> { %v1519_v48 = vpop.permute.xlu1 %1518 }
 0x173   : >> { %v1677_v25 = vsel %vm359_vm5, %v7993_v62, %v1519_v48 }
 0x174   : >> { %2048 = vmatmul.mubr.bf16.gmra.mrb[16].mxu1 %v1677_v25  ;;  %v7064_v25 = vld [vmem:[#allocation7 + $0x110] ss:$8 sps:$4 sm:$0xff]  }
 0x175   : >> { %6508 = vmatprep.mubr.msk.bf16.mxu1 %vm359_vm5, %v1627_v3  ;;  %3791 = vmatpush1.bf16.msra.mxu1 %v7064_v25  ;;  %v7087_v25 = vld [vmem:[#allocation7 + $0x164] ss:$8 sps:$4 sm:$0xff]  }
 0x176   : >> { %3792 = vmatprep.subr.bf16.mxu1 %v7071_v30 }
 0x179   : >> { %3793 = vmatpush1.bf16.msra.mxu1 %v7069_v55 }
 0x17a   : >> { %3794 = vmatprep.subr.bf16.mxu1 %v7074_v37  ;;  %v7085_v37 = vld [vmem:[#allocation7 + $0x160] ss:$8 sps:$4 sm:$0xff]  }
 0x17d   : >> { %v1521_v29 = vpop.permute.xlu0 %1520 }
 0x17e   : >> { %v1680_v62 = vsel %vm359_vm5, %v8027_v58, %v1521_v29  ;;  %v1130_v58 = vld [vmem:[#allocation3 + $0xcc] sm:$0xe] }
 0x17f   : >> { %2058 = vmatmul.mubr.bf16.gmra.mrb[20].mxu1 %v1680_v62  ;;  %v6469_v45 = vcombine.low %v1130_v58, %v8054_v4  ;;  %v7079_v58 = vld [vmem:[#allocation7 + $0x144] ss:$8 sps:$4 sm:$0xff]  }
 0x180   : >> { %6509 = vmatprep.mubr.msk.bf16.mxu1 %vm359_vm5, %v1630_v39 }
 0x181   : >> { %v1634_v2 = vrot.slane %v6469_v45, 1 }
 0x183   : >> { %v1636_v33 = vsel %vm1582_vm11, %v1634_v2, %v1635_v12  ;;  %v7077_v12 = vld [vmem:[#allocation7 + $0x140] ss:$8 sps:$4 sm:$0xff]  }
 0x187   : >> { %v1523_v60 = vpop.permute.xlu1 %1522 }
 0x188   : >> { %v1683_v28 = vsel %vm359_vm5, %v8040_v31, %v1523_v60 }
 0x189   : >> { %2068 = vmatmul.mubr.bf16.gmra.mrb[24].mxu1 %v1683_v28 }
 0x18a   : >> { %6510 = vmatprep.mubr.msk.bf16.mxu1 %vm359_vm5, %v1633_v35  ;;  %v7072_v35 = vld [vmem:[#allocation7 + $0x130] ss:$8 sps:$4 sm:$0xff]  }
 0x18b   : >> { %v1527_v32 = vpop.permute.xlu1 %1526  ;;  %3795 = vmatpush1.bf16.msra.mxu1 %v7072_v35 }
 0x18c   : >> { %v1689_v31 = vsel %vm359_vm5, %v8057_v7, %v1527_v32  ;;  %3796 = vmatprep.subr.bf16.mxu1 %v7079_v58  ;;  %v7088_v58 = vld [vmem:[#allocation7 + $0x170] ss:$8 sps:$4 sm:$0xff]  }
 0x18d   : >> { %v1525_v44 = vpop.permute.xlu0 %1524 }
 0x18e   : >> { %v1686_v41 = vsel %vm359_vm5, %v8069_v16, %v1525_v44  ;;  %v2951_v44 = vld [vmem:[#allocation3] sm:$0xf] }
 0x18f   : >> { %3797 = vmatpush1.bf16.msra.mxu1 %v7077_v12 }
 0x191   : >> { %2078 = vmatmul.mubr.bf16.gmra.mrb[28].mxu1 %v1686_v41  ;;  %v2952_v41 = vld [vmem:[#allocation3 + $0x4] sm:$0xf] }
 0x192   : >> { %6511 = vmatprep.mubr.msk.bf16.mxu1 %vm359_vm5, %v1636_v33  ;;  %v8256_v45 = vcombine.low %v2951_v44, %v2952_v41  ;;  %v7090_v44 = vld [vmem:[#allocation7 + $0x174] ss:$8 sps:$4 sm:$0xff]  }
 0x194   : >> { %10115 = vst [vmem:[#allocation13_spill] sm:$0xff] %v8256_v45  ;;  %v3168_v43 = vshrl.u32 %v8256_v45, 16 }
 0x199   : >> { %2088 = vmatmul.mubr.bf16.gmra.mrb[32].mxu1 %v1689_v31  ;;  %v7045_v31 = vld [vmem:[#allocation3 + $0x8] ss:$0 sps:$4 sm:$0x11]  }
 0x19a   : >> { %v3175_v50 = vshll.u32 %v7045_v31, 16 }
 0x19c   : >> { %v3177_v24 = vrot.slane %v3175_v50, 1 }
 0x1d8   : >> { %v8164_v18 = vpop.f32.mrb[0].mxu0 }
 0x1d9   : >> { %v1925_v51 = vpop.f32.mrb[1].mxu0 }
 0x1da   : >> { %v8166_v16 = vpop.f32.mrb[2].mxu0  ;;  %v7082_v51 = vld [vmem:[#allocation7 + $0x154] ss:$8 sps:$4 sm:$0xff]  }
 0x1db   : >> { %v1928_v34 = vpop.f32.mrb[3].mxu0  ;;  %3798 = vmatprep.subr.bf16.mxu1 %v7082_v51 }
 0x1dc   : >> { %v3170_v34 = vshll.u32 %v8256_v45, 16 }
 0x1de   : >> { %v3172_v5 = vrot.slane %v3170_v34, 1  ;;  %v3005_v34 = vld [vmem:[#allocation3] sm:$0xe] }
 0x1e0   : >> { %v3173_v59 = vor.u32 %v3172_v5, %v3168_v43  ;;  %v6581_v43 = vcombine.low %v3005_v34, %v2952_v41 }
 0x1e2   : >> { %v3178_v55 = vsel %vm1275_vm7, %v3173_v59, %v3177_v24  ;;  %v3473_v50 = vrot.slane %v6581_v43, 1  ;;  %v3474_v59 = vrot.slane %v7045_v31, 1 }
 0x1e4   : >> { %v3475_v24 = vsel %vm1582_vm11, %v3473_v50, %v3474_v59 }
 0x1e5   : >> { %6623 = vmatprep.mubr.msk.bf16.mxu1 %vm359_vm5, %v3475_v24 }
 0x1ef   : >> { %v8168_v53 = vpop.f32.mrb[4].mxu0 }
 0x1f0   : >> { %2128 = vrot.lane.b32.xlu0 %v8168_v53, %s7358_s8  ;;  %v1933_v4 = vpop.f32.mrb[5].mxu0 }
 0x1f1   : >> { %v8172_v42 = vpop.f32.mrb[6].mxu0 }
 0x1f2   : >> { %2130 = vrot.lane.b32.xlu1 %v8172_v42, %s7358_s8  ;;  %v1936_v52 = vpop.f32.mrb[7].mxu0 }
 0x1f3   : >> { %v7080_v52 = vld [vmem:[#allocation7 + $0x150] ss:$8 sps:$4 sm:$0xff]  }
 0x1f4   : >> { %3799 = vmatpush1.bf16.msra.mxu1 %v7080_v52 }
 0x1f5   : >> { %3800 = vmatprep.subr.bf16.mxu1 %v7087_v25 }
 0x1f7   : >> { %v8176_v7 = vpop.f32.mrb[8].mxu0 }
 0x1f8   : >> { %2132 = vrot.lane.b32.xlu0 %v8176_v7, %s7358_s8  ;;  %v8180_v6 = vpop.f32.mrb[9].mxu0  ;;  %3801 = vmatpush1.bf16.msra.mxu1 %v7085_v37 }
 0x1f9   : >> { %v8182_v56 = vpop.f32.mrb[10].mxu0  ;;  %3802 = vmatprep.subr.bf16.mxu1 %v7090_v44 }
 0x1fa   : >> { %2134 = vrot.lane.b32.xlu1 %v8182_v56, %s7358_s8  ;;  %v8186_v0 = vpop.f32.mrb[11].mxu0 }
 0x1fc   : >> { %3803 = vmatpush1.bf16.msra.mxu1 %v7088_v58 }
 0x1ff   : >> { %v8188_v57 = vpop.f32.mrb[12].mxu0 }
 0x200   : >> { %2136 = vrot.lane.b32.xlu0 %v8188_v57, %s7358_s8  ;;  %v8192_v46 = vpop.f32.mrb[13].mxu0 }
 0x201   : >> { %v8194_v40 = vpop.f32.mrb[14].mxu0 }
 0x202   : >> { %2138 = vrot.lane.b32.xlu1 %v8194_v40, %s7358_s8  ;;  %v8198_v38 = vpop.f32.mrb[15].mxu0 }
 0x207   : >> { %v8200_v14 = vpop.f32.mrb[16].mxu0 }
 0x208   : >> { %2140 = vrot.lane.b32.xlu0 %v8200_v14, %s7358_s8  ;;  %v8204_v10 = vpop.f32.mrb[17].mxu0 }
 0x209   : >> { %v8206_v11 = vpop.f32.mrb[18].mxu0 }
 0x20a   : >> { %2142 = vrot.lane.b32.xlu1 %v8206_v11, %s7358_s8  ;;  %v8210_v13 = vpop.f32.mrb[19].mxu0 }
 0x20f   : >> { %v8212_v17 = vpop.f32.mrb[20].mxu0 }
 0x210   : >> { %2144 = vrot.lane.b32.xlu0 %v8212_v17, %s7358_s8  ;;  %v8216_v19 = vpop.f32.mrb[21].mxu0 }
 0x211   : >> { %v8218_v27 = vpop.f32.mrb[22].mxu0 }
 0x212   : >> { %2146 = vrot.lane.b32.xlu1 %v8218_v27, %s7358_s8  ;;  %v8222_v15 = vpop.f32.mrb[23].mxu0 }
 0x217   : >> { %v8224_v48 = vpop.f32.mrb[24].mxu0 }
 0x218   : >> { %2148 = vrot.lane.b32.xlu0 %v8224_v48, %s7358_s8  ;;  %v8228_v3 = vpop.f32.mrb[25].mxu0 }
 0x219   : >> { %v8230_v63 = vpop.f32.mrb[26].mxu0 }
 0x21a   : >> { %2150 = vrot.lane.b32.xlu1 %v8230_v63, %s7358_s8  ;;  %v8234_v26 = vpop.f32.mrb[27].mxu0 }
 0x21f   : >> { %v8236_v36 = vpop.f32.mrb[28].mxu0 }
 0x220   : >> { %2152 = vrot.lane.b32.xlu0 %v8236_v36, %s7358_s8  ;;  %v8242_v39 = vpop.f32.mrb[29].mxu0 }
 0x221   : >> { %v8246_v62 = vpop.f32.mrb[30].mxu0 }
 0x222   : >> { %v8238_v29 = vpop.f32.mrb[0].mxu1  ;;  %2154 = vrot.lane.b32.xlu1 %v8246_v62, %s7358_s8  ;;  %v8252_v60 = vpop.f32.mrb[31].mxu0 }
 0x223   : >> { %v8244_v61 = vpop.f32.mrb[1].mxu1 }
 0x224   : >> { %v8248_v8 = vpop.f32.mrb[2].mxu1 }
 0x225   : >> { %v8254_v28 = vpop.f32.mrb[3].mxu1 }
 0x227   : >> { %v8258_v32 = vpop.f32.mrb[32].mxu0 }
 0x228   : >> { %2156 = vrot.lane.b32.xlu0 %v8258_v32, %s7358_s8  ;;  %v8262_v2 = vpop.f32.mrb[33].mxu0 }
 0x229   : >> { %v8264_v33 = vpop.f32.mrb[34].mxu0 }
 0x22a   : >> { %2158 = vrot.lane.b32.xlu1 %v8264_v33, %s7358_s8  ;;  %v8269_v4 = vpop.f32.mrb[35].mxu0 }
 0x22c   : >> { %2160 = vrot.lane.b32.xlu0 %v8238_v29, %s7358_s8 }
 0x22e   : >> { %2162 = vrot.lane.b32.xlu1 %v8248_v8, %s7358_s8 }
 0x22f   : >> { %v8273_v47 = vpop.f32.mrb[4].mxu1 }
 0x230   : >> { %10116 = vst [vmem:[#allocation14_spill] sm:$0xff] %v8273_v47  ;;  %v8275_v54 = vpop.f32.mrb[5].mxu1  ;;  %2164 = vrot.lane.b32.xlu0 %v8273_v47, %s7358_s8 }
 0x231   : >> { %v8279_v9 = vpop.f32.mrb[6].mxu1 }
 0x232   : >> { %10117 = vst [vmem:[#allocation15_spill] sm:$0xff] %v8279_v9  ;;  %v8282_v21 = vpop.f32.mrb[7].mxu1  ;;  %2166 = vrot.lane.b32.xlu1 %v8279_v9, %s7358_s8 }
 0x237   : >> { %v8288_v22 = vpop.f32.mrb[8].mxu1 }
 0x238   : >> { %10118 = vst [vmem:[#allocation16_spill] sm:$0xff] %v8288_v22  ;;  %2168 = vrot.lane.b32.xlu0 %v8288_v22, %s7358_s8  ;;  %v8292_v49 = vpop.f32.mrb[9].mxu1 }
 0x239   : >> { %v8294_v30 = vpop.f32.mrb[10].mxu1 }
 0x23a   : >> { %10119 = vst [vmem:[#allocation17_spill] sm:$0xff] %v8294_v30  ;;  %2170 = vrot.lane.b32.xlu1 %v8294_v30, %s7358_s8  ;;  %v8299_v35 = vpop.f32.mrb[11].mxu1 }
 0x23b   : >> { %10120 = vst [vmem:[#allocation18_spill] sm:$0xff] %v8299_v35 }
 0x23c   : >> { %3383 = vrot.lane.b32.xlu0 %v3178_v55, %s7358_s8 }
 0x23f   : >> { %v8302_v12 = vpop.f32.mrb[12].mxu1 }
 0x240   : >> { %10121 = vst [vmem:[#allocation19_spill] sm:$0xff] %v8302_v12  ;;  %2172 = vrot.lane.b32.xlu1 %v8302_v12, %s7358_s8  ;;  %v8306_v51 = vpop.f32.mrb[13].mxu1  ;;  %v8346_v12 = vld [vmem:[%s10073_s2] ss:$0 sm:$0xff] }
 0x241   : >> { %10122 = vst [vmem:[#allocation20_spill] sm:$0xff] %v8306_v51  ;;  %v8308_v52 = vpop.f32.mrb[14].mxu1 }
 0x242   : >> { %10123 = vst [vmem:[#allocation21_spill] sm:$0xff] %v8308_v52  ;;  %2174 = vrot.lane.b32.xlu0 %v8308_v52, %s7358_s8  ;;  %v8312_v5 = vpop.f32.mrb[15].mxu1 }
 0x243   : >> { %10124 = vst [vmem:[#allocation22_spill] sm:$0xff] %v8312_v5 }
 0x247   : >> { %v8316_v25 = vpop.f32.mrb[16].mxu1 }
 0x248   : >> { %10125 = vst [vmem:[#allocation23_spill] sm:$0xff] %v8316_v25  ;;  %2176 = vrot.lane.b32.xlu0 %v8316_v25, %s7358_s8  ;;  %v8320_v55 = vpop.f32.mrb[17].mxu1 }
 0x249   : >> { %10126 = vst [vmem:[#allocation24_spill] sm:$0xff] %v8320_v55  ;;  %v8322_v37 = vpop.f32.mrb[18].mxu1 }
 0x24a   : >> { %v8324_v41 = vpop.f32.mrb[19].mxu1 }
 0x24b   : >> { %10127 = vst [vmem:[#allocation25_spill] sm:$0xff] %v8324_v41 }
 0x252   : >> { %v8326_v44 = vpop.f32.mrb[20].mxu1 }
 0x253   : >> { %v8328_v58 = vpop.f32.mrb[21].mxu1 }
 0x254   : >> { %10128 = vst [vmem:[#allocation26_spill] sm:$0xff] %v8328_v58  ;;  %v8330_v31 = vpop.f32.mrb[22].mxu1 }
 0x255   : >> { %v8332_v34 = vpop.f32.mrb[23].mxu1 }
 0x256   : >> { %10129 = vst [vmem:[#allocation27_spill] sm:$0xff] %v8332_v34 }
 0x25c   : >> { %v8334_v43 = vpop.f32.mrb[24].mxu1 }
 0x25d   : >> { %v8336_v50 = vpop.f32.mrb[25].mxu1 }
 0x25e   : >> { %10130 = vst [vmem:[#allocation28_spill] sm:$0xff] %v8336_v50  ;;  %v8338_v59 = vpop.f32.mrb[26].mxu1 }
 0x25f   : >> { %v8340_v24 = vpop.f32.mrb[27].mxu1 }
 0x260   : >> { %10131 = vst [vmem:[#allocation29_spill] sm:$0xff] %v8340_v24 }
 0x262   : >> { %v2129_v25 = vpop.permute.xlu0 %2128 }
 0x263   : >> { %v2224_v52 = vadd.f32 %v2129_v25, %v8164_v18 }
 0x264   : >> { %v2131_v58 = vpop.permute.xlu1 %2130  ;;  %v8350_v30 = vpop.f32.mrb[28].mxu1 }
 0x265   : >> { %v2256_v41 = vadd.f32 %v2224_v52, %v8180_v6  ;;  %v2225_v34 = vadd.f32 %v2131_v58, %v8166_v16  ;;  %v8352_v50 = vpop.f32.mrb[29].mxu1 }
 0x266   : >> { %10132 = vst [vmem:[#allocation30_spill] sm:$0xff] %v8352_v50  ;;  %v8356_v22 = vpop.f32.mrb[30].mxu1 }
 0x267   : >> { %v2295_v55 = vadd.f32 %v8346_v12, %v2256_v41  ;;  %v2257_v24 = vadd.f32 %v2225_v34, %v8186_v0  ;;  %10133 = vst [vmem:[#allocation31_spill] sm:$0xff] %v8356_v22  ;;  %v8358_v18 = vpop.f32.mrb[31].mxu1 }
 0x268   : >> { %10134 = vst [vmem:[#allocation32_spill] sm:$0xff] %v8358_v18 }
 0x269   : >> { %vm2327_vm10 = vcmp.gt.f32.partialorder %v2295_v55, 0.0  ;;  %v2359_v25 = vmul.f32 0.2, %v2295_v55  ;;  %v2296_v45 = vadd.f32 %v8346_v12, %v2257_v24 }
 0x26a   : >> { %v2133_v5 = vpop.permute.xlu0 %2132 }
 0x26b   : >> { %v2391_v6 = vsel %vm2327_vm10, %v2295_v55, %v2359_v25  ;;  %vm2328_vm12 = vcmp.gt.f32.partialorder %v2296_v45, 0.0  ;;  %v2360_v16 = vmul.f32 0.2, %v2296_v45  ;;  %v2226_v52 = vadd.f32 %v2133_v5, %v8168_v53  ;;  %v2839_v25 = vld [vmem:[#allocation3 + $0xc] sm:$0xf] }
 0x26c   : >> { %v6811_v58 = vpack.c.bf16 %v2391_v6, %v2391_v6  ;;  %v2135_v50 = vpop.permute.xlu1 %2134 }
 0x26d   : >> { %v2392_v51 = vsel %vm2328_vm12, %v2296_v45, %v2360_v16  ;;  %v2258_v41 = vadd.f32 %v2226_v52, %v8192_v46  ;;  %v2227_v0 = vadd.f32 %v2135_v50, %v8172_v42  ;;  %v2843_v42 = vld [vmem:[#allocation3 + $0x14] sm:$0x1] }
 0x26e   : >> { %v2520_v34 = vshrl.u32 %v6811_v58, 16  ;;  %v6812_v22 = vpack.c.bf16 %v2392_v51, %v2392_v51  ;;  %v2523_v47 = vshll.u32 %v6811_v58, 16 }
 0x26f   : >> { %v2297_v18 = vadd.f32 %v8346_v12, %v2258_v41  ;;  %v2259_v9 = vadd.f32 %v2227_v0, %v8198_v38 }
 0x270   : >> { %v2522_v24 = vrot.slane %v2520_v34, 7  ;;  %v2528_v55 = vshrl.u32 %v6812_v22, 16  ;;  %v2531_v46 = vshll.u32 %v6812_v22, 16 }
 0x271   : >> { %vm2329_vm13 = vcmp.gt.f32.partialorder %v2297_v18, 0.0  ;;  %v2361_v35 = vmul.f32 0.2, %v2297_v18  ;;  %v2298_v53 = vadd.f32 %v8346_v12, %v2259_v9 }
 0x272   : >> { %v2525_v5 = vor.u32 %v2523_v47, %v2522_v24  ;;  %v2526_v45 = vrot.slane %v2522_v24, 4  ;;  %v2530_v6 = vrot.slane %v2528_v55, 7  ;;  %v2137_v16 = vpop.permute.xlu0 %2136 }
 0x273   : >> { %v2393_v50 = vsel %vm2329_vm13, %v2297_v18, %v2361_v35  ;;  %vm2330_vm14 = vcmp.gt.f32.partialorder %v2298_v53, 0.0  ;;  %v2362_v51 = vmul.f32 0.2, %v2298_v53  ;;  %v2228_v52 = vadd.f32 %v2137_v16, %v8176_v7 }
 0x274   : >> { %v2840_v38 = vsel %vm7714_vm15, %v2525_v5, %v2839_v25  ;;  %v2533_v58 = vor.u32 %v2531_v46, %v2530_v6  ;;  %v2535_v41 = vrot.slane %v2530_v6, 4  ;;  %v6813_v0 = vpack.c.bf16 %v2393_v50, %v2393_v50  ;;  %v2139_v34 = vpop.permute.xlu1 %2138 }
 0x275   : >> { %2841 = vst [vmem:[#allocation3 + $0xc] sm:$0xf] %v2840_v38  ;;  %v2394_v9 = vsel %vm2330_vm14, %v2298_v53, %v2362_v51  ;;  %v2260_v47 = vadd.f32 %v2228_v52, %v8204_v10  ;;  %v2229_v22 = vadd.f32 %v2139_v34, %v8182_v56  ;;  %v2846_v10 = vld [vmem:[#allocation3 + $0x18] sm:$0xf] }
 0x276   : >> { %v2534_v35 = vsel %vm7720_vm1, %v2526_v45, %v2533_v58  ;;  %v2844_v18 = vsel %vm7551_vm3, %v2535_v41, %v2843_v42  ;;  %v2537_v7 = vshrl.u32 %v6813_v0, 16  ;;  %v6814_v24 = vpack.c.bf16 %v2394_v9, %v2394_v9 }
 0x277   : >> { %2842 = vst.msk [vmem:[#allocation3 + $0x10] sm:$0xf] %vm205_vm0, %v2534_v35  ;;  %2845 = vst [vmem:[#allocation3 + $0x14] sm:$0x1] %v2844_v18  ;;  %v2299_v55 = vadd.f32 %v8346_v12, %v2260_v47  ;;  %v2261_v25 = vadd.f32 %v2229_v22, %v8210_v13  ;;  %v2540_v5 = vshll.u32 %v6813_v0, 16 }
 0x278   : >> { %v2539_v53 = vrot.slane %v2537_v7, 7  ;;  %v2545_v6 = vshrl.u32 %v6814_v24, 16  ;;  %v2548_v45 = vshll.u32 %v6814_v24, 16  ;;  %v2850_v13 = vld [vmem:[#allocation3 + $0x20] sm:$0x1] }
 0x279   : >> { %vm2331_vm6 = vcmp.gt.f32.partialorder %v2299_v55, 0.0  ;;  %v2363_v56 = vmul.f32 0.2, %v2299_v55  ;;  %v2300_v16 = vadd.f32 %v8346_v12, %v2261_v25 }
 0x27a   : >> { %v2542_v46 = vor.u32 %v2540_v5, %v2539_v53  ;;  %v2141_v42 = vpop.permute.xlu0 %2140  ;;  %v2543_v50 = vrot.slane %v2539_v53, 4  ;;  %v2547_v51 = vrot.slane %v2545_v6, 7 }
 0x27b   : >> { %v2395_v52 = vsel %vm2331_vm6, %v2299_v55, %v2363_v56  ;;  %v2230_v38 = vadd.f32 %v2141_v42, %v8188_v57  ;;  %vm2332_vm8 = vcmp.gt.f32.partialorder %v2300_v16, 0.0  ;;  %v2364_v0 = vmul.f32 0.2, %v2300_v16 }
 0x27c   : >> { %v2847_v58 = vsel %vm7714_vm15, %v2542_v46, %v2846_v10  ;;  %v6815_v41 = vpack.c.bf16 %v2395_v52, %v2395_v52  ;;  %v2143_v34 = vpop.permute.xlu1 %2142  ;;  %v2550_v9 = vor.u32 %v2548_v45, %v2547_v51  ;;  %v2552_v47 = vrot.slane %v2547_v51, 4  ;;  %v2953_v10 = vld [vmem:[#allocation3 + $0xc] sm:$0xf] }
 0x27d   : >> { %2848 = vst [vmem:[#allocation3 + $0x18] sm:$0xf] %v2847_v58  ;;  %v2262_v22 = vadd.f32 %v2230_v38, %v8216_v19  ;;  %v2231_v35 = vadd.f32 %v2143_v34, %v8194_v40  ;;  %v2396_v24 = vsel %vm2332_vm8, %v2300_v16, %v2364_v0  ;;  %v8392_v6 = vld [vmem:[#allocation3 + $0xc] sm:$0xe]  ;;  %v2853_v40 = vld [vmem:[#allocation3 + $0x24] sm:$0xf] }
 0x27e   : >> { %v2554_v18 = vshrl.u32 %v6815_v41, 16  ;;  %v2557_v7 = vshll.u32 %v6815_v41, 16  ;;  %v8385_v55 = vld [vmem:[#allocation3 + $0x10] sm:$0xf]  ;;  %v2551_v57 = vsel %vm7720_vm1, %v2543_v50, %v2550_v9  ;;  %v2851_v25 = vsel %vm7551_vm3, %v2552_v47, %v2850_v13  ;;  %v2857_v41 = vld [vmem:[#allocation3 + $0x2c] sm:$0x1] }
 0x27f   : >> { %v6816_v53 = vpack.c.bf16 %v2396_v24, %v2396_v24  ;;  %v2301_v5 = vadd.f32 %v8346_v12, %v2262_v22  ;;  %2849 = vst.msk [vmem:[#allocation3 + $0x1c] sm:$0xf] %vm205_vm0, %v2551_v57  ;;  %2852 = vst [vmem:[#allocation3 + $0x20] sm:$0x1] %v2851_v25  ;;  %v2263_v56 = vadd.f32 %v2231_v35, %v8222_v15 }
 0x280   : >> { %v2556_v19 = vrot.slane %v2554_v18, 7  ;;  %v8397_v46 = vcombine.low %v2953_v10, %v8385_v55  ;;  %v6582_v45 = vcombine.low %v8392_v6, %v8385_v55  ;;  %v10143_v55 = vld [vmem:[#allocation24_spill] sm:$0xff] }
 0x281   : >> { %v2562_v16 = vshrl.u32 %v6816_v53, 16  ;;  %v2565_v42 = vshll.u32 %v6816_v53, 16  ;;  %vm2333_vm9 = vcmp.gt.f32.partialorder %v2301_v5, 0.0  ;;  %v2365_v50 = vmul.f32 0.2, %v2301_v5 }
 0x282   : >> { %v2559_v51 = vor.u32 %v2557_v7, %v2556_v19  ;;  %v2560_v52 = vrot.slane %v2556_v19, 4  ;;  %v2302_v38 = vadd.f32 %v8346_v12, %v2263_v56  ;;  %v2145_v58 = vpop.permute.xlu0 %2144  ;;  %v3180_v13 = vshrl.u32 %v8397_v46, 16  ;;  %v8407_v7 = vld [vmem:[#allocation3 + $0x14] ss:$0 sps:$4 sm:$0x11]  }
 0x283   : >> { %v2564_v0 = vrot.slane %v2562_v16, 7  ;;  %v2397_v15 = vsel %vm2333_vm9, %v2301_v5, %v2365_v50  ;;  %v2232_v34 = vadd.f32 %v2145_v58, %v8200_v14  ;;  %v3182_v9 = vshll.u32 %v8397_v46, 16 }
 0x284   : >> { %v2854_v47 = vsel %vm7714_vm15, %v2559_v51, %v2853_v40  ;;  %v6817_v22 = vpack.c.bf16 %v2397_v15, %v2397_v15  ;;  %vm2334_vm10 = vcmp.gt.f32.partialorder %v2302_v38, 0.0  ;;  %v2366_v35 = vmul.f32 0.2, %v2302_v38  ;;  %v2147_v18 = vpop.permute.xlu1 %2146 }
 0x285   : >> { %2855 = vst [vmem:[#allocation3 + $0x24] sm:$0xf] %v2854_v47  ;;  %v2567_v24 = vor.u32 %v2565_v42, %v2564_v0  ;;  %v2569_v57 = vrot.slane %v2564_v0, 4  ;;  %v2264_v25 = vadd.f32 %v2232_v34, %v8228_v3  ;;  %v2233_v53 = vadd.f32 %v2147_v18, %v8206_v11  ;;  %v2860_v42 = vld [vmem:[#allocation3 + $0x30] sm:$0xf] }
 0x286   : >> { %v2571_v5 = vshrl.u32 %v6817_v22, 16  ;;  %v2574_v14 = vshll.u32 %v6817_v22, 16  ;;  %v2398_v10 = vsel %vm2334_vm10, %v2302_v38, %v2366_v35  ;;  %v3184_v19 = vrot.slane %v3182_v9, 1  ;;  %v8419_v58 = vld [vmem:[#allocation3 + $0x1c] sm:$0xf] }
 0x287   : >> { %v2568_v40 = vsel %vm7720_vm1, %v2560_v52, %v2567_v24  ;;  %v2858_v56 = vsel %vm7551_vm3, %v2569_v57, %v2857_v41  ;;  %v6818_v16 = vpack.c.bf16 %v2398_v10, %v2398_v10  ;;  %v2303_v50 = vadd.f32 %v8346_v12, %v2264_v25  ;;  %v2955_v35 = vld [vmem:[#allocation3 + $0x18] sm:$0xf] }
 0x288   : >> { %2856 = vst.msk [vmem:[#allocation3 + $0x28] sm:$0xf] %vm205_vm0, %v2568_v40  ;;  %2859 = vst [vmem:[#allocation3 + $0x2c] sm:$0x1] %v2858_v56  ;;  %v2573_v3 = vrot.slane %v2571_v5, 7  ;;  %v2265_v11 = vadd.f32 %v2233_v53, %v8234_v26  ;;  %v3185_v51 = vor.u32 %v3184_v19, %v3180_v13  ;;  %v3187_v38 = vshll.u32 %v8407_v7, 16 }
 0x289   : >> { %v2579_v0 = vshrl.u32 %v6818_v16, 16  ;;  %v2582_v52 = vshll.u32 %v6818_v16, 16  ;;  %vm2335_vm12 = vcmp.gt.f32.partialorder %v2303_v50, 0.0  ;;  %v2367_v15 = vmul.f32 0.2, %v2303_v50 }
 0x28a   : >> { %v2576_v41 = vor.u32 %v2574_v14, %v2573_v3  ;;  %v2577_v34 = vrot.slane %v2573_v3, 4  ;;  %v2304_v9 = vadd.f32 %v8346_v12, %v2265_v11  ;;  %v3189_v47 = vrot.slane %v3187_v38, 1  ;;  %v2149_v22 = vpop.permute.xlu0 %2148  ;;  %v2864_v25 = vld [vmem:[#allocation3 + $0x38] sm:$0x1] }
 0x28b   : >> { %v2581_v18 = vrot.slane %v2579_v0, 7  ;;  %v2399_v24 = vsel %vm2335_vm12, %v2303_v50, %v2367_v15  ;;  %v2234_v26 = vadd.f32 %v2149_v22, %v8212_v17  ;;  %v8424_v13 = vcombine.low %v2955_v35, %v8419_v58 }
 0x28c   : >> { %v2861_v57 = vsel %vm7714_vm15, %v2576_v41, %v2860_v42  ;;  %v6819_v53 = vpack.c.bf16 %v2399_v24, %v2399_v24  ;;  %vm2336_vm13 = vcmp.gt.f32.partialorder %v2304_v9, 0.0  ;;  %v2368_v5 = vmul.f32 0.2, %v2304_v9  ;;  %v2151_v14 = vpop.permute.xlu1 %2150 }
 0x28d   : >> { %2862 = vst [vmem:[#allocation3 + $0x30] sm:$0xf] %v2861_v57  ;;  %v2584_v10 = vor.u32 %v2582_v52, %v2581_v18  ;;  %v2586_v19 = vrot.slane %v2581_v18, 4  ;;  %v3190_v40 = vsel %vm1275_vm7, %v3185_v51, %v3189_v47  ;;  %v2266_v56 = vadd.f32 %v2234_v26, %v8242_v39  ;;  %v8437_v52 = vld [vmem:[#allocation3 + $0x20] ss:$0 sps:$4 sm:$0x11]  }
 0x28e   : >> { %v2588_v16 = vshrl.u32 %v6819_v53, 16  ;;  %v2591_v17 = vshll.u32 %v6819_v53, 16  ;;  %v2400_v50 = vsel %vm2336_vm13, %v2304_v9, %v2368_v5  ;;  %3385 = vrot.lane.b32.xlu1 %v3190_v40, %s7358_s8  ;;  %v2235_v3 = vadd.f32 %v2151_v14, %v8218_v27  ;;  %v2867_v39 = vld [vmem:[#allocation3 + $0x3c] sm:$0xf]  ;;  %v2871_v57 = vld [vmem:[#allocation3 + $0x44] sm:$0x1] }
 0x28f   : >> { %v2585_v42 = vsel %vm7720_vm1, %v2577_v34, %v2584_v10  ;;  %v2865_v11 = vsel %vm7551_vm3, %v2586_v19, %v2864_v25  ;;  %v6820_v38 = vpack.c.bf16 %v2400_v50, %v2400_v50  ;;  %v2305_v0 = vadd.f32 %v8346_v12, %v2266_v56  ;;  %v8450_v40 = vld [vmem:[#allocation3 + $0x28] sm:$0xf] }
 0x290   : >> { %2863 = vst.msk [vmem:[#allocation3 + $0x34] sm:$0xf] %vm205_vm0, %v2585_v42  ;;  %2866 = vst [vmem:[#allocation3 + $0x38] sm:$0x1] %v2865_v11  ;;  %v2590_v51 = vrot.slane %v2588_v16, 7  ;;  %v2267_v15 = vadd.f32 %v2235_v3, %v8252_v60  ;;  %v3192_v27 = vshrl.u32 %v8424_v13, 16 }
 0x291   : >> { %v3194_v41 = vshll.u32 %v8424_v13, 16  ;;  %v2596_v34 = vshrl.u32 %v6820_v38, 16  ;;  %v2599_v9 = vshll.u32 %v6820_v38, 16  ;;  %vm2337_vm14 = vcmp.gt.f32.partialorder %v2305_v0, 0.0 }
 0x292   : >> { %v2369_v47 = vmul.f32 0.2, %v2305_v0  ;;  %v2593_v22 = vor.u32 %v2591_v17, %v2590_v51  ;;  %v2594_v35 = vrot.slane %v2590_v51, 4  ;;  %v2306_v18 = vadd.f32 %v8346_v12, %v2267_v15  ;;  %2178 = vrot.lane.b32.xlu1 %v8322_v37, %s7358_s8  ;;  %v2153_v26 = vpop.permute.xlu0 %2152  ;;  %v8452_v42 = vld [vmem:[#allocation3 + $0x2c] ss:$0 sps:$4 sm:$0x11]  }
 0x293   : >> { %v3196_v24 = vrot.slane %v3194_v41, 1  ;;  %v2598_v25 = vrot.slane %v2596_v34, 7  ;;  %v3199_v53 = vshll.u32 %v8437_v52, 16  ;;  %v2236_v5 = vadd.f32 %v2153_v26, %v8224_v48  ;;  %v2957_v41 = vld [vmem:[#allocation3 + $0x24] sm:$0xf] }
 0x294   : >> { %v2401_v60 = vsel %vm2337_vm14, %v2305_v0, %v2369_v47  ;;  %v2868_v14 = vsel %vm7714_vm15, %v2593_v22, %v2867_v39  ;;  %vm2338_vm6 = vcmp.gt.f32.partialorder %v2306_v18, 0.0  ;;  %v2370_v19 = vmul.f32 0.2, %v2306_v18  ;;  %v2155_v3 = vpop.permute.xlu1 %2154 }
 0x295   : >> { %v6821_v10 = vpack.c.bf16 %v2401_v60, %v2401_v60  ;;  %2869 = vst [vmem:[#allocation3 + $0x3c] sm:$0xf] %v2868_v14  ;;  %v2601_v56 = vor.u32 %v2599_v9, %v2598_v25  ;;  %v2603_v16 = vrot.slane %v2598_v25, 4  ;;  %v3197_v17 = vor.u32 %v3196_v24, %v3192_v27  ;;  %v2874_v24 = vld [vmem:[#allocation3 + $0x48] sm:$0xf] }
 0x296   : >> { %v3201_v50 = vrot.slane %v3199_v53, 1  ;;  %v2402_v0 = vsel %vm2338_vm6, %v2306_v18, %v2370_v19  ;;  %2180 = vrot.lane.b32.xlu1 %v8326_v44, %s7358_s8  ;;  %v2268_v48 = vadd.f32 %v2236_v5, %v8262_v2  ;;  %v2237_v47 = vadd.f32 %v2155_v3, %v8230_v63  ;;  %v2089_v18 = vpop.f32.mrb[32].mxu1 }
 0x297   : >> { %v2605_v11 = vshrl.u32 %v6821_v10, 16  ;;  %v2608_v38 = vshll.u32 %v6821_v10, 16  ;;  %v2602_v39 = vsel %vm7720_vm1, %v2594_v35, %v2601_v56  ;;  %v2872_v51 = vsel %vm7551_vm3, %v2603_v16, %v2871_v57  ;;  %v8462_v34 = vld [vmem:[#allocation3 + $0x34] sm:$0xf]  ;;  %v2959_v35 = vld [vmem:[#allocation3 + $0x30] sm:$0xf] }
 0x298   : >> { %v6822_v15 = vpack.c.bf16 %v2402_v0, %v2402_v0  ;;  %v3202_v27 = vsel %vm1275_vm7, %v3197_v17, %v3201_v50  ;;  %2870 = vst.msk [vmem:[#allocation3 + $0x40] sm:$0xf] %vm205_vm0, %v2602_v39  ;;  %2873 = vst [vmem:[#allocation3 + $0x44] sm:$0x1] %v2872_v51  ;;  %v2307_v2 = vadd.f32 %v8346_v12, %v2268_v48  ;;  %v3211_v25 = vshll.u32 %v8452_v42, 16 }
 0x299   : >> { %v2607_v9 = vrot.slane %v2605_v11, 7  ;;  %3387 = vrot.lane.b32.xlu0 %v3202_v27, %s7358_s8  ;;  %v8469_v22 = vcombine.low %v2957_v41, %v8450_v40  ;;  %v8473_v60 = vcombine.low %v2959_v35, %v8462_v34  ;;  %v2269_v63 = vadd.f32 %v2237_v47, %v8269_v4  ;;  %v2878_v50 = vld [vmem:[#allocation3 + $0x50] sm:$0x1] }
 0x29a   : >> { %v2613_v26 = vshrl.u32 %v6822_v15, 16  ;;  %v2616_v57 = vshll.u32 %v6822_v15, 16  ;;  %vm2339_vm8 = vcmp.gt.f32.partialorder %v2307_v2, 0.0  ;;  %v2371_v14 = vmul.f32 0.2, %v2307_v2  ;;  %v2157_v10 = vpop.permute.xlu0 %2156 }
 0x29b   : >> { %v2610_v53 = vor.u32 %v2608_v38, %v2607_v9  ;;  %v2611_v5 = vrot.slane %v2607_v9, 4  ;;  %v3204_v56 = vshrl.u32 %v8469_v22, 16  ;;  %v3206_v16 = vshll.u32 %v8469_v22, 16 }
 0x29c   : >> { %v2615_v19 = vrot.slane %v2613_v26, 7  ;;  %v2403_v3 = vsel %vm2339_vm8, %v2307_v2, %v2371_v14  ;;  %v3213_v11 = vrot.slane %v3211_v25, 1  ;;  %v2238_v38 = vadd.f32 %v2157_v10, %v8236_v36  ;;  %v2159_v0 = vpop.permute.xlu1 %2158  ;;  %v2881_v14 = vld [vmem:[#allocation3 + $0x54] sm:$0xf] }
 0x29d   : >> { %v2875_v17 = vsel %vm7714_vm15, %v2610_v53, %v2874_v24  ;;  %2182 = vrot.lane.b32.xlu0 %v8330_v31, %s7358_s8  ;;  %v6823_v4 = vpack.c.bf16 %v2403_v3, %v2403_v3  ;;  %v2308_v51 = vadd.f32 %v8346_v12, %v2269_v63  ;;  %v3208_v15 = vrot.slane %v3206_v16, 1 }
 0x29e   : >> { %2876 = vst [vmem:[#allocation3 + $0x48] sm:$0xf] %v2875_v17  ;;  %v2618_v48 = vor.u32 %v2616_v57, %v2615_v19  ;;  %v2620_v39 = vrot.slane %v2615_v19, 4  ;;  %v2270_v27 = vadd.f32 %v2238_v38, %v8244_v61  ;;  %v2239_v41 = vadd.f32 %v2159_v0, %v8246_v62  ;;  %v2161_v9 = vpop.permute.xlu0 %2160 }
 0x29f   : >> { %v3216_v2 = vshrl.u32 %v8473_v60, 16  ;;  %v2622_v35 = vshrl.u32 %v6823_v4, 16  ;;  %v2625_v18 = vshll.u32 %v6823_v4, 16  ;;  %vm2340_vm9 = vcmp.gt.f32.partialorder %v2308_v51, 0.0 }
 0x2a0   : >> { %v2619_v47 = vsel %vm7720_vm1, %v2611_v5, %v2618_v48  ;;  %v2879_v36 = vsel %vm7551_vm3, %v2620_v39, %v2878_v50  ;;  %v2372_v24 = vmul.f32 0.2, %v2308_v51  ;;  %v3209_v61 = vor.u32 %v3208_v15, %v3204_v56  ;;  %v2163_v26 = vpop.permute.xlu1 %2162  ;;  %v8508_v15 = vld [vmem:[#allocation3 + $0x38] ss:$0 sps:$4 sm:$0x11]  }
 0x2a1   : >> { %2877 = vst.msk [vmem:[#allocation3 + $0x4c] sm:$0xf] %vm205_vm0, %v2619_v47  ;;  %2880 = vst [vmem:[#allocation3 + $0x50] sm:$0x1] %v2879_v36  ;;  %2184 = vrot.lane.b32.xlu0 %v8334_v43, %s7358_s8  ;;  %v2309_v62 = vadd.f32 %v8346_v12, %v2270_v27  ;;  %v2624_v57 = vrot.slane %v2622_v35, 7  ;;  %v2271_v25 = vadd.f32 %v2239_v41, %v8254_v28 }
 0x2a2   : >> { %v2240_v53 = vadd.f32 %v2161_v9, %v8258_v32  ;;  %v2241_v5 = vadd.f32 %v2163_v26, %v8264_v33  ;;  %v2404_v10 = vsel %vm2340_vm9, %v2308_v51, %v2372_v24  ;;  %v3214_v19 = vsel %vm1275_vm7, %v3209_v61, %v3213_v11  ;;  %v2165_v47 = vpop.permute.xlu0 %2164 }
 0x2a3   : >> { %vm2341_vm10 = vcmp.gt.f32.partialorder %v2309_v62, 0.0  ;;  %v2373_v63 = vmul.f32 0.2, %v2309_v62  ;;  %v2627_v16 = vor.u32 %v2625_v18, %v2624_v57  ;;  %v2628_v17 = vrot.slane %v2624_v57, 4  ;;  %3389 = vrot.lane.b32.xlu1 %v3214_v19, %s7358_s8  ;;  %v2888_v57 = vld [vmem:[#allocation3 + $0x60] sm:$0xf] }
 0x2a4   : >> { %v6824_v50 = vpack.c.bf16 %v2404_v10, %v2404_v10  ;;  %v2310_v56 = vadd.f32 %v8346_v12, %v2271_v25  ;;  %v2272_v28 = vadd.f32 %v2240_v53, %v8275_v54  ;;  %v2273_v32 = vadd.f32 %v2241_v5, %v8282_v21  ;;  %v2885_v54 = vld [vmem:[#allocation3 + $0x5c] sm:$0x1]  ;;  %v2167_v18 = vpop.permute.xlu1 %2166 }
 0x2a5   : >> { %v2405_v3 = vsel %vm2341_vm10, %v2309_v62, %v2373_v63  ;;  %v3218_v33 = vshll.u32 %v8473_v60, 16  ;;  %v2882_v38 = vsel %vm7714_vm15, %v2627_v16, %v2881_v14  ;;  %v3223_v14 = vshll.u32 %v8508_v15, 16 }
 0x2a6   : >> { %v2630_v11 = vshrl.u32 %v6824_v50, 16  ;;  %v2633_v0 = vshll.u32 %v6824_v50, 16  ;;  %v6825_v48 = vpack.c.bf16 %v2405_v3, %v2405_v3  ;;  %2883 = vst [vmem:[#allocation3 + $0x54] sm:$0xf] %v2882_v38  ;;  %vm2342_vm12 = vcmp.gt.f32.partialorder %v2310_v56, 0.0 }
 0x2a7   : >> { %v2374_v39 = vmul.f32 0.2, %v2310_v56  ;;  %v2311_v4 = vadd.f32 %v8346_v12, %v2272_v28  ;;  %v2312_v51 = vadd.f32 %v8346_v12, %v2273_v32  ;;  %2186 = vrot.lane.b32.xlu1 %v8338_v59, %s7358_s8  ;;  %v3220_v9 = vrot.slane %v3218_v33, 1 }
 0x2a8   : >> { %v2632_v27 = vrot.slane %v2630_v11, 7  ;;  %v2639_v21 = vshrl.u32 %v6825_v48, 16  ;;  %v2642_v41 = vshll.u32 %v6825_v48, 16  ;;  %v3225_v32 = vrot.slane %v3223_v14, 1  ;;  %v8524_v11 = vpop.f32.mrb[33].mxu1 }
 0x2a9   : >> { %v2406_v36 = vsel %vm2342_vm12, %v2310_v56, %v2374_v39  ;;  %vm2343_vm13 = vcmp.gt.f32.partialorder %v2311_v4, 0.0  ;;  %v2375_v35 = vmul.f32 0.2, %v2311_v4  ;;  %vm2344_vm14 = vcmp.gt.f32.partialorder %v2312_v51, 0.0 }
 0x2aa   : >> { %v2635_v24 = vor.u32 %v2633_v0, %v2632_v27  ;;  %v2637_v61 = vrot.slane %v2632_v27, 4  ;;  %v2641_v62 = vrot.slane %v2639_v21, 7  ;;  %v6826_v26 = vpack.c.bf16 %v2406_v36, %v2406_v36  ;;  %v2169_v38 = vpop.permute.xlu0 %2168  ;;  %v2892_v27 = vld [vmem:[#allocation3 + $0x68] sm:$0x1] }
 0x2ab   : >> { %v2407_v25 = vsel %vm2343_vm13, %v2311_v4, %v2375_v35  ;;  %v2376_v53 = vmul.f32 0.2, %v2312_v51  ;;  %v3221_v5 = vor.u32 %v3220_v9, %v3216_v2  ;;  %2188 = vrot.lane.b32.xlu1 %v8350_v30, %s7358_s8  ;;  %v2242_v33 = vadd.f32 %v2165_v47, %v8238_v29  ;;  %v10135_v35 = vld [vmem:[#allocation18_spill] sm:$0xff] }
 0x2ac   : >> { %v2636_v10 = vsel %vm7720_vm1, %v2628_v17, %v2635_v24  ;;  %v2886_v19 = vsel %vm7551_vm3, %v2637_v61, %v2885_v54  ;;  %v2644_v63 = vor.u32 %v2642_v41, %v2641_v62  ;;  %v2645_v16 = vrot.slane %v2641_v62, 4  ;;  %v2171_v4 = vpop.permute.xlu1 %2170  ;;  %v2092_v54 = vpop.f32.mrb[34].mxu1  ;;  %v2895_v61 = vld [vmem:[#allocation3 + $0x6c] sm:$0xf]  ;;  %v2899_v62 = vld [vmem:[#allocation3 + $0x74] sm:$0x1] }
 0x2ad   : >> { %2884 = vst.msk [vmem:[#allocation3 + $0x58] sm:$0xf] %vm205_vm0, %v2636_v10  ;;  %2887 = vst [vmem:[#allocation3 + $0x5c] sm:$0x1] %v2886_v19  ;;  %v2647_v50 = vshrl.u32 %v6826_v26, 16  ;;  %v2650_v56 = vshll.u32 %v6826_v26, 16  ;;  %v6827_v3 = vpack.c.bf16 %v2407_v25, %v2407_v25  ;;  %v2408_v2 = vsel %vm2344_vm14, %v2312_v51, %v2376_v53 }
 0x2ae   : >> { %v2889_v28 = vsel %vm7714_vm15, %v2644_v63, %v2888_v57  ;;  %v6828_v17 = vpack.c.bf16 %v2408_v2, %v2408_v2  ;;  %v2243_v39 = vadd.f32 %v2167_v18, %v8248_v8  ;;  %v3226_v41 = vsel %vm1275_vm7, %v3221_v5, %v3225_v32  ;;  %v10136_v18 = vld [vmem:[#allocation14_spill] sm:$0xff]  ;;  %v10137_v25 = vld [vmem:[#allocation15_spill] sm:$0xff]  ;;  %v8534_v14 = vpop.f32.mrb[35].mxu1  ;;  %v10139_v32 = vld [vmem:[#allocation20_spill] sm:$0xff] }
 0x2af   : >> { %2890 = vst [vmem:[#allocation3 + $0x60] sm:$0xf] %v2889_v28  ;;  %v2649_v30 = vrot.slane %v2647_v50, 7  ;;  %v2656_v0 = vshrl.u32 %v6827_v3, 16  ;;  %v2659_v48 = vshll.u32 %v6827_v3, 16  ;;  %v2274_v9 = vadd.f32 %v2242_v33, %v8292_v49  ;;  %3391 = vrot.lane.b32.xlu0 %v3226_v41, %s7358_s8 }
 0x2b0   : >> { %v2664_v51 = vshrl.u32 %v6828_v17, 16  ;;  %v2667_v21 = vshll.u32 %v6828_v17, 16  ;;  %v2275_v24 = vadd.f32 %v2243_v39, %v10135_v35  ;;  %v2244_v57 = vadd.f32 %v2169_v38, %v10136_v18  ;;  %v8540_v63 = vld [vmem:[#allocation3 + $0x40] sm:$0xf]  ;;  %v10138_v17 = vld [vmem:[#allocation31_spill] sm:$0xff] }
 0x2b1   : >> { %v2652_v36 = vor.u32 %v2650_v56, %v2649_v30  ;;  %v2654_v29 = vrot.slane %v2649_v30, 4  ;;  %v2658_v47 = vrot.slane %v2656_v0, 7  ;;  %v2313_v8 = vadd.f32 %v8346_v12, %v2274_v9  ;;  %v8542_v50 = vld [vmem:[#allocation3 + $0x44] ss:$0 sps:$4 sm:$0x11]  }
 0x2b2   : >> { %v2666_v26 = vrot.slane %v2664_v51, 7  ;;  %v2245_v53 = vadd.f32 %v2171_v4, %v10137_v25  ;;  %v2276_v33 = vadd.f32 %v2244_v57, %v10139_v32  ;;  %v10140_v38 = vld [vmem:[#allocation22_spill] sm:$0xff]  ;;  %v2961_v0 = vld [vmem:[#allocation3 + $0x3c] sm:$0xf] }
 0x2b3   : >> { %v2653_v49 = vsel %vm7720_vm1, %v2645_v16, %v2652_v36  ;;  %v2893_v5 = vsel %vm7551_vm3, %v2654_v29, %v2892_v27  ;;  %v2661_v10 = vor.u32 %v2659_v48, %v2658_v47  ;;  %v2662_v19 = vrot.slane %v2658_v47, 4  ;;  %2190 = vrot.lane.b32.xlu0 %v10138_v17, %s7358_s8  ;;  %v3384_v47 = vpop.permute.xlu0 %3383 }
 0x2b4   : >> { %2891 = vst.msk [vmem:[#allocation3 + $0x64] sm:$0xf] %vm205_vm0, %v2653_v49  ;;  %2894 = vst [vmem:[#allocation3 + $0x68] sm:$0x1] %v2893_v5  ;;  %v2669_v56 = vor.u32 %v2667_v21, %v2666_v26  ;;  %v2671_v3 = vrot.slane %v2666_v26, 4  ;;  %vm2345_vm6 = vcmp.gt.f32.partialorder %v2313_v8, 0.0  ;;  %v2314_v16 = vadd.f32 %v8346_v12, %v2275_v24  ;;  %v2173_v5 = vpop.permute.xlu1 %2172 }
 0x2b5   : >> { %v2377_v2 = vmul.f32 0.2, %v2313_v8  ;;  %v2896_v28 = vsel %vm7714_vm15, %v2661_v10, %v2895_v61  ;;  %v2277_v30 = vadd.f32 %v2245_v53, %v10140_v38  ;;  %v8557_v54 = vcombine.low %v2961_v0, %v8540_v63  ;;  %v10141_v53 = vld [vmem:[#allocation13_spill] sm:$0xff]  ;;  %v10142_v0 = vld [vmem:[#allocation16_spill] sm:$0xff] }
 0x2b6   : >> { %2897 = vst [vmem:[#allocation3 + $0x6c] sm:$0xf] %v2896_v28  ;;  %v2670_v48 = vsel %vm7720_vm1, %v2662_v19, %v2669_v56  ;;  %v2900_v39 = vsel %vm7551_vm3, %v2671_v3, %v2899_v62  ;;  %vm2346_vm8 = vcmp.gt.f32.partialorder %v2314_v16, 0.0  ;;  %v2378_v51 = vmul.f32 0.2, %v2314_v16 }
 0x2b7   : >> { %v2409_v4 = vsel %vm2345_vm6, %v2313_v8, %v2377_v2  ;;  %2898 = vst.msk [vmem:[#allocation3 + $0x70] sm:$0xf] %vm205_vm0, %v2670_v48  ;;  %2901 = vst [vmem:[#allocation3 + $0x74] sm:$0x1] %v2900_v39  ;;  %v2315_v21 = vadd.f32 %v8346_v12, %v2276_v33  ;;  %v2316_v41 = vadd.f32 %v8346_v12, %v2277_v30  ;;  %v3228_v9 = vshrl.u32 %v8557_v54, 16 }
 0x2b8   : >> { %v6829_v27 = vpack.c.bf16 %v2409_v4, %v2409_v4  ;;  %v3230_v36 = vshll.u32 %v8557_v54, 16  ;;  %v3235_v29 = vshll.u32 %v8542_v50, 16  ;;  %v2410_v61 = vsel %vm2346_vm8, %v2314_v16, %v2378_v51  ;;  %v2902_v10 = vld [vmem:[#allocation3 + $0x78] sm:$0xf]  ;;  %v2906_v33 = vld [vmem:[#allocation3 + $0x80] sm:$0x1]  ;;  %v2175_v4 = vpop.permute.xlu0 %2174 }
 0x2b9   : >> { %vm2347_vm9 = vcmp.gt.f32.partialorder %v2315_v21, 0.0  ;;  %v6830_v62 = vpack.c.bf16 %v2410_v61, %v2410_v61  ;;  %v2379_v26 = vmul.f32 0.2, %v2315_v21  ;;  %vm2348_vm10 = vcmp.gt.f32.partialorder %v2316_v41, 0.0 }
 0x2ba   : >> { %v2673_v35 = vshrl.u32 %v6829_v27, 16  ;;  %v2676_v24 = vshll.u32 %v6829_v27, 16  ;;  %v2380_v8 = vmul.f32 0.2, %v2316_v41  ;;  %v3232_v57 = vrot.slane %v3230_v36, 1 }
 0x2bb   : >> { %v3237_v25 = vrot.slane %v3235_v29, 1  ;;  %v3528_v49 = vsel %vm359_vm5, %v10141_v53, %v3384_v47  ;;  %v2681_v19 = vshrl.u32 %v6830_v62, 16  ;;  %v2684_v56 = vshll.u32 %v6830_v62, 16  ;;  %v8573_v36 = vld [vmem:[#allocation3 + $0x4c] sm:$0xf]  ;;  %v10144_v53 = vld [vmem:[#allocation17_spill] sm:$0xff] }
 0x2bc   : >> { %v2675_v18 = vrot.slane %v2673_v35, 7  ;;  %v2411_v3 = vsel %vm2347_vm9, %v2315_v21, %v2379_v26  ;;  %v2412_v2 = vsel %vm2348_vm10, %v2316_v41, %v2380_v8  ;;  %3813 = vmatmul.mubr.bf16.vlgmr.msra.gmra.mrb[36].mxu1 %v3528_v49  ;;  %v3233_v30 = vor.u32 %v3232_v57, %v3228_v9  ;;  %v2909_v35 = vld [vmem:[#allocation3 + $0x84] sm:$0xf]  ;;  %v2963_v26 = vld [vmem:[#allocation3 + $0x48] sm:$0xf] }
 0x2bd   : >> { %v6831_v17 = vpack.c.bf16 %v2411_v3, %v2411_v3  ;;  %v6832_v32 = vpack.c.bf16 %v2412_v2, %v2412_v2  ;;  %v2683_v38 = vrot.slane %v2681_v19, 7  ;;  %v2246_v48 = vadd.f32 %v2173_v5, %v10142_v0  ;;  %v2913_v57 = vld [vmem:[#allocation3 + $0x8c] sm:$0x1]  ;;  %v8587_v5 = vld [vmem:[#allocation3 + $0x50] ss:$0 sps:$4 sm:$0x11]  }
 0x2be   : >> { %v2678_v28 = vor.u32 %v2676_v24, %v2675_v18  ;;  %v2679_v16 = vrot.slane %v2675_v18, 4  ;;  %v3476_v39 = vrot.slane %v6582_v45, 1  ;;  %v3238_v24 = vsel %vm1275_vm7, %v3233_v30, %v3237_v25  ;;  %v8590_v3 = vld [vmem:[#allocation3 + $0x5c] ss:$0 sps:$4 sm:$0x11]  }
 0x2bf   : >> { %v2690_v51 = vshrl.u32 %v6831_v17, 16  ;;  %v2693_v21 = vshll.u32 %v6831_v17, 16  ;;  %v2698_v41 = vshrl.u32 %v6832_v32, 16  ;;  %v2686_v29 = vor.u32 %v2684_v56, %v2683_v38  ;;  %3393 = vrot.lane.b32.xlu1 %v3238_v24, %s7358_s8  ;;  %v8614_v24 = vld [vmem:[#allocation3 + $0x64] sm:$0xf] }
 0x2c0   : >> { %v2903_v27 = vsel %vm7714_vm15, %v2678_v28, %v2902_v10  ;;  %v2688_v47 = vrot.slane %v2683_v38, 4  ;;  %v2701_v9 = vshll.u32 %v6832_v32, 16  ;;  %v2278_v6 = vadd.f32 %v2246_v48, %v10143_v55  ;;  %v8596_v38 = vld [vmem:[#allocation3 + $0x58] sm:$0xf] }
 0x2c1   : >> { %2904 = vst [vmem:[#allocation3 + $0x78] sm:$0xf] %v2903_v27  ;;  %v2692_v61 = vrot.slane %v2690_v51, 7  ;;  %v2700_v62 = vrot.slane %v2698_v41, 7  ;;  %v3477_v45 = vrot.slane %v8407_v7, 1  ;;  %v2687_v8 = vsel %vm7720_vm1, %v2679_v16, %v2686_v29  ;;  %v10145_v16 = vld [vmem:[#allocation25_spill] sm:$0xff] }
 0x2c2   : >> { %v2907_v18 = vsel %vm7551_vm3, %v2688_v47, %v2906_v33  ;;  %v2247_v49 = vadd.f32 %v2175_v4, %v10144_v53  ;;  %v8585_v25 = vcombine.low %v2963_v26, %v8573_v36  ;;  %2905 = vst.msk [vmem:[#allocation3 + $0x7c] sm:$0xf] %vm205_vm0, %v2687_v8  ;;  %v2317_v2 = vadd.f32 %v8346_v12, %v2278_v6  ;;  %v2177_v33 = vpop.permute.xlu0 %2176  ;;  %v10146_v29 = vld [vmem:[#allocation19_spill] sm:$0xff] }
 0x2c3   : >> { %2908 = vst [vmem:[#allocation3 + $0x80] sm:$0x1] %v2907_v18  ;;  %v2695_v10 = vor.u32 %v2693_v21, %v2692_v61  ;;  %v2696_v7 = vrot.slane %v2692_v61, 4  ;;  %v2703_v19 = vor.u32 %v2701_v9, %v2700_v62  ;;  %v2705_v56 = vrot.slane %v2700_v62, 4  ;;  %v2965_v21 = vld [vmem:[#allocation3 + $0x54] sm:$0xf] }
 0x2c4   : >> { %v3478_v28 = vsel %vm1582_vm11, %v3476_v39, %v3477_v45  ;;  %v2279_v17 = vadd.f32 %v2247_v49, %v10145_v16  ;;  %v3240_v32 = vshrl.u32 %v8585_v25, 16  ;;  %v3242_v39 = vshll.u32 %v8585_v25, 16  ;;  %v2967_v18 = vld [vmem:[#allocation3 + $0x60] sm:$0xf]  ;;  %v2916_v16 = vld [vmem:[#allocation3 + $0x90] sm:$0xf] }
 0x2c5   : >> { %v2910_v30 = vsel %vm7714_vm15, %v2695_v10, %v2909_v35  ;;  %v2704_v0 = vsel %vm7720_vm1, %v2696_v7, %v2703_v19  ;;  %v2914_v48 = vsel %vm7551_vm3, %v2705_v56, %v2913_v57  ;;  %6624 = vmatprep.mubr.msk.bf16.mxu1 %vm359_vm5, %v3478_v28  ;;  %vm2349_vm12 = vcmp.gt.f32.partialorder %v2317_v2, 0.0  ;;  %v8618_v57 = vld [vmem:[#allocation3 + $0x68] ss:$0 sps:$4 sm:$0x11]  }
 0x2c6   : >> { %2911 = vst [vmem:[#allocation3 + $0x84] sm:$0xf] %v2910_v30  ;;  %2912 = vst.msk [vmem:[#allocation3 + $0x88] sm:$0xf] %vm205_vm0, %v2704_v0  ;;  %v2381_v4 = vmul.f32 0.2, %v2317_v2  ;;  %v2318_v27 = vadd.f32 %v8346_v12, %v2279_v17  ;;  %v2248_v47 = vadd.f32 %v2177_v33, %v10146_v29  ;;  %v8611_v35 = vcombine.low %v2965_v21, %v8596_v38 }
 0x2c7   : >> { %2915 = vst [vmem:[#allocation3 + $0x8c] sm:$0x1] %v2914_v48  ;;  %v3247_v51 = vshll.u32 %v8587_v5, 16  ;;  %v3244_v41 = vrot.slane %v3242_v39, 1  ;;  %v3259_v9 = vshll.u32 %v8590_v3, 16  ;;  %v10147_v12 = vld [vmem:[#allocation26_spill] sm:$0xff]  ;;  %v8622_v7 = vcombine.low %v2967_v18, %v8614_v24 }
 0x2c8   : >> { %v2413_v61 = vsel %vm2349_vm12, %v2317_v2, %v2381_v4  ;;  %vm2350_vm13 = vcmp.gt.f32.partialorder %v2318_v27, 0.0  ;;  %v2382_v62 = vmul.f32 0.2, %v2318_v27  ;;  %v2280_v26 = vadd.f32 %v2248_v47, %v10147_v12  ;;  %v8629_v17 = vld [vmem:[%s10073_s2] ss:$0 sm:$0xff] }
 0x2c9   : >> { %v3249_v55 = vrot.slane %v3247_v51, 1  ;;  %v6833_v6 = vpack.c.bf16 %v2413_v61, %v2413_v61  ;;  %v3245_v45 = vor.u32 %v3244_v41, %v3240_v32  ;;  %v3252_v8 = vshrl.u32 %v8611_v35, 16  ;;  %v8634_v48 = vld [vmem:[#allocation3 + $0x74] ss:$0 sps:$4 sm:$0x11]  }
 0x2ca   : >> { %v2414_v53 = vsel %vm2350_vm13, %v2318_v27, %v2382_v62  ;;  %v3254_v49 = vshll.u32 %v8611_v35, 16  ;;  %v3261_v10 = vrot.slane %v3259_v9, 1  ;;  %v2319_v32 = vadd.f32 %v8629_v17, %v2280_v26  ;;  %v8637_v21 = vld [vmem:[#allocation3 + $0x70] sm:$0xf]  ;;  %v2969_v9 = vld [vmem:[#allocation3 + $0x6c] sm:$0xf] }
 0x2cb   : >> { %v2707_v19 = vshrl.u32 %v6833_v6, 16  ;;  %v2710_v56 = vshll.u32 %v6833_v6, 16  ;;  %v6834_v2 = vpack.c.bf16 %v2414_v53, %v2414_v53  ;;  %v3250_v28 = vsel %vm1275_vm7, %v3245_v45, %v3249_v55  ;;  %v2920_v45 = vld [vmem:[#allocation3 + $0x98] sm:$0x1] }
 0x2cc   : >> { %3395 = vrot.lane.b32.xlu0 %v3250_v28, %s7358_s8  ;;  %v3256_v33 = vrot.slane %v3254_v49, 1  ;;  %v3264_v30 = vshrl.u32 %v8622_v7, 16  ;;  %v3266_v0 = vshll.u32 %v8622_v7, 16  ;;  %v3271_v51 = vshll.u32 %v8618_v57, 16  ;;  %v8643_v49 = vld [vmem:[#allocation3 + $0x7c] sm:$0xf] }
 0x2cd   : >> { %v2709_v39 = vrot.slane %v2707_v19, 7  ;;  %v2715_v4 = vshrl.u32 %v6834_v2, 16  ;;  %v2718_v27 = vshll.u32 %v6834_v2, 16  ;;  %vm2351_vm14 = vcmp.gt.f32.partialorder %v2319_v32, 0.0 }
 0x2ce   : >> { %v2383_v41 = vmul.f32 0.2, %v2319_v32  ;;  %v3257_v29 = vor.u32 %v3256_v33, %v3252_v8  ;;  %v3268_v47 = vrot.slane %v3266_v0, 1  ;;  %v3273_v6 = vrot.slane %v3271_v51, 1  ;;  %v8650_v33 = vld [vmem:[#allocation3 + $0x88] sm:$0xf] }
 0x2cf   : >> { %v2712_v61 = vor.u32 %v2710_v56, %v2709_v39  ;;  %v2713_v62 = vrot.slane %v2709_v39, 4  ;;  %v2717_v55 = vrot.slane %v2715_v4, 7  ;;  %v8641_v53 = vcombine.low %v2969_v9, %v8637_v21  ;;  %v8648_v56 = vld [vmem:[#allocation3 + $0x80] ss:$0 sps:$4 sm:$0x11]  }
 0x2d0   : >> { %v2415_v12 = vsel %vm2351_vm14, %v2319_v32, %v2383_v41  ;;  %v3262_v26 = vsel %vm1275_vm7, %v3257_v29, %v3261_v10  ;;  %v3269_v18 = vor.u32 %v3268_v47, %v3264_v30  ;;  %v3283_v30 = vshll.u32 %v8634_v48, 16  ;;  %v8655_v0 = vld [vmem:[#allocation3 + $0x8c] ss:$0 sps:$4 sm:$0x11]   ;;  %v2973_v47 = vld [vmem:[#allocation3 + $0x84] sm:$0xf] }
 0x2d1   : >> { %v2917_v19 = vsel %vm7714_vm15, %v2712_v61, %v2916_v16  ;;  %v2720_v8 = vor.u32 %v2718_v27, %v2717_v55  ;;  %v2722_v2 = vrot.slane %v2717_v55, 4  ;;  %v6835_v28 = vpack.c.bf16 %v2415_v12, %v2415_v12  ;;  %3397 = vrot.lane.b32.xlu1 %v3262_v26, %s7358_s8  ;;  %v2971_v27 = vld [vmem:[#allocation3 + $0x78] sm:$0xf] }
 0x2d2   : >> { %2918 = vst [vmem:[#allocation3 + $0x90] sm:$0xf] %v2917_v19  ;;  %v3274_v10 = vsel %vm1275_vm7, %v3269_v18, %v3273_v6  ;;  %v3278_v32 = vshll.u32 %v8641_v53, 16  ;;  %v3276_v51 = vshrl.u32 %v8641_v53, 16  ;;  %v8665_v29 = vcombine.low %v2971_v27, %v8643_v49  ;;  %v2923_v6 = vld [vmem:[#allocation3 + $0x9c] sm:$0xf] }
 0x2d3   : >> { %v2721_v16 = vsel %vm7720_vm1, %v2713_v62, %v2720_v8  ;;  %v2921_v39 = vsel %vm7551_vm3, %v2722_v2, %v2920_v45  ;;  %v2724_v4 = vshrl.u32 %v6835_v28, 16  ;;  %3399 = vrot.lane.b32.xlu0 %v3274_v10, %s7358_s8  ;;  %v2727_v61 = vshll.u32 %v6835_v28, 16 }
 0x2d4   : >> { %2919 = vst.msk [vmem:[#allocation3 + $0x94] sm:$0xf] %vm205_vm0, %v2721_v16  ;;  %2922 = vst [vmem:[#allocation3 + $0x98] sm:$0x1] %v2921_v39  ;;  %v3280_v41 = vrot.slane %v3278_v32, 1  ;;  %v3285_v62 = vrot.slane %v3283_v30, 1  ;;  %v8670_v55 = vcombine.low %v2973_v47, %v8650_v33 }
 0x2d5   : >> { %v8667_v9 = vrot.slane %v2724_v4, 7  ;;  %v3290_v12 = vshll.u32 %v8665_v29, 16  ;;  %v3295_v26 = vshll.u32 %v8648_v56, 16  ;;  %v3307_v18 = vshll.u32 %v8655_v0, 16 }
 0x2d6   : >> { %v3281_v45 = vor.u32 %v3280_v41, %v3276_v51  ;;  %v3302_v8 = vshll.u32 %v8670_v55, 16  ;;  %v3288_v28 = vshrl.u32 %v8665_v29, 16  ;;  %v3300_v30 = vshrl.u32 %v8670_v55, 16 }
 0x2d7   : >> { %v2729_v19 = vor.u32 %v2727_v61, %v8667_v9  ;;  %v3292_v10 = vrot.slane %v3290_v12, 1  ;;  %v3297_v4 = vrot.slane %v3295_v26, 1  ;;  %v3309_v27 = vrot.slane %v3307_v18, 1 }
 0x2d8   : >> { %v3286_v2 = vsel %vm1275_vm7, %v3281_v45, %v3285_v62  ;;  %v3304_v16 = vrot.slane %v3302_v8, 1 }
 0x2d9   : >> { %v2924_v32 = vsel %vm7714_vm15, %v2729_v19, %v2923_v6  ;;  %3401 = vrot.lane.b32.xlu1 %v3286_v2, %s7358_s8  ;;  %v3293_v39 = vor.u32 %v3292_v10, %v3288_v28  ;;  %v2975_v41 = vld [vmem:[#allocation3 + $0x90] sm:$0xf]  ;;  %v3007_v10 = vld [vmem:[#allocation3 + $0x18] sm:$0xe] }
 0x2da   : >> { %2925 = vst [vmem:[#allocation3 + $0x9c] sm:$0xf] %v2924_v32  ;;  %v3305_v51 = vor.u32 %v3304_v16, %v3300_v30  ;;  %v6583_v32 = vcombine.low %v3007_v10, %v8419_v58  ;;  %v3480_v16 = vrot.slane %v8437_v52, 1  ;;  %v3483_v52 = vrot.slane %v8452_v42, 1 }
 0x2db   : >> { %v8683_v47 = vld [vmem:[#allocation3 + $0x94] sm:$0xf]  ;;  %v3298_v61 = vsel %vm1275_vm7, %v3293_v39, %v3297_v4  ;;  %v8689_v45 = vld [vmem:[#allocation3 + $0x98] ss:$0 sps:$4 sm:$0x11]  }
 0x2dc   : >> { %v8687_v62 = vcombine.low %v2975_v41, %v8683_v47  ;;  %3403 = vrot.lane.b32.xlu0 %v3298_v61, %s7358_s8  ;;  %v3310_v6 = vsel %vm1275_vm7, %v3305_v51, %v3309_v27  ;;  %v3319_v26 = vshll.u32 %v8689_v45, 16  ;;  %v3479_v30 = vrot.slane %v6583_v32, 1  ;;  %v3008_v51 = vld [vmem:[#allocation3 + $0x24] sm:$0xe]  ;;  %v10151_v32 = vld [vmem:[#allocation28_spill] sm:$0xff] }
 0x2dd   : >> { %3405 = vrot.lane.b32.xlu1 %v3310_v6, %s7358_s8  ;;  %v6584_v61 = vcombine.low %v3008_v51, %v8450_v40  ;;  %v10148_v6 = vld [vmem:[#allocation21_spill] sm:$0xff]  ;;  %v3009_v51 = vld [vmem:[#allocation3 + $0x30] sm:$0xe] }
 0x2de   : >> { %v3314_v12 = vshll.u32 %v8687_v62, 16  ;;  %v3312_v18 = vshrl.u32 %v8687_v62, 16  ;;  %v3321_v2 = vrot.slane %v3319_v26, 1  ;;  %v3481_v27 = vsel %vm1582_vm11, %v3479_v30, %v3480_v16  ;;  %v10149_v26 = vld [vmem:[#allocation27_spill] sm:$0xff] }
 0x2e0   : >> { %v3316_v19 = vrot.slane %v3314_v12, 1 }
 0x2e2   : >> { %v3317_v8 = vor.u32 %v3316_v19, %v3312_v18  ;;  %v3482_v19 = vrot.slane %v6584_v61, 1 }
 0x2e4   : >> { %v3322_v28 = vsel %vm1275_vm7, %v3317_v8, %v3321_v2  ;;  %v3484_v16 = vsel %vm1582_vm11, %v3482_v19, %v3483_v52 }
 0x2e5   : >> { %3407 = vrot.lane.b32.xlu0 %v3322_v28, %s7358_s8 }
 0x300   : >> { %v3386_v39 = vpop.permute.xlu1 %3385 }
 0x301   : >> { %v3531_v4 = vsel %vm359_vm5, %v8397_v46, %v3386_v39  ;;  %v10150_v46 = vld [vmem:[#allocation23_spill] sm:$0xff] }
 0x302   : >> { %3821 = vmatmul.mubr.bf16.gmra.mrb[40].mxu1 %v3531_v4 }
 0x303   : >> { %6625 = vmatprep.mubr.msk.bf16.mxu1 %vm359_vm5, %v3481_v27 }
 0x304   : >> { %v2179_v41 = vpop.permute.xlu1 %2178 }
 0x305   : >> { %v2249_v12 = vadd.f32 %v2179_v41, %v10148_v6  ;;  %v6585_v6 = vcombine.low %v3009_v51, %v8462_v34 }
 0x307   : >> { %v2281_v58 = vadd.f32 %v2249_v12, %v10149_v26 }
 0x308   : >> { %v2181_v18 = vpop.permute.xlu1 %2180 }
 0x309   : >> { %v2320_v8 = vadd.f32 %v8629_v17, %v2281_v58  ;;  %v2250_v2 = vadd.f32 %v2181_v18, %v10150_v46  ;;  %v2927_v46 = vld [vmem:[#allocation3 + $0xa4] sm:$0x1] }
 0x30b   : >> { %v3388_v28 = vpop.permute.xlu0 %3387  ;;  %vm2352_vm6 = vcmp.gt.f32.partialorder %v2320_v8, 0.0  ;;  %v2384_v10 = vmul.f32 0.2, %v2320_v8  ;;  %v2282_v30 = vadd.f32 %v2250_v2, %v10151_v32  ;;  %v3486_v32 = vrot.slane %v8508_v15, 1 }
 0x30c   : >> { %v3534_v40 = vsel %vm359_vm5, %v8424_v13, %v3388_v28  ;;  %v10152_v13 = vld [vmem:[#allocation29_spill] sm:$0xff] }
 0x30d   : >> { %3829 = vmatmul.mubr.bf16.gmra.mrb[44].mxu1 %v3534_v40  ;;  %v2416_v39 = vsel %vm2352_vm6, %v2320_v8, %v2384_v10  ;;  %v2321_v4 = vadd.f32 %v8629_v17, %v2282_v30  ;;  %v3485_v10 = vrot.slane %v6585_v6, 1 }
 0x30e   : >> { %6626 = vmatprep.mubr.msk.bf16.mxu1 %vm359_vm5, %v3484_v16  ;;  %v6836_v42 = vpack.c.bf16 %v2416_v39, %v2416_v39 }
 0x30f   : >> { %v2183_v27 = vpop.permute.xlu0 %2182  ;;  %vm2353_vm8 = vcmp.gt.f32.partialorder %v2321_v4, 0.0  ;;  %v2385_v41 = vmul.f32 0.2, %v2321_v4 }
 0x310   : >> { %v2251_v61 = vadd.f32 %v2183_v27, %v8322_v37  ;;  %v2732_v12 = vshrl.u32 %v6836_v42, 16  ;;  %v2735_v19 = vshll.u32 %v6836_v42, 16  ;;  %v2730_v37 = vrot.slane %v8667_v9, 4  ;;  %v10153_v42 = vld [vmem:[#allocation30_spill] sm:$0xff]  ;;  %v2930_v9 = vld [vmem:[#allocation3 + $0xa8] sm:$0xf] }
 0x311   : >> { %v2417_v26 = vsel %vm2353_vm8, %v2321_v4, %v2385_v41 }
 0x312   : >> { %v2283_v58 = vadd.f32 %v2251_v61, %v10152_v13  ;;  %v2734_v18 = vrot.slane %v2732_v12, 7  ;;  %v6837_v52 = vpack.c.bf16 %v2417_v26, %v2417_v26  ;;  %v3487_v12 = vsel %vm1582_vm11, %v3485_v10, %v3486_v32 }
 0x313   : >> { %v2185_v8 = vpop.permute.xlu0 %2184 }
 0x314   : >> { %v2322_v2 = vadd.f32 %v8629_v17, %v2283_v58  ;;  %v2252_v28 = vadd.f32 %v2185_v8, %v8326_v44  ;;  %v2737_v30 = vor.u32 %v2735_v19, %v2734_v18  ;;  %v2739_v34 = vrot.slane %v2734_v18, 4  ;;  %v3010_v8 = vld [vmem:[#allocation3 + $0x3c] sm:$0xe] }
 0x315   : >> { %v2741_v40 = vshrl.u32 %v6837_v52, 16  ;;  %v2744_v16 = vshll.u32 %v6837_v52, 16  ;;  %v3390_v4 = vpop.permute.xlu1 %3389 }
 0x316   : >> { %vm2354_vm9 = vcmp.gt.f32.partialorder %v2322_v2, 0.0  ;;  %v2386_v39 = vmul.f32 0.2, %v2322_v2  ;;  %v2284_v27 = vadd.f32 %v2252_v28, %v10153_v42  ;;  %v2738_v51 = vsel %vm7720_vm1, %v2730_v37, %v2737_v30  ;;  %v10154_v37 = vld [vmem:[#allocation32_spill] sm:$0xff] }
 0x317   : >> { %v2928_v44 = vsel %vm7551_vm3, %v2739_v34, %v2927_v46  ;;  %v2743_v41 = vrot.slane %v2741_v40, 7  ;;  %v3537_v15 = vsel %vm359_vm5, %v8469_v22, %v3390_v4  ;;  %2926 = vst.msk [vmem:[#allocation3 + $0xa0] sm:$0xf] %vm205_vm0, %v2738_v51  ;;  %v2934_v34 = vld [vmem:[#allocation3 + $0xb0] sm:$0x1] }
 0x318   : >> { %2929 = vst [vmem:[#allocation3 + $0xa4] sm:$0x1] %v2928_v44  ;;  %v2418_v61 = vsel %vm2354_vm9, %v2322_v2, %v2386_v39  ;;  %v2323_v6 = vadd.f32 %v8629_v17, %v2284_v27  ;;  %3839 = vmatmul.mubr.bf16.gmra.mrb[48].mxu1 %v3537_v15  ;;  %v6586_v2 = vcombine.low %v3010_v8, %v8540_v63  ;;  %v2977_v39 = vld [vmem:[#allocation3 + $0x9c] sm:$0xf] }
 0x319   : >> { %v2746_v26 = vor.u32 %v2744_v16, %v2743_v41  ;;  %v6838_v13 = vpack.c.bf16 %v2418_v61, %v2418_v61  ;;  %6627 = vmatprep.mubr.msk.bf16.mxu1 %vm359_vm5, %v3487_v12  ;;  %v2187_v18 = vpop.permute.xlu1 %2186  ;;  %v3489_v16 = vrot.slane %v8542_v50, 1  ;;  %v2747_v4 = vrot.slane %v2743_v41, 4 }
 0x31a   : >> { %vm2355_vm10 = vcmp.gt.f32.partialorder %v2323_v6, 0.0  ;;  %v2387_v58 = vmul.f32 0.2, %v2323_v6  ;;  %v2253_v52 = vadd.f32 %v2187_v18, %v8330_v31  ;;  %v3488_v15 = vrot.slane %v6586_v2, 1 }
 0x31b   : >> { %v2931_v22 = vsel %vm7714_vm15, %v2746_v26, %v2930_v9  ;;  %v2749_v19 = vshrl.u32 %v6838_v13, 16  ;;  %v2752_v10 = vshll.u32 %v6838_v13, 16  ;;  %v2937_v26 = vld [vmem:[#allocation3 + $0xb4] sm:$0xf] }
 0x31c   : >> { %2932 = vst [vmem:[#allocation3 + $0xa8] sm:$0xf] %v2931_v22  ;;  %v2419_v46 = vsel %vm2355_vm10, %v2323_v6, %v2387_v58  ;;  %v2285_v30 = vadd.f32 %v2253_v52, %v10154_v37  ;;  %v3490_v2 = vsel %vm1582_vm11, %v3488_v15, %v3489_v16  ;;  %v2941_v15 = vld [vmem:[#allocation3 + $0xbc] sm:$0x1] }
 0x31d   : >> { %v2751_v28 = vrot.slane %v2749_v19, 7  ;;  %v6839_v32 = vpack.c.bf16 %v2419_v46, %v2419_v46  ;;  %v2189_v40 = vpop.permute.xlu1 %2188 }
 0x31e   : >> { %v8741_v31 = vld [vmem:[#allocation3 + $0xa0] sm:$0xf]  ;;  %v2324_v44 = vadd.f32 %v8629_v17, %v2285_v30  ;;  %v2254_v63 = vadd.f32 %v2189_v40, %v8334_v43 }
 0x31f   : >> { %v2754_v42 = vor.u32 %v2752_v10, %v2751_v28  ;;  %v2756_v27 = vrot.slane %v2751_v28, 4  ;;  %v2758_v51 = vshrl.u32 %v6839_v32, 16  ;;  %v8746_v9 = vcombine.low %v2977_v39, %v8741_v31  ;;  %v8748_v61 = vld [vmem:[#allocation3 + $0xa4] ss:$0 sps:$4 sm:$0x11]  }
 0x320   : >> { %v2761_v12 = vshll.u32 %v6839_v32, 16  ;;  %vm2356_vm12 = vcmp.gt.f32.partialorder %v2324_v44, 0.0  ;;  %v2388_v43 = vmul.f32 0.2, %v2324_v44  ;;  %v2286_v13 = vadd.f32 %v2254_v63, %v8524_v11 }
 0x321   : >> { %v2755_v50 = vsel %vm7720_vm1, %v2747_v4, %v2754_v42  ;;  %v2935_v41 = vsel %vm7551_vm3, %v2756_v27, %v2934_v34  ;;  %v2760_v6 = vrot.slane %v2758_v51, 7  ;;  %v3392_v18 = vpop.permute.xlu0 %3391  ;;  %v3326_v22 = vshll.u32 %v8746_v9, 16 }
 0x322   : >> { %2933 = vst.msk [vmem:[#allocation3 + $0xac] sm:$0xf] %vm205_vm0, %v2755_v50  ;;  %2936 = vst [vmem:[#allocation3 + $0xb0] sm:$0x1] %v2935_v41  ;;  %v3331_v19 = vshll.u32 %v8748_v61, 16  ;;  %v2420_v52 = vsel %vm2356_vm12, %v2324_v44, %v2388_v43  ;;  %v3540_v8 = vsel %vm359_vm5, %v8473_v60, %v3392_v18  ;;  %v2325_v46 = vadd.f32 %v8629_v17, %v2286_v13 }
 0x323   : >> { %v2763_v58 = vor.u32 %v2761_v12, %v2760_v6  ;;  %v6840_v10 = vpack.c.bf16 %v2420_v52, %v2420_v52  ;;  %3849 = vmatmul.mubr.bf16.gmra.mrb[52].mxu1 %v3540_v8  ;;  %v3324_v11 = vshrl.u32 %v8746_v9, 16  ;;  %v3328_v32 = vrot.slane %v3326_v22, 1  ;;  %v2979_v4 = vld [vmem:[#allocation3 + $0xa8] sm:$0xf] }
 0x324   : >> { %vm2357_vm13 = vcmp.gt.f32.partialorder %v2325_v46, 0.0  ;;  %v2389_v37 = vmul.f32 0.2, %v2325_v46  ;;  %6628 = vmatprep.mubr.msk.bf16.mxu1 %vm359_vm5, %v3490_v2  ;;  %v3333_v40 = vrot.slane %v3331_v19, 1  ;;  %v2944_v2 = vld [vmem:[#allocation3 + $0xc0] sm:$0xf] }
 0x325   : >> { %v2938_v28 = vsel %vm7714_vm15, %v2763_v58, %v2937_v26  ;;  %v2766_v30 = vshrl.u32 %v6840_v10, 16  ;;  %v2191_v34 = vpop.permute.xlu0 %2190  ;;  %v3329_v60 = vor.u32 %v3328_v32, %v3324_v11  ;;  %v2769_v27 = vshll.u32 %v6840_v10, 16  ;;  %v3011_v58 = vld [vmem:[#allocation3 + $0x48] sm:$0xe] }
 0x326   : >> { %2939 = vst [vmem:[#allocation3 + $0xb4] sm:$0xf] %v2938_v28  ;;  %v2421_v39 = vsel %vm2357_vm13, %v2325_v46, %v2389_v37  ;;  %v2255_v16 = vadd.f32 %v2191_v34, %v8338_v59  ;;  %v2764_v26 = vrot.slane %v2760_v6, 4  ;;  %v6587_v22 = vcombine.low %v3011_v58, %v8573_v36 }
 0x327   : >> { %v2768_v42 = vrot.slane %v2766_v30, 7  ;;  %v6841_v51 = vpack.c.bf16 %v2421_v39, %v2421_v39  ;;  %v3334_v44 = vsel %vm1275_vm7, %v3329_v60, %v3333_v40  ;;  %v3492_v40 = vrot.slane %v8587_v5, 1 }
 0x328   : >> { %v2287_v50 = vadd.f32 %v2255_v16, %v8534_v14  ;;  %3409 = vrot.lane.b32.xlu1 %v3334_v44, %s7358_s8  ;;  %v3491_v60 = vrot.slane %v6587_v22, 1  ;;  %v8809_v22 = vld [vmem:[#allocation3 + $0xd4] ss:$0 sps:$4 sm:$0x11]  }
 0x329   : >> { %v8768_v63 = vld [vmem:[#allocation3 + $0xac] sm:$0xf]  ;;  %v8775_v12 = vld [vmem:[#allocation3 + $0xb0] ss:$0 sps:$4 sm:$0x11]   ;;  %v2771_v59 = vor.u32 %v2769_v27, %v2768_v42  ;;  %v2773_v43 = vrot.slane %v2768_v42, 4 }
 0x32a   : >> { %v8773_v41 = vcombine.low %v2979_v4, %v8768_v63  ;;  %v2775_v13 = vshrl.u32 %v6841_v51, 16  ;;  %v2326_v18 = vadd.f32 %v8629_v17, %v2287_v50  ;;  %v3343_v14 = vshll.u32 %v8775_v12, 16  ;;  %v3012_v42 = vld [vmem:[#allocation3 + $0x54] sm:$0xe]  ;;  %v2948_v27 = vld [vmem:[#allocation3 + $0xc8] sm:$0x1] }
 0x32b   : >> { %v2772_v52 = vsel %vm7720_vm1, %v2764_v26, %v2771_v59  ;;  %v2942_v8 = vsel %vm7551_vm3, %v2773_v43, %v2941_v15  ;;  %v2778_v6 = vshll.u32 %v6841_v51, 16  ;;  %v2985_v15 = vld [vmem:[#allocation3 + $0xcc] sm:$0xf]  ;;  %v8794_v50 = vld [vmem:[#allocation3 + $0xd0] sm:$0xf]  ;;  %v3493_v5 = vsel %vm1582_vm11, %v3491_v60, %v3492_v40 }
 0x32c   : >> { %v3338_v19 = vshll.u32 %v8773_v41, 16  ;;  %v2777_v46 = vrot.slane %v2775_v13, 7  ;;  %2940 = vst.msk [vmem:[#allocation3 + $0xb8] sm:$0xf] %vm205_vm0, %v2772_v52  ;;  %2943 = vst [vmem:[#allocation3 + $0xbc] sm:$0x1] %v2942_v8  ;;  %v8800_v13 = vcombine.low %v2985_v15, %v8794_v50  ;;  %v6588_v58 = vcombine.low %v3012_v42, %v8596_v38 }
 0x32d   : >> { %vm2358_vm14 = vcmp.gt.f32.partialorder %v2326_v18, 0.0  ;;  %v2390_v17 = vmul.f32 0.2, %v2326_v18  ;;  %v3336_v36 = vshrl.u32 %v8773_v41, 16  ;;  %v3345_v37 = vrot.slane %v3343_v14, 1 }
 0x32e   : >> { %v3340_v28 = vrot.slane %v3338_v19, 1  ;;  %v2780_v10 = vor.u32 %v2778_v6, %v2777_v46  ;;  %v2981_v44 = vld [vmem:[#allocation3 + $0xb4] sm:$0xf]  ;;  %v2781_v19 = vrot.slane %v2777_v46, 4  ;;  %v3374_v8 = vshll.u32 %v8800_v13, 16 }
 0x32f   : >> { %v2422_v11 = vsel %vm2358_vm14, %v2326_v18, %v2390_v17  ;;  %v3372_v17 = vshrl.u32 %v8800_v13, 16  ;;  %v3013_v42 = vld [vmem:[#allocation3 + $0x60] sm:$0xe] }
 0x330   : >> { %v3341_v32 = vor.u32 %v3340_v28, %v3336_v36  ;;  %v2945_v30 = vsel %vm7714_vm15, %v2780_v10, %v2944_v2  ;;  %v6842_v34 = vpack.c.bf16 %v2422_v11, %v2422_v11  ;;  %v3376_v28 = vrot.slane %v3374_v8, 1 }
 0x331   : >> { %2946 = vst [vmem:[#allocation3 + $0xc0] sm:$0xf] %v2945_v30  ;;  %v3394_v4 = vpop.permute.xlu1 %3393  ;;  %v3379_v11 = vshll.u32 %v8809_v22, 16 }
 0x332   : >> { %v3346_v39 = vsel %vm1275_vm7, %v3341_v32, %v3345_v37  ;;  %v2783_v16 = vshrl.u32 %v6842_v34, 16  ;;  %v3543_v51 = vsel %vm359_vm5, %v8557_v54, %v3394_v4  ;;  %v2786_v59 = vshll.u32 %v6842_v34, 16 }
 0x333   : >> { %3411 = vrot.lane.b32.xlu0 %v3346_v39, %s7358_s8  ;;  %3859 = vmatmul.mubr.bf16.gmra.mrb[56].mxu1 %v3543_v51  ;;  %v8797_v43 = vld [vmem:[#allocation3 + $0xb8] sm:$0xf]  ;;  %v8807_v18 = vld [vmem:[#allocation3 + $0xbc] ss:$0 sps:$4 sm:$0x11]   ;;  %v3494_v32 = vrot.slane %v6588_v58, 1  ;;  %v3377_v60 = vor.u32 %v3376_v28, %v3372_v17  ;;  %v6589_v51 = vcombine.low %v3013_v42, %v8614_v24 }
 0x334   : >> { %v2785_v26 = vrot.slane %v2783_v16, 7  ;;  %6629 = vmatprep.mubr.msk.bf16.mxu1 %vm359_vm5, %v3493_v5  ;;  %v8805_v54 = vcombine.low %v2981_v44, %v8797_v43  ;;  %v3355_v2 = vshll.u32 %v8807_v18, 16  ;;  %v3495_v37 = vrot.slane %v8590_v3, 1  ;;  %v3017_v42 = vld [vmem:[#allocation3 + $0x90] sm:$0xe] }
 0x335   : >> { %v3381_v40 = vrot.slane %v3379_v11, 1  ;;  %v3497_v5 = vrot.slane %v6589_v51, 1  ;;  %v3498_v58 = vrot.slane %v8618_v57, 1  ;;  %v3015_v11 = vld [vmem:[#allocation3 + $0x78] sm:$0xe] }
 0x336   : >> { %v2788_v14 = vor.u32 %v2786_v59, %v2785_v26  ;;  %v2790_v52 = vrot.slane %v2785_v26, 4  ;;  %v3350_v6 = vshll.u32 %v8805_v54, 16  ;;  %v3348_v46 = vshrl.u32 %v8805_v54, 16 }
 0x337   : >> { %v3357_v34 = vrot.slane %v3355_v2, 1  ;;  %v3382_v3 = vsel %vm1275_vm7, %v3377_v60, %v3381_v40  ;;  %v3499_v2 = vsel %vm1582_vm11, %v3497_v5, %v3498_v58  ;;  %v3016_v40 = vld [vmem:[#allocation3 + $0x84] sm:$0xe] }
 0x338   : >> { %v2789_v38 = vsel %vm7720_vm1, %v2781_v19, %v2788_v14  ;;  %v2949_v36 = vsel %vm7551_vm3, %v2790_v52, %v2948_v27  ;;  %v3352_v10 = vrot.slane %v3350_v6, 1  ;;  %v3496_v27 = vsel %vm1582_vm11, %v3494_v32, %v3495_v37  ;;  %v2983_v44 = vld [vmem:[#allocation3 + $0xc0] sm:$0xf]  ;;  %v3014_v6 = vld [vmem:[#allocation3 + $0x6c] sm:$0xe] }
 0x339   : >> { %2947 = vst.msk [vmem:[#allocation3 + $0xc4] sm:$0xf] %vm205_vm0, %v2789_v38  ;;  %2950 = vst [vmem:[#allocation3 + $0xc8] sm:$0x1] %v2949_v36  ;;  %v6590_v17 = vcombine.low %v3014_v6, %v8637_v21  ;;  %v6591_v21 = vcombine.low %v3015_v11, %v8643_v49  ;;  %v3507_v49 = vrot.slane %v8655_v0, 1 }
 0x33a   : >> { %v3353_v30 = vor.u32 %v3352_v10, %v3348_v46 }
 0x33b   : >> { %v3500_v46 = vrot.slane %v6590_v17, 1  ;;  %v3020_v17 = vld [vmem:[#allocation3 + $0xb4] sm:$0xe] }
 0x33c   : >> { %v3358_v16 = vsel %vm1275_vm7, %v3353_v30, %v3357_v34  ;;  %v3503_v30 = vrot.slane %v6591_v21, 1  ;;  %v3504_v34 = vrot.slane %v8648_v56, 1 }
 0x33d   : >> { %3413 = vrot.lane.b32.xlu1 %v3358_v16, %s7358_s8 }
 0x33e   : >> { %v3396_v39 = vpop.permute.xlu0 %3395 }
 0x33f   : >> { %v3546_v4 = vsel %vm359_vm5, %v8585_v25, %v3396_v39 }
 0x340   : >> { %3869 = vmatmul.mubr.bf16.gmra.mrb[60].mxu1 %v3546_v4  ;;  %v8831_v15 = vld [vmem:[#allocation3 + $0xc4] sm:$0xf]  ;;  %v8836_v59 = vld [vmem:[#allocation3 + $0xc8] ss:$0 sps:$4 sm:$0x11]  }
 0x341   : >> { %6630 = vmatprep.mubr.msk.bf16.mxu1 %vm359_vm5, %v3496_v27  ;;  %v8834_v26 = vcombine.low %v2983_v44, %v8831_v15  ;;  %3417 = vrot.lane.b32.xlu1 %v3382_v3, %s7358_s8  ;;  %v3367_v19 = vshll.u32 %v8836_v59, 16  ;;  %v3018_v44 = vld [vmem:[#allocation3 + $0x9c] sm:$0xe] }
 0x343   : >> { %v3398_v25 = vpop.permute.xlu1 %3397  ;;  %v3362_v24 = vshll.u32 %v8834_v26, 16  ;;  %v3360_v52 = vshrl.u32 %v8834_v26, 16  ;;  %v3369_v36 = vrot.slane %v3367_v19, 1 }
 0x344   : >> { %v3549_v14 = vsel %vm359_vm5, %v8611_v35, %v3398_v25  ;;  %v3501_v35 = vrot.slane %v8634_v48, 1  ;;  %v3505_v48 = vsel %vm1582_vm11, %v3503_v30, %v3504_v34 }
 0x345   : >> { %v3364_v8 = vrot.slane %v3362_v24, 1  ;;  %v3400_v57 = vpop.permute.xlu0 %3399 }
 0x346   : >> { %v3552_v10 = vsel %vm359_vm5, %v8622_v7, %v3400_v57  ;;  %v3502_v32 = vsel %vm1582_vm11, %v3500_v46, %v3501_v35  ;;  %v6592_v7 = vcombine.low %v3016_v40, %v8650_v33  ;;  %v3510_v33 = vrot.slane %v8689_v45, 1 }
 0x347   : >> { %v3365_v38 = vor.u32 %v3364_v8, %v3360_v52  ;;  %v3519_v57 = vrot.slane %v8807_v18, 1 }
 0x348   : >> { %3879 = vmatmul.mubr.bf16.gmra.mrb[64].mxu1 %v3549_v14  ;;  %v3506_v16 = vrot.slane %v6592_v7, 1  ;;  %v3019_v14 = vld [vmem:[#allocation3 + $0xa8] sm:$0xe] }
 0x349   : >> { %6631 = vmatprep.mubr.msk.bf16.mxu1 %vm359_vm5, %v3499_v2  ;;  %v3370_v28 = vsel %vm1275_vm7, %v3365_v38, %v3369_v36  ;;  %v6595_v52 = vcombine.low %v3019_v14, %v8768_v63  ;;  %v6596_v38 = vcombine.low %v3020_v17, %v8797_v43 }
 0x34a   : >> { %3415 = vrot.lane.b32.xlu0 %v3370_v28, %s7358_s8  ;;  %v3508_v56 = vsel %vm1582_vm11, %v3506_v16, %v3507_v49 }
 0x34b   : >> { %v3402_v37 = vpop.permute.xlu1 %3401  ;;  %v3515_v8 = vrot.slane %v6595_v52, 1  ;;  %v3518_v36 = vrot.slane %v6596_v38, 1  ;;  %v7134_v52 = vld [vmem:[#allocation7 + $0x1a4] ss:$8 sps:$4 sm:$0xff]  }
 0x34c   : >> { %v3555_v60 = vsel %vm359_vm5, %v8641_v53, %v3402_v37  ;;  %v6593_v53 = vcombine.low %v3017_v42, %v8683_v47  ;;  %v3513_v47 = vrot.slane %v8748_v61, 1  ;;  %v3516_v61 = vrot.slane %v8775_v12, 1 }
 0x34d   : >> { %v3520_v12 = vsel %vm1582_vm11, %v3518_v36, %v3519_v57  ;;  %v3525_v37 = vrot.slane %v8809_v22, 1  ;;  %v7140_v57 = vld [vmem:[#allocation7 + $0x1c0] ss:$8 sps:$4 sm:$0xff]  }
 0x34e   : >> { %v3404_v39 = vpop.permute.xlu0 %3403  ;;  %v3509_v51 = vrot.slane %v6593_v53, 1  ;;  %v3517_v2 = vsel %vm1582_vm11, %v3515_v8, %v3516_v61  ;;  %v7132_v61 = vld [vmem:[#allocation7 + $0x1a0] ss:$8 sps:$4 sm:$0xff]  }
 0x34f   : >> { %v3558_v4 = vsel %vm359_vm5, %v8665_v29, %v3404_v39  ;;  %v3406_v27 = vpop.permute.xlu1 %3405  ;;  %v6594_v29 = vcombine.low %v3018_v44, %v8741_v31 }
 0x350   : >> { %3889 = vmatmul.mubr.bf16.gmra.mrb[68].mxu1 %v3552_v10  ;;  %v3561_v3 = vsel %vm359_vm5, %v8670_v55, %v3406_v27  ;;  %v3511_v0 = vsel %vm1582_vm11, %v3509_v51, %v3510_v33  ;;  %v3522_v10 = vrot.slane %v8836_v59, 1 }
 0x351   : >> { %6632 = vmatprep.mubr.msk.bf16.mxu1 %vm359_vm5, %v3502_v32  ;;  %v3512_v5 = vrot.slane %v6594_v29, 1  ;;  %v7126_v29 = vld [vmem:[#allocation7 + $0x184] ss:$8 sps:$4 sm:$0xff]  }
 0x352   : >> { %5672 = vmatprep.subr.bf16.mxu0 %v7126_v29 }
 0x353   : >> { %v3514_v45 = vsel %vm1582_vm11, %v3512_v5, %v3513_v47 }
 0x357   : >> { %v3408_v25 = vpop.permute.xlu0 %3407 }
 0x358   : >> { %3899 = vmatmul.mubr.bf16.gmra.mrb[72].mxu1 %v3555_v60  ;;  %v3564_v58 = vsel %vm359_vm5, %v8687_v62, %v3408_v25 }
 0x359   : >> { %6633 = vmatprep.mubr.msk.bf16.mxu1 %vm359_vm5, %v3505_v48 }
 0x360   : >> { %3909 = vmatmul.mubr.bf16.gmra.mrb[76].mxu1 %v3558_v4 }
 0x361   : >> { %6634 = vmatprep.mubr.msk.bf16.mxu1 %vm359_vm5, %v3508_v56 }
 0x368   : >> { %3919 = vmatmul.mubr.bf16.gmra.mrb[80].mxu1 %v3561_v3 }
 0x369   : >> { %6635 = vmatprep.mubr.msk.bf16.mxu1 %vm359_vm5, %v3511_v0  ;;  %v7124_v0 = vld [vmem:[#allocation7 + $0x180] ss:$8 sps:$4 sm:$0xff]  }
 0x36a   : >> { %5673 = vmatpush1.bf16.msra.mxu0 %v7124_v0 }
 0x370   : >> { %3929 = vmatmul.mubr.bf16.gmra.mrb[84].mxu1 %v3564_v58 }
 0x371   : >> { %6636 = vmatprep.mubr.msk.bf16.mxu1 %vm359_vm5, %v3514_v45  ;;  %v7129_v45 = vld [vmem:[#allocation7 + $0x190] ss:$8 sps:$4 sm:$0xff]  }
 0x38f   : >> { %v8879_v55 = vpop.f32.mrb[36].mxu1 }
 0x390   : >> { %v3816_v24 = vpop.f32.mrb[37].mxu1 }
 0x391   : >> { %v8881_v19 = vpop.f32.mrb[38].mxu1  ;;  %v7131_v24 = vld [vmem:[#allocation7 + $0x194] ss:$8 sps:$4 sm:$0xff]  }
 0x392   : >> { %v3819_v31 = vpop.f32.mrb[39].mxu1  ;;  %5674 = vmatprep.subr.bf16.mxu0 %v7131_v24  ;;  %v7158_v24 = vld [vmem:[#allocation7 + $0x204] ss:$8 sps:$4 sm:$0xff]  }
 0x393   : >> { %5675 = vmatpush1.bf16.msra.mxu0 %v7129_v45  ;;  %v7156_v45 = vld [vmem:[#allocation7 + $0x200] ss:$8 sps:$4 sm:$0xff]  }
 0x394   : >> { %5676 = vmatprep.subr.bf16.mxu0 %v7134_v52 }
 0x397   : >> { %5677 = vmatpush1.bf16.msra.mxu0 %v7132_v61 }
 0x39a   : >> { %v3410_v6 = vpop.permute.xlu1 %3409 }
 0x39b   : >> { %v3567_v62 = vsel %vm359_vm5, %v8746_v9, %v3410_v6  ;;  %v3021_v9 = vld [vmem:[#allocation3 + $0xc0] sm:$0xe] }
 0x39c   : >> { %3939 = vmatmul.mubr.bf16.gmra.mrb[88].mxu1 %v3567_v62  ;;  %v6597_v46 = vcombine.low %v3021_v9, %v8831_v15  ;;  %v7137_v62 = vld [vmem:[#allocation7 + $0x1b0] ss:$8 sps:$4 sm:$0xff]   ;;  %v9001_v9 = vld [vmem:[#allocation3 + $0x4] sm:$0xf] }
 0x39d   : >> { %6637 = vmatprep.mubr.msk.bf16.mxu1 %vm359_vm5, %v3517_v2  ;;  %v7139_v2 = vld [vmem:[#allocation7 + $0x1b4] ss:$8 sps:$4 sm:$0xff]  }
 0x39e   : >> { %v3521_v35 = vrot.slane %v6597_v46, 1  ;;  %5678 = vmatprep.subr.bf16.mxu0 %v7139_v2  ;;  %v7145_v46 = vld [vmem:[#allocation7 + $0x1d0] ss:$8 sps:$4 sm:$0xff]  }
 0x39f   : >> { %5679 = vmatpush1.bf16.msra.mxu0 %v7137_v62  ;;  %v7161_v2 = vld [vmem:[#allocation7 + $0x210] ss:$8 sps:$4 sm:$0xff]  }
 0x3a0   : >> { %v3523_v18 = vsel %vm1582_vm11, %v3521_v35, %v3522_v10  ;;  %v7147_v35 = vld [vmem:[#allocation7 + $0x1d4] ss:$8 sps:$4 sm:$0xff]  }
 0x3a5   : >> { %v3412_v28 = vpop.permute.xlu0 %3411 }
 0x3a6   : >> { %v3570_v63 = vsel %vm359_vm5, %v8773_v41, %v3412_v28  ;;  %v3022_v41 = vld [vmem:[#allocation3 + $0xcc] sm:$0xe]  ;;  %v7142_v28 = vld [vmem:[#allocation7 + $0x1c4] ss:$8 sps:$4 sm:$0xff]  }
 0x3a7   : >> { %3949 = vmatmul.mubr.bf16.gmra.mrb[92].mxu1 %v3570_v63  ;;  %v6598_v32 = vcombine.low %v3022_v41, %v8794_v50  ;;  %5680 = vmatprep.subr.bf16.mxu0 %v7142_v28  ;;  %v7148_v41 = vld [vmem:[#allocation7 + $0x1e0] ss:$8 sps:$4 sm:$0xff]  }
 0x3a8   : >> { %6638 = vmatprep.mubr.msk.bf16.mxu1 %vm359_vm5, %v3520_v12  ;;  %v4843_v12 = vld [vmem:[#allocation3] sm:$0xf]  ;;  %5681 = vmatpush1.bf16.msra.mxu0 %v7140_v57  ;;  %v7163_v57 = vld [vmem:[#allocation7 + $0x214] ss:$8 sps:$4 sm:$0xff]  }
 0x3a9   : >> { %v3524_v21 = vrot.slane %v6598_v32, 1  ;;  %5682 = vmatprep.subr.bf16.mxu0 %v7147_v35  ;;  %v7150_v32 = vld [vmem:[#allocation7 + $0x1e4] ss:$8 sps:$4 sm:$0xff]  }
 0x3ab   : >> { %v3526_v15 = vsel %vm1582_vm11, %v3524_v21, %v3525_v37  ;;  %v7123_v37 = vld [vmem:[#allocation3 + $0x8] ss:$0 sps:$4 sm:$0x11]  }
 0x3ac   : >> { %5683 = vmatpush1.bf16.msra.mxu0 %v7145_v46 }
 0x3ad   : >> { %5684 = vmatprep.subr.bf16.mxu0 %v7150_v32  ;;  %v7166_v32 = vld [vmem:[#allocation7 + $0x224] ss:$8 sps:$4 sm:$0xff]  }
 0x3af   : >> { %v3414_v11 = vpop.permute.xlu1 %3413 }
 0x3b0   : >> { %v3573_v43 = vsel %vm359_vm5, %v8805_v54, %v3414_v11  ;;  %5685 = vmatpush1.bf16.msra.mxu0 %v7148_v41  ;;  %v7164_v41 = vld [vmem:[#allocation7 + $0x220] ss:$8 sps:$4 sm:$0xff]  }
 0x3b1   : >> { %3959 = vmatmul.mubr.bf16.gmra.mrb[96].mxu1 %v3573_v43 }
 0x3b2   : >> { %6639 = vmatprep.mubr.msk.bf16.mxu1 %vm359_vm5, %v3523_v18  ;;  %v9012_v18 = vcombine.low %v4843_v12, %v9001_v9 }
 0x3b3   : >> { %v3418_v54 = vpop.permute.xlu1 %3417 }
 0x3b4   : >> { %v3579_v34 = vsel %vm359_vm5, %v8800_v13, %v3418_v54 }
 0x3bc   : >> { %v3416_v30 = vpop.permute.xlu0 %3415 }
 0x3bd   : >> { %v3576_v59 = vsel %vm359_vm5, %v8834_v26, %v3416_v30  ;;  %v5062_v30 = vshll.u32 %v9012_v18, 16 }
 0x3be   : >> { %3969 = vmatmul.mubr.bf16.gmra.mrb[100].mxu1 %v3576_v59  ;;  %v7155_v59 = vld [vmem:[#allocation7 + $0x1f4] ss:$8 sps:$4 sm:$0xff]  }
 0x3bf   : >> { %6640 = vmatprep.mubr.msk.bf16.mxu1 %vm359_vm5, %v3526_v15  ;;  %v7153_v15 = vld [vmem:[#allocation7 + $0x1f0] ss:$8 sps:$4 sm:$0xff]   ;;  %5686 = vmatprep.subr.bf16.mxu0 %v7155_v59  ;;  %v5064_v29 = vrot.slane %v5062_v30, 1  ;;  %v7171_v59 = vld [vmem:[#allocation7 + $0x234] ss:$8 sps:$4 sm:$0xff]  }
 0x3c0   : >> { %5687 = vmatpush1.bf16.msra.mxu0 %v7153_v15  ;;  %v7169_v15 = vld [vmem:[#allocation7 + $0x230] ss:$8 sps:$4 sm:$0xff]  }
 0x3c1   : >> { %5688 = vmatprep.subr.bf16.mxu0 %v7158_v24 }
 0x3c4   : >> { %5689 = vmatpush1.bf16.msra.mxu0 %v7156_v45  ;;  %v4897_v45 = vld [vmem:[#allocation3] sm:$0xe] }
 0x3c5   : >> { %5690 = vmatprep.subr.bf16.mxu0 %v7163_v57 }
 0x3c6   : >> { %3979 = vmatmul.mubr.bf16.gmra.mrb[104].mxu1 %v3579_v34 }
 0x3c8   : >> { %5691 = vmatpush1.bf16.msra.mxu0 %v7161_v2 }
 0x3c9   : >> { %5692 = vmatprep.subr.bf16.mxu0 %v7166_v32  ;;  %v9064_v32 = vld [vmem:[%s10073_s2 + $0x1] ss:$0 sm:$0xff] }
 0x3cc   : >> { %5693 = vmatpush1.bf16.msra.mxu0 %v7164_v41 }
 0x3cd   : >> { %5694 = vmatprep.subr.bf16.mxu0 %v7171_v59 }
 0x3d0   : >> { %5695 = vmatpush1.bf16.msra.mxu0 %v7169_v15 }
 0x3d5   : >> { %v8909_v60 = vpop.f32.mrb[40].mxu1 }
 0x3d6   : >> { %v3824_v50 = vpop.f32.mrb[41].mxu1  ;;  %4019 = vrot.lane.b32.xlu0 %v8909_v60, %s7358_s8 }
 0x3d7   : >> { %v8913_v22 = vpop.f32.mrb[42].mxu1  ;;  %v5060_v50 = vshrl.u32 %v9012_v18, 16 }
 0x3d8   : >> { %v3827_v40 = vpop.f32.mrb[43].mxu1  ;;  %4021 = vrot.lane.b32.xlu1 %v8913_v22, %s7358_s8 }
 0x3d9   : >> { %v5067_v40 = vshll.u32 %v7123_v37, 16  ;;  %v5065_v61 = vor.u32 %v5064_v29, %v5060_v50 }
 0x3db   : >> { %v5069_v62 = vrot.slane %v5067_v40, 1 }
 0x3dd   : >> { %v5070_v35 = vsel %vm1275_vm7, %v5065_v61, %v5069_v62  ;;  %v6711_v61 = vcombine.low %v4897_v45, %v9001_v9  ;;  %v5366_v62 = vrot.slane %v7123_v37, 1 }
 0x3df   : >> { %v5365_v2 = vrot.slane %v6711_v61, 1 }
 0x3e0   : >> { %v8917_v26 = vpop.f32.mrb[44].mxu1 }
 0x3e1   : >> { %v8919_v48 = vpop.f32.mrb[45].mxu1  ;;  %4023 = vrot.lane.b32.xlu0 %v8917_v26, %s7358_s8  ;;  %v5367_v41 = vsel %vm1582_vm11, %v5365_v2, %v5366_v62 }
 0x3e2   : >> { %v8923_v13 = vpop.f32.mrb[46].mxu1  ;;  %6753 = vmatprep.mubr.msk.bf16.mxu0 %vm359_vm5, %v5367_v41 }
 0x3e3   : >> { %v8925_v7 = vpop.f32.mrb[47].mxu1  ;;  %4025 = vrot.lane.b32.xlu1 %v8923_v13, %s7358_s8 }
 0x3eb   : >> { %v8929_v39 = vpop.f32.mrb[48].mxu1 }
 0x3ec   : >> { %v8931_v16 = vpop.f32.mrb[49].mxu1  ;;  %4027 = vrot.lane.b32.xlu0 %v8929_v39, %s7358_s8 }
 0x3ed   : >> { %v8935_v49 = vpop.f32.mrb[50].mxu1 }
 0x3ee   : >> { %v8937_v4 = vpop.f32.mrb[51].mxu1  ;;  %4029 = vrot.lane.b32.xlu1 %v8935_v49, %s7358_s8 }
 0x3f6   : >> { %v8941_v42 = vpop.f32.mrb[52].mxu1 }
 0x3f7   : >> { %v8943_v56 = vpop.f32.mrb[53].mxu1  ;;  %4031 = vrot.lane.b32.xlu0 %v8941_v42, %s7358_s8 }
 0x3f8   : >> { %v8947_v53 = vpop.f32.mrb[54].mxu1 }
 0x3f9   : >> { %4033 = vrot.lane.b32.xlu1 %v8947_v53, %s7358_s8  ;;  %v8951_v27 = vpop.f32.mrb[55].mxu1 }
 0x406   : >> { %v8953_v51 = vpop.f32.mrb[56].mxu1 }
 0x407   : >> { %v8955_v33 = vpop.f32.mrb[57].mxu1  ;;  %4035 = vrot.lane.b32.xlu0 %v8953_v51, %s7358_s8 }
 0x408   : >> { %v8959_v3 = vpop.f32.mrb[58].mxu1 }
 0x409   : >> { %4037 = vrot.lane.b32.xlu1 %v8959_v3, %s7358_s8  ;;  %v8963_v44 = vpop.f32.mrb[59].mxu1 }
 0x413   : >> { %v8965_v25 = vpop.f32.mrb[60].mxu1 }
 0x414   : >> { %4039 = vrot.lane.b32.xlu0 %v8965_v25, %s7358_s8  ;;  %v8969_v5 = vpop.f32.mrb[61].mxu1 }
 0x415   : >> { %v8971_v47 = vpop.f32.mrb[62].mxu1 }
 0x416   : >> { %4041 = vrot.lane.b32.xlu1 %v8971_v47, %s7358_s8  ;;  %v8975_v58 = vpop.f32.mrb[63].mxu1 }
 0x41b   : >> { %v8977_v31 = vpop.f32.mrb[64].mxu1 }
 0x41c   : >> { %4043 = vrot.lane.b32.xlu0 %v8977_v31, %s7358_s8  ;;  %v8981_v14 = vpop.f32.mrb[65].mxu1 }
 0x41d   : >> { %v8983_v8 = vpop.f32.mrb[66].mxu1 }
 0x41e   : >> { %4045 = vrot.lane.b32.xlu1 %v8983_v8, %s7358_s8  ;;  %v8987_v6 = vpop.f32.mrb[67].mxu1 }
 0x423   : >> { %v8989_v17 = vpop.f32.mrb[68].mxu1 }
 0x424   : >> { %4047 = vrot.lane.b32.xlu0 %v8989_v17, %s7358_s8  ;;  %v8993_v38 = vpop.f32.mrb[69].mxu1 }
 0x425   : >> { %v8995_v36 = vpop.f32.mrb[70].mxu1 }
 0x426   : >> { %4049 = vrot.lane.b32.xlu1 %v8995_v36, %s7358_s8  ;;  %v8999_v63 = vpop.f32.mrb[71].mxu1 }
 0x42b   : >> { %v9003_v10 = vpop.f32.mrb[72].mxu1 }
 0x42c   : >> { %4051 = vrot.lane.b32.xlu0 %v9003_v10, %s7358_s8  ;;  %v9007_v11 = vpop.f32.mrb[73].mxu1 }
 0x42d   : >> { %v9009_v43 = vpop.f32.mrb[74].mxu1 }
 0x42e   : >> { %4053 = vrot.lane.b32.xlu1 %v9009_v43, %s7358_s8  ;;  %v9016_v21 = vpop.f32.mrb[75].mxu1 }
 0x433   : >> { %v9019_v54 = vpop.f32.mrb[76].mxu1 }
 0x434   : >> { %4055 = vrot.lane.b32.xlu0 %v9019_v54, %s7358_s8  ;;  %v9023_v34 = vpop.f32.mrb[77].mxu1 }
 0x435   : >> { %v9026_v0 = vpop.f32.mrb[78].mxu1 }
 0x436   : >> { %4057 = vrot.lane.b32.xlu1 %v9026_v0, %s7358_s8  ;;  %v9030_v52 = vpop.f32.mrb[79].mxu1 }
 0x43b   : >> { %v9032_v28 = vpop.f32.mrb[80].mxu1 }
 0x43c   : >> { %10155 = vst [vmem:[#allocation18_spill] sm:$0xff] %v9032_v28  ;;  %4059 = vrot.lane.b32.xlu0 %v9032_v28, %s7358_s8  ;;  %v9036_v12 = vpop.f32.mrb[81].mxu1 }
 0x43d   : >> { %v9038_v46 = vpop.f32.mrb[82].mxu1 }
 0x43e   : >> { %10156 = vst [vmem:[#allocation14_spill] sm:$0xff] %v9038_v46  ;;  %4061 = vrot.lane.b32.xlu1 %v9038_v46, %s7358_s8  ;;  %v9043_v30 = vpop.f32.mrb[83].mxu1 }
 0x440   : >> { %5275 = vrot.lane.b32.xlu0 %v5070_v35, %s7358_s8 }
 0x443   : >> { %v9046_v50 = vpop.f32.mrb[84].mxu1 }
 0x444   : >> { %10157 = vst [vmem:[#allocation15_spill] sm:$0xff] %v9046_v50  ;;  %4063 = vrot.lane.b32.xlu1 %v9046_v50, %s7358_s8  ;;  %v9050_v40 = vpop.f32.mrb[85].mxu1 }
 0x445   : >> { %v9052_v29 = vpop.f32.mrb[86].mxu1 }
 0x446   : >> { %10158 = vst [vmem:[#allocation31_spill] sm:$0xff] %v9052_v29  ;;  %4065 = vrot.lane.b32.xlu0 %v9052_v29, %s7358_s8  ;;  %v9056_v24 = vpop.f32.mrb[87].mxu1 }
 0x448   : >> { %v4020_v57 = vpop.permute.xlu0 %4019 }
 0x449   : >> { %v4115_v35 = vadd.f32 %v4020_v57, %v8879_v55 }
 0x44a   : >> { %v4022_v15 = vpop.permute.xlu1 %4021 }
 0x44b   : >> { %v4147_v59 = vadd.f32 %v4115_v35, %v8919_v48  ;;  %v4116_v29 = vadd.f32 %v4022_v15, %v8881_v19 }
 0x44d   : >> { %v4187_v9 = vadd.f32 %v9064_v32, %v4147_v59  ;;  %v4148_v37 = vadd.f32 %v4116_v29, %v8925_v7 }
 0x44f   : >> { %vm4219_vm6 = vcmp.gt.f32.partialorder %v4187_v9, 0.0  ;;  %v4251_v55 = vmul.f32 0.2, %v4187_v9  ;;  %v4188_v45 = vadd.f32 %v9064_v32, %v4148_v37 }
 0x451   : >> { %v4283_v61 = vsel %vm4219_vm6, %v4187_v9, %v4251_v55  ;;  %vm4220_vm8 = vcmp.gt.f32.partialorder %v4188_v45, 0.0  ;;  %v4252_v62 = vmul.f32 0.2, %v4188_v45 }
 0x452   : >> { %v6843_v2 = vpack.c.bf16 %v4283_v61, %v4283_v61 }
 0x453   : >> { %v4024_v57 = vpop.permute.xlu0 %4023  ;;  %v4284_v50 = vsel %vm4220_vm8, %v4188_v45, %v4252_v62  ;;  %v4731_v45 = vld [vmem:[#allocation3 + $0xc] sm:$0xf] }
 0x454   : >> { %v4117_v41 = vadd.f32 %v4024_v57, %v8909_v60  ;;  %v4412_v46 = vshrl.u32 %v6843_v2, 16  ;;  %v6844_v48 = vpack.c.bf16 %v4284_v50, %v4284_v50  ;;  %v4415_v29 = vshll.u32 %v6843_v2, 16  ;;  %v4735_v2 = vld [vmem:[#allocation3 + $0x14] sm:$0x1] }
 0x455   : >> { %v4026_v35 = vpop.permute.xlu1 %4025 }
 0x456   : >> { %v4149_v19 = vadd.f32 %v4117_v41, %v8931_v16  ;;  %v4118_v15 = vadd.f32 %v4026_v35, %v8913_v22  ;;  %v4414_v7 = vrot.slane %v4412_v46, 7  ;;  %v4420_v59 = vshrl.u32 %v6844_v48, 16 }
 0x457   : >> { %v4423_v28 = vshll.u32 %v6844_v48, 16 }
 0x458   : >> { %v4189_v37 = vadd.f32 %v9064_v32, %v4149_v19  ;;  %v4150_v9 = vadd.f32 %v4118_v15, %v8937_v4  ;;  %v4417_v55 = vor.u32 %v4415_v29, %v4414_v7  ;;  %v4422_v61 = vrot.slane %v4420_v59, 7 }
 0x459   : >> { %v4418_v62 = vrot.slane %v4414_v7, 4 }
 0x45a   : >> { %vm4221_vm9 = vcmp.gt.f32.partialorder %v4189_v37, 0.0  ;;  %v4253_v60 = vmul.f32 0.2, %v4189_v37  ;;  %v4190_v50 = vadd.f32 %v9064_v32, %v4150_v9  ;;  %v4732_v16 = vsel %vm7714_vm15, %v4417_v55, %v4731_v45 }
 0x45b   : >> { %v4425_v22 = vor.u32 %v4423_v28, %v4422_v61  ;;  %v4427_v46 = vrot.slane %v4422_v61, 4  ;;  %4733 = vst [vmem:[#allocation3 + $0xc] sm:$0xf] %v4732_v16 }
 0x45c   : >> { %v4285_v57 = vsel %vm4221_vm9, %v4189_v37, %v4253_v60  ;;  %vm4222_vm10 = vcmp.gt.f32.partialorder %v4190_v50, 0.0  ;;  %v4254_v41 = vmul.f32 0.2, %v4190_v50  ;;  %v4738_v60 = vld [vmem:[#allocation3 + $0x18] sm:$0xf] }
 0x45d   : >> { %v4426_v4 = vsel %vm7720_vm1, %v4418_v62, %v4425_v22  ;;  %v4736_v48 = vsel %vm7551_vm3, %v4427_v46, %v4735_v2  ;;  %v6845_v35 = vpack.c.bf16 %v4285_v57, %v4285_v57  ;;  %v4742_v2 = vld [vmem:[#allocation3 + $0x20] sm:$0x1] }
 0x45e   : >> { %4734 = vst.msk [vmem:[#allocation3 + $0x10] sm:$0xf] %vm205_vm0, %v4426_v4  ;;  %4737 = vst [vmem:[#allocation3 + $0x14] sm:$0x1] %v4736_v48  ;;  %v4286_v19 = vsel %vm4222_vm10, %v4190_v50, %v4254_v41  ;;  %v4028_v15 = vpop.permute.xlu0 %4027 }
 0x45f   : >> { %v4429_v7 = vshrl.u32 %v6845_v35, 16  ;;  %v6846_v28 = vpack.c.bf16 %v4286_v19, %v4286_v19  ;;  %v4119_v29 = vadd.f32 %v4028_v15, %v8917_v26  ;;  %v4432_v9 = vshll.u32 %v6845_v35, 16 }
 0x460   : >> { %v4030_v59 = vpop.permute.xlu1 %4029 }
 0x461   : >> { %v4431_v37 = vrot.slane %v4429_v7, 7  ;;  %v4437_v55 = vshrl.u32 %v6846_v28, 16  ;;  %v4151_v61 = vadd.f32 %v4119_v29, %v8943_v56  ;;  %v4120_v45 = vadd.f32 %v4030_v59, %v8923_v13 }
 0x462   : >> { %v4440_v22 = vshll.u32 %v6846_v28, 16  ;;  %v4845_v41 = vld [vmem:[#allocation3 + $0xc] sm:$0xf] }
 0x463   : >> { %v4434_v62 = vor.u32 %v4432_v9, %v4431_v37  ;;  %v4439_v16 = vrot.slane %v4437_v55, 7  ;;  %v4191_v46 = vadd.f32 %v9064_v32, %v4151_v61  ;;  %v4435_v50 = vrot.slane %v4431_v37, 4  ;;  %v4898_v26 = vld [vmem:[#allocation3 + $0xc] sm:$0xe] }
 0x464   : >> { %v4152_v57 = vadd.f32 %v4120_v45, %v8951_v27 }
 0x465   : >> { %v4739_v4 = vsel %vm7714_vm15, %v4434_v62, %v4738_v60  ;;  %v4442_v48 = vor.u32 %v4440_v22, %v4439_v16  ;;  %v4444_v35 = vrot.slane %v4439_v16, 4  ;;  %vm4223_vm12 = vcmp.gt.f32.partialorder %v4191_v46, 0.0  ;;  %v4846_v56 = vld [vmem:[#allocation3 + $0x10] sm:$0xf] }
 0x466   : >> { %4740 = vst [vmem:[#allocation3 + $0x18] sm:$0xf] %v4739_v4  ;;  %v4255_v13 = vmul.f32 0.2, %v4191_v46  ;;  %v4192_v19 = vadd.f32 %v9064_v32, %v4152_v57  ;;  %v9093_v15 = vcombine.low %v4845_v41, %v4846_v56  ;;  %v6712_v28 = vcombine.low %v4898_v26, %v4846_v56 }
 0x467   : >> { %v7128_v7 = vld [vmem:[#allocation3 + $0x14] ss:$0 sps:$4 sm:$0x11]   ;;  %v4443_v27 = vsel %vm7720_vm1, %v4435_v50, %v4442_v48  ;;  %v4743_v29 = vsel %vm7551_vm3, %v4444_v35, %v4742_v2 }
 0x468   : >> { %4741 = vst.msk [vmem:[#allocation3 + $0x1c] sm:$0xf] %vm205_vm0, %v4443_v27  ;;  %4744 = vst [vmem:[#allocation3 + $0x20] sm:$0x1] %v4743_v29  ;;  %v4287_v59 = vsel %vm4223_vm12, %v4191_v46, %v4255_v13  ;;  %vm4224_vm13 = vcmp.gt.f32.partialorder %v4192_v19, 0.0  ;;  %v5074_v55 = vshll.u32 %v9093_v15, 16 }
 0x469   : >> { %v4256_v37 = vmul.f32 0.2, %v4192_v19  ;;  %v6847_v9 = vpack.c.bf16 %v4287_v59, %v4287_v59  ;;  %v5079_v61 = vshll.u32 %v7128_v7, 16  ;;  %v5368_v45 = vrot.slane %v6712_v28, 1  ;;  %v4032_v57 = vpop.permute.xlu0 %4031 }
 0x46a   : >> { %v5369_v62 = vrot.slane %v7128_v7, 1  ;;  %v5072_v50 = vshrl.u32 %v9093_v15, 16  ;;  %v5076_v41 = vrot.slane %v5074_v55, 1  ;;  %v4121_v26 = vadd.f32 %v4032_v57, %v8929_v39  ;;  %v4745_v55 = vld [vmem:[#allocation3 + $0x24] sm:$0xf] }
 0x46b   : >> { %v4288_v60 = vsel %vm4224_vm13, %v4192_v19, %v4256_v37  ;;  %v4446_v16 = vshrl.u32 %v6847_v9, 16  ;;  %v4449_v2 = vshll.u32 %v6847_v9, 16  ;;  %v4034_v35 = vpop.permute.xlu1 %4033  ;;  %v5081_v13 = vrot.slane %v5079_v61, 1 }
 0x46c   : >> { %v6848_v22 = vpack.c.bf16 %v4288_v60, %v4288_v60  ;;  %v9104_v46 = vsel %vm1582_vm11, %v5368_v45, %v5369_v62  ;;  %v5077_v56 = vor.u32 %v5076_v41, %v5072_v50  ;;  %v4153_v19 = vadd.f32 %v4121_v26, %v8955_v33  ;;  %v4749_v41 = vld [vmem:[#allocation3 + $0x2c] sm:$0x1] }
 0x46d   : >> { %v4448_v4 = vrot.slane %v4446_v16, 7  ;;  %v4122_v7 = vadd.f32 %v4034_v35, %v8935_v49  ;;  %v4847_v28 = vld [vmem:[#allocation3 + $0x18] sm:$0xf] }
 0x46e   : >> { %v4454_v48 = vshrl.u32 %v6848_v22, 16  ;;  %v4899_v27 = vld [vmem:[#allocation3 + $0x18] sm:$0xe]  ;;  %v4457_v37 = vshll.u32 %v6848_v22, 16  ;;  %v5082_v9 = vsel %vm1275_vm7, %v5077_v56, %v5081_v13  ;;  %v4193_v45 = vadd.f32 %v9064_v32, %v4153_v19 }
 0x46f   : >> { %v4451_v29 = vor.u32 %v4449_v2, %v4448_v4  ;;  %v4848_v39 = vld [vmem:[#allocation3 + $0x1c] sm:$0xf]  ;;  %v4154_v60 = vadd.f32 %v4122_v7, %v8963_v44  ;;  %5277 = vrot.lane.b32.xlu1 %v5082_v9, %s7358_s8  ;;  %v7136_v33 = vld [vmem:[#allocation3 + $0x20] ss:$0 sps:$4 sm:$0x11]   ;;  %v4452_v49 = vrot.slane %v4448_v4, 4 }
 0x470   : >> { %v4456_v59 = vrot.slane %v4454_v48, 7  ;;  %v9112_v61 = vcombine.low %v4847_v28, %v4848_v39  ;;  %v6713_v62 = vcombine.low %v4899_v27, %v4848_v39  ;;  %v9116_v50 = vpop.f32.mrb[88].mxu1  ;;  %vm4225_vm14 = vcmp.gt.f32.partialorder %v4193_v45, 0.0 }
 0x471   : >> { %v4746_v16 = vsel %vm7714_vm15, %v4451_v29, %v4745_v55  ;;  %v4257_v2 = vmul.f32 0.2, %v4193_v45  ;;  %v4194_v44 = vadd.f32 %v9064_v32, %v4154_v60  ;;  %4067 = vrot.lane.b32.xlu0 %v9116_v50, %s7358_s8  ;;  %v9121_v26 = vpop.f32.mrb[89].mxu1  ;;  %v5091_v13 = vshll.u32 %v7136_v33, 16 }
 0x472   : >> { %v4459_v57 = vor.u32 %v4457_v37, %v4456_v59  ;;  %v4461_v22 = vrot.slane %v4456_v59, 4  ;;  %4747 = vst [vmem:[#allocation3 + $0x24] sm:$0xf] %v4746_v16  ;;  %v9127_v35 = vpop.f32.mrb[90].mxu1  ;;  %v5086_v56 = vshll.u32 %v9112_v61, 16  ;;  %v5371_v27 = vrot.slane %v6713_v62, 1 }
 0x473   : >> { %v4289_v19 = vsel %vm4225_vm14, %v4193_v45, %v4257_v2  ;;  %vm4226_vm6 = vcmp.gt.f32.partialorder %v4194_v44, 0.0  ;;  %v4258_v7 = vmul.f32 0.2, %v4194_v44  ;;  %v9131_v28 = vpop.f32.mrb[91].mxu1  ;;  %4069 = vrot.lane.b32.xlu1 %v9127_v35, %s7358_s8  ;;  %v5084_v59 = vshrl.u32 %v9112_v61, 16 }
 0x474   : >> { %v4460_v4 = vsel %vm7720_vm1, %v4452_v49, %v4459_v57  ;;  %v4750_v48 = vsel %vm7551_vm3, %v4461_v22, %v4749_v41  ;;  %v6849_v29 = vpack.c.bf16 %v4289_v19, %v4289_v19  ;;  %v5088_v37 = vrot.slane %v5086_v56, 1 }
 0x475   : >> { %4748 = vst.msk [vmem:[#allocation3 + $0x28] sm:$0xf] %vm205_vm0, %v4460_v4  ;;  %4751 = vst [vmem:[#allocation3 + $0x2c] sm:$0x1] %v4750_v48  ;;  %v5372_v9 = vrot.slane %v7136_v33, 1  ;;  %v4290_v39 = vsel %vm4226_vm6, %v4194_v44, %v4258_v7  ;;  %v5093_v16 = vrot.slane %v5091_v13, 1 }
 0x476   : >> { %v4463_v55 = vshrl.u32 %v6849_v29, 16  ;;  %v6850_v60 = vpack.c.bf16 %v4290_v39, %v4290_v39  ;;  %v5089_v49 = vor.u32 %v5088_v37, %v5084_v59  ;;  %v4466_v22 = vshll.u32 %v6849_v29, 16  ;;  %v4752_v4 = vld [vmem:[#allocation3 + $0x30] sm:$0xf] }
 0x477   : >> { %v9137_v45 = vsel %vm1582_vm11, %v5371_v27, %v5372_v9 }
 0x478   : >> { %v4465_v57 = vrot.slane %v4463_v55, 7  ;;  %v4471_v41 = vshrl.u32 %v6850_v60, 16  ;;  %v5094_v2 = vsel %vm1275_vm7, %v5089_v49, %v5093_v16  ;;  %v4474_v62 = vshll.u32 %v6850_v60, 16 }
 0x479   : >> { %5279 = vrot.lane.b32.xlu0 %v5094_v2, %s7358_s8  ;;  %v4849_v33 = vld [vmem:[#allocation3 + $0x24] sm:$0xf]  ;;  %v4036_v19 = vpop.permute.xlu0 %4035  ;;  %v4756_v2 = vld [vmem:[#allocation3 + $0x38] sm:$0x1] }
 0x47a   : >> { %v9141_v48 = vpop.f32.mrb[92].mxu1  ;;  %v4468_v44 = vor.u32 %v4466_v22, %v4465_v57  ;;  %v4473_v56 = vrot.slane %v4471_v41, 7  ;;  %v4900_v27 = vld [vmem:[#allocation3 + $0x24] sm:$0xe]  ;;  %v4123_v29 = vadd.f32 %v4036_v19, %v8941_v42  ;;  %v4469_v55 = vrot.slane %v4465_v57, 4 }
 0x47b   : >> { %10159 = vst [vmem:[#allocation20_spill] sm:$0xff] %v9141_v48  ;;  %v9143_v7 = vpop.f32.mrb[93].mxu1  ;;  %4071 = vrot.lane.b32.xlu1 %v9141_v48, %s7358_s8  ;;  %v4038_v22 = vpop.permute.xlu1 %4037 }
 0x47c   : >> { %v4850_v13 = vld [vmem:[#allocation3 + $0x28] sm:$0xf]  ;;  %v9148_v59 = vpop.f32.mrb[94].mxu1  ;;  %v7144_v9 = vld [vmem:[#allocation3 + $0x2c] ss:$0 sps:$4 sm:$0x11]   ;;  %v4753_v60 = vsel %vm7714_vm15, %v4468_v44, %v4752_v4  ;;  %v4476_v49 = vor.u32 %v4474_v62, %v4473_v56  ;;  %v4155_v48 = vadd.f32 %v4123_v29, %v8969_v5  ;;  %v4124_v42 = vadd.f32 %v4038_v22, %v8947_v53 }
 0x47d   : >> { %10160 = vst [vmem:[#allocation22_spill] sm:$0xff] %v9148_v59  ;;  %v9150_v37 = vcombine.low %v4849_v33, %v4850_v13  ;;  %v6714_v39 = vcombine.low %v4900_v27, %v4850_v13  ;;  %v4478_v16 = vrot.slane %v4473_v56, 4  ;;  %v9154_v41 = vpop.f32.mrb[95].mxu1  ;;  %4754 = vst [vmem:[#allocation3 + $0x30] sm:$0xf] %v4753_v60  ;;  %4073 = vrot.lane.b32.xlu0 %v9148_v59, %s7358_s8  ;;  %v5103_v44 = vshll.u32 %v7144_v9, 16 }
 0x47e   : >> { %v4477_v4 = vsel %vm7720_vm1, %v4469_v55, %v4476_v49  ;;  %v4195_v53 = vadd.f32 %v9064_v32, %v4155_v48  ;;  %v4156_v5 = vadd.f32 %v4124_v42, %v8975_v58  ;;  %v5375_v13 = vrot.slane %v7144_v9, 1 }
 0x47f   : >> { %10161 = vst [vmem:[#allocation13_spill] sm:$0xff] %v9150_v37  ;;  %v5096_v33 = vshrl.u32 %v9150_v37, 16  ;;  %v5098_v57 = vshll.u32 %v9150_v37, 16  ;;  %v4757_v62 = vsel %vm7551_vm3, %v4478_v16, %v4756_v2  ;;  %v5374_v56 = vrot.slane %v6714_v39, 1  ;;  %4755 = vst.msk [vmem:[#allocation3 + $0x34] sm:$0xf] %vm205_vm0, %v4477_v4 }
 0x480   : >> { %4758 = vst [vmem:[#allocation3 + $0x38] sm:$0x1] %v4757_v62  ;;  %v5105_v27 = vrot.slane %v5103_v44, 1  ;;  %vm4227_vm8 = vcmp.gt.f32.partialorder %v4195_v53, 0.0  ;;  %v4259_v29 = vmul.f32 0.2, %v4195_v53  ;;  %v4196_v60 = vadd.f32 %v9064_v32, %v4156_v5 }
 0x481   : >> { %v5100_v19 = vrot.slane %v5098_v57, 1  ;;  %v9171_v49 = vsel %vm1582_vm11, %v5374_v56, %v5375_v13 }
 0x482   : >> { %v4291_v16 = vsel %vm4227_vm8, %v4195_v53, %v4259_v29  ;;  %vm4228_vm9 = vcmp.gt.f32.partialorder %v4196_v60, 0.0  ;;  %v4260_v39 = vmul.f32 0.2, %v4196_v60 }
 0x483   : >> { %v5101_v55 = vor.u32 %v5100_v19, %v5096_v33  ;;  %v6851_v2 = vpack.c.bf16 %v4291_v16, %v4291_v16 }
 0x484   : >> { %v4292_v58 = vsel %vm4228_vm9, %v4196_v60, %v4260_v39  ;;  %v9175_v9 = vpop.f32.mrb[96].mxu1  ;;  %v4851_v42 = vld [vmem:[#allocation3 + $0x30] sm:$0xf] }
 0x485   : >> { %v5106_v22 = vsel %vm1275_vm7, %v5101_v55, %v5105_v27  ;;  %10162 = vst [vmem:[#allocation16_spill] sm:$0xff] %v9175_v9  ;;  %v4901_v57 = vld [vmem:[#allocation3 + $0x30] sm:$0xe]  ;;  %v4480_v4 = vshrl.u32 %v6851_v2, 16  ;;  %v4483_v62 = vshll.u32 %v6851_v2, 16  ;;  %v6852_v33 = vpack.c.bf16 %v4292_v58, %v4292_v58  ;;  %v9178_v56 = vpop.f32.mrb[97].mxu1  ;;  %4075 = vrot.lane.b32.xlu0 %v9175_v9, %s7358_s8 }
 0x486   : >> { %5281 = vrot.lane.b32.xlu1 %v5106_v22, %s7358_s8  ;;  %v4040_v48 = vpop.permute.xlu0 %4039  ;;  %v4852_v53 = vld [vmem:[#allocation3 + $0x34] sm:$0xf]  ;;  %v9182_v19 = vpop.f32.mrb[98].mxu1 }
 0x487   : >> { %v4125_v44 = vadd.f32 %v4040_v48, %v8953_v51  ;;  %10163 = vst [vmem:[#allocation24_spill] sm:$0xff] %v9182_v19  ;;  %v9184_v13 = vcombine.low %v4851_v42, %v4852_v53  ;;  %v7152_v27 = vld [vmem:[#allocation3 + $0x38] ss:$0 sps:$4 sm:$0x11]   ;;  %v6715_v29 = vcombine.low %v4901_v57, %v4852_v53  ;;  %v4482_v60 = vrot.slane %v4480_v4, 7  ;;  %v9187_v22 = vpop.f32.mrb[99].mxu1 }
 0x488   : >> { %v4042_v5 = vpop.permute.xlu1 %4041  ;;  %v4488_v55 = vshrl.u32 %v6852_v33, 16  ;;  %v4491_v16 = vshll.u32 %v6852_v33, 16  ;;  %v5115_v48 = vshll.u32 %v7152_v27, 16  ;;  %v4759_v33 = vld [vmem:[#allocation3 + $0x3c] sm:$0xf] }
 0x489   : >> { %10164 = vst [vmem:[#allocation17_spill] sm:$0xff] %v9184_v13  ;;  %v4157_v39 = vadd.f32 %v4125_v44, %v8981_v14  ;;  %v4126_v51 = vadd.f32 %v4042_v5, %v8959_v3  ;;  %v5108_v2 = vshrl.u32 %v9184_v13, 16  ;;  %v5110_v58 = vshll.u32 %v9184_v13, 16  ;;  %v4763_v13 = vld [vmem:[#allocation3 + $0x44] sm:$0x1] }
 0x48a   : >> { %4077 = vrot.lane.b32.xlu1 %v9182_v19, %s7358_s8  ;;  %v4485_v42 = vor.u32 %v4483_v62, %v4482_v60  ;;  %v4486_v9 = vrot.slane %v4482_v60, 4  ;;  %v4490_v57 = vrot.slane %v4488_v55, 7  ;;  %v5117_v53 = vrot.slane %v5115_v48, 1 }
 0x48b   : >> { %v4197_v4 = vadd.f32 %v9064_v32, %v4157_v39  ;;  %v4158_v14 = vadd.f32 %v4126_v51, %v8987_v6  ;;  %v5112_v44 = vrot.slane %v5110_v58, 1  ;;  %v5377_v59 = vrot.slane %v6715_v29, 1 }
 0x48c   : >> { %v4760_v19 = vsel %vm7714_vm15, %v4485_v42, %v4759_v33  ;;  %v4493_v3 = vor.u32 %v4491_v16, %v4490_v57  ;;  %v4495_v5 = vrot.slane %v4490_v57, 4  ;;  %v5378_v39 = vrot.slane %v7152_v27, 1 }
 0x48d   : >> { %vm4229_vm10 = vcmp.gt.f32.partialorder %v4197_v4, 0.0  ;;  %4761 = vst [vmem:[#allocation3 + $0x3c] sm:$0xf] %v4760_v19  ;;  %v4261_v37 = vmul.f32 0.2, %v4197_v4  ;;  %v4198_v62 = vadd.f32 %v9064_v32, %v4158_v14  ;;  %v5113_v55 = vor.u32 %v5112_v44, %v5108_v2 }
 0x48e   : >> { %v4044_v60 = vpop.permute.xlu0 %4043  ;;  %v4494_v6 = vsel %vm7720_vm1, %v4486_v9, %v4493_v3  ;;  %v4764_v29 = vsel %vm7551_vm3, %v4495_v5, %v4763_v13  ;;  %v9210_v9 = vsel %vm1582_vm11, %v5377_v59, %v5378_v39 }
 0x48f   : >> { %v4127_v51 = vadd.f32 %v4044_v60, %v8965_v25  ;;  %4762 = vst.msk [vmem:[#allocation3 + $0x40] sm:$0xf] %vm205_vm0, %v4494_v6  ;;  %4765 = vst [vmem:[#allocation3 + $0x44] sm:$0x1] %v4764_v29  ;;  %v4293_v16 = vsel %vm4229_vm10, %v4197_v4, %v4261_v37  ;;  %vm4230_vm12 = vcmp.gt.f32.partialorder %v4198_v62, 0.0  ;;  %v5118_v48 = vsel %vm1275_vm7, %v5113_v55, %v5117_v53 }
 0x490   : >> { %v4262_v19 = vmul.f32 0.2, %v4198_v62  ;;  %v4046_v58 = vpop.permute.xlu1 %4045  ;;  %v6853_v42 = vpack.c.bf16 %v4293_v16, %v4293_v16  ;;  %5283 = vrot.lane.b32.xlu0 %v5118_v48, %s7358_s8  ;;  %v4766_v16 = vld [vmem:[#allocation3 + $0x48] sm:$0xf] }
 0x491   : >> { %v4159_v27 = vadd.f32 %v4127_v51, %v8993_v38  ;;  %v4128_v2 = vadd.f32 %v4046_v58, %v8971_v47  ;;  %v3970_v13 = vpop.f32.mrb[100].mxu1 }
 0x492   : >> { %v4294_v25 = vsel %vm4230_vm12, %v4198_v62, %v4262_v19  ;;  %v4497_v57 = vshrl.u32 %v6853_v42, 16  ;;  %v9213_v4 = vpop.f32.mrb[101].mxu1  ;;  %4079 = vrot.lane.b32.xlu1 %v3970_v13, %s7358_s8  ;;  %v4500_v47 = vshll.u32 %v6853_v42, 16 }
 0x493   : >> { %v6854_v33 = vpack.c.bf16 %v4294_v25, %v4294_v25  ;;  %v4199_v37 = vadd.f32 %v9064_v32, %v4159_v27  ;;  %v4160_v14 = vadd.f32 %v4128_v2, %v8999_v63  ;;  %v3974_v38 = vpop.f32.mrb[102].mxu1 }
 0x494   : >> { %v4499_v44 = vrot.slane %v4497_v57, 7  ;;  %v9217_v3 = vpop.f32.mrb[103].mxu1  ;;  %4081 = vrot.lane.b32.xlu0 %v3974_v38, %s7358_s8  ;;  %v4853_v55 = vld [vmem:[#allocation3 + $0x3c] sm:$0xf] }
 0x495   : >> { %v4505_v53 = vshrl.u32 %v6854_v33, 16  ;;  %vm4231_vm13 = vcmp.gt.f32.partialorder %v4199_v37, 0.0  ;;  %v4508_v59 = vshll.u32 %v6854_v33, 16  ;;  %v4263_v5 = vmul.f32 0.2, %v4199_v37 }
 0x496   : >> { %v4200_v62 = vadd.f32 %v9064_v32, %v4160_v14  ;;  %v4048_v60 = vpop.permute.xlu0 %4047  ;;  %v4502_v39 = vor.u32 %v4500_v47, %v4499_v44  ;;  %v4503_v6 = vrot.slane %v4499_v44, 4  ;;  %v9222_v51 = vld [vmem:[#allocation3 + $0x40] sm:$0xf]  ;;  %v9229_v57 = vld [vmem:[#allocation3 + $0x44] ss:$0 sps:$4 sm:$0x11]  }
 0x497   : >> { %v4507_v29 = vrot.slane %v4505_v53, 7  ;;  %v4129_v63 = vadd.f32 %v4048_v60, %v8977_v31  ;;  %v4295_v19 = vsel %vm4231_vm13, %v4199_v37, %v4263_v5  ;;  %v9225_v42 = vcombine.low %v4853_v55, %v9222_v51  ;;  %v4770_v31 = vld [vmem:[#allocation3 + $0x50] sm:$0x1] }
 0x498   : >> { %vm4232_vm14 = vcmp.gt.f32.partialorder %v4200_v62, 0.0  ;;  %v4264_v58 = vmul.f32 0.2, %v4200_v62  ;;  %v4050_v48 = vpop.permute.xlu1 %4049  ;;  %v4767_v27 = vsel %vm7714_vm15, %v4502_v39, %v4766_v16  ;;  %v6855_v13 = vpack.c.bf16 %v4295_v19, %v4295_v19  ;;  %v4777_v19 = vld [vmem:[#allocation3 + $0x5c] sm:$0x1] }
 0x499   : >> { %v4510_v2 = vor.u32 %v4508_v59, %v4507_v29  ;;  %v4512_v25 = vrot.slane %v4507_v29, 4  ;;  %4768 = vst [vmem:[#allocation3 + $0x48] sm:$0xf] %v4767_v27  ;;  %v4161_v14 = vadd.f32 %v4129_v63, %v9007_v11  ;;  %v4130_v37 = vadd.f32 %v4050_v48, %v8983_v8  ;;  %v3980_v44 = vpop.f32.mrb[104].mxu1  ;;  %v9244_v29 = vld [vmem:[#allocation3 + $0x3c] sm:$0xe] }
 0x49a   : >> { %v4296_v33 = vsel %vm4232_vm14, %v4200_v62, %v4264_v58  ;;  %v5120_v38 = vshrl.u32 %v9225_v42, 16  ;;  %v4514_v59 = vshrl.u32 %v6855_v13, 16  ;;  %v4517_v5 = vshll.u32 %v6855_v13, 16  ;;  %v9238_v60 = vpop.f32.mrb[105].mxu1 }
 0x49b   : >> { %v4511_v47 = vsel %vm7720_vm1, %v4503_v6, %v4510_v2  ;;  %v4771_v53 = vsel %vm7551_vm3, %v4512_v25, %v4770_v31  ;;  %v6856_v62 = vpack.c.bf16 %v4296_v33, %v4296_v33  ;;  %v4201_v11 = vadd.f32 %v9064_v32, %v4161_v14  ;;  %v3983_v39 = vpop.f32.mrb[106].mxu1  ;;  %v4773_v14 = vld [vmem:[#allocation3 + $0x54] sm:$0xf] }
 0x49c   : >> { %4769 = vst.msk [vmem:[#allocation3 + $0x4c] sm:$0xf] %vm205_vm0, %v4511_v47  ;;  %4772 = vst [vmem:[#allocation3 + $0x50] sm:$0x1] %v4771_v53  ;;  %v4162_v8 = vadd.f32 %v4130_v37, %v9016_v21  ;;  %v5122_v55 = vshll.u32 %v9225_v42, 16  ;;  %v4516_v6 = vrot.slane %v4514_v59, 7 }
 0x49d   : >> { %v5127_v63 = vshll.u32 %v9229_v57, 16  ;;  %v9247_v16 = vpop.f32.mrb[107].mxu1  ;;  %v4522_v48 = vshrl.u32 %v6856_v62, 16  ;;  %v4525_v27 = vshll.u32 %v6856_v62, 16  ;;  %vm4233_vm6 = vcmp.gt.f32.partialorder %v4201_v11, 0.0 }
 0x49e   : >> { %v4265_v2 = vmul.f32 0.2, %v4201_v11  ;;  %v4052_v21 = vpop.permute.xlu0 %4051  ;;  %v4519_v25 = vor.u32 %v4517_v5, %v4516_v6  ;;  %v4520_v13 = vrot.slane %v4516_v6, 4  ;;  %v4202_v31 = vadd.f32 %v9064_v32, %v4162_v8 }
 0x49f   : >> { %v4131_v33 = vadd.f32 %v4052_v21, %v8989_v17  ;;  %v4524_v37 = vrot.slane %v4522_v48, 7  ;;  %v5124_v53 = vrot.slane %v5122_v55, 1  ;;  %v5129_v59 = vrot.slane %v5127_v63, 1 }
 0x4a0   : >> { %v4297_v44 = vsel %vm4233_vm6, %v4201_v11, %v4265_v2  ;;  %v4054_v47 = vpop.permute.xlu1 %4053  ;;  %v4774_v39 = vsel %vm7714_vm15, %v4519_v25, %v4773_v14  ;;  %vm4234_vm8 = vcmp.gt.f32.partialorder %v4202_v31, 0.0  ;;  %v4266_v62 = vmul.f32 0.2, %v4202_v31 }
 0x4a1   : >> { %v6857_v58 = vpack.c.bf16 %v4297_v44, %v4297_v44  ;;  %4775 = vst [vmem:[#allocation3 + $0x54] sm:$0xf] %v4774_v39  ;;  %v4527_v5 = vor.u32 %v4525_v27, %v4524_v37  ;;  %v4529_v6 = vrot.slane %v4524_v37, 4  ;;  %v4163_v8 = vadd.f32 %v4131_v33, %v9023_v34  ;;  %v4855_v37 = vld [vmem:[#allocation3 + $0x48] sm:$0xf] }
 0x4a2   : >> { %v4132_v17 = vadd.f32 %v4054_v47, %v8995_v36  ;;  %v4298_v11 = vsel %vm4234_vm8, %v4202_v31, %v4266_v62  ;;  %v5125_v2 = vor.u32 %v5124_v53, %v5120_v38  ;;  %v4780_v62 = vld [vmem:[#allocation3 + $0x60] sm:$0xf] }
 0x4a3   : >> { %v4531_v21 = vshrl.u32 %v6857_v58, 16  ;;  %v4534_v48 = vshll.u32 %v6857_v58, 16  ;;  %v9258_v55 = vld [vmem:[#allocation3 + $0x4c] sm:$0xf]  ;;  %v4528_v63 = vsel %vm7720_vm1, %v4520_v13, %v4527_v5  ;;  %v4778_v25 = vsel %vm7551_vm3, %v4529_v6, %v4777_v19 }
 0x4a4   : >> { %v6858_v14 = vpack.c.bf16 %v4298_v11, %v4298_v11  ;;  %v4203_v27 = vadd.f32 %v9064_v32, %v4163_v8  ;;  %4776 = vst.msk [vmem:[#allocation3 + $0x58] sm:$0xf] %vm205_vm0, %v4528_v63  ;;  %4779 = vst [vmem:[#allocation3 + $0x5c] sm:$0x1] %v4778_v25  ;;  %v4164_v34 = vadd.f32 %v4132_v17, %v9030_v52 }
 0x4a5   : >> { %v4533_v36 = vrot.slane %v4531_v21, 7  ;;  %v5130_v38 = vsel %vm1275_vm7, %v5125_v2, %v5129_v59  ;;  %v9269_v58 = vcombine.low %v4855_v37, %v9258_v55 }
 0x4a6   : >> { %v4539_v31 = vshrl.u32 %v6858_v14, 16  ;;  %v4542_v13 = vshll.u32 %v6858_v14, 16  ;;  %vm4235_vm9 = vcmp.gt.f32.partialorder %v4203_v27, 0.0  ;;  %v4267_v33 = vmul.f32 0.2, %v4203_v27  ;;  %5285 = vrot.lane.b32.xlu1 %v5130_v38, %s7358_s8  ;;  %v4056_v19 = vpop.permute.xlu0 %4055 }
 0x4a7   : >> { %v4536_v44 = vor.u32 %v4534_v48, %v4533_v36  ;;  %v4537_v47 = vrot.slane %v4533_v36, 4  ;;  %v4204_v53 = vadd.f32 %v9064_v32, %v4164_v34  ;;  %v4133_v39 = vadd.f32 %v4056_v19, %v9003_v10  ;;  %v9278_v48 = vld [vmem:[#allocation3 + $0x50] ss:$0 sps:$4 sm:$0x11]   ;;  %v4784_v14 = vld [vmem:[#allocation3 + $0x68] sm:$0x1] }
 0x4a8   : >> { %v4541_v52 = vrot.slane %v4539_v31, 7  ;;  %v4299_v5 = vsel %vm4235_vm9, %v4203_v27, %v4267_v33  ;;  %v4058_v59 = vpop.permute.xlu1 %4057  ;;  %v5132_v6 = vshrl.u32 %v9269_v58, 16  ;;  %v5134_v8 = vshll.u32 %v9269_v58, 16 }
 0x4a9   : >> { %v4781_v17 = vsel %vm7714_vm15, %v4536_v44, %v4780_v62  ;;  %v6859_v21 = vpack.c.bf16 %v4299_v5, %v4299_v5  ;;  %vm4236_vm10 = vcmp.gt.f32.partialorder %v4204_v53, 0.0  ;;  %v4268_v11 = vmul.f32 0.2, %v4204_v53 }
 0x4aa   : >> { %4782 = vst [vmem:[#allocation3 + $0x60] sm:$0xf] %v4781_v17  ;;  %v4544_v2 = vor.u32 %v4542_v13, %v4541_v52  ;;  %v4546_v63 = vrot.slane %v4541_v52, 4  ;;  %v4165_v10 = vadd.f32 %v4133_v39, %v9036_v12  ;;  %v4134_v25 = vadd.f32 %v4058_v59, %v9009_v43 }
 0x4ab   : >> { %v4548_v27 = vshrl.u32 %v6859_v21, 16  ;;  %v4551_v37 = vshll.u32 %v6859_v21, 16  ;;  %v4300_v36 = vsel %vm4236_vm10, %v4204_v53, %v4268_v11  ;;  %v5136_v34 = vrot.slane %v5134_v8, 1  ;;  %v9290_v53 = vld [vmem:[#allocation3 + $0x58] sm:$0xf] }
 0x4ac   : >> { %v4545_v38 = vsel %vm7720_vm1, %v4537_v47, %v4544_v2  ;;  %v4785_v31 = vsel %vm7551_vm3, %v4546_v63, %v4784_v14  ;;  %v6860_v33 = vpack.c.bf16 %v4300_v36, %v4300_v36  ;;  %v4205_v19 = vadd.f32 %v9064_v32, %v4165_v10  ;;  %v4857_v21 = vld [vmem:[#allocation3 + $0x54] sm:$0xf]  ;;  %v4787_v11 = vld [vmem:[#allocation3 + $0x6c] sm:$0xf] }
 0x4ad   : >> { %4783 = vst.msk [vmem:[#allocation3 + $0x64] sm:$0xf] %vm205_vm0, %v4545_v38  ;;  %4786 = vst [vmem:[#allocation3 + $0x68] sm:$0x1] %v4785_v31  ;;  %v4550_v12 = vrot.slane %v4548_v27, 7  ;;  %v4166_v43 = vadd.f32 %v4134_v25, %v9043_v30  ;;  %v5137_v13 = vor.u32 %v5136_v34, %v5132_v6  ;;  %v5139_v44 = vshll.u32 %v9278_v48, 16 }
 0x4ae   : >> { %v4556_v39 = vshrl.u32 %v6860_v33, 16  ;;  %v4559_v62 = vshll.u32 %v6860_v33, 16  ;;  %vm4237_vm12 = vcmp.gt.f32.partialorder %v4205_v19, 0.0  ;;  %v4269_v47 = vmul.f32 0.2, %v4205_v19  ;;  %v4060_v52 = vpop.permute.xlu0 %4059 }
 0x4af   : >> { %v4553_v5 = vor.u32 %v4551_v37, %v4550_v12  ;;  %v4554_v59 = vrot.slane %v4550_v12, 4  ;;  %v4206_v8 = vadd.f32 %v9064_v32, %v4166_v43  ;;  %v5141_v17 = vrot.slane %v5139_v44, 1  ;;  %v4791_v33 = vld [vmem:[#allocation3 + $0x74] sm:$0x1] }
 0x4b0   : >> { %v4558_v2 = vrot.slane %v4556_v39, 7  ;;  %v4301_v63 = vsel %vm4237_vm12, %v4205_v19, %v4269_v47  ;;  %v4135_v30 = vadd.f32 %v4060_v52, %v9019_v54  ;;  %v4062_v6 = vpop.permute.xlu1 %4061  ;;  %v9295_v10 = vcombine.low %v4857_v21, %v9290_v53  ;;  %v9308_v47 = vld [vmem:[#allocation3 + $0x5c] ss:$0 sps:$4 sm:$0x11]  }
 0x4b1   : >> { %v4788_v25 = vsel %vm7714_vm15, %v4553_v5, %v4787_v11  ;;  %v6861_v14 = vpack.c.bf16 %v4301_v63, %v4301_v63  ;;  %vm4238_vm13 = vcmp.gt.f32.partialorder %v4206_v8, 0.0  ;;  %v4270_v27 = vmul.f32 0.2, %v4206_v8 }
 0x4b2   : >> { %4789 = vst [vmem:[#allocation3 + $0x6c] sm:$0xf] %v4788_v25  ;;  %v4561_v37 = vor.u32 %v4559_v62, %v4558_v2  ;;  %v4563_v36 = vrot.slane %v4558_v2, 4  ;;  %v5142_v34 = vsel %vm1275_vm7, %v5137_v13, %v5141_v17  ;;  %v4167_v38 = vadd.f32 %v4135_v30, %v9050_v40  ;;  %v5276_v31 = vpop.permute.xlu0 %5275 }
 0x4b3   : >> { %v4565_v54 = vshrl.u32 %v6861_v14, 16  ;;  %v4568_v19 = vshll.u32 %v6861_v14, 16  ;;  %v4302_v12 = vsel %vm4238_vm13, %v4206_v8, %v4270_v27  ;;  %5287 = vrot.lane.b32.xlu0 %v5142_v34, %s7358_s8  ;;  %v4136_v43 = vadd.f32 %v4062_v6, %v9026_v0  ;;  %v10165_v14 = vld [vmem:[#allocation18_spill] sm:$0xff] }
 0x4b4   : >> { %v4562_v44 = vsel %vm7720_vm1, %v4554_v59, %v4561_v37  ;;  %v4792_v39 = vsel %vm7551_vm3, %v4563_v36, %v4791_v33  ;;  %v6862_v62 = vpack.c.bf16 %v4302_v12, %v4302_v12  ;;  %v4207_v13 = vadd.f32 %v9064_v32, %v4167_v38  ;;  %v9323_v38 = vld [vmem:[#allocation3 + $0x64] sm:$0xf]  ;;  %v4798_v12 = vld [vmem:[#allocation3 + $0x80] sm:$0x1] }
 0x4b5   : >> { %4790 = vst.msk [vmem:[#allocation3 + $0x70] sm:$0xf] %vm205_vm0, %v4562_v44  ;;  %4793 = vst [vmem:[#allocation3 + $0x74] sm:$0x1] %v4792_v39  ;;  %v4567_v40 = vrot.slane %v4565_v54, 7  ;;  %v4168_v52 = vadd.f32 %v4136_v43, %v9056_v24  ;;  %v5420_v0 = vsel %vm359_vm5, %v9012_v18, %v5276_v31  ;;  %v5144_v5 = vshrl.u32 %v9295_v10, 16 }
 0x4b6   : >> { %v4573_v59 = vshrl.u32 %v6862_v62, 16  ;;  %v4576_v8 = vshll.u32 %v6862_v62, 16  ;;  %vm4239_vm14 = vcmp.gt.f32.partialorder %v4207_v13, 0.0  ;;  %v4271_v17 = vmul.f32 0.2, %v4207_v13  ;;  %5705 = vmatmul.mubr.bf16.vlgmr.msra.gmra.mrb[36].mxu0 %v5420_v0  ;;  %v4064_v21 = vpop.permute.xlu1 %4063 }
 0x4b7   : >> { %v4570_v11 = vor.u32 %v4568_v19, %v4567_v40  ;;  %v4571_v2 = vrot.slane %v4567_v40, 4  ;;  %v4208_v63 = vadd.f32 %v9064_v32, %v4168_v52  ;;  %v5146_v30 = vshll.u32 %v9295_v10, 16  ;;  %6754 = vmatprep.mubr.msk.bf16.mxu0 %vm359_vm5, %v9104_v46  ;;  %v4794_v24 = vld [vmem:[#allocation3 + $0x78] sm:$0xf] }
 0x4b8   : >> { %v4575_v6 = vrot.slane %v4573_v59, 7  ;;  %v4303_v18 = vsel %vm4239_vm14, %v4207_v13, %v4271_v17  ;;  %v5151_v25 = vshll.u32 %v9308_v47, 16  ;;  %v4137_v27 = vadd.f32 %v4064_v21, %v10165_v14  ;;  %v4066_v54 = vpop.permute.xlu0 %4065  ;;  %v9325_v19 = vld [vmem:[#allocation3 + $0x68] ss:$0 sps:$4 sm:$0x11]   ;;  %v10166_v21 = vld [vmem:[#allocation14_spill] sm:$0xff] }
 0x4b9   : >> { %v4795_v37 = vsel %vm7714_vm15, %v4570_v11, %v4794_v24  ;;  %v6863_v36 = vpack.c.bf16 %v4303_v18, %v4303_v18  ;;  %vm4240_vm6 = vcmp.gt.f32.partialorder %v4208_v63, 0.0  ;;  %v4272_v34 = vmul.f32 0.2, %v4208_v63  ;;  %v4859_v59 = vld [vmem:[#allocation3 + $0x60] sm:$0xf] }
 0x4ba   : >> { %4796 = vst [vmem:[#allocation3 + $0x78] sm:$0xf] %v4795_v37  ;;  %v4578_v32 = vor.u32 %v4576_v8, %v4575_v6  ;;  %v4580_v31 = vrot.slane %v4575_v6, 4  ;;  %v5148_v33 = vrot.slane %v5146_v30, 1  ;;  %v5153_v46 = vrot.slane %v5151_v25, 1 }
 0x4bb   : >> { %v4582_v43 = vshrl.u32 %v6863_v36, 16  ;;  %v4585_v44 = vshll.u32 %v6863_v36, 16  ;;  %v4304_v39 = vsel %vm4240_vm6, %v4208_v63, %v4272_v34  ;;  %v4169_v62 = vadd.f32 %v4137_v27, %v9121_v26  ;;  %v9336_v17 = vld [vmem:[%s10073_s2 + $0x1] ss:$0 sm:$0xff]  ;;  %v4801_v25 = vld [vmem:[#allocation3 + $0x84] sm:$0xf] }
 0x4bc   : >> { %v4579_v13 = vsel %vm7720_vm1, %v4571_v2, %v4578_v32  ;;  %v4799_v40 = vsel %vm7551_vm3, %v4580_v31, %v4798_v12  ;;  %v6864_v52 = vpack.c.bf16 %v4304_v39, %v4304_v39  ;;  %v5149_v0 = vor.u32 %v5148_v33, %v5144_v5  ;;  %v9343_v63 = vld [vmem:[#allocation3 + $0x70] sm:$0xf]  ;;  %v9347_v18 = vld [vmem:[#allocation3 + $0x74] ss:$0 sps:$4 sm:$0x11]  }
 0x4bd   : >> { %4797 = vst.msk [vmem:[#allocation3 + $0x7c] sm:$0xf] %vm205_vm0, %v4579_v13  ;;  %4800 = vst [vmem:[#allocation3 + $0x80] sm:$0x1] %v4799_v40  ;;  %v4584_v8 = vrot.slane %v4582_v43, 7  ;;  %v4209_v26 = vadd.f32 %v9336_v17, %v4169_v62  ;;  %v4138_v11 = vadd.f32 %v4066_v54, %v10166_v21  ;;  %v9341_v2 = vcombine.low %v4859_v59, %v9323_v38 }
 0x4be   : >> { %v4590_v5 = vshrl.u32 %v6864_v52, 16  ;;  %v4593_v30 = vshll.u32 %v6864_v52, 16  ;;  %v5154_v24 = vsel %vm1275_vm7, %v5149_v0, %v5153_v46  ;;  %v5163_v6 = vshll.u32 %v9325_v19, 16  ;;  %v4861_v33 = vld [vmem:[#allocation3 + $0x6c] sm:$0xf] }
 0x4bf   : >> { %v4587_v14 = vor.u32 %v4585_v44, %v4584_v8  ;;  %v4588_v27 = vrot.slane %v4584_v8, 4  ;;  %5289 = vrot.lane.b32.xlu1 %v5154_v24, %s7358_s8  ;;  %vm4241_vm8 = vcmp.gt.f32.partialorder %v4209_v26, 0.0  ;;  %v4273_v37 = vmul.f32 0.2, %v4209_v26 }
 0x4c0   : >> { %v4592_v36 = vrot.slane %v4590_v5, 7  ;;  %v4170_v34 = vadd.f32 %v4138_v11, %v9131_v28  ;;  %v5156_v32 = vshrl.u32 %v9341_v2, 16  ;;  %v5158_v31 = vshll.u32 %v9341_v2, 16  ;;  %v4805_v28 = vld [vmem:[#allocation3 + $0x8c] sm:$0x1] }
 0x4c1   : >> { %v4802_v46 = vsel %vm7714_vm15, %v4587_v14, %v4801_v25  ;;  %v4305_v54 = vsel %vm4241_vm8, %v4209_v26, %v4273_v37  ;;  %v5165_v12 = vrot.slane %v5163_v6, 1  ;;  %v9356_v43 = vcombine.low %v4861_v33, %v9343_v63  ;;  %v4863_v14 = vld [vmem:[#allocation3 + $0x78] sm:$0xf] }
 0x4c2   : >> { %4803 = vst [vmem:[#allocation3 + $0x84] sm:$0xf] %v4802_v46  ;;  %v4595_v44 = vor.u32 %v4593_v30, %v4592_v36  ;;  %v4597_v39 = vrot.slane %v4592_v36, 4  ;;  %v6865_v62 = vpack.c.bf16 %v4305_v54, %v4305_v54  ;;  %v4210_v13 = vadd.f32 %v9336_v17, %v4170_v34  ;;  %v4903_v30 = vld [vmem:[#allocation3 + $0x48] sm:$0xe] }
 0x4c3   : >> { %v5160_v40 = vrot.slane %v5158_v31, 1  ;;  %v5168_v52 = vshrl.u32 %v9356_v43, 16  ;;  %v5170_v0 = vshll.u32 %v9356_v43, 16  ;;  %v5175_v59 = vshll.u32 %v9347_v18, 16 }
 0x4c4   : >> { %v4596_v8 = vsel %vm7720_vm1, %v4588_v27, %v4595_v44  ;;  %v4806_v26 = vsel %vm7551_vm3, %v4597_v39, %v4805_v28  ;;  %v4599_v21 = vshrl.u32 %v6865_v62, 16  ;;  %v4602_v11 = vshll.u32 %v6865_v62, 16  ;;  %v9366_v5 = vld [vmem:[#allocation3 + $0x7c] sm:$0xf] }
 0x4c5   : >> { %4804 = vst.msk [vmem:[#allocation3 + $0x88] sm:$0xf] %vm205_vm0, %v4596_v8  ;;  %4807 = vst [vmem:[#allocation3 + $0x8c] sm:$0x1] %v4806_v26  ;;  %vm4242_vm9 = vcmp.gt.f32.partialorder %v4210_v13, 0.0  ;;  %v5161_v6 = vor.u32 %v5160_v40, %v5156_v32  ;;  %v5172_v25 = vrot.slane %v5170_v0, 1  ;;  %v9370_v27 = vcombine.low %v4863_v14, %v9366_v5 }
 0x4c6   : >> { %v4274_v24 = vmul.f32 0.2, %v4210_v13  ;;  %v4601_v37 = vrot.slane %v4599_v21, 7  ;;  %v5177_v36 = vrot.slane %v5175_v59, 1  ;;  %v10167_v31 = vcombine.low %v9244_v29, %v9222_v51  ;;  %v4808_v32 = vld [vmem:[#allocation3 + $0x90] sm:$0xf] }
 0x4c7   : >> { %v9372_v34 = vld [vmem:[#allocation3 + $0x80] ss:$0 sps:$4 sm:$0x11]   ;;  %v5166_v54 = vsel %vm1275_vm7, %v5161_v6, %v5165_v12  ;;  %v5173_v44 = vor.u32 %v5172_v25, %v5168_v52  ;;  %v6717_v39 = vcombine.low %v4903_v30, %v9258_v55  ;;  %v5180_v0 = vshrl.u32 %v9370_v27, 16  ;;  %v4904_v55 = vld [vmem:[#allocation3 + $0x54] sm:$0xe] }
 0x4c8   : >> { %v5380_v33 = vrot.slane %v10167_v31, 1  ;;  %v4306_v46 = vsel %vm4242_vm9, %v4210_v13, %v4274_v24  ;;  %v4604_v62 = vor.u32 %v4602_v11, %v4601_v37  ;;  %v4605_v28 = vrot.slane %v4601_v37, 4  ;;  %5291 = vrot.lane.b32.xlu0 %v5166_v54, %s7358_s8  ;;  %v4905_v13 = vld [vmem:[#allocation3 + $0x60] sm:$0xe]  ;;  %v4906_v30 = vld [vmem:[#allocation3 + $0x6c] sm:$0xe] }
 0x4c9   : >> { %v6866_v40 = vpack.c.bf16 %v4306_v46, %v4306_v46  ;;  %v5178_v59 = vsel %vm1275_vm7, %v5173_v44, %v5177_v36  ;;  %v5182_v8 = vshll.u32 %v9370_v27, 16  ;;  %v5187_v51 = vshll.u32 %v9372_v34, 16  ;;  %v4865_v25 = vld [vmem:[#allocation3 + $0x84] sm:$0xf] }
 0x4ca   : >> { %v10168_v29 = vrot.slane %v9229_v57, 1  ;;  %v4809_v52 = vsel %vm7714_vm15, %v4604_v62, %v4808_v32  ;;  %5293 = vrot.lane.b32.xlu1 %v5178_v59, %s7358_s8  ;;  %v5383_v11 = vrot.slane %v6717_v39, 1  ;;  %v5384_v57 = vrot.slane %v9278_v48, 1 }
 0x4cb   : >> { %v4607_v26 = vshrl.u32 %v6866_v40, 16  ;;  %v4610_v21 = vshll.u32 %v6866_v40, 16  ;;  %4810 = vst [vmem:[#allocation3 + $0x90] sm:$0xf] %v4809_v52  ;;  %v5184_v24 = vrot.slane %v5182_v8, 1  ;;  %v5189_v6 = vrot.slane %v5187_v51, 1 }
 0x4cc   : >> { %v9387_v12 = vsel %vm1582_vm11, %v5380_v33, %v10168_v29  ;;  %v6718_v14 = vcombine.low %v4904_v55, %v9290_v53  ;;  %v4866_v36 = vld [vmem:[#allocation3 + $0x88] sm:$0xf]  ;;  %v5387_v31 = vrot.slane %v9308_v47, 1  ;;  %v6719_v33 = vcombine.low %v4905_v13, %v9323_v38  ;;  %v7181_v39 = vld [vmem:[#allocation3 + $0x8c] ss:$0 sps:$4 sm:$0x11]  }
 0x4cd   : >> { %v4609_v37 = vrot.slane %v4607_v26, 7  ;;  %v6720_v46 = vcombine.low %v4906_v30, %v9343_v63  ;;  %v5185_v54 = vor.u32 %v5184_v24, %v5180_v0  ;;  %v9397_v44 = vcombine.low %v4865_v25, %v4866_v36  ;;  %v4812_v8 = vld [vmem:[#allocation3 + $0x98] sm:$0x1] }
 0x4ce   : >> { %v9400_v32 = vsel %vm1582_vm11, %v5383_v11, %v5384_v57  ;;  %v5386_v62 = vrot.slane %v6718_v14, 1  ;;  %v5389_v59 = vrot.slane %v6719_v33, 1  ;;  %v5390_v53 = vrot.slane %v9325_v19, 1  ;;  %v4907_v19 = vld [vmem:[#allocation3 + $0x78] sm:$0xe] }
 0x4cf   : >> { %v4612_v40 = vor.u32 %v4610_v21, %v4609_v37  ;;  %v4614_v48 = vrot.slane %v4609_v37, 4  ;;  %v5190_v47 = vsel %vm1275_vm7, %v5185_v54, %v5189_v6  ;;  %v5194_v38 = vshll.u32 %v9397_v44, 16  ;;  %v4908_v21 = vld [vmem:[#allocation3 + $0x84] sm:$0xe] }
 0x4d0   : >> { %v5199_v51 = vshll.u32 %v7181_v39, 16  ;;  %5295 = vrot.lane.b32.xlu0 %v5190_v47, %s7358_s8  ;;  %v9411_v29 = vsel %vm1582_vm11, %v5386_v62, %v5387_v31  ;;  %v9414_v55 = vsel %vm1582_vm11, %v5389_v59, %v5390_v53  ;;  %v5192_v13 = vshrl.u32 %v9397_v44, 16 }
 0x4d1   : >> { %v4613_v63 = vsel %vm7720_vm1, %v4605_v28, %v4612_v40  ;;  %v4813_v0 = vsel %vm7551_vm3, %v4614_v48, %v4812_v8  ;;  %v5196_v52 = vrot.slane %v5194_v38, 1  ;;  %v5392_v26 = vrot.slane %v6720_v46, 1 }
 0x4d2   : >> { %4811 = vst.msk [vmem:[#allocation3 + $0x94] sm:$0xf] %vm205_vm0, %v4613_v63  ;;  %4814 = vst [vmem:[#allocation3 + $0x98] sm:$0x1] %v4813_v0  ;;  %v5393_v28 = vrot.slane %v9347_v18, 1  ;;  %v6721_v11 = vcombine.low %v4907_v19, %v9366_v5  ;;  %v5396_v30 = vrot.slane %v9372_v34, 1  ;;  %v6722_v24 = vcombine.low %v4908_v21, %v4866_v36 }
 0x4d3   : >> { %v5399_v6 = vrot.slane %v7181_v39, 1  ;;  %v5197_v25 = vor.u32 %v5196_v52, %v5192_v13  ;;  %v5201_v57 = vrot.slane %v5199_v51, 1  ;;  %v4867_v34 = vld [vmem:[#allocation3 + $0x90] sm:$0xf] }
 0x4d4   : >> { %v9422_v14 = vsel %vm1582_vm11, %v5392_v26, %v5393_v28  ;;  %v5395_v37 = vrot.slane %v6721_v11, 1  ;;  %v5398_v31 = vrot.slane %v6722_v24, 1  ;;  %v4909_v46 = vld [vmem:[#allocation3 + $0x90] sm:$0xe]  ;;  %v10169_v26 = vld [vmem:[#allocation15_spill] sm:$0xff] }
 0x4d5   : >> { %v5202_v33 = vsel %vm1275_vm7, %v5197_v25, %v5201_v57 }
 0x4d6   : >> { %5297 = vrot.lane.b32.xlu1 %v5202_v33, %s7358_s8  ;;  %v9427_v18 = vsel %vm1582_vm11, %v5395_v37, %v5396_v30  ;;  %v9430_v5 = vsel %vm1582_vm11, %v5398_v31, %v5399_v6  ;;  %v10170_v30 = vld [vmem:[#allocation31_spill] sm:$0xff] }
 0x4d9   : >> { %v4868_v36 = vld [vmem:[#allocation3 + $0x94] sm:$0xf]  ;;  %v7183_v39 = vld [vmem:[#allocation3 + $0x98] ss:$0 sps:$4 sm:$0x11]  }
 0x4da   : >> { %v9432_v54 = vcombine.low %v4867_v34, %v4868_v36  ;;  %v6723_v62 = vcombine.low %v4909_v46, %v4868_v36  ;;  %v5211_v48 = vshll.u32 %v7183_v39, 16  ;;  %v5402_v53 = vrot.slane %v7183_v39, 1 }
 0x4dc   : >> { %v5206_v40 = vshll.u32 %v9432_v54, 16  ;;  %v5401_v59 = vrot.slane %v6723_v62, 1  ;;  %v5204_v8 = vshrl.u32 %v9432_v54, 16  ;;  %v5213_v63 = vrot.slane %v5211_v48, 1 }
 0x4de   : >> { %v5208_v47 = vrot.slane %v5206_v40, 1  ;;  %v9437_v38 = vsel %vm1582_vm11, %v5401_v59, %v5402_v53 }
 0x4e0   : >> { %v5209_v51 = vor.u32 %v5208_v47, %v5204_v8 }
 0x4e1   : >> { %v5278_v19 = vpop.permute.xlu1 %5277 }
 0x4e2   : >> { %v5214_v0 = vsel %vm1275_vm7, %v5209_v51, %v5213_v63  ;;  %v5423_v13 = vsel %vm359_vm5, %v9093_v15, %v5278_v19 }
 0x4e3   : >> { %5299 = vrot.lane.b32.xlu0 %v5214_v0, %s7358_s8  ;;  %5713 = vmatmul.mubr.bf16.gmra.mrb[40].mxu0 %v5423_v13  ;;  %v4068_v52 = vpop.permute.xlu0 %4067  ;;  %v4815_v0 = vld [vmem:[#allocation3 + $0x9c] sm:$0xf] }
 0x4e4   : >> { %v4139_v28 = vadd.f32 %v4068_v52, %v10169_v26  ;;  %6755 = vmatprep.mubr.msk.bf16.mxu0 %vm359_vm5, %v9137_v45  ;;  %v4819_v26 = vld [vmem:[#allocation3 + $0xa4] sm:$0x1] }
 0x4e5   : >> { %v4070_v21 = vpop.permute.xlu1 %4069 }
 0x4e6   : >> { %v4171_v11 = vadd.f32 %v4139_v28, %v9143_v7  ;;  %v4140_v24 = vadd.f32 %v4070_v21, %v10170_v30 }
 0x4e8   : >> { %v4211_v6 = vadd.f32 %v9336_v17, %v4171_v11  ;;  %v4172_v25 = vadd.f32 %v4140_v24, %v9154_v41 }
 0x4ea   : >> { %vm4243_vm10 = vcmp.gt.f32.partialorder %v4211_v6, 0.0  ;;  %v4275_v57 = vmul.f32 0.2, %v4211_v6  ;;  %v4212_v15 = vadd.f32 %v9336_v17, %v4172_v25 }
 0x4eb   : >> { %v5280_v37 = vpop.permute.xlu0 %5279 }
 0x4ec   : >> { %v4307_v31 = vsel %vm4243_vm10, %v4211_v6, %v4275_v57  ;;  %vm4244_vm12 = vcmp.gt.f32.partialorder %v4212_v15, 0.0  ;;  %v4276_v33 = vmul.f32 0.2, %v4212_v15  ;;  %v5426_v45 = vsel %vm359_vm5, %v9112_v61, %v5280_v37  ;;  %v10171_v6 = vld [vmem:[#allocation13_spill] sm:$0xff] }
 0x4ed   : >> { %v4072_v34 = vpop.permute.xlu1 %4071  ;;  %v6867_v36 = vpack.c.bf16 %v4307_v31, %v4307_v31  ;;  %5721 = vmatmul.mubr.bf16.gmra.mrb[44].mxu0 %v5426_v45 }
 0x4ee   : >> { %v4141_v7 = vadd.f32 %v4072_v34, %v9116_v50  ;;  %v4308_v46 = vsel %vm4244_vm12, %v4212_v15, %v4276_v33  ;;  %6756 = vmatprep.mubr.msk.bf16.mxu0 %vm359_vm5, %v9171_v49  ;;  %v10172_v33 = vld [vmem:[#allocation20_spill] sm:$0xff] }
 0x4ef   : >> { %v4616_v41 = vshrl.u32 %v6867_v36, 16  ;;  %v6868_v39 = vpack.c.bf16 %v4308_v46, %v4308_v46  ;;  %v4074_v40 = vpop.permute.xlu0 %4073  ;;  %v4619_v53 = vshll.u32 %v6867_v36, 16 }
 0x4f0   : >> { %v4173_v62 = vadd.f32 %v4141_v7, %v9178_v56  ;;  %v4142_v48 = vadd.f32 %v4074_v40, %v9127_v35  ;;  %v4822_v40 = vld [vmem:[#allocation3 + $0xa8] sm:$0xf] }
 0x4f1   : >> { %v4618_v59 = vrot.slane %v4616_v41, 7  ;;  %v4624_v8 = vshrl.u32 %v6868_v39, 16  ;;  %v4627_v63 = vshll.u32 %v6868_v39, 16  ;;  %v10173_v39 = vld [vmem:[#allocation22_spill] sm:$0xff] }
 0x4f2   : >> { %v4213_v61 = vadd.f32 %v9336_v17, %v4173_v62  ;;  %v4174_v47 = vadd.f32 %v4142_v48, %v9187_v22 }
 0x4f3   : >> { %v4621_v50 = vor.u32 %v4619_v53, %v4618_v59  ;;  %v4626_v51 = vrot.slane %v4624_v8, 7  ;;  %v4622_v13 = vrot.slane %v4618_v59, 4 }
 0x4f4   : >> { %vm4245_vm13 = vcmp.gt.f32.partialorder %v4213_v61, 0.0  ;;  %v4277_v49 = vmul.f32 0.2, %v4213_v61  ;;  %v4214_v19 = vadd.f32 %v9336_v17, %v4174_v47  ;;  %v4826_v47 = vld [vmem:[#allocation3 + $0xb0] sm:$0x1] }
 0x4f5   : >> { %v4816_v56 = vsel %vm7714_vm15, %v4621_v50, %v4815_v0  ;;  %v4629_v35 = vor.u32 %v4627_v63, %v4626_v51  ;;  %v4631_v52 = vrot.slane %v4626_v51, 4 }
 0x4f6   : >> { %4817 = vst [vmem:[#allocation3 + $0x9c] sm:$0xf] %v4816_v56  ;;  %v4309_v28 = vsel %vm4245_vm13, %v4213_v61, %v4277_v49  ;;  %vm4246_vm14 = vcmp.gt.f32.partialorder %v4214_v19, 0.0  ;;  %v4278_v21 = vmul.f32 0.2, %v4214_v19 }
 0x4f7   : >> { %v4630_v11 = vsel %vm7720_vm1, %v4622_v13, %v4629_v35  ;;  %v4820_v30 = vsel %vm7551_vm3, %v4631_v52, %v4819_v26  ;;  %v6869_v24 = vpack.c.bf16 %v4309_v28, %v4309_v28  ;;  %v4076_v15 = vpop.permute.xlu0 %4075 }
 0x4f8   : >> { %v5282_v22 = vpop.permute.xlu1 %5281  ;;  %4818 = vst.msk [vmem:[#allocation3 + $0xa0] sm:$0xf] %vm205_vm0, %v4630_v11  ;;  %4821 = vst [vmem:[#allocation3 + $0xa4] sm:$0x1] %v4820_v30  ;;  %v4310_v57 = vsel %vm4246_vm14, %v4214_v19, %v4278_v21  ;;  %v4143_v45 = vadd.f32 %v4076_v15, %v10172_v33  ;;  %v10174_v30 = vld [vmem:[#allocation17_spill] sm:$0xff] }
 0x4f9   : >> { %v5429_v25 = vsel %vm359_vm5, %v10171_v6, %v5282_v22  ;;  %v4633_v37 = vshrl.u32 %v6869_v24, 16  ;;  %v6870_v31 = vpack.c.bf16 %v4310_v57, %v4310_v57  ;;  %v4636_v7 = vshll.u32 %v6869_v24, 16 }
 0x4fa   : >> { %5731 = vmatmul.mubr.bf16.gmra.mrb[48].mxu0 %v5429_v25  ;;  %v4175_v41 = vadd.f32 %v4143_v45, %v9213_v4 }
 0x4fb   : >> { %6757 = vmatprep.mubr.msk.bf16.mxu0 %vm359_vm5, %v9210_v9  ;;  %v4635_v36 = vrot.slane %v4633_v37, 7  ;;  %v4641_v46 = vshrl.u32 %v6870_v31, 16  ;;  %v4644_v53 = vshll.u32 %v6870_v31, 16 }
 0x4fc   : >> { %v4078_v34 = vpop.permute.xlu1 %4077  ;;  %v4215_v8 = vadd.f32 %v9336_v17, %v4175_v41 }
 0x4fd   : >> { %v4144_v62 = vadd.f32 %v4078_v34, %v10173_v39  ;;  %v4638_v48 = vor.u32 %v4636_v7, %v4635_v36  ;;  %v4643_v59 = vrot.slane %v4641_v46, 7  ;;  %v4639_v61 = vrot.slane %v4635_v36, 4  ;;  %v4869_v51 = vld [vmem:[#allocation3 + $0x9c] sm:$0xf]  ;;  %v10175_v34 = vld [vmem:[#allocation16_spill] sm:$0xff] }
 0x4fe   : >> { %v4910_v9 = vld [vmem:[#allocation3 + $0x9c] sm:$0xe]  ;;  %vm4247_vm6 = vcmp.gt.f32.partialorder %v4215_v8, 0.0  ;;  %v4279_v19 = vmul.f32 0.2, %v4215_v8 }
 0x4ff   : >> { %v4176_v50 = vadd.f32 %v4144_v62, %v9217_v3  ;;  %v4823_v63 = vsel %vm7714_vm15, %v4638_v48, %v4822_v40  ;;  %v4646_v0 = vor.u32 %v4644_v53, %v4643_v59  ;;  %v4648_v49 = vrot.slane %v4643_v59, 4  ;;  %v4870_v4 = vld [vmem:[#allocation3 + $0xa0] sm:$0xf]  ;;  %v7185_v35 = vld [vmem:[#allocation3 + $0xa4] ss:$0 sps:$4 sm:$0x11]  }
 0x500   : >> { %4824 = vst [vmem:[#allocation3 + $0xa8] sm:$0xf] %v4823_v63  ;;  %v9480_v56 = vcombine.low %v4869_v51, %v4870_v4  ;;  %v6724_v52 = vcombine.low %v4910_v9, %v4870_v4  ;;  %v4311_v28 = vsel %vm4247_vm6, %v4215_v8, %v4279_v19  ;;  %v5223_v15 = vshll.u32 %v7185_v35, 16  ;;  %v10176_v8 = vld [vmem:[#allocation24_spill] sm:$0xff] }
 0x501   : >> { %v4216_v13 = vadd.f32 %v9336_v17, %v4176_v50  ;;  %v4647_v3 = vsel %vm7720_vm1, %v4639_v61, %v4646_v0  ;;  %v4827_v26 = vsel %vm7551_vm3, %v4648_v49, %v4826_v47  ;;  %v6871_v11 = vpack.c.bf16 %v4311_v28, %v4311_v28  ;;  %v4829_v19 = vld [vmem:[#allocation3 + $0xb4] sm:$0xf] }
 0x502   : >> { %4825 = vst.msk [vmem:[#allocation3 + $0xac] sm:$0xf] %vm205_vm0, %v4647_v3  ;;  %4828 = vst [vmem:[#allocation3 + $0xb0] sm:$0x1] %v4827_v26  ;;  %v5284_v22 = vpop.permute.xlu0 %5283  ;;  %v5218_v6 = vshll.u32 %v9480_v56, 16  ;;  %v5404_v37 = vrot.slane %v6724_v52, 1 }
 0x503   : >> { %vm4248_vm8 = vcmp.gt.f32.partialorder %v4216_v13, 0.0  ;;  %v4280_v21 = vmul.f32 0.2, %v4216_v13  ;;  %v5432_v24 = vsel %vm359_vm5, %v10174_v30, %v5284_v22  ;;  %v5405_v31 = vrot.slane %v7185_v35, 1  ;;  %v4833_v22 = vld [vmem:[#allocation3 + $0xbc] sm:$0x1] }
 0x504   : >> { %v4080_v57 = vpop.permute.xlu1 %4079  ;;  %5741 = vmatmul.mubr.bf16.gmra.mrb[52].mxu0 %v5432_v24  ;;  %v4650_v33 = vshrl.u32 %v6871_v11, 16  ;;  %v5216_v46 = vshrl.u32 %v9480_v56, 16  ;;  %v5220_v41 = vrot.slane %v5218_v6, 1  ;;  %v4653_v40 = vshll.u32 %v6871_v11, 16 }
 0x505   : >> { %v4312_v25 = vsel %vm4248_vm8, %v4216_v13, %v4280_v21  ;;  %v4145_v36 = vadd.f32 %v4080_v57, %v10175_v34  ;;  %6758 = vmatprep.mubr.msk.bf16.mxu0 %vm359_vm5, %v9387_v12  ;;  %v9495_v39 = vsel %vm1582_vm11, %v5404_v37, %v5405_v31  ;;  %v5225_v50 = vrot.slane %v5223_v15, 1 }
 0x506   : >> { %v6872_v45 = vpack.c.bf16 %v4312_v25, %v4312_v25  ;;  %v4082_v7 = vpop.permute.xlu0 %4081  ;;  %v4652_v62 = vrot.slane %v4650_v33, 7  ;;  %v5221_v47 = vor.u32 %v5220_v41, %v5216_v46 }
 0x507   : >> { %v4177_v59 = vadd.f32 %v4145_v36, %v9238_v60  ;;  %v4146_v61 = vadd.f32 %v4082_v7, %v10176_v8  ;;  %v4871_v51 = vld [vmem:[#allocation3 + $0xa8] sm:$0xf] }
 0x508   : >> { %v4658_v48 = vshrl.u32 %v6872_v45, 16  ;;  %v4661_v53 = vshll.u32 %v6872_v45, 16  ;;  %v4911_v9 = vld [vmem:[#allocation3 + $0xa8] sm:$0xe]  ;;  %v4655_v12 = vor.u32 %v4653_v40, %v4652_v62  ;;  %v4656_v63 = vrot.slane %v4652_v62, 4 }
 0x509   : >> { %v4217_v49 = vadd.f32 %v9336_v17, %v4177_v59  ;;  %v4872_v4 = vld [vmem:[#allocation3 + $0xac] sm:$0xf]  ;;  %v4178_v13 = vadd.f32 %v4146_v61, %v9247_v16  ;;  %v5226_v35 = vsel %vm1275_vm7, %v5221_v47, %v5225_v50  ;;  %v7187_v60 = vld [vmem:[#allocation3 + $0xb0] ss:$0 sps:$4 sm:$0x11]  }
 0x50a   : >> { %v4660_v0 = vrot.slane %v4658_v48, 7  ;;  %v9502_v52 = vcombine.low %v4871_v51, %v4872_v4  ;;  %v6725_v3 = vcombine.low %v4911_v9, %v4872_v4  ;;  %v4830_v26 = vsel %vm7714_vm15, %v4655_v12, %v4829_v19  ;;  %5301 = vrot.lane.b32.xlu1 %v5226_v35, %s7358_s8  ;;  %v4836_v61 = vld [vmem:[#allocation3 + $0xc0] sm:$0xf]  ;;  %v4877_v50 = vld [vmem:[#allocation3 + $0xcc] sm:$0xf] }
 0x50b   : >> { %vm4249_vm9 = vcmp.gt.f32.partialorder %v4217_v49, 0.0  ;;  %4831 = vst [vmem:[#allocation3 + $0xb4] sm:$0xf] %v4830_v26  ;;  %v4281_v11 = vmul.f32 0.2, %v4217_v49  ;;  %v4218_v30 = vadd.f32 %v9336_v17, %v4178_v13  ;;  %v5235_v57 = vshll.u32 %v7187_v60, 16 }
 0x50c   : >> { %v4663_v28 = vor.u32 %v4661_v53, %v4660_v0  ;;  %v4665_v21 = vrot.slane %v4660_v0, 4  ;;  %v5228_v16 = vshrl.u32 %v9502_v52, 16  ;;  %v5230_v24 = vshll.u32 %v9502_v52, 16  ;;  %v9520_v51 = vld [vmem:[#allocation3 + $0xd0] sm:$0xf] }
 0x50d   : >> { %v5407_v15 = vrot.slane %v6725_v3, 1  ;;  %v4313_v37 = vsel %vm4249_vm9, %v4217_v49, %v4281_v11  ;;  %vm4250_vm10 = vcmp.gt.f32.partialorder %v4218_v30, 0.0  ;;  %v4282_v31 = vmul.f32 0.2, %v4218_v30 }
 0x50e   : >> { %v4664_v6 = vsel %vm7720_vm1, %v4656_v63, %v4663_v28  ;;  %v4834_v25 = vsel %vm7551_vm3, %v4665_v21, %v4833_v22  ;;  %v5232_v33 = vrot.slane %v5230_v24, 1  ;;  %v6873_v17 = vpack.c.bf16 %v4313_v37, %v4313_v37  ;;  %v9527_v35 = vld [vmem:[#allocation3 + $0xd4] ss:$0 sps:$4 sm:$0x11]   ;;  %v4840_v22 = vld [vmem:[#allocation3 + $0xc8] sm:$0x1] }
 0x50f   : >> { %4832 = vst.msk [vmem:[#allocation3 + $0xb8] sm:$0xf] %vm205_vm0, %v4664_v6  ;;  %4835 = vst [vmem:[#allocation3 + $0xbc] sm:$0x1] %v4834_v25  ;;  %v5408_v45 = vrot.slane %v7187_v60, 1  ;;  %v4314_v34 = vsel %vm4250_vm10, %v4218_v30, %v4282_v31  ;;  %v5237_v7 = vrot.slane %v5235_v57, 1  ;;  %v9525_v13 = vcombine.low %v4877_v50, %v9520_v51 }
 0x510   : >> { %v5233_v36 = vor.u32 %v5232_v33, %v5228_v16  ;;  %v4667_v46 = vshrl.u32 %v6873_v17, 16  ;;  %v6874_v41 = vpack.c.bf16 %v4314_v34, %v4314_v34  ;;  %v4670_v59 = vshll.u32 %v6873_v17, 16 }
 0x511   : >> { %v9516_v62 = vsel %vm1582_vm11, %v5407_v15, %v5408_v45  ;;  %v5264_v24 = vshrl.u32 %v9525_v13, 16  ;;  %v5266_v37 = vshll.u32 %v9525_v13, 16  ;;  %v5271_v23 = vshll.u32 %v9527_v35, 16 }
 0x512   : >> { %v5238_v40 = vsel %vm1275_vm7, %v5233_v36, %v5237_v7  ;;  %v4669_v48 = vrot.slane %v4667_v46, 7  ;;  %v4675_v53 = vshrl.u32 %v6874_v41, 16  ;;  %v4873_v8 = vld [vmem:[#allocation3 + $0xb4] sm:$0xf]  ;;  %v4678_v63 = vshll.u32 %v6874_v41, 16 }
 0x513   : >> { %5303 = vrot.lane.b32.xlu0 %v5238_v40, %s7358_s8  ;;  %v4912_v47 = vld [vmem:[#allocation3 + $0xb4] sm:$0xe]  ;;  %v5268_v45 = vrot.slane %v5266_v37, 1  ;;  %v5273_v34 = vrot.slane %v5271_v23, 1 }
 0x514   : >> { %v4672_v9 = vor.u32 %v4670_v59, %v4669_v48  ;;  %v4677_v12 = vrot.slane %v4675_v53, 7  ;;  %v4673_v60 = vrot.slane %v4669_v48, 4 }
 0x515   : >> { %v5269_v7 = vor.u32 %v5268_v45, %v5264_v24 }
 0x516   : >> { %v4874_v0 = vld [vmem:[#allocation3 + $0xb8] sm:$0xf]  ;;  %v7189_v4 = vld [vmem:[#allocation3 + $0xbc] ss:$0 sps:$4 sm:$0x11]   ;;  %v4837_v3 = vsel %vm7714_vm15, %v4672_v9, %v4836_v61  ;;  %v4680_v26 = vor.u32 %v4678_v63, %v4677_v12  ;;  %v4682_v28 = vrot.slane %v4677_v12, 4 }
 0x517   : >> { %v9522_v49 = vcombine.low %v4873_v8, %v4874_v0  ;;  %v6726_v19 = vcombine.low %v4912_v47, %v4874_v0  ;;  %4838 = vst [vmem:[#allocation3 + $0xc0] sm:$0xf] %v4837_v3  ;;  %v5247_v16 = vshll.u32 %v7189_v4, 16  ;;  %v5411_v57 = vrot.slane %v7189_v4, 1 }
 0x518   : >> { %v5286_v21 = vpop.permute.xlu1 %5285  ;;  %v4681_v6 = vsel %vm7720_vm1, %v4673_v60, %v4680_v26  ;;  %v4841_v20 = vsel %vm7551_vm3, %v4682_v28, %v4840_v22 }
 0x519   : >> { %v5435_v11 = vsel %vm359_vm5, %v9225_v42, %v5286_v21  ;;  %v5242_v30 = vshll.u32 %v9522_v49, 16  ;;  %v5410_v25 = vrot.slane %v6726_v19, 1  ;;  %4839 = vst.msk [vmem:[#allocation3 + $0xc4] sm:$0xf] %vm205_vm0, %v4681_v6  ;;  %4842 = vst [vmem:[#allocation3 + $0xc8] sm:$0x1] %v4841_v20 }
 0x51a   : >> { %5751 = vmatmul.mubr.bf16.gmra.mrb[56].mxu0 %v5435_v11  ;;  %v5240_v42 = vshrl.u32 %v9522_v49, 16  ;;  %v5249_v17 = vrot.slane %v5247_v16, 1 }
 0x51b   : >> { %6759 = vmatprep.mubr.msk.bf16.mxu0 %vm359_vm5, %v9400_v32  ;;  %v5244_v15 = vrot.slane %v5242_v30, 1  ;;  %v5412_v31 = vsel %vm1582_vm11, %v5410_v25, %v5411_v57  ;;  %v5274_v32 = vsel %vm1275_vm7, %v5269_v7, %v5273_v34  ;;  %v5417_v25 = vrot.slane %v9527_v35, 1 }
 0x51d   : >> { %v5245_v33 = vor.u32 %v5244_v15, %v5240_v42 }
 0x51e   : >> { %v4875_v46 = vld [vmem:[#allocation3 + $0xc0] sm:$0xf] }
 0x51f   : >> { %v5250_v36 = vsel %vm1275_vm7, %v5245_v33, %v5249_v17  ;;  %v4913_v40 = vld [vmem:[#allocation3 + $0xc0] sm:$0xe] }
 0x520   : >> { %5305 = vrot.lane.b32.xlu1 %v5250_v36, %s7358_s8  ;;  %v4876_v41 = vld [vmem:[#allocation3 + $0xc4] sm:$0xf]  ;;  %v7191_v59 = vld [vmem:[#allocation3 + $0xc8] ss:$0 sps:$4 sm:$0x11]  }
 0x521   : >> { %v6691_v48 = vcombine.low %v4875_v46, %v4876_v41  ;;  %v6727_v53 = vcombine.low %v4913_v40, %v4876_v41  ;;  %v5259_v47 = vshll.u32 %v7191_v59, 16  ;;  %v5414_v12 = vrot.slane %v7191_v59, 1 }
 0x523   : >> { %v5254_v61 = vshll.u32 %v6691_v48, 16  ;;  %v5413_v50 = vrot.slane %v6727_v53, 1  ;;  %v5252_v63 = vshrl.u32 %v6691_v48, 16  ;;  %v5261_v60 = vrot.slane %v5259_v47, 1 }
 0x524   : >> { %5309 = vrot.lane.b32.xlu1 %v5274_v32, %s7358_s8 }
 0x525   : >> { %v5288_v8 = vpop.permute.xlu0 %5287  ;;  %v5256_v0 = vrot.slane %v5254_v61, 1  ;;  %v5415_v4 = vsel %vm1582_vm11, %v5413_v50, %v5414_v12 }
 0x526   : >> { %v5438_v9 = vsel %vm359_vm5, %v9269_v58, %v5288_v8 }
 0x527   : >> { %5761 = vmatmul.mubr.bf16.gmra.mrb[60].mxu0 %v5438_v9  ;;  %v5257_v19 = vor.u32 %v5256_v0, %v5252_v63 }
 0x528   : >> { %6760 = vmatprep.mubr.msk.bf16.mxu0 %vm359_vm5, %v9411_v29 }
 0x529   : >> { %v5262_v3 = vsel %vm1275_vm7, %v5257_v19, %v5261_v60 }
 0x52a   : >> { %5307 = vrot.lane.b32.xlu0 %v5262_v3, %s7358_s8 }
 0x531   : >> { %v5290_v26 = vpop.permute.xlu1 %5289 }
 0x532   : >> { %v5441_v28 = vsel %vm359_vm5, %v9295_v10, %v5290_v26 }
 0x533   : >> { %5771 = vmatmul.mubr.bf16.gmra.mrb[64].mxu0 %v5441_v28 }
 0x534   : >> { %6761 = vmatprep.mubr.msk.bf16.mxu0 %vm359_vm5, %v9414_v55 }
 0x53a   : >> { %v5292_v58 = vpop.permute.xlu0 %5291 }
 0x53b   : >> { %v5444_v29 = vsel %vm359_vm5, %v9341_v2, %v5292_v58 }
 0x53c   : >> { %5781 = vmatmul.mubr.bf16.gmra.mrb[68].mxu0 %v5444_v29  ;;  %v5294_v21 = vpop.permute.xlu1 %5293 }
 0x53d   : >> { %6762 = vmatprep.mubr.msk.bf16.mxu0 %vm359_vm5, %v9422_v14  ;;  %v5447_v22 = vsel %vm359_vm5, %v9356_v43, %v5294_v21 }
 0x542   : >> { %v5296_v10 = vpop.permute.xlu0 %5295 }
 0x543   : >> { %v5450_v55 = vsel %vm359_vm5, %v9370_v27, %v5296_v10 }
 0x544   : >> { %5791 = vmatmul.mubr.bf16.gmra.mrb[72].mxu0 %v5447_v22 }
 0x545   : >> { %6763 = vmatprep.mubr.msk.bf16.mxu0 %vm359_vm5, %v9427_v18 }
 0x548   : >> { %v5298_v2 = vpop.permute.xlu1 %5297 }
 0x549   : >> { %v5453_v14 = vsel %vm359_vm5, %v9397_v44, %v5298_v2 }
 0x54c   : >> { %5801 = vmatmul.mubr.bf16.gmra.mrb[76].mxu0 %v5450_v55 }
 0x54d   : >> { %6764 = vmatprep.mubr.msk.bf16.mxu0 %vm359_vm5, %v9430_v5 }
 0x554   : >> { %5811 = vmatmul.mubr.bf16.gmra.mrb[80].mxu0 %v5453_v14 }
 0x555   : >> { %6765 = vmatprep.mubr.msk.bf16.mxu0 %vm359_vm5, %v9437_v38  ;;  %v5300_v43 = vpop.permute.xlu0 %5299 }
 0x556   : >> { %v5456_v18 = vsel %vm359_vm5, %v9432_v54, %v5300_v43 }
 0x55c   : >> { %5821 = vmatmul.mubr.bf16.gmra.mrb[84].mxu0 %v5456_v18 }
 0x55d   : >> { %6766 = vmatprep.mubr.msk.bf16.mxu0 %vm359_vm5, %v9495_v39 }
 0x57c   : >> { %v5302_v27 = vpop.permute.xlu1 %5301 }
 0x57d   : >> { %v5459_v5 = vsel %vm359_vm5, %v9480_v56, %v5302_v27 }
 0x57e   : >> { %5831 = vmatmul.mubr.bf16.gmra.mrb[88].mxu0 %v5459_v5 }
 0x57f   : >> { %6767 = vmatprep.mubr.msk.bf16.mxu0 %vm359_vm5, %v9516_v62 }
 0x585   : >> { %v5304_v44 = vpop.permute.xlu0 %5303 }
 0x586   : >> { %v5462_v38 = vsel %vm359_vm5, %v9502_v52, %v5304_v44  ;;  %v4914_v52 = vld [vmem:[#allocation3 + $0xcc] sm:$0xe]  ;;  %v9734_v44 = vld [vmem:[%s10073_s2 + $0x2] ss:$0 sm:$0xff] }
 0x587   : >> { %5841 = vmatmul.mubr.bf16.gmra.mrb[92].mxu0 %v5462_v38  ;;  %v6728_v20 = vcombine.low %v4914_v52, %v9520_v51  ;;  %v6112_v52 = vld [vmem:[%s7533_s26 + $0x8] sm:$0xff] }
 0x588   : >> { %6768 = vmatprep.mubr.msk.bf16.mxu0 %vm359_vm5, %v5412_v31 }
 0x589   : >> { %v9588_v54 = vpop.f32.mrb[36].mxu0  ;;  %v5416_v57 = vrot.slane %v6728_v20, 1 }
 0x58a   : >> { %v5708_v11 = vpop.f32.mrb[37].mxu0 }
 0x58b   : >> { %v9590_v30 = vpop.f32.mrb[38].mxu0  ;;  %v5418_v15 = vsel %vm1582_vm11, %v5416_v57, %v5417_v25 }
 0x58c   : >> { %v5711_v39 = vpop.f32.mrb[39].mxu0 }
 0x592   : >> { %v5306_v16 = vpop.permute.xlu1 %5305 }
 0x593   : >> { %v5465_v56 = vsel %vm359_vm5, %v9522_v49, %v5306_v16  ;;  %v6111_v16 = vld [vmem:[%s7533_s26] sm:$0xff] }
 0x594   : >> { %5851 = vmatmul.mubr.bf16.gmra.mrb[96].mxu0 %v5465_v56 }
 0x595   : >> { %6769 = vmatprep.mubr.msk.bf16.mxu0 %vm359_vm5, %v5415_v4 }
 0x596   : >> { %v5310_v6 = vpop.permute.xlu1 %5309 }
 0x597   : >> { %v5471_v42 = vsel %vm359_vm5, %v9525_v13, %v5310_v6 }
 0x59c   : >> { %v5308_v62 = vpop.permute.xlu0 %5307 }
 0x59d   : >> { %v5468_v24 = vsel %vm359_vm5, %v6691_v48, %v5308_v62 }
 0x59e   : >> { %5861 = vmatmul.mubr.bf16.gmra.mrb[100].mxu0 %v5468_v24 }
 0x59f   : >> { %6770 = vmatprep.mubr.msk.bf16.mxu0 %vm359_vm5, %v5418_v15 }
 0x5a6   : >> { %5871 = vmatmul.mubr.bf16.gmra.mrb[104].mxu0 %v5471_v42 }
 0x5b6   : >> { %v9602_v49 = vpop.f32.mrb[40].mxu0 }
 0x5b7   : >> { %v5716_v37 = vpop.f32.mrb[41].mxu0  ;;  %5911 = vrot.lane.b32.xlu0 %v9602_v49, %s7358_s8 }
 0x5b8   : >> { %v9606_v23 = vpop.f32.mrb[42].mxu0 }
 0x5b9   : >> { %v5719_v51 = vpop.f32.mrb[43].mxu0  ;;  %5913 = vrot.lane.b32.xlu1 %v9606_v23, %s7358_s8 }
 0x5c0   : >> { %v9610_v35 = vpop.f32.mrb[44].mxu0 }
 0x5c1   : >> { %v9612_v13 = vpop.f32.mrb[45].mxu0  ;;  %5915 = vrot.lane.b32.xlu0 %v9610_v35, %s7358_s8 }
 0x5c2   : >> { %v9616_v31 = vpop.f32.mrb[46].mxu0 }
 0x5c3   : >> { %v9618_v33 = vpop.f32.mrb[47].mxu0  ;;  %5917 = vrot.lane.b32.xlu1 %v9616_v31, %s7358_s8 }
 0x5cd   : >> { %v9622_v17 = vpop.f32.mrb[48].mxu0 }
 0x5ce   : >> { %v9624_v45 = vpop.f32.mrb[49].mxu0  ;;  %5919 = vrot.lane.b32.xlu0 %v9622_v17, %s7358_s8 }
 0x5cf   : >> { %v9628_v34 = vpop.f32.mrb[50].mxu0 }
 0x5d0   : >> { %v9630_v36 = vpop.f32.mrb[51].mxu0  ;;  %5921 = vrot.lane.b32.xlu1 %v9628_v34, %s7358_s8 }
 0x5d7   : >> { %v9634_v7 = vpop.f32.mrb[52].mxu0 }
 0x5d8   : >> { %v9636_v46 = vpop.f32.mrb[53].mxu0  ;;  %5923 = vrot.lane.b32.xlu0 %v9634_v7, %s7358_s8 }
 0x5d9   : >> { %v9640_v32 = vpop.f32.mrb[54].mxu0 }
 0x5da   : >> { %5925 = vrot.lane.b32.xlu1 %v9640_v32, %s7358_s8  ;;  %v9644_v41 = vpop.f32.mrb[55].mxu0 }
 0x5ed   : >> { %v9646_v40 = vpop.f32.mrb[56].mxu0 }
 0x5ee   : >> { %v9648_v48 = vpop.f32.mrb[57].mxu0  ;;  %5927 = vrot.lane.b32.xlu0 %v9646_v40, %s7358_s8 }
 0x5ef   : >> { %v9652_v59 = vpop.f32.mrb[58].mxu0 }
 0x5f0   : >> { %5929 = vrot.lane.b32.xlu1 %v9652_v59, %s7358_s8  ;;  %v9656_v53 = vpop.f32.mrb[59].mxu0 }
 0x5fa   : >> { %v9658_v8 = vpop.f32.mrb[60].mxu0 }
 0x5fb   : >> { %5931 = vrot.lane.b32.xlu0 %v9658_v8, %s7358_s8  ;;  %v9662_v61 = vpop.f32.mrb[61].mxu0 }
 0x5fc   : >> { %v9664_v47 = vpop.f32.mrb[62].mxu0 }
 0x5fd   : >> { %5933 = vrot.lane.b32.xlu1 %v9664_v47, %s7358_s8  ;;  %v9668_v50 = vpop.f32.mrb[63].mxu0 }
 0x606   : >> { %v9670_v9 = vpop.f32.mrb[64].mxu0 }
 0x607   : >> { %5935 = vrot.lane.b32.xlu0 %v9670_v9, %s7358_s8  ;;  %v9674_v12 = vpop.f32.mrb[65].mxu0 }
 0x608   : >> { %v9676_v63 = vpop.f32.mrb[66].mxu0 }
 0x609   : >> { %5937 = vrot.lane.b32.xlu1 %v9676_v63, %s7358_s8  ;;  %v9680_v0 = vpop.f32.mrb[67].mxu0 }
 0x60f   : >> { %v9682_v4 = vpop.f32.mrb[68].mxu0 }
 0x610   : >> { %5939 = vrot.lane.b32.xlu0 %v9682_v4, %s7358_s8  ;;  %v9686_v19 = vpop.f32.mrb[69].mxu0 }
 0x611   : >> { %v9688_v60 = vpop.f32.mrb[70].mxu0 }
 0x612   : >> { %5941 = vrot.lane.b32.xlu1 %v9688_v60, %s7358_s8  ;;  %v9692_v3 = vpop.f32.mrb[71].mxu0 }
 0x617   : >> { %v9694_v26 = vpop.f32.mrb[72].mxu0 }
 0x618   : >> { %5943 = vrot.lane.b32.xlu0 %v9694_v26, %s7358_s8  ;;  %v9698_v28 = vpop.f32.mrb[73].mxu0 }
 0x619   : >> { %v9700_v58 = vpop.f32.mrb[74].mxu0 }
 0x61a   : >> { %5945 = vrot.lane.b32.xlu1 %v9700_v58, %s7358_s8  ;;  %v9704_v29 = vpop.f32.mrb[75].mxu0 }
 0x61f   : >> { %v9706_v21 = vpop.f32.mrb[76].mxu0 }
 0x620   : >> { %5947 = vrot.lane.b32.xlu0 %v9706_v21, %s7358_s8  ;;  %v9710_v22 = vpop.f32.mrb[77].mxu0 }
 0x621   : >> { %v9712_v10 = vpop.f32.mrb[78].mxu0 }
 0x622   : >> { %5949 = vrot.lane.b32.xlu1 %v9712_v10, %s7358_s8  ;;  %v9716_v55 = vpop.f32.mrb[79].mxu0 }
 0x627   : >> { %v9718_v2 = vpop.f32.mrb[80].mxu0 }
 0x628   : >> { %5951 = vrot.lane.b32.xlu0 %v9718_v2, %s7358_s8  ;;  %v9722_v14 = vpop.f32.mrb[81].mxu0 }
 0x629   : >> { %v9724_v43 = vpop.f32.mrb[82].mxu0  ;;  %v5912_v27 = vpop.permute.xlu0 %5911 }
 0x62a   : >> { %5953 = vrot.lane.b32.xlu1 %v9724_v43, %s7358_s8  ;;  %v9728_v18 = vpop.f32.mrb[83].mxu0  ;;  %v6007_v5 = vadd.f32 %v5912_v27, %v9588_v54 }
 0x62b   : >> { %v5914_v38 = vpop.permute.xlu1 %5913 }
 0x62c   : >> { %v6039_v11 = vadd.f32 %v6007_v5, %v9612_v13  ;;  %v6008_v39 = vadd.f32 %v5914_v38, %v9590_v30  ;;  %v6114_v38 = vld [vmem:[%s7533_s26 + $0x18] sm:$0xff] }
 0x62e   : >> { %v6079_v62 = vadd.f32 %v9734_v44, %v6039_v11  ;;  %v6040_v24 = vadd.f32 %v6008_v39, %v9618_v33  ;;  %v6113_v33 = vld [vmem:[%s7533_s26 + $0x10] sm:$0xff] }
 0x62f   : >> { %v9739_v56 = vpop.f32.mrb[84].mxu0 }
 0x630   : >> { %5955 = vrot.lane.b32.xlu0 %v9739_v56, %s7358_s8  ;;  %v9745_v54 = vpop.f32.mrb[85].mxu0  ;;  %v6143_v20 = vadd.f32 %v6111_v16, %v6079_v62  ;;  %v6080_v30 = vadd.f32 %v9734_v44, %v6040_v24 }
 0x631   : >> { %v9748_v6 = vpop.f32.mrb[86].mxu0 }
 0x632   : >> { %5957 = vrot.lane.b32.xlu1 %v9748_v6, %s7358_s8  ;;  %v9753_v25 = vpop.f32.mrb[87].mxu0  ;;  %6175 = vst.msk [vmem:[#allocation2] sm:$0xff] %vm359_vm5, %v6143_v20  ;;  %v6144_v57 = vadd.f32 %v6112_v52, %v6080_v30  ;;  %v6115_v52 = vld [vmem:[%s7533_s26 + $0x20] sm:$0xff]  ;;  %v6116_v30 = vld [vmem:[%s7533_s26 + $0x28] sm:$0xff] }
 0x633   : >> { %v5916_v42 = vpop.permute.xlu0 %5915 }
 0x634   : >> { %6176 = vst.msk [vmem:[#allocation2 + $0x8] sm:$0xff] %vm359_vm5, %v6144_v57  ;;  %v6009_v15 = vadd.f32 %v5916_v42, %v9602_v49 }
 0x635   : >> { %v5918_v37 = vpop.permute.xlu1 %5917 }
 0x636   : >> { %v6041_v51 = vadd.f32 %v6009_v15, %v9624_v45  ;;  %v6010_v13 = vadd.f32 %v5918_v37, %v9606_v23 }
 0x638   : >> { %v6081_v27 = vadd.f32 %v9734_v44, %v6041_v51  ;;  %v6042_v5 = vadd.f32 %v6010_v13, %v9630_v36  ;;  %v6117_v13 = vld [vmem:[%s7533_s26 + $0x30] sm:$0xff] }
 0x63a   : >> { %v6145_v11 = vadd.f32 %v6113_v33, %v6081_v27  ;;  %v6082_v39 = vadd.f32 %v9734_v44, %v6042_v5  ;;  %v6118_v27 = vld [vmem:[%s7533_s26 + $0x38] sm:$0xff] }
 0x63c   : >> { %6177 = vst.msk [vmem:[#allocation2 + $0x10] sm:$0xff] %vm359_vm5, %v6145_v11  ;;  %v6146_v16 = vadd.f32 %v6114_v38, %v6082_v39 }
 0x63e   : >> { %6178 = vst.msk [vmem:[#allocation2 + $0x18] sm:$0xff] %vm359_vm5, %v6146_v16 }
 0x640   : >> { %v5920_v49 = vpop.permute.xlu0 %5919 }
 0x641   : >> { %v6011_v45 = vadd.f32 %v5920_v49, %v9610_v35 }
 0x642   : >> { %v5922_v62 = vpop.permute.xlu1 %5921 }
 0x643   : >> { %v6043_v23 = vadd.f32 %v6011_v45, %v9636_v46  ;;  %v6012_v24 = vadd.f32 %v5922_v62, %v9616_v31 }
 0x645   : >> { %v6083_v36 = vadd.f32 %v9734_v44, %v6043_v23  ;;  %v6044_v20 = vadd.f32 %v6012_v24, %v9644_v41 }
 0x647   : >> { %v6147_v57 = vadd.f32 %v6115_v52, %v6083_v36  ;;  %v6084_v42 = vadd.f32 %v9734_v44, %v6044_v20  ;;  %v6119_v20 = vld [vmem:[%s7533_s26 + $0x40] sm:$0xff] }
 0x649   : >> { %6179 = vst.msk [vmem:[#allocation2 + $0x20] sm:$0xff] %vm359_vm5, %v6147_v57  ;;  %v6148_v15 = vadd.f32 %v6116_v30, %v6084_v42  ;;  %v6120_v42 = vld [vmem:[%s7533_s26 + $0x48] sm:$0xff] }
 0x64a   : >> { %v5924_v35 = vpop.permute.xlu0 %5923 }
 0x64b   : >> { %6180 = vst.msk [vmem:[#allocation2 + $0x28] sm:$0xff] %vm359_vm5, %v6148_v15  ;;  %v6013_v46 = vadd.f32 %v5924_v35, %v9622_v17 }
 0x64c   : >> { %v5926_v37 = vpop.permute.xlu1 %5925 }
 0x64d   : >> { %v6045_v31 = vadd.f32 %v6013_v46, %v9648_v48  ;;  %v6014_v51 = vadd.f32 %v5926_v37, %v9628_v34 }
 0x64f   : >> { %v6085_v41 = vadd.f32 %v9734_v44, %v6045_v31  ;;  %v6046_v33 = vadd.f32 %v6014_v51, %v9656_v53 }
 0x650   : > { %v6211_v1 = vld [vmem:[#allocation2 + $0x20] sm:$0xff] (%p394_p4) }
 0x651   : >> { %v6149_v5 = vadd.f32 %v6117_v13, %v6085_v41  ;;  %v6086_v38 = vadd.f32 %v9734_v44, %v6046_v33  ;;  %v9785_v11 = vpop.f32.mrb[88].mxu0  ;;  %v6121_v33 = vld [vmem:[%s7533_s26 + $0x50] sm:$0xff]  ;;  %6243 = vst.msk [vmem:[%s7699_s18 + $0x20] sm:$0xff] (%p394_p4), %vm359_vm5, %v6211_v1 }
 0x652   : >> { %5959 = vrot.lane.b32.xlu0 %v9785_v11, %s7358_s8  ;;  %v9790_v17 = vpop.f32.mrb[89].mxu0 }
 0x653   : >> { %6181 = vst.msk [vmem:[#allocation2 + $0x30] sm:$0xff] %vm359_vm5, %v6149_v5  ;;  %v6150_v39 = vadd.f32 %v6118_v27, %v6086_v38  ;;  %v9792_v34 = vpop.f32.mrb[90].mxu0  ;;  %v6122_v38 = vld [vmem:[%s7533_s26 + $0x58] sm:$0xff] }
 0x654   : >> { %5961 = vrot.lane.b32.xlu1 %v9792_v34, %s7358_s8  ;;  %v9797_v48 = vpop.f32.mrb[91].mxu0 }
 0x655   : >> { %6182 = vst.msk [vmem:[#allocation2 + $0x38] sm:$0xff] %vm359_vm5, %v6150_v39 }
 0x65a   : >> { %v9799_v53 = vpop.f32.mrb[92].mxu0 }
 0x65b   : >> { %5963 = vrot.lane.b32.xlu0 %v9799_v53, %s7358_s8  ;;  %v9803_v16 = vpop.f32.mrb[93].mxu0 }
 0x65c   : >> { %v9805_v49 = vpop.f32.mrb[94].mxu0 }
 0x65d   : >> { %5965 = vrot.lane.b32.xlu1 %v9805_v49, %s7358_s8  ;;  %v9809_v45 = vpop.f32.mrb[95].mxu0 }
 0x660   : >> { %v5928_v62 = vpop.permute.xlu0 %5927 }
 0x661   : >> { %v6015_v23 = vadd.f32 %v5928_v62, %v9634_v7 }
 0x662   : >> { %v5930_v24 = vpop.permute.xlu1 %5929 }
 0x663   : >> { %v6047_v52 = vadd.f32 %v6015_v23, %v9662_v61  ;;  %v6016_v36 = vadd.f32 %v5930_v24, %v9640_v32 }
 0x665   : >> { %v6087_v30 = vadd.f32 %v9734_v44, %v6047_v52  ;;  %v6048_v57 = vadd.f32 %v6016_v36, %v9668_v50 }
 0x667   : >> { %v6151_v15 = vadd.f32 %v6119_v20, %v6087_v30  ;;  %v6088_v35 = vadd.f32 %v9734_v44, %v6048_v57  ;;  %v9819_v46 = vpop.f32.mrb[96].mxu0 }
 0x668   : >> { %5967 = vrot.lane.b32.xlu0 %v9819_v46, %s7358_s8  ;;  %v9823_v7 = vpop.f32.mrb[97].mxu0 }
 0x669   : >> { %6183 = vst.msk [vmem:[#allocation2 + $0x40] sm:$0xff] %vm359_vm5, %v6151_v15  ;;  %v6152_v32 = vadd.f32 %v6120_v42, %v6088_v35  ;;  %v9826_v61 = vpop.f32.mrb[98].mxu0  ;;  %v6123_v42 = vld [vmem:[%s7533_s26 + $0x60] sm:$0xff] }
 0x66a   : >> { %5969 = vrot.lane.b32.xlu1 %v9826_v61, %s7358_s8  ;;  %v9830_v50 = vpop.f32.mrb[99].mxu0 }
 0x66b   : >> { %6184 = vst.msk [vmem:[#allocation2 + $0x48] sm:$0xff] %vm359_vm5, %v6152_v32 }
 0x66d   : >> { %v5932_v37 = vpop.permute.xlu0 %5931 }
 0x66e   : >> { %v6017_v31 = vadd.f32 %v5932_v37, %v9646_v40 }
 0x66f   : >> { %v5934_v51 = vpop.permute.xlu1 %5933 }
 0x670   : >> { %v6049_v13 = vadd.f32 %v6017_v31, %v9674_v12  ;;  %v6018_v41 = vadd.f32 %v5934_v51, %v9652_v59  ;;  %v6124_v31 = vld [vmem:[%s7533_s26 + $0x68] sm:$0xff] }
 0x671   : >> { %v5862_v39 = vpop.f32.mrb[100].mxu0 }
 0x672   : >> { %v6089_v27 = vadd.f32 %v9734_v44, %v6049_v13  ;;  %v6050_v5 = vadd.f32 %v6018_v41, %v9680_v0  ;;  %5971 = vrot.lane.b32.xlu0 %v5862_v39, %s7358_s8  ;;  %v9842_v24 = vpop.f32.mrb[101].mxu0 }
 0x673   : >> { %v5866_v40 = vpop.f32.mrb[102].mxu0 }
 0x674   : >> { %v6153_v62 = vadd.f32 %v6121_v33, %v6089_v27  ;;  %v6090_v23 = vadd.f32 %v9734_v44, %v6050_v5  ;;  %5973 = vrot.lane.b32.xlu1 %v5866_v40, %s7358_s8  ;;  %v9846_v12 = vpop.f32.mrb[103].mxu0  ;;  %v6125_v5 = vld [vmem:[%s7533_s26 + $0x70] sm:$0xff]  ;;  %s7273_s8 = scalar_lea.vmem (%p394_p4), %s10011_s7, 4096 }
 0x675   : > { %p7274_p6 = scmp.ne.s32.totalorder (%p394_p4), %s10011_s7, %s7273_s8  ;;  %p7281_p3 = scmp.lt.s32.totalorder (%p394_p4), %s7279_s25, %s7273_s8 }
 0x676   : >> { %6185 = vst.msk [vmem:[#allocation2 + $0x50] sm:$0xff] %vm359_vm5, %v6153_v62  ;;  %v6154_v59 = vadd.f32 %v6122_v38, %v6090_v23  ;;  %v6126_v62 = vld [vmem:[%s7533_s26 + $0x78] sm:$0xff] }
 0x677   : > { %p7275_p8 = pnand (%p394_p4), %p7274_p6, %p7476_p12  ;;  %p7282_p7 = por (%p394_p4), %p7281_p3, %p7280_p13 }
 0x678   : >> { %6186 = vst.msk [vmem:[#allocation2 + $0x58] sm:$0xff] %vm359_vm5, %v6154_v59 }
 0x679   : >> { %v5936_v0 = vpop.permute.xlu0 %5935  ;;  %v5872_v57 = vpop.f32.mrb[104].mxu0  ;;  %p7276_p10 = pneg (%p394_p4), %p7275_p8 }
 0x67a   : >> { %v6019_v52 = vadd.f32 %v5936_v0, %v9658_v8  ;;  %v9853_v15 = vpop.f32.mrb[105].mxu0 }
 0x67b   : >> { %v5938_v36 = vpop.permute.xlu1 %5937  ;;  %v5875_v37 = vpop.f32.mrb[106].mxu0  ;;  %p7283_p9 = pnand (%p394_p4), %p7282_p7, %p7276_p10 }
 0x67c   : >> { %v6051_v20 = vadd.f32 %v6019_v52, %v9686_v19  ;;  %v6020_v30 = vadd.f32 %v5938_v36, %v9664_v47  ;;  %v9858_v51 = vpop.f32.mrb[107].mxu0  ;;  %v6127_v36 = vld [vmem:[%s7533_s26 + $0x80] sm:$0xff] }
 0x67e   : >> { %v6091_v35 = vadd.f32 %v9734_v44, %v6051_v20  ;;  %v6052_v32 = vadd.f32 %v6020_v30, %v9692_v3  ;;  %v6128_v30 = vld [vmem:[%s7533_s26 + $0x88] sm:$0xff] }
 0x680   : >> { %v6155_v8 = vadd.f32 %v6123_v42, %v6091_v35  ;;  %v6092_v13 = vadd.f32 %v9734_v44, %v6052_v32 }
 0x682   : >> { %6187 = vst.msk [vmem:[#allocation2 + $0x60] sm:$0xff] %vm359_vm5, %v6155_v8  ;;  %v6156_v47 = vadd.f32 %v6124_v31, %v6092_v13  ;;  %v5940_v19 = vpop.permute.xlu0 %5939  ;;  %v6129_v31 = vld [vmem:[%s7533_s26 + $0x90] sm:$0xff]  ;;  %v6130_v13 = vld [vmem:[%s7533_s26 + $0x98] sm:$0xff] }
 0x683   : >> { %v6021_v41 = vadd.f32 %v5940_v19, %v9670_v9 }
 0x684   : >> { %6188 = vst.msk [vmem:[#allocation2 + $0x68] sm:$0xff] %vm359_vm5, %v6156_v47  ;;  %v5942_v33 = vpop.permute.xlu1 %5941 }
 0x685   : >> { %v6053_v27 = vadd.f32 %v6021_v41, %v9698_v28  ;;  %v6022_v3 = vadd.f32 %v5942_v33, %v9676_v63 }
 0x687   : >> { %v6093_v38 = vadd.f32 %v9734_v44, %v6053_v27  ;;  %v6054_v39 = vadd.f32 %v6022_v3, %v9704_v29  ;;  %v6131_v3 = vld [vmem:[%s7533_s26 + $0xa0] sm:$0xff] }
 0x689   : >> { %v6157_v23 = vadd.f32 %v6125_v5, %v6093_v38  ;;  %v6094_v40 = vadd.f32 %v9734_v44, %v6054_v39  ;;  %v6132_v38 = vld [vmem:[%s7533_s26 + $0xa8] sm:$0xff] }
 0x68a   : >> { %v5944_v59 = vpop.permute.xlu0 %5943 }
 0x68b   : >> { %6189 = vst.msk [vmem:[#allocation2 + $0x70] sm:$0xff] %vm359_vm5, %v6157_v23  ;;  %v6158_v9 = vadd.f32 %v6126_v62, %v6094_v40  ;;  %v6023_v0 = vadd.f32 %v5944_v59, %v9682_v4 }
 0x68c   : >> { %v5946_v28 = vpop.permute.xlu1 %5945 }
 0x68d   : >> { %6190 = vst.msk [vmem:[#allocation2 + $0x78] sm:$0xff] %vm359_vm5, %v6158_v9  ;;  %v6055_v63 = vadd.f32 %v6023_v0, %v9710_v22  ;;  %v6024_v52 = vadd.f32 %v5946_v28, %v9688_v60  ;;  %v6133_v9 = vld [vmem:[%s7533_s26 + $0xb0] sm:$0xff]  ;;  %v6134_v28 = vld [vmem:[%s7533_s26 + $0xb8] sm:$0xff] }
 0x68f   : >> { %v6095_v29 = vadd.f32 %v9734_v44, %v6055_v63  ;;  %v6056_v20 = vadd.f32 %v6024_v52, %v9716_v55 }
 0x691   : >> { %v6159_v57 = vadd.f32 %v6127_v36, %v6095_v29  ;;  %v6096_v42 = vadd.f32 %v9734_v44, %v6056_v20 }
 0x692   : >> { %v5948_v35 = vpop.permute.xlu0 %5947 }
 0x693   : >> { %6191 = vst.msk [vmem:[#allocation2 + $0x80] sm:$0xff] %vm359_vm5, %v6159_v57  ;;  %v6160_v4 = vadd.f32 %v6128_v30, %v6096_v42  ;;  %v6025_v32 = vadd.f32 %v5948_v35, %v9694_v26  ;;  %v6135_v30 = vld [vmem:[%s7533_s26 + $0xc0] sm:$0xff]  ;;  %v6136_v42 = vld [vmem:[%s7533_s26 + $0xc8] sm:$0xff] }
 0x694   : >> { %v5950_v22 = vpop.permute.xlu1 %5949 }
 0x695   : >> { %6192 = vst.msk [vmem:[#allocation2 + $0x88] sm:$0xff] %vm359_vm5, %v6160_v4  ;;  %v6057_v60 = vadd.f32 %v6025_v32, %v9722_v14  ;;  %v6026_v37 = vadd.f32 %v5950_v22, %v9700_v58 }
 0x697   : >> { %v6097_v55 = vadd.f32 %v9734_v44, %v6057_v60  ;;  %v6058_v8 = vadd.f32 %v6026_v37, %v9728_v18  ;;  %v6137_v37 = vld [vmem:[%s7533_s26 + $0xd0] sm:$0xff] }
 0x699   : >> { %v6161_v47 = vadd.f32 %v6129_v31, %v6097_v55  ;;  %v6098_v19 = vadd.f32 %v9734_v44, %v6058_v8  ;;  %v6138_v55 = vld [vmem:[%s7533_s26 + $0xd8] sm:$0xff] }
 0x69a   : >> { %v5952_v41 = vpop.permute.xlu0 %5951 }
 0x69b   : >> { %6193 = vst.msk [vmem:[#allocation2 + $0x90] sm:$0xff] %vm359_vm5, %v6161_v47  ;;  %v6162_v26 = vadd.f32 %v6130_v13, %v6098_v19  ;;  %v6027_v33 = vadd.f32 %v5952_v41, %v9706_v21 }
 0x69c   : >> { %v5954_v14 = vpop.permute.xlu1 %5953 }
 0x69d   : >> { %6194 = vst.msk [vmem:[#allocation2 + $0x98] sm:$0xff] %vm359_vm5, %v6162_v26  ;;  %v6059_v58 = vadd.f32 %v6027_v33, %v9745_v54  ;;  %v6028_v27 = vadd.f32 %v5954_v14, %v9712_v10  ;;  %v6139_v26 = vld [vmem:[%s7533_s26 + $0xe0] sm:$0xff]  ;;  %v6140_v14 = vld [vmem:[%s7533_s26 + $0xe8] sm:$0xff] }
 0x69f   : >> { %v6099_v18 = vadd.f32 %v9734_v44, %v6059_v58  ;;  %v6060_v5 = vadd.f32 %v6028_v27, %v9753_v25 }
 0x6a1   : >> { %v6163_v39 = vadd.f32 %v6131_v3, %v6099_v18  ;;  %v6100_v62 = vadd.f32 %v9734_v44, %v6060_v5 }
 0x6a2   : >> { %v5956_v23 = vpop.permute.xlu0 %5955 }
 0x6a3   : >> { %6195 = vst.msk [vmem:[#allocation2 + $0xa0] sm:$0xff] %vm359_vm5, %v6163_v39  ;;  %v6164_v21 = vadd.f32 %v6132_v38, %v6100_v62  ;;  %v6029_v40 = vadd.f32 %v5956_v23, %v9718_v2  ;;  %v6141_v38 = vld [vmem:[%s7533_s26 + $0xf0] sm:$0xff]  ;;  %v6142_v62 = vld [vmem:[%s7533_s26 + $0xf8] sm:$0xff]  ;;  %s10009_s26 = scalar_lea.hbm (%p394_p4), %s10074_s3, %s6875_s22 }
 0x6a4   : >> { %v5958_v54 = vpop.permute.xlu1 %5957 }
 0x6a5   : >> { %6196 = vst.msk [vmem:[#allocation2 + $0xa8] sm:$0xff] %vm359_vm5, %v6164_v21  ;;  %v6061_v10 = vadd.f32 %v6029_v40, %v9790_v17  ;;  %v6030_v59 = vadd.f32 %v5958_v54, %v9724_v43  ;;  %v6213_v54 = vld [vmem:[#allocation2 + $0x30] sm:$0xff] (%p394_p4) }
 0x6a6   : > { %6245 = vst.msk [vmem:[%s7699_s18 + $0x30] sm:$0xff] (%p394_p4), %vm359_vm5, %v6213_v54 }
 0x6a7   : >> { %v6101_v25 = vadd.f32 %v9734_v44, %v6061_v10  ;;  %v6062_v0 = vadd.f32 %v6030_v59, %v9797_v48  ;;  %v6214_v10 = vld [vmem:[#allocation2 + $0x38] sm:$0xff] (%p394_p4)  ;;  %v6215_v59 = vld [vmem:[#allocation2 + $0x40] sm:$0xff] (%p394_p4) }
 0x6a8   : > { %6246 = vst.msk [vmem:[%s7699_s18 + $0x38] sm:$0xff] (%p394_p4), %vm359_vm5, %v6214_v10  ;;  %6247 = vst.msk [vmem:[%s7699_s18 + $0x40] sm:$0xff] (%p394_p4), %vm359_vm5, %v6215_v59 }
 0x6a9   : >> { %v6165_v63 = vadd.f32 %v6133_v9, %v6101_v25  ;;  %v6102_v52 = vadd.f32 %v9734_v44, %v6062_v0  ;;  %v6216_v9 = vld [vmem:[#allocation2 + $0x48] sm:$0xff] (%p394_p4)  ;;  %v6217_v25 = vld [vmem:[#allocation2 + $0x50] sm:$0xff] (%p394_p4)  ;;  %v6218_v0 = vld [vmem:[#allocation2 + $0x58] sm:$0xff] (%p394_p4) }
 0x6aa   : > { %6248 = vst.msk [vmem:[%s7699_s18 + $0x48] sm:$0xff] (%p394_p4), %vm359_vm5, %v6216_v9  ;;  %6249 = vst.msk [vmem:[%s7699_s18 + $0x50] sm:$0xff] (%p394_p4), %vm359_vm5, %v6217_v25 }
 0x6ab   : >> { %6197 = vst.msk [vmem:[#allocation2 + $0xb0] sm:$0xff] %vm359_vm5, %v6165_v63  ;;  %v6166_v2 = vadd.f32 %v6134_v28, %v6102_v52  ;;  %6250 = vst.msk [vmem:[%s7699_s18 + $0x58] sm:$0xff] (%p394_p4), %vm359_vm5, %v6218_v0  ;;  %v6219_v28 = vld [vmem:[#allocation2 + $0x60] sm:$0xff] (%p394_p4)  ;;  %v6220_v63 = vld [vmem:[#allocation2 + $0x68] sm:$0xff] (%p394_p4) }
 0x6ac   : > { %v6221_v52 = vld [vmem:[#allocation2 + $0x70] sm:$0xff] (%p394_p4)  ;;  %6251 = vst.msk [vmem:[%s7699_s18 + $0x60] sm:$0xff] (%p394_p4), %vm359_vm5, %v6219_v28  ;;  %6252 = vst.msk [vmem:[%s7699_s18 + $0x68] sm:$0xff] (%p394_p4), %vm359_vm5, %v6220_v63 }
 0x6ad   : >> { %6198 = vst.msk [vmem:[#allocation2 + $0xb8] sm:$0xff] %vm359_vm5, %v6166_v2  ;;  %6253 = vst.msk [vmem:[%s7699_s18 + $0x70] sm:$0xff] (%p394_p4), %vm359_vm5, %v6221_v52  ;;  %v6222_v2 = vld [vmem:[#allocation2 + $0x78] sm:$0xff] (%p394_p4) }
 0x6ae   : > { %6254 = vst.msk [vmem:[%s7699_s18 + $0x78] sm:$0xff] (%p394_p4), %vm359_vm5, %v6222_v2 }
 0x6c4   : >> { %v5960_v36 = vpop.permute.xlu0 %5959 }
 0x6c5   : >> { %v6031_v17 = vadd.f32 %v5960_v36, %v9739_v56  ;;  %v6223_v36 = vld [vmem:[#allocation2 + $0x80] sm:$0xff] (%p394_p4) }
 0x6c6   : >> { %v5962_v29 = vpop.permute.xlu1 %5961  ;;  %6255 = vst.msk [vmem:[%s7699_s18 + $0x80] sm:$0xff] (%p394_p4), %vm359_vm5, %v6223_v36 }
 0x6c7   : >> { %v6063_v43 = vadd.f32 %v6031_v17, %v9803_v16  ;;  %v6032_v20 = vadd.f32 %v5962_v29, %v9748_v6  ;;  %v6224_v17 = vld [vmem:[#allocation2 + $0x88] sm:$0xff] (%p394_p4)  ;;  %v6225_v29 = vld [vmem:[#allocation2 + $0x90] sm:$0xff] (%p394_p4) }
 0x6c8   : > { %6256 = vst.msk [vmem:[%s7699_s18 + $0x88] sm:$0xff] (%p394_p4), %vm359_vm5, %v6224_v17  ;;  %6257 = vst.msk [vmem:[%s7699_s18 + $0x90] sm:$0xff] (%p394_p4), %vm359_vm5, %v6225_v29 }
 0x6c9   : >> { %v6103_v48 = vadd.f32 %v9734_v44, %v6063_v43  ;;  %v6064_v57 = vadd.f32 %v6032_v20, %v9809_v45  ;;  %v6226_v43 = vld [vmem:[#allocation2 + $0x98] sm:$0xff] (%p394_p4)  ;;  %v6227_v20 = vld [vmem:[#allocation2 + $0xa0] sm:$0xff] (%p394_p4) }
 0x6ca   : > { %6258 = vst.msk [vmem:[%s7699_s18 + $0x98] sm:$0xff] (%p394_p4), %vm359_vm5, %v6226_v43  ;;  %6259 = vst.msk [vmem:[%s7699_s18 + $0xa0] sm:$0xff] (%p394_p4), %vm359_vm5, %v6227_v20 }
 0x6cb   : >> { %v6167_v35 = vadd.f32 %v6135_v30, %v6103_v48  ;;  %v6104_v4 = vadd.f32 %v9734_v44, %v6064_v57  ;;  %v6228_v30 = vld [vmem:[#allocation2 + $0xa8] sm:$0xff] (%p394_p4)  ;;  %v6229_v48 = vld [vmem:[#allocation2 + $0xb0] sm:$0xff] (%p394_p4)  ;;  %v6230_v57 = vld [vmem:[#allocation2 + $0xb8] sm:$0xff] (%p394_p4) }
 0x6cc   : > { %6260 = vst.msk [vmem:[%s7699_s18 + $0xa8] sm:$0xff] (%p394_p4), %vm359_vm5, %v6228_v30  ;;  %6261 = vst.msk [vmem:[%s7699_s18 + $0xb0] sm:$0xff] (%p394_p4), %vm359_vm5, %v6229_v48 }
 0x6cd   : >> { %v5964_v32 = vpop.permute.xlu0 %5963  ;;  %6199 = vst.msk [vmem:[#allocation2 + $0xc0] sm:$0xff] %vm359_vm5, %v6167_v35  ;;  %v6168_v56 = vadd.f32 %v6136_v42, %v6104_v4  ;;  %6262 = vst.msk [vmem:[%s7699_s18 + $0xb8] sm:$0xff] (%p394_p4), %vm359_vm5, %v6230_v57 }
 0x6ce   : >> { %v6033_v22 = vadd.f32 %v5964_v32, %v9785_v11 }
 0x6cf   : >> { %v5966_v16 = vpop.permute.xlu1 %5965  ;;  %6200 = vst.msk [vmem:[#allocation2 + $0xc8] sm:$0xff] %vm359_vm5, %v6168_v56 }
 0x6d0   : >> { %v6065_v6 = vadd.f32 %v6033_v22, %v9823_v7  ;;  %v6034_v60 = vadd.f32 %v5966_v16, %v9792_v34 }
 0x6d2   : >> { %v6105_v45 = vadd.f32 %v9734_v44, %v6065_v6  ;;  %v6066_v31 = vadd.f32 %v6034_v60, %v9830_v50 }
 0x6d4   : >> { %v6169_v8 = vadd.f32 %v6137_v37, %v6105_v45  ;;  %v6106_v13 = vadd.f32 %v9734_v44, %v6066_v31  ;;  %v6231_v42 = vld [vmem:[#allocation2 + $0xc0] sm:$0xff] (%p394_p4) }
 0x6d5   : > { %6263 = vst.msk [vmem:[%s7699_s18 + $0xc0] sm:$0xff] (%p394_p4), %vm359_vm5, %v6231_v42 }
 0x6d6   : >> { %6201 = vst.msk [vmem:[#allocation2 + $0xd0] sm:$0xff] %vm359_vm5, %v6169_v8  ;;  %v6170_v11 = vadd.f32 %v6138_v55, %v6106_v13  ;;  %v6232_v35 = vld [vmem:[#allocation2 + $0xc8] sm:$0xff] (%p394_p4) }
 0x6d7   : > { %6264 = vst.msk [vmem:[%s7699_s18 + $0xc8] sm:$0xff] (%p394_p4), %vm359_vm5, %v6232_v35 }
 0x6d8   : >> { %6202 = vst.msk [vmem:[#allocation2 + $0xd8] sm:$0xff] %vm359_vm5, %v6170_v11 }
 0x6da   : >> { %v5968_v47 = vpop.permute.xlu0 %5967 }
 0x6db   : >> { %v6035_v7 = vadd.f32 %v5968_v47, %v9799_v53 }
 0x6dc   : >> { %v5970_v19 = vpop.permute.xlu1 %5969 }
 0x6dd   : >> { %v6067_v34 = vadd.f32 %v6035_v7, %v9842_v24  ;;  %v6036_v41 = vadd.f32 %v5970_v19, %v9805_v49  ;;  %v6233_v4 = vld [vmem:[#allocation2 + $0xd0] sm:$0xff] (%p394_p4) }
 0x6de   : > { %6265 = vst.msk [vmem:[%s7699_s18 + $0xd0] sm:$0xff] (%p394_p4), %vm359_vm5, %v6233_v4 }
 0x6df   : >> { %v6107_v50 = vadd.f32 %v9734_v44, %v6067_v34  ;;  %v6068_v33 = vadd.f32 %v6036_v41, %v9846_v12  ;;  %v6234_v32 = vld [vmem:[#allocation2 + $0xd8] sm:$0xff] (%p394_p4) }
 0x6e0   : > { %6266 = vst.msk [vmem:[%s7699_s18 + $0xd8] sm:$0xff] (%p394_p4), %vm359_vm5, %v6234_v32 }
 0x6e1   : >> { %v6171_v58 = vadd.f32 %v6139_v26, %v6107_v50  ;;  %v6108_v27 = vadd.f32 %v9734_v44, %v6068_v33 }
 0x6e3   : >> { %6203 = vst.msk [vmem:[#allocation2 + $0xe0] sm:$0xff] %vm359_vm5, %v6171_v58  ;;  %v6172_v3 = vadd.f32 %v6140_v14, %v6108_v27 }
 0x6e4   : >> { %v5972_v53 = vpop.permute.xlu0 %5971 }
 0x6e5   : >> { %6204 = vst.msk [vmem:[#allocation2 + $0xe8] sm:$0xff] %vm359_vm5, %v6172_v3  ;;  %v6037_v24 = vadd.f32 %v5972_v53, %v9819_v46  ;;  %v6207_v46 = vld [vmem:[#allocation2] sm:$0xff] (%p394_p4) }
 0x6e6   : >> { %v5974_v18 = vpop.permute.xlu1 %5973  ;;  %6239 = vst.msk [vmem:[%s7699_s18] sm:$0xff] (%p394_p4), %vm359_vm5, %v6207_v46 }
 0x6e7   : >> { %v6069_v49 = vadd.f32 %v6037_v24, %v9853_v15  ;;  %v6038_v5 = vadd.f32 %v5974_v18, %v9826_v61  ;;  %v6209_v61 = vld [vmem:[#allocation2 + $0x10] sm:$0xff] (%p394_p4)  ;;  %v6210_v15 = vld [vmem:[#allocation2 + $0x18] sm:$0xff] (%p394_p4) }
 0x6e8   : > { %6241 = vst.msk [vmem:[%s7699_s18 + $0x10] sm:$0xff] (%p394_p4), %vm359_vm5, %v6209_v61  ;;  %6242 = vst.msk [vmem:[%s7699_s18 + $0x18] sm:$0xff] (%p394_p4), %vm359_vm5, %v6210_v15 }
 0x6e9   : >> { %v6109_v12 = vadd.f32 %v9734_v44, %v6069_v49  ;;  %v6070_v39 = vadd.f32 %v6038_v5, %v9858_v51  ;;  %396 = sbr.rel (!%p394_p4) target bundleno = 135 (0x87), region = 94  ;;  %v6212_v51 = vld [vmem:[#allocation2 + $0x28] sm:$0xff] (%p394_p4) }
 0x6ea   : > { %6244 = vst.msk [vmem:[%s7699_s18 + $0x28] sm:$0xff] (%p394_p4), %vm359_vm5, %v6212_v51  ;;  %v6235_v56 = vld [vmem:[#allocation2 + $0xe0] sm:$0xff] (%p394_p4) }
 0x6eb   : >> { %v6173_v23 = vadd.f32 %v6141_v38, %v6109_v12  ;;  %v6110_v21 = vadd.f32 %v9734_v44, %v6070_v39  ;;  %v6208_v44 = vld [vmem:[#allocation2 + $0x8] sm:$0xff] (%p394_p4)  ;;  %6267 = vst.msk [vmem:[%s7699_s18 + $0xe0] sm:$0xff] (%p394_p4), %vm359_vm5, %v6235_v56 }
 0x6ec   : > { %6240 = vst.msk [vmem:[%s7699_s18 + $0x8] sm:$0xff] (%p394_p4), %vm359_vm5, %v6208_v44  ;;  %v6236_v22 = vld [vmem:[#allocation2 + $0xe8] sm:$0xff] (%p394_p4) }
 0x6ed   : >> { %6205 = vst.msk [vmem:[#allocation2 + $0xf0] sm:$0xff] %vm359_vm5, %v6173_v23  ;;  %v6174_v40 = vadd.f32 %v6142_v62, %v6110_v21  ;;  %6268 = vst.msk [vmem:[%s7699_s18 + $0xe8] sm:$0xff] (%p394_p4), %vm359_vm5, %v6236_v22 }
 0x6ef   : >> { %6206 = vst.msk [vmem:[#allocation2 + $0xf8] sm:$0xff] %vm359_vm5, %v6174_v40 }
 0x6f4   : > { %v6237_v16 = vld [vmem:[#allocation2 + $0xf0] sm:$0xff] }
 0x6f5   : > { %6269 = vst.msk [vmem:[%s7699_s18 + $0xf0] sm:$0xff] %vm359_vm5, %v6237_v16 }
 0x6f6   : > { %v6238_v6 = vld [vmem:[#allocation2 + $0xf8] sm:$0xff] }
 0x6f7   : > { %6270 = vst.msk [vmem:[%s7699_s18 + $0xf8] sm:$0xff] %vm359_vm5, %v6238_v6 }
 0x6f8   : > { %7286 = shalt.err (!%p7283_p9)
}
 0x6f9   : > { %s7287_s18 = scalar_lea.hbm %s10009_s26, 4096  ;;  %s7291_s27 = scalar_lea.hbm %s10074_s3, 8192 }
 0x6fa   : > { %p7288_p1 = scmp.ne.s32.totalorder %s10009_s26, %s7287_s18  ;;  %p7292_p11 = scmp.lt.u32.totalorder %s10009_s26, %s10074_s3 }
 0x6fb   : > { %p7293_p2 = scmp.lt.u32.totalorder %s7291_s27, %s7287_s18  ;;  %p7295_p6 = scmp.lt.u32.totalorder %s7287_s18, %s10009_s26 }
 0x6fc   : > { %p7289_p0 = pnand %p7288_p1, %p7476_p12 }
 0x6fd   : > { %p7294_p4 = por %p7293_p2, %p7292_p11 }
 0x6fe   : > { %p7290_p5 = pneg %p7289_p0 }
 0x6ff   : > { %p7296_p8 = por %p7295_p6, %p7294_p4 }
 0x701   : > { %p7297_p10 = pnand %p7296_p8, %p7290_p5 }
 0x703   : > { %7300 = shalt.err (!%p7297_p10)
}
 0x704   : > { %s7360_s29 = smov 128   ;;  %s7361_s30 = smov 8  }
 0x705   : > { %6906 = dma.vmem_to_hbm [thread:$0]  (%p7476_p12), %s10011_s7, 4096, %s10009_s26, %s6272_s20, %s7360_s29, %s7360_s29, %s7361_s30  }
 0x706 PF: > { %s6300_s22 = sand.u32 1, %s7335_s12   ;;  %p10177_p13 = scmp.ne.s32.totalorder %s10097_s19, 0 }
 0x707   : > { %p10178_p3 = scmp.ge.s32.totalorder %s7347_s15, 2  ;;  %s6301_s16 = scalar_lea.sflag [#allocation6], %s6300_s22 }
 0x709   : > { %p6917_p7 = pnand %p10178_p3, %p10177_p13 }
 0x70b   : > { %7330 = dma.done.wait (!%p6917_p7), %s6301_s16, 4096  }
 0x70c   : > { %7332 = vsyncadd (!%p6917_p7), %s6301_s16, 4294963200  ;;  %p17_p9 = scmp.ge.s32.totalorder %s7438_s24, 4   ;;  %s10179_s12 = smov %s7339_s13 }
 0x70d   : > { %s10180_s13 = smov %s7343_s14  ;;  %s10181_s14 = smov %s7472_s17 }
 0x70e   : > { %s10182_s15 = smov %s7438_s24  ;;  %19 = sbr.rel (!%p17_p9) target bundleno = 6 (0x6), region = 105 }
 0x715   :  { %6306 = vsyncpa [#allocation5], 1 }
 0x716   :  { %6308 = vsyncpa [#allocation5 + $0x1], 1 }
 0x717   :  { %6309 = vsyncpa [#allocation8], 1 }
 0x718   :  { %6310 = vsyncpa [#allocation6], 1 }
 0x719   :  { %6312 = vsyncpa [#allocation6 + $0x1], 1 }

</bundles_post_ra>
